<compile_context>
chip_gen: v7x
topology: tpu7x:2x2x1
jax: 0.10.0
libtpu: 0.0.40
codegen_flags: <defaults>
</compile_context>

<pallas_src>
import functools

import jax
import jax.numpy as jnp
from jax.experimental import pallas as pl
from jax.experimental.pallas import tpu as pltpu


_C_PAD = 8                                    # pad C_in so patch rows are sublane-aligned
_POOL_MEMBERS = ((0, 0), (0, 1), (1, 0), (1, 1))   # (pi, pj) offsets of the 2x2 pool window


def _round_up(x, m):
    return ((x + m - 1) // m) * m


# ----------------------------- Pallas kernels ------------------------------

def _conv_relu_pool_kernel(a_ref, w_ref, b_ref, o_ref, patch_ref,
                           *, Cp, Wq, Lp, Lpad):
    """Fused 5x5 conv (pad=2) + bias + ReLU + 2x2 max-pool for ONE sample.

    a_ref:     (4, Cp, SLAB) bf16  phase-split, zero-padded input
    w_ref:     (Cout, 25*Cp) bf16  weights, (kh,kw)-major / channel-minor cols
    b_ref:     (Cout, 1)     f32
    o_ref:     (Cout, Lp)    bf16  pooled output, flattened as oi*Wq + oj
    patch_ref: (25*Cp, 4*Lpad) bf16 VMEM scratch -- in-kernel im2col buffer,
               one 128-aligned Lpad-wide stripe per pool-window member.
    """
    # ---- in-kernel im2col: 25 taps x 4 pool members, all static lane slices ----
    # Because the spatial dims stay flattened *with* their padding columns,
    # the window element x_pad[c, 2*oi+pi+kh, 2*oj+pj+kw] of pooled output
    # position m' = oi*Wq + oj is exactly a[phase, c, m' + off]  (pure shift).
    for p_idx, (pi, pj) in enumerate(_POOL_MEMBERS):
        c0 = p_idx * Lpad
        for kh in range(5):
            for kw in range(5):
                u, v = kh + pi, kw + pj
                phase = (u % 2) * 2 + (v % 2)
                off = (u // 2) * Wq + (v // 2)
                r0 = (kh * 5 + kw) * Cp
                patch_ref[r0:r0 + Cp, c0:c0 + Lp] = a_ref[phase, :, off:off + Lp]
    # Columns [Lp, Lpad) of each stripe are never written and may hold stale
    # VMEM data; matmul columns are independent, so whatever they produce is
    # confined to output columns that are never read below.

    # ---- one long MXU dot over all 4 pool members (single weight pass) ----
    z = jnp.dot(w_ref[...], patch_ref[...], preferred_element_type=jnp.float32)

    # ---- fused 2x2 max-pool + shared bias + ReLU ----
    # relu(max_p(conv_p) + b) == maxpool(relu(conv + b))  (relu monotone, b shared).
    zm = z[:, 0:Lp]
    for p_idx in range(1, 4):
        zm = jnp.maximum(zm, z[:, p_idx * Lpad:p_idx * Lpad + Lp])
    o_ref[...] = jnp.maximum(zm + b_ref[...], 0.0).astype(o_ref.dtype)


def _fc_kernel(x_ref, w_ref, b_ref, o_ref):
    # x_ref: (N, K) bf16  w_ref: (K, Cout) bf16  b_ref: (1, Cout) f32  o_ref: (N, Cout) f32
    o_ref[...] = jnp.dot(x_ref[...], w_ref[...],
                         preferred_element_type=jnp.float32) + b_ref[...]


# ------------------------- host-side layout helpers ------------------------

def _prep_conv_input(x):
    """(N, C, H, W) float -> phase-split slabs (N, 4, Cp, Hq*Wq + 2) bf16."""
    N, C, H, W = x.shape
    assert H % 2 == 0 and W % 2 == 0, "even spatial dims required for 2x2 pool"
    Cp = _round_up(C, _C_PAD)
    x = x.astype(jnp.bfloat16)
    if Cp != C:
        x = jnp.pad(x, ((0, 0), (0, Cp - C), (0, 0), (0, 0)))
    xp = jnp.pad(x, ((0, 0), (0, 0), (2, 2), (2, 2)))          # conv padding = 2
    Hq, Wq = (H + 4) // 2, (W + 4) // 2
    ph = xp.reshape(N, Cp, Hq, 2, Wq, 2)
    ph = jnp.transpose(ph, (0, 3, 5, 1, 2, 4))                 # (N, ru, rv, C, i, j)
    ph = ph.reshape(N, 4, Cp, Hq * Wq)
    ph = jnp.pad(ph, ((0, 0), (0, 0), (0, 0), (0, 2)))         # slack: off + Lp <= SLAB
    return ph, Hq, Wq


def _prep_conv_weight(w):
    """(Cout, C, 5, 5) -> (Cout, 25*Cp) bf16, (kh,kw)-major / channel-minor."""
    Cout, C, KH, KW = w.shape
    assert (KH, KW) == (5, 5)
    Cp = _round_up(C, _C_PAD)
    if Cp != C:
        w = jnp.pad(w, ((0, 0), (0, Cp - C), (0, 0), (0, 0)))
    w2 = jnp.transpose(w, (0, 2, 3, 1)).reshape(Cout, KH * KW * Cp)
    return w2.astype(jnp.bfloat16)


# ----------------------------- Pallas wrappers -----------------------------

def conv_relu_pool_layer(x, w, b):
    """x: (N,C,H,W), w: (Cout,C,5,5), b: (Cout,) -> (N, Cout, H//2, W//2) bf16."""
    N, C, H, W = x.shape
    Cout = w.shape[0]
    Ho, Wo = H // 2, W // 2

    a, Hq, Wq = _prep_conv_input(x)            # (N, 4, Cp, SLAB) bf16
    w2 = _prep_conv_weight(w)                  # (Cout, K) bf16
    _, _, Cp, SLAB = a.shape
    K = w2.shape[1]
    Lp = Ho * Wq                               # flattened pooled positions (incl. pad cols)
    Lpad = _round_up(Lp, 128)                  # 128-aligned stripe per pool member

    kernel = functools.partial(_conv_relu_pool_kernel,
                               Cp=Cp, Wq=Wq, Lp=Lp, Lpad=Lpad)

    flops = N * 2 * Cout * K * 4 * Lpad
    bytes_accessed = (N * (4 * Cp * SLAB + Cout * Lp) + Cout * K) * 2 + Cout * 4

    y = pl.pallas_call(
        kernel,
        out_shape=jax.ShapeDtypeStruct((N, Cout, Lp), jnp.bfloat16),
        grid=(N,),
        in_specs=[
            pl.BlockSpec((None, 4, Cp, SLAB), lambda n: (n, 0, 0, 0)),
            pl.BlockSpec((Cout, K), lambda n: (0, 0)),      # stays resident across grid
            pl.BlockSpec((Cout, 1), lambda n: (0, 0)),
        ],
        out_specs=pl.BlockSpec((None, Cout, Lp), lambda n: (n, 0, 0)),
        scratch_shapes=[pltpu.VMEM((K, 4 * Lpad), jnp.bfloat16)],
        compiler_params=pltpu.CompilerParams(
            dimension_semantics=("parallel",)),              # N>=2 -> both v7x TCs busy
        cost_estimate=pl.CostEstimate(flops=flops, transcendentals=0,
                                      bytes_accessed=bytes_accessed),
    )(a, w2, b.reshape(Cout, 1).astype(jnp.float32))

    # Strip the Wq->Wo padding columns and restore NCHW for the next stage.
    return y.reshape(N, Cout, Ho, Wq)[:, :, :, :Wo]


def fc_layer(x, Wt, b):
    """x: (N, K), Wt: (K, Cout), b: (Cout,) -> (N, Cout) f32."""
    N, K = x.shape
    Cout = Wt.shape[1]
    return pl.pallas_call(
        _fc_kernel,
        out_shape=jax.ShapeDtypeStruct((N, Cout), jnp.float32),
        grid=(1,),
        in_specs=[
            pl.BlockSpec((N, K), lambda i: (0, 0)),
            pl.BlockSpec((K, Cout), lambda i: (0, 0)),
            pl.BlockSpec((1, Cout), lambda i: (0, 0)),
        ],
        out_specs=pl.BlockSpec((N, Cout), lambda i: (0, 0)),
        compiler_params=pltpu.CompilerParams(
            dimension_semantics=("arbitrary",)),
        cost_estimate=pl.CostEstimate(
            flops=2 * N * K * Cout, transcendentals=0,
            bytes_accessed=N * K * 2 + K * Cout * 2 + N * Cout * 4),
    )(x.astype(jnp.bfloat16),
      Wt.astype(jnp.bfloat16),
      b.reshape(1, Cout).astype(jnp.float32))


# ------------------------------- JAX glue ----------------------------------

def cnn_forward(x, params):
    """Pallas implementation of CNN.forward.  x: (N, 1, 28, 28) -> (N, 10)."""
    w1, b1, w2, b2, wf, bf = params
    N = x.shape[0]

    h1 = conv_relu_pool_layer(x, w1, b1)       # (N, 16, 14, 14) bf16
    h2 = conv_relu_pool_layer(h1, w2, b2)      # (N, 32,  7,  7) bf16

    flat = h2.reshape(N, -1)                   # (N, 1568) NCHW order == torch .view
    return fc_layer(flat, wf.T, bf)            # (N, 10) f32


# ------------------------- pure-JAX reference check ------------------------

def reference_forward(x, params):
    w1, b1, w2, b2, wf, bf = params

    def conv(h, w, b):
        y = jax.lax.conv_general_dilated(
            h, w, window_strides=(1, 1), padding=[(2, 2), (2, 2)],
            dimension_numbers=("NCHW", "OIHW", "NCHW"),
            precision=jax.lax.Precision.HIGHEST)
        return y + b[None, :, None, None]

    def pool(h):
        return jax.lax.reduce_window(h, -jnp.inf, jax.lax.max,
                                     (1, 1, 2, 2), (1, 1, 2, 2), "VALID")

    h = pool(jax.nn.relu(conv(x, w1, b1)))
    h = pool(jax.nn.relu(conv(h, w2, b2)))
    h = h.reshape(h.shape[0], -1)
    return h @ wf.T + bf


# --------------------------------- main -------------------------------------

if __name__ == "__main__":
    key = jax.random.PRNGKey(0)
    k1, k2, k3, k4, k5, k6, kx = jax.random.split(key, 7)

    # Deterministic synthetic parameters (PyTorch layouts: OIHW conv weights,
    # (out_features, in_features) linear weight).
    w1 = jax.random.normal(k1, (16, 1, 5, 5), jnp.float32) * 0.2
    b1 = jax.random.normal(k2, (16,), jnp.float32) * 0.1
    w2 = jax.random.normal(k3, (32, 16, 5, 5), jnp.float32) * 0.05
    b2 = jax.random.normal(k4, (32,), jnp.float32) * 0.1
    wf = jax.random.normal(k5, (10, 32 * 7 * 7), jnp.float32) * 0.02
    bf = jax.random.normal(k6, (10,), jnp.float32) * 0.1
    params = (w1, b1, w2, b2, wf, bf)

    # Small batch; spatial 28x28 is implied by the 32*7*7 fully-connected layer.
    x = jax.random.normal(kx, (2, 1, 28, 28), jnp.float32)

    out = jax.jit(cnn_forward)(x, params)
    out = jax.block_until_ready(out)
    assert out.shape == (2, 10) and out.dtype == jnp.float32

    # Reference is full-f32 HIGHEST precision; kernels use bf16 MXU inputs with
    # f32 accumulation, so compare at bf16-appropriate tolerance.
    ref = jax.block_until_ready(reference_forward(x, params))
    assert jnp.allclose(out, ref, rtol=2e-2, atol=2e-2), (out, ref)

    print("KERNEL_OK")
</pallas_src>

<mosaic_0001>
module attributes {stable_mosaic.version = 11 : i64} {
  func.func @_conv_relu_pool_kernel(%arg0: i32, %arg1: memref<1x4x8x258xbf16, #tpu.memory_space<vmem>>, %arg2: memref<16x200xbf16, #tpu.memory_space<vmem>>, %arg3: memref<16x1xf32, #tpu.memory_space<vmem>>, %arg4: memref<1x16x224xbf16, #tpu.memory_space<vmem>>, %arg5: memref<200x1024xbf16, #tpu.memory_space<vmem>>) attributes {dimension_semantics = [#tpu.dimension_semantics<parallel>], iteration_bounds = array<i64: 2>, scalar_prefetch = 0 : i64, scratch_operands = 1 : i64, tpu.core_type = #tpu.core_type<tc>, window_params = [{transform_indices = @transform_0, window_bounds = array<i64: 1, 4, 8, 258>}, {pipeline_mode = #tpu.pipeline_mode<synchronous>, transform_indices = @transform_1, window_bounds = array<i64: 16, 200>}, {pipeline_mode = #tpu.pipeline_mode<synchronous>, transform_indices = @transform_2, window_bounds = array<i64: 16, 1>}, {transform_indices = @transform_3, window_bounds = array<i64: 1, 16, 224>}]} {
    %c0 = arith.constant 0 : index
    %c0_0 = arith.constant 0 : index
    %c0_1 = arith.constant 0 : index
    %c0_2 = arith.constant 0 : index
    %0 = vector.load %arg1[%c0, %c0_0, %c0_1, %c0_2] : memref<1x4x8x258xbf16, #tpu.memory_space<vmem>>, vector<1x1x8x224xbf16>
    %1 = vector.shape_cast %0 : vector<1x1x8x224xbf16> to vector<8x224xbf16>
    %c0_3 = arith.constant 0 : index
    %c0_4 = arith.constant 0 : index
    %2 = vector.load %arg5[%c0_3, %c0_4] : memref<200x1024xbf16, #tpu.memory_space<vmem>>, vector<8x224xbf16>
    tpu.vector_store %arg5[%c0_3, %c0_4], %1 {strides = array<i32>} : memref<200x1024xbf16, #tpu.memory_space<vmem>>, vector<8x224xbf16>,
    %c0_5 = arith.constant 0 : index
    %c1 = arith.constant 1 : index
    %c0_6 = arith.constant 0 : index
    %c0_7 = arith.constant 0 : index
    %3 = vector.load %arg1[%c0_5, %c1, %c0_6, %c0_7] : memref<1x4x8x258xbf16, #tpu.memory_space<vmem>>, vector<1x1x8x224xbf16>
    %4 = vector.shape_cast %3 : vector<1x1x8x224xbf16> to vector<8x224xbf16>
    %c8 = arith.constant 8 : index
    %c0_8 = arith.constant 0 : index
    %5 = vector.load %arg5[%c8, %c0_8] : memref<200x1024xbf16, #tpu.memory_space<vmem>>, vector<8x224xbf16>
    tpu.vector_store %arg5[%c8, %c0_8], %4 {strides = array<i32>} : memref<200x1024xbf16, #tpu.memory_space<vmem>>, vector<8x224xbf16>,
    %c0_9 = arith.constant 0 : index
    %c0_10 = arith.constant 0 : index
    %c0_11 = arith.constant 0 : index
    %c1_12 = arith.constant 1 : index
    %6 = vector.load %arg1[%c0_9, %c0_10, %c0_11, %c1_12] : memref<1x4x8x258xbf16, #tpu.memory_space<vmem>>, vector<1x1x8x224xbf16>
    %7 = vector.shape_cast %6 : vector<1x1x8x224xbf16> to vector<8x224xbf16>
    %c16 = arith.constant 16 : index
    %c0_13 = arith.constant 0 : index
    %8 = vector.load %arg5[%c16, %c0_13] : memref<200x1024xbf16, #tpu.memory_space<vmem>>, vector<8x224xbf16>
    tpu.vector_store %arg5[%c16, %c0_13], %7 {strides = array<i32>} : memref<200x1024xbf16, #tpu.memory_space<vmem>>, vector<8x224xbf16>,
    %c0_14 = arith.constant 0 : index
    %c1_15 = arith.constant 1 : index
    %c0_16 = arith.constant 0 : index
    %c1_17 = arith.constant 1 : index
    %9 = vector.load %arg1[%c0_14, %c1_15, %c0_16, %c1_17] : memref<1x4x8x258xbf16, #tpu.memory_space<vmem>>, vector<1x1x8x224xbf16>
    %10 = vector.shape_cast %9 : vector<1x1x8x224xbf16> to vector<8x224xbf16>
    %c24 = arith.constant 24 : index
    %c0_18 = arith.constant 0 : index
    %11 = vector.load %arg5[%c24, %c0_18] : memref<200x1024xbf16, #tpu.memory_space<vmem>>, vector<8x224xbf16>
    tpu.vector_store %arg5[%c24, %c0_18], %10 {strides = array<i32>} : memref<200x1024xbf16, #tpu.memory_space<vmem>>, vector<8x224xbf16>,
    %c0_19 = arith.constant 0 : index
    %c0_20 = arith.constant 0 : index
    %c0_21 = arith.constant 0 : index
    %c2 = arith.constant 2 : index
    %12 = vector.load %arg1[%c0_19, %c0_20, %c0_21, %c2] : memref<1x4x8x258xbf16, #tpu.memory_space<vmem>>, vector<1x1x8x224xbf16>
    %13 = vector.shape_cast %12 : vector<1x1x8x224xbf16> to vector<8x224xbf16>
    %c32 = arith.constant 32 : index
    %c0_22 = arith.constant 0 : index
    %14 = vector.load %arg5[%c32, %c0_22] : memref<200x1024xbf16, #tpu.memory_space<vmem>>, vector<8x224xbf16>
    tpu.vector_store %arg5[%c32, %c0_22], %13 {strides = array<i32>} : memref<200x1024xbf16, #tpu.memory_space<vmem>>, vector<8x224xbf16>,
    %c0_23 = arith.constant 0 : index
    %c2_24 = arith.constant 2 : index
    %c0_25 = arith.constant 0 : index
    %c0_26 = arith.constant 0 : index
    %15 = vector.load %arg1[%c0_23, %c2_24, %c0_25, %c0_26] : memref<1x4x8x258xbf16, #tpu.memory_space<vmem>>, vector<1x1x8x224xbf16>
    %16 = vector.shape_cast %15 : vector<1x1x8x224xbf16> to vector<8x224xbf16>
    %c40 = arith.constant 40 : index
    %c0_27 = arith.constant 0 : index
    %17 = vector.load %arg5[%c40, %c0_27] : memref<200x1024xbf16, #tpu.memory_space<vmem>>, vector<8x224xbf16>
    tpu.vector_store %arg5[%c40, %c0_27], %16 {strides = array<i32>} : memref<200x1024xbf16, #tpu.memory_space<vmem>>, vector<8x224xbf16>,
    %c0_28 = arith.constant 0 : index
    %c3 = arith.constant 3 : index
    %c0_29 = arith.constant 0 : index
    %c0_30 = arith.constant 0 : index
    %18 = vector.load %arg1[%c0_28, %c3, %c0_29, %c0_30] : memref<1x4x8x258xbf16, #tpu.memory_space<vmem>>, vector<1x1x8x224xbf16>
    %19 = vector.shape_cast %18 : vector<1x1x8x224xbf16> to vector<8x224xbf16>
    %c48 = arith.constant 48 : index
    %c0_31 = arith.constant 0 : index
    %20 = vector.load %arg5[%c48, %c0_31] : memref<200x1024xbf16, #tpu.memory_space<vmem>>, vector<8x224xbf16>
    tpu.vector_store %arg5[%c48, %c0_31], %19 {strides = array<i32>} : memref<200x1024xbf16, #tpu.memory_space<vmem>>, vector<8x224xbf16>,
    %c0_32 = arith.constant 0 : index
    %c2_33 = arith.constant 2 : index
    %c0_34 = arith.constant 0 : index
    %c1_35 = arith.constant 1 : index
    %21 = vector.load %arg1[%c0_32, %c2_33, %c0_34, %c1_35] : memref<1x4x8x258xbf16, #tpu.memory_space<vmem>>, vector<1x1x8x224xbf16>
    %22 = vector.shape_cast %21 : vector<1x1x8x224xbf16> to vector<8x224xbf16>
    %c56 = arith.constant 56 : index
    %c0_36 = arith.constant 0 : index
    %23 = vector.load %arg5[%c56, %c0_36] : memref<200x1024xbf16, #tpu.memory_space<vmem>>, vector<8x224xbf16>
    tpu.vector_store %arg5[%c56, %c0_36], %22 {strides = array<i32>} : memref<200x1024xbf16, #tpu.memory_space<vmem>>, vector<8x224xbf16>,
    %c0_37 = arith.constant 0 : index
    %c3_38 = arith.constant 3 : index
    %c0_39 = arith.constant 0 : index
    %c1_40 = arith.constant 1 : index
    %24 = vector.load %arg1[%c0_37, %c3_38, %c0_39, %c1_40] : memref<1x4x8x258xbf16, #tpu.memory_space<vmem>>, vector<1x1x8x224xbf16>
    %25 = vector.shape_cast %24 : vector<1x1x8x224xbf16> to vector<8x224xbf16>
    %c64 = arith.constant 64 : index
    %c0_41 = arith.constant 0 : index
    %26 = vector.load %arg5[%c64, %c0_41] : memref<200x1024xbf16, #tpu.memory_space<vmem>>, vector<8x224xbf16>
    tpu.vector_store %arg5[%c64, %c0_41], %25 {strides = array<i32>} : memref<200x1024xbf16, #tpu.memory_space<vmem>>, vector<8x224xbf16>,
    %c0_42 = arith.constant 0 : index
    %c2_43 = arith.constant 2 : index
    %c0_44 = arith.constant 0 : index
    %c2_45 = arith.constant 2 : index
    %27 = vector.load %arg1[%c0_42, %c2_43, %c0_44, %c2_45] : memref<1x4x8x258xbf16, #tpu.memory_space<vmem>>, vector<1x1x8x224xbf16>
    %28 = vector.shape_cast %27 : vector<1x1x8x224xbf16> to vector<8x224xbf16>
    %c72 = arith.constant 72 : index
    %c0_46 = arith.constant 0 : index
    %29 = vector.load %arg5[%c72, %c0_46] : memref<200x1024xbf16, #tpu.memory_space<vmem>>, vector<8x224xbf16>
    tpu.vector_store %arg5[%c72, %c0_46], %28 {strides = array<i32>} : memref<200x1024xbf16, #tpu.memory_space<vmem>>, vector<8x224xbf16>,
    %c0_47 = arith.constant 0 : index
    %c0_48 = arith.constant 0 : index
    %c0_49 = arith.constant 0 : index
    %c16_50 = arith.constant 16 : index
    %30 = vector.load %arg1[%c0_47, %c0_48, %c0_49, %c16_50] : memref<1x4x8x258xbf16, #tpu.memory_space<vmem>>, vector<1x1x8x224xbf16>
    %31 = vector.shape_cast %30 : vector<1x1x8x224xbf16> to vector<8x224xbf16>
    %c80 = arith.constant 80 : index
    %c0_51 = arith.constant 0 : index
    %32 = vector.load %arg5[%c80, %c0_51] : memref<200x1024xbf16, #tpu.memory_space<vmem>>, vector<8x224xbf16>
    tpu.vector_store %arg5[%c80, %c0_51], %31 {strides = array<i32>} : memref<200x1024xbf16, #tpu.memory_space<vmem>>, vector<8x224xbf16>,
    %c0_52 = arith.constant 0 : index
    %c1_53 = arith.constant 1 : index
    %c0_54 = arith.constant 0 : index
    %c16_55 = arith.constant 16 : index
    %33 = vector.load %arg1[%c0_52, %c1_53, %c0_54, %c16_55] : memref<1x4x8x258xbf16, #tpu.memory_space<vmem>>, vector<1x1x8x224xbf16>
    %34 = vector.shape_cast %33 : vector<1x1x8x224xbf16> to vector<8x224xbf16>
    %c88 = arith.constant 88 : index
    %c0_56 = arith.constant 0 : index
    %35 = vector.load %arg5[%c88, %c0_56] : memref<200x1024xbf16, #tpu.memory_space<vmem>>, vector<8x224xbf16>
    tpu.vector_store %arg5[%c88, %c0_56], %34 {strides = array<i32>} : memref<200x1024xbf16, #tpu.memory_space<vmem>>, vector<8x224xbf16>,
    %c0_57 = arith.constant 0 : index
    %c0_58 = arith.constant 0 : index
    %c0_59 = arith.constant 0 : index
    %c17 = arith.constant 17 : index
    %36 = vector.load %arg1[%c0_57, %c0_58, %c0_59, %c17] : memref<1x4x8x258xbf16, #tpu.memory_space<vmem>>, vector<1x1x8x224xbf16>
    %37 = vector.shape_cast %36 : vector<1x1x8x224xbf16> to vector<8x224xbf16>
    %c96 = arith.constant 96 : index
    %c0_60 = arith.constant 0 : index
    %38 = vector.load %arg5[%c96, %c0_60] : memref<200x1024xbf16, #tpu.memory_space<vmem>>, vector<8x224xbf16>
    tpu.vector_store %arg5[%c96, %c0_60], %37 {strides = array<i32>} : memref<200x1024xbf16, #tpu.memory_space<vmem>>, vector<8x224xbf16>,
    %c0_61 = arith.constant 0 : index
    %c1_62 = arith.constant 1 : index
    %c0_63 = arith.constant 0 : index
    %c17_64 = arith.constant 17 : index
    %39 = vector.load %arg1[%c0_61, %c1_62, %c0_63, %c17_64] : memref<1x4x8x258xbf16, #tpu.memory_space<vmem>>, vector<1x1x8x224xbf16>
    %40 = vector.shape_cast %39 : vector<1x1x8x224xbf16> to vector<8x224xbf16>
    %c104 = arith.constant 104 : index
    %c0_65 = arith.constant 0 : index
    %41 = vector.load %arg5[%c104, %c0_65] : memref<200x1024xbf16, #tpu.memory_space<vmem>>, vector<8x224xbf16>
    tpu.vector_store %arg5[%c104, %c0_65], %40 {strides = array<i32>} : memref<200x1024xbf16, #tpu.memory_space<vmem>>, vector<8x224xbf16>,
    %c0_66 = arith.constant 0 : index
    %c0_67 = arith.constant 0 : index
    %c0_68 = arith.constant 0 : index
    %c18 = arith.constant 18 : index
    %42 = vector.load %arg1[%c0_66, %c0_67, %c0_68, %c18] : memref<1x4x8x258xbf16, #tpu.memory_space<vmem>>, vector<1x1x8x224xbf16>
    %43 = vector.shape_cast %42 : vector<1x1x8x224xbf16> to vector<8x224xbf16>
    %c112 = arith.constant 112 : index
    %c0_69 = arith.constant 0 : index
    %44 = vector.load %arg5[%c112, %c0_69] : memref<200x1024xbf16, #tpu.memory_space<vmem>>, vector<8x224xbf16>
    tpu.vector_store %arg5[%c112, %c0_69], %43 {strides = array<i32>} : memref<200x1024xbf16, #tpu.memory_space<vmem>>, vector<8x224xbf16>,
    %c0_70 = arith.constant 0 : index
    %c2_71 = arith.constant 2 : index
    %c0_72 = arith.constant 0 : index
    %c16_73 = arith.constant 16 : index
    %45 = vector.load %arg1[%c0_70, %c2_71, %c0_72, %c16_73] : memref<1x4x8x258xbf16, #tpu.memory_space<vmem>>, vector<1x1x8x224xbf16>
    %46 = vector.shape_cast %45 : vector<1x1x8x224xbf16> to vector<8x224xbf16>
    %c120 = arith.constant 120 : index
    %c0_74 = arith.constant 0 : index
    %47 = vector.load %arg5[%c120, %c0_74] : memref<200x1024xbf16, #tpu.memory_space<vmem>>, vector<8x224xbf16>
    tpu.vector_store %arg5[%c120, %c0_74], %46 {strides = array<i32>} : memref<200x1024xbf16, #tpu.memory_space<vmem>>, vector<8x224xbf16>,
    %c0_75 = arith.constant 0 : index
    %c3_76 = arith.constant 3 : index
    %c0_77 = arith.constant 0 : index
    %c16_78 = arith.constant 16 : index
    %48 = vector.load %arg1[%c0_75, %c3_76, %c0_77, %c16_78] : memref<1x4x8x258xbf16, #tpu.memory_space<vmem>>, vector<1x1x8x224xbf16>
    %49 = vector.shape_cast %48 : vector<1x1x8x224xbf16> to vector<8x224xbf16>
    %c128 = arith.constant 128 : index
    %c0_79 = arith.constant 0 : index
    %50 = vector.load %arg5[%c128, %c0_79] : memref<200x1024xbf16, #tpu.memory_space<vmem>>, vector<8x224xbf16>
    tpu.vector_store %arg5[%c128, %c0_79], %49 {strides = array<i32>} : memref<200x1024xbf16, #tpu.memory_space<vmem>>, vector<8x224xbf16>,
    %c0_80 = arith.constant 0 : index
    %c2_81 = arith.constant 2 : index
    %c0_82 = arith.constant 0 : index
    %c17_83 = arith.constant 17 : index
    %51 = vector.load %arg1[%c0_80, %c2_81, %c0_82, %c17_83] : memref<1x4x8x258xbf16, #tpu.memory_space<vmem>>, vector<1x1x8x224xbf16>
    %52 = vector.shape_cast %51 : vector<1x1x8x224xbf16> to vector<8x224xbf16>
    %c136 = arith.constant 136 : index
    %c0_84 = arith.constant 0 : index
    %53 = vector.load %arg5[%c136, %c0_84] : memref<200x1024xbf16, #tpu.memory_space<vmem>>, vector<8x224xbf16>
    tpu.vector_store %arg5[%c136, %c0_84], %52 {strides = array<i32>} : memref<200x1024xbf16, #tpu.memory_space<vmem>>, vector<8x224xbf16>,
    %c0_85 = arith.constant 0 : index
    %c3_86 = arith.constant 3 : index
    %c0_87 = arith.constant 0 : index
    %c17_88 = arith.constant 17 : index
    %54 = vector.load %arg1[%c0_85, %c3_86, %c0_87, %c17_88] : memref<1x4x8x258xbf16, #tpu.memory_space<vmem>>, vector<1x1x8x224xbf16>
    %55 = vector.shape_cast %54 : vector<1x1x8x224xbf16> to vector<8x224xbf16>
    %c144 = arith.constant 144 : index
    %c0_89 = arith.constant 0 : index
    %56 = vector.load %arg5[%c144, %c0_89] : memref<200x1024xbf16, #tpu.memory_space<vmem>>, vector<8x224xbf16>
    tpu.vector_store %arg5[%c144, %c0_89], %55 {strides = array<i32>} : memref<200x1024xbf16, #tpu.memory_space<vmem>>, vector<8x224xbf16>,
    %c0_90 = arith.constant 0 : index
    %c2_91 = arith.constant 2 : index
    %c0_92 = arith.constant 0 : index
    %c18_93 = arith.constant 18 : index
    %57 = vector.load %arg1[%c0_90, %c2_91, %c0_92, %c18_93] : memref<1x4x8x258xbf16, #tpu.memory_space<vmem>>, vector<1x1x8x224xbf16>
    %58 = vector.shape_cast %57 : vector<1x1x8x224xbf16> to vector<8x224xbf16>
    %c152 = arith.constant 152 : index
    %c0_94 = arith.constant 0 : index
    %59 = vector.load %arg5[%c152, %c0_94] : memref<200x1024xbf16, #tpu.memory_space<vmem>>, vector<8x224xbf16>
    tpu.vector_store %arg5[%c152, %c0_94], %58 {strides = array<i32>} : memref<200x1024xbf16, #tpu.memory_space<vmem>>, vector<8x224xbf16>,
    %c0_95 = arith.constant 0 : index
    %c0_96 = arith.constant 0 : index
    %c0_97 = arith.constant 0 : index
    %c32_98 = arith.constant 32 : index
    %60 = vector.load %arg1[%c0_95, %c0_96, %c0_97, %c32_98] : memref<1x4x8x258xbf16, #tpu.memory_space<vmem>>, vector<1x1x8x224xbf16>
    %61 = vector.shape_cast %60 : vector<1x1x8x224xbf16> to vector<8x224xbf16>
    %c160 = arith.constant 160 : index
    %c0_99 = arith.constant 0 : index
    %62 = vector.load %arg5[%c160, %c0_99] : memref<200x1024xbf16, #tpu.memory_space<vmem>>, vector<8x224xbf16>
    tpu.vector_store %arg5[%c160, %c0_99], %61 {strides = array<i32>} : memref<200x1024xbf16, #tpu.memory_space<vmem>>, vector<8x224xbf16>,
    %c0_100 = arith.constant 0 : index
    %c1_101 = arith.constant 1 : index
    %c0_102 = arith.constant 0 : index
    %c32_103 = arith.constant 32 : index
    %63 = vector.load %arg1[%c0_100, %c1_101, %c0_102, %c32_103] : memref<1x4x8x258xbf16, #tpu.memory_space<vmem>>, vector<1x1x8x224xbf16>
    %64 = vector.shape_cast %63 : vector<1x1x8x224xbf16> to vector<8x224xbf16>
    %c168 = arith.constant 168 : index
    %c0_104 = arith.constant 0 : index
    %65 = vector.load %arg5[%c168, %c0_104] : memref<200x1024xbf16, #tpu.memory_space<vmem>>, vector<8x224xbf16>
    tpu.vector_store %arg5[%c168, %c0_104], %64 {strides = array<i32>} : memref<200x1024xbf16, #tpu.memory_space<vmem>>, vector<8x224xbf16>,
    %c0_105 = arith.constant 0 : index
    %c0_106 = arith.constant 0 : index
    %c0_107 = arith.constant 0 : index
    %c33 = arith.constant 33 : index
    %66 = vector.load %arg1[%c0_105, %c0_106, %c0_107, %c33] : memref<1x4x8x258xbf16, #tpu.memory_space<vmem>>, vector<1x1x8x224xbf16>
    %67 = vector.shape_cast %66 : vector<1x1x8x224xbf16> to vector<8x224xbf16>
    %c176 = arith.constant 176 : index
    %c0_108 = arith.constant 0 : index
    %68 = vector.load %arg5[%c176, %c0_108] : memref<200x1024xbf16, #tpu.memory_space<vmem>>, vector<8x224xbf16>
    tpu.vector_store %arg5[%c176, %c0_108], %67 {strides = array<i32>} : memref<200x1024xbf16, #tpu.memory_space<vmem>>, vector<8x224xbf16>,
    %c0_109 = arith.constant 0 : index
    %c1_110 = arith.constant 1 : index
    %c0_111 = arith.constant 0 : index
    %c33_112 = arith.constant 33 : index
    %69 = vector.load %arg1[%c0_109, %c1_110, %c0_111, %c33_112] : memref<1x4x8x258xbf16, #tpu.memory_space<vmem>>, vector<1x1x8x224xbf16>
    %70 = vector.shape_cast %69 : vector<1x1x8x224xbf16> to vector<8x224xbf16>
    %c184 = arith.constant 184 : index
    %c0_113 = arith.constant 0 : index
    %71 = vector.load %arg5[%c184, %c0_113] : memref<200x1024xbf16, #tpu.memory_space<vmem>>, vector<8x224xbf16>
    tpu.vector_store %arg5[%c184, %c0_113], %70 {strides = array<i32>} : memref<200x1024xbf16, #tpu.memory_space<vmem>>, vector<8x224xbf16>,
    %c0_114 = arith.constant 0 : index
    %c0_115 = arith.constant 0 : index
    %c0_116 = arith.constant 0 : index
    %c34 = arith.constant 34 : index
    %72 = vector.load %arg1[%c0_114, %c0_115, %c0_116, %c34] : memref<1x4x8x258xbf16, #tpu.memory_space<vmem>>, vector<1x1x8x224xbf16>
    %73 = vector.shape_cast %72 : vector<1x1x8x224xbf16> to vector<8x224xbf16>
    %c192 = arith.constant 192 : index
    %c0_117 = arith.constant 0 : index
    %74 = vector.load %arg5[%c192, %c0_117] : memref<200x1024xbf16, #tpu.memory_space<vmem>>, vector<8x224xbf16>
    tpu.vector_store %arg5[%c192, %c0_117], %73 {strides = array<i32>} : memref<200x1024xbf16, #tpu.memory_space<vmem>>, vector<8x224xbf16>,
    %c0_118 = arith.constant 0 : index
    %c1_119 = arith.constant 1 : index
    %c0_120 = arith.constant 0 : index
    %c0_121 = arith.constant 0 : index
    %75 = vector.load %arg1[%c0_118, %c1_119, %c0_120, %c0_121] : memref<1x4x8x258xbf16, #tpu.memory_space<vmem>>, vector<1x1x8x224xbf16>
    %76 = vector.shape_cast %75 : vector<1x1x8x224xbf16> to vector<8x224xbf16>
    %c0_122 = arith.constant 0 : index
    %c256 = arith.constant 256 : index
    %77 = vector.load %arg5[%c0_122, %c256] : memref<200x1024xbf16, #tpu.memory_space<vmem>>, vector<8x224xbf16>
    tpu.vector_store %arg5[%c0_122, %c256], %76 {strides = array<i32>} : memref<200x1024xbf16, #tpu.memory_space<vmem>>, vector<8x224xbf16>,
    %c0_123 = arith.constant 0 : index
    %c0_124 = arith.constant 0 : index
    %c0_125 = arith.constant 0 : index
    %c1_126 = arith.constant 1 : index
    %78 = vector.load %arg1[%c0_123, %c0_124, %c0_125, %c1_126] : memref<1x4x8x258xbf16, #tpu.memory_space<vmem>>, vector<1x1x8x224xbf16>
    %79 = vector.shape_cast %78 : vector<1x1x8x224xbf16> to vector<8x224xbf16>
    %c8_127 = arith.constant 8 : index
    %c256_128 = arith.constant 256 : index
    %80 = vector.load %arg5[%c8_127, %c256_128] : memref<200x1024xbf16, #tpu.memory_space<vmem>>, vector<8x224xbf16>
    tpu.vector_store %arg5[%c8_127, %c256_128], %79 {strides = array<i32>} : memref<200x1024xbf16, #tpu.memory_space<vmem>>, vector<8x224xbf16>,
    %c0_129 = arith.constant 0 : index
    %c1_130 = arith.constant 1 : index
    %c0_131 = arith.constant 0 : index
    %c1_132 = arith.constant 1 : index
    %81 = vector.load %arg1[%c0_129, %c1_130, %c0_131, %c1_132] : memref<1x4x8x258xbf16, #tpu.memory_space<vmem>>, vector<1x1x8x224xbf16>
    %82 = vector.shape_cast %81 : vector<1x1x8x224xbf16> to vector<8x224xbf16>
    %c16_133 = arith.constant 16 : index
    %c256_134 = arith.constant 256 : index
    %83 = vector.load %arg5[%c16_133, %c256_134] : memref<200x1024xbf16, #tpu.memory_space<vmem>>, vector<8x224xbf16>
    tpu.vector_store %arg5[%c16_133, %c256_134], %82 {strides = array<i32>} : memref<200x1024xbf16, #tpu.memory_space<vmem>>, vector<8x224xbf16>,
    %c0_135 = arith.constant 0 : index
    %c0_136 = arith.constant 0 : index
    %c0_137 = arith.constant 0 : index
    %c2_138 = arith.constant 2 : index
    %84 = vector.load %arg1[%c0_135, %c0_136, %c0_137, %c2_138] : memref<1x4x8x258xbf16, #tpu.memory_space<vmem>>, vector<1x1x8x224xbf16>
    %85 = vector.shape_cast %84 : vector<1x1x8x224xbf16> to vector<8x224xbf16>
    %c24_139 = arith.constant 24 : index
    %c256_140 = arith.constant 256 : index
    %86 = vector.load %arg5[%c24_139, %c256_140] : memref<200x1024xbf16, #tpu.memory_space<vmem>>, vector<8x224xbf16>
    tpu.vector_store %arg5[%c24_139, %c256_140], %85 {strides = array<i32>} : memref<200x1024xbf16, #tpu.memory_space<vmem>>, vector<8x224xbf16>,
    %c0_141 = arith.constant 0 : index
    %c1_142 = arith.constant 1 : index
    %c0_143 = arith.constant 0 : index
    %c2_144 = arith.constant 2 : index
    %87 = vector.load %arg1[%c0_141, %c1_142, %c0_143, %c2_144] : memref<1x4x8x258xbf16, #tpu.memory_space<vmem>>, vector<1x1x8x224xbf16>
    %88 = vector.shape_cast %87 : vector<1x1x8x224xbf16> to vector<8x224xbf16>
    %c32_145 = arith.constant 32 : index
    %c256_146 = arith.constant 256 : index
    %89 = vector.load %arg5[%c32_145, %c256_146] : memref<200x1024xbf16, #tpu.memory_space<vmem>>, vector<8x224xbf16>
    tpu.vector_store %arg5[%c32_145, %c256_146], %88 {strides = array<i32>} : memref<200x1024xbf16, #tpu.memory_space<vmem>>, vector<8x224xbf16>,
    %c0_147 = arith.constant 0 : index
    %c3_148 = arith.constant 3 : index
    %c0_149 = arith.constant 0 : index
    %c0_150 = arith.constant 0 : index
    %90 = vector.load %arg1[%c0_147, %c3_148, %c0_149, %c0_150] : memref<1x4x8x258xbf16, #tpu.memory_space<vmem>>, vector<1x1x8x224xbf16>
    %91 = vector.shape_cast %90 : vector<1x1x8x224xbf16> to vector<8x224xbf16>
    %c40_151 = arith.constant 40 : index
    %c256_152 = arith.constant 256 : index
    %92 = vector.load %arg5[%c40_151, %c256_152] : memref<200x1024xbf16, #tpu.memory_space<vmem>>, vector<8x224xbf16>
    tpu.vector_store %arg5[%c40_151, %c256_152], %91 {strides = array<i32>} : memref<200x1024xbf16, #tpu.memory_space<vmem>>, vector<8x224xbf16>,
    %c0_153 = arith.constant 0 : index
    %c2_154 = arith.constant 2 : index
    %c0_155 = arith.constant 0 : index
    %c1_156 = arith.constant 1 : index
    %93 = vector.load %arg1[%c0_153, %c2_154, %c0_155, %c1_156] : memref<1x4x8x258xbf16, #tpu.memory_space<vmem>>, vector<1x1x8x224xbf16>
    %94 = vector.shape_cast %93 : vector<1x1x8x224xbf16> to vector<8x224xbf16>
    %c48_157 = arith.constant 48 : index
    %c256_158 = arith.constant 256 : index
    %95 = vector.load %arg5[%c48_157, %c256_158] : memref<200x1024xbf16, #tpu.memory_space<vmem>>, vector<8x224xbf16>
    tpu.vector_store %arg5[%c48_157, %c256_158], %94 {strides = array<i32>} : memref<200x1024xbf16, #tpu.memory_space<vmem>>, vector<8x224xbf16>,
    %c0_159 = arith.constant 0 : index
    %c3_160 = arith.constant 3 : index
    %c0_161 = arith.constant 0 : index
    %c1_162 = arith.constant 1 : index
    %96 = vector.load %arg1[%c0_159, %c3_160, %c0_161, %c1_162] : memref<1x4x8x258xbf16, #tpu.memory_space<vmem>>, vector<1x1x8x224xbf16>
    %97 = vector.shape_cast %96 : vector<1x1x8x224xbf16> to vector<8x224xbf16>
    %c56_163 = arith.constant 56 : index
    %c256_164 = arith.constant 256 : index
    %98 = vector.load %arg5[%c56_163, %c256_164] : memref<200x1024xbf16, #tpu.memory_space<vmem>>, vector<8x224xbf16>
    tpu.vector_store %arg5[%c56_163, %c256_164], %97 {strides = array<i32>} : memref<200x1024xbf16, #tpu.memory_space<vmem>>, vector<8x224xbf16>,
    %c0_165 = arith.constant 0 : index
    %c2_166 = arith.constant 2 : index
    %c0_167 = arith.constant 0 : index
    %c2_168 = arith.constant 2 : index
    %99 = vector.load %arg1[%c0_165, %c2_166, %c0_167, %c2_168] : memref<1x4x8x258xbf16, #tpu.memory_space<vmem>>, vector<1x1x8x224xbf16>
    %100 = vector.shape_cast %99 : vector<1x1x8x224xbf16> to vector<8x224xbf16>
    %c64_169 = arith.constant 64 : index
    %c256_170 = arith.constant 256 : index
    %101 = vector.load %arg5[%c64_169, %c256_170] : memref<200x1024xbf16, #tpu.memory_space<vmem>>, vector<8x224xbf16>
    tpu.vector_store %arg5[%c64_169, %c256_170], %100 {strides = array<i32>} : memref<200x1024xbf16, #tpu.memory_space<vmem>>, vector<8x224xbf16>,
    %c0_171 = arith.constant 0 : index
    %c3_172 = arith.constant 3 : index
    %c0_173 = arith.constant 0 : index
    %c2_174 = arith.constant 2 : index
    %102 = vector.load %arg1[%c0_171, %c3_172, %c0_173, %c2_174] : memref<1x4x8x258xbf16, #tpu.memory_space<vmem>>, vector<1x1x8x224xbf16>
    %103 = vector.shape_cast %102 : vector<1x1x8x224xbf16> to vector<8x224xbf16>
    %c72_175 = arith.constant 72 : index
    %c256_176 = arith.constant 256 : index
    %104 = vector.load %arg5[%c72_175, %c256_176] : memref<200x1024xbf16, #tpu.memory_space<vmem>>, vector<8x224xbf16>
    tpu.vector_store %arg5[%c72_175, %c256_176], %103 {strides = array<i32>} : memref<200x1024xbf16, #tpu.memory_space<vmem>>, vector<8x224xbf16>,
    %c0_177 = arith.constant 0 : index
    %c1_178 = arith.constant 1 : index
    %c0_179 = arith.constant 0 : index
    %c16_180 = arith.constant 16 : index
    %105 = vector.load %arg1[%c0_177, %c1_178, %c0_179, %c16_180] : memref<1x4x8x258xbf16, #tpu.memory_space<vmem>>, vector<1x1x8x224xbf16>
    %106 = vector.shape_cast %105 : vector<1x1x8x224xbf16> to vector<8x224xbf16>
    %c80_181 = arith.constant 80 : index
    %c256_182 = arith.constant 256 : index
    %107 = vector.load %arg5[%c80_181, %c256_182] : memref<200x1024xbf16, #tpu.memory_space<vmem>>, vector<8x224xbf16>
    tpu.vector_store %arg5[%c80_181, %c256_182], %106 {strides = array<i32>} : memref<200x1024xbf16, #tpu.memory_space<vmem>>, vector<8x224xbf16>,
    %c0_183 = arith.constant 0 : index
    %c0_184 = arith.constant 0 : index
    %c0_185 = arith.constant 0 : index
    %c17_186 = arith.constant 17 : index
    %108 = vector.load %arg1[%c0_183, %c0_184, %c0_185, %c17_186] : memref<1x4x8x258xbf16, #tpu.memory_space<vmem>>, vector<1x1x8x224xbf16>
    %109 = vector.shape_cast %108 : vector<1x1x8x224xbf16> to vector<8x224xbf16>
    %c88_187 = arith.constant 88 : index
    %c256_188 = arith.constant 256 : index
    %110 = vector.load %arg5[%c88_187, %c256_188] : memref<200x1024xbf16, #tpu.memory_space<vmem>>, vector<8x224xbf16>
    tpu.vector_store %arg5[%c88_187, %c256_188], %109 {strides = array<i32>} : memref<200x1024xbf16, #tpu.memory_space<vmem>>, vector<8x224xbf16>,
    %c0_189 = arith.constant 0 : index
    %c1_190 = arith.constant 1 : index
    %c0_191 = arith.constant 0 : index
    %c17_192 = arith.constant 17 : index
    %111 = vector.load %arg1[%c0_189, %c1_190, %c0_191, %c17_192] : memref<1x4x8x258xbf16, #tpu.memory_space<vmem>>, vector<1x1x8x224xbf16>
    %112 = vector.shape_cast %111 : vector<1x1x8x224xbf16> to vector<8x224xbf16>
    %c96_193 = arith.constant 96 : index
    %c256_194 = arith.constant 256 : index
    %113 = vector.load %arg5[%c96_193, %c256_194] : memref<200x1024xbf16, #tpu.memory_space<vmem>>, vector<8x224xbf16>
    tpu.vector_store %arg5[%c96_193, %c256_194], %112 {strides = array<i32>} : memref<200x1024xbf16, #tpu.memory_space<vmem>>, vector<8x224xbf16>,
    %c0_195 = arith.constant 0 : index
    %c0_196 = arith.constant 0 : index
    %c0_197 = arith.constant 0 : index
    %c18_198 = arith.constant 18 : index
    %114 = vector.load %arg1[%c0_195, %c0_196, %c0_197, %c18_198] : memref<1x4x8x258xbf16, #tpu.memory_space<vmem>>, vector<1x1x8x224xbf16>
    %115 = vector.shape_cast %114 : vector<1x1x8x224xbf16> to vector<8x224xbf16>
    %c104_199 = arith.constant 104 : index
    %c256_200 = arith.constant 256 : index
    %116 = vector.load %arg5[%c104_199, %c256_200] : memref<200x1024xbf16, #tpu.memory_space<vmem>>, vector<8x224xbf16>
    tpu.vector_store %arg5[%c104_199, %c256_200], %115 {strides = array<i32>} : memref<200x1024xbf16, #tpu.memory_space<vmem>>, vector<8x224xbf16>,
    %c0_201 = arith.constant 0 : index
    %c1_202 = arith.constant 1 : index
    %c0_203 = arith.constant 0 : index
    %c18_204 = arith.constant 18 : index
    %117 = vector.load %arg1[%c0_201, %c1_202, %c0_203, %c18_204] : memref<1x4x8x258xbf16, #tpu.memory_space<vmem>>, vector<1x1x8x224xbf16>
    %118 = vector.shape_cast %117 : vector<1x1x8x224xbf16> to vector<8x224xbf16>
    %c112_205 = arith.constant 112 : index
    %c256_206 = arith.constant 256 : index
    %119 = vector.load %arg5[%c112_205, %c256_206] : memref<200x1024xbf16, #tpu.memory_space<vmem>>, vector<8x224xbf16>
    tpu.vector_store %arg5[%c112_205, %c256_206], %118 {strides = array<i32>} : memref<200x1024xbf16, #tpu.memory_space<vmem>>, vector<8x224xbf16>,
    %c0_207 = arith.constant 0 : index
    %c3_208 = arith.constant 3 : index
    %c0_209 = arith.constant 0 : index
    %c16_210 = arith.constant 16 : index
    %120 = vector.load %arg1[%c0_207, %c3_208, %c0_209, %c16_210] : memref<1x4x8x258xbf16, #tpu.memory_space<vmem>>, vector<1x1x8x224xbf16>
    %121 = vector.shape_cast %120 : vector<1x1x8x224xbf16> to vector<8x224xbf16>
    %c120_211 = arith.constant 120 : index
    %c256_212 = arith.constant 256 : index
    %122 = vector.load %arg5[%c120_211, %c256_212] : memref<200x1024xbf16, #tpu.memory_space<vmem>>, vector<8x224xbf16>
    tpu.vector_store %arg5[%c120_211, %c256_212], %121 {strides = array<i32>} : memref<200x1024xbf16, #tpu.memory_space<vmem>>, vector<8x224xbf16>,
    %c0_213 = arith.constant 0 : index
    %c2_214 = arith.constant 2 : index
    %c0_215 = arith.constant 0 : index
    %c17_216 = arith.constant 17 : index
    %123 = vector.load %arg1[%c0_213, %c2_214, %c0_215, %c17_216] : memref<1x4x8x258xbf16, #tpu.memory_space<vmem>>, vector<1x1x8x224xbf16>
    %124 = vector.shape_cast %123 : vector<1x1x8x224xbf16> to vector<8x224xbf16>
    %c128_217 = arith.constant 128 : index
    %c256_218 = arith.constant 256 : index
    %125 = vector.load %arg5[%c128_217, %c256_218] : memref<200x1024xbf16, #tpu.memory_space<vmem>>, vector<8x224xbf16>
    tpu.vector_store %arg5[%c128_217, %c256_218], %124 {strides = array<i32>} : memref<200x1024xbf16, #tpu.memory_space<vmem>>, vector<8x224xbf16>,
    %c0_219 = arith.constant 0 : index
    %c3_220 = arith.constant 3 : index
    %c0_221 = arith.constant 0 : index
    %c17_222 = arith.constant 17 : index
    %126 = vector.load %arg1[%c0_219, %c3_220, %c0_221, %c17_222] : memref<1x4x8x258xbf16, #tpu.memory_space<vmem>>, vector<1x1x8x224xbf16>
    %127 = vector.shape_cast %126 : vector<1x1x8x224xbf16> to vector<8x224xbf16>
    %c136_223 = arith.constant 136 : index
    %c256_224 = arith.constant 256 : index
    %128 = vector.load %arg5[%c136_223, %c256_224] : memref<200x1024xbf16, #tpu.memory_space<vmem>>, vector<8x224xbf16>
    tpu.vector_store %arg5[%c136_223, %c256_224], %127 {strides = array<i32>} : memref<200x1024xbf16, #tpu.memory_space<vmem>>, vector<8x224xbf16>,
    %c0_225 = arith.constant 0 : index
    %c2_226 = arith.constant 2 : index
    %c0_227 = arith.constant 0 : index
    %c18_228 = arith.constant 18 : index
    %129 = vector.load %arg1[%c0_225, %c2_226, %c0_227, %c18_228] : memref<1x4x8x258xbf16, #tpu.memory_space<vmem>>, vector<1x1x8x224xbf16>
    %130 = vector.shape_cast %129 : vector<1x1x8x224xbf16> to vector<8x224xbf16>
    %c144_229 = arith.constant 144 : index
    %c256_230 = arith.constant 256 : index
    %131 = vector.load %arg5[%c144_229, %c256_230] : memref<200x1024xbf16, #tpu.memory_space<vmem>>, vector<8x224xbf16>
    tpu.vector_store %arg5[%c144_229, %c256_230], %130 {strides = array<i32>} : memref<200x1024xbf16, #tpu.memory_space<vmem>>, vector<8x224xbf16>,
    %c0_231 = arith.constant 0 : index
    %c3_232 = arith.constant 3 : index
    %c0_233 = arith.constant 0 : index
    %c18_234 = arith.constant 18 : index
    %132 = vector.load %arg1[%c0_231, %c3_232, %c0_233, %c18_234] : memref<1x4x8x258xbf16, #tpu.memory_space<vmem>>, vector<1x1x8x224xbf16>
    %133 = vector.shape_cast %132 : vector<1x1x8x224xbf16> to vector<8x224xbf16>
    %c152_235 = arith.constant 152 : index
    %c256_236 = arith.constant 256 : index
    %134 = vector.load %arg5[%c152_235, %c256_236] : memref<200x1024xbf16, #tpu.memory_space<vmem>>, vector<8x224xbf16>
    tpu.vector_store %arg5[%c152_235, %c256_236], %133 {strides = array<i32>} : memref<200x1024xbf16, #tpu.memory_space<vmem>>, vector<8x224xbf16>,
    %c0_237 = arith.constant 0 : index
    %c1_238 = arith.constant 1 : index
    %c0_239 = arith.constant 0 : index
    %c32_240 = arith.constant 32 : index
    %135 = vector.load %arg1[%c0_237, %c1_238, %c0_239, %c32_240] : memref<1x4x8x258xbf16, #tpu.memory_space<vmem>>, vector<1x1x8x224xbf16>
    %136 = vector.shape_cast %135 : vector<1x1x8x224xbf16> to vector<8x224xbf16>
    %c160_241 = arith.constant 160 : index
    %c256_242 = arith.constant 256 : index
    %137 = vector.load %arg5[%c160_241, %c256_242] : memref<200x1024xbf16, #tpu.memory_space<vmem>>, vector<8x224xbf16>
    tpu.vector_store %arg5[%c160_241, %c256_242], %136 {strides = array<i32>} : memref<200x1024xbf16, #tpu.memory_space<vmem>>, vector<8x224xbf16>,
    %c0_243 = arith.constant 0 : index
    %c0_244 = arith.constant 0 : index
    %c0_245 = arith.constant 0 : index
    %c33_246 = arith.constant 33 : index
    %138 = vector.load %arg1[%c0_243, %c0_244, %c0_245, %c33_246] : memref<1x4x8x258xbf16, #tpu.memory_space<vmem>>, vector<1x1x8x224xbf16>
    %139 = vector.shape_cast %138 : vector<1x1x8x224xbf16> to vector<8x224xbf16>
    %c168_247 = arith.constant 168 : index
    %c256_248 = arith.constant 256 : index
    %140 = vector.load %arg5[%c168_247, %c256_248] : memref<200x1024xbf16, #tpu.memory_space<vmem>>, vector<8x224xbf16>
    tpu.vector_store %arg5[%c168_247, %c256_248], %139 {strides = array<i32>} : memref<200x1024xbf16, #tpu.memory_space<vmem>>, vector<8x224xbf16>,
    %c0_249 = arith.constant 0 : index
    %c1_250 = arith.constant 1 : index
    %c0_251 = arith.constant 0 : index
    %c33_252 = arith.constant 33 : index
    %141 = vector.load %arg1[%c0_249, %c1_250, %c0_251, %c33_252] : memref<1x4x8x258xbf16, #tpu.memory_space<vmem>>, vector<1x1x8x224xbf16>
    %142 = vector.shape_cast %141 : vector<1x1x8x224xbf16> to vector<8x224xbf16>
    %c176_253 = arith.constant 176 : index
    %c256_254 = arith.constant 256 : index
    %143 = vector.load %arg5[%c176_253, %c256_254] : memref<200x1024xbf16, #tpu.memory_space<vmem>>, vector<8x224xbf16>
    tpu.vector_store %arg5[%c176_253, %c256_254], %142 {strides = array<i32>} : memref<200x1024xbf16, #tpu.memory_space<vmem>>, vector<8x224xbf16>,
    %c0_255 = arith.constant 0 : index
    %c0_256 = arith.constant 0 : index
    %c0_257 = arith.constant 0 : index
    %c34_258 = arith.constant 34 : index
    %144 = vector.load %arg1[%c0_255, %c0_256, %c0_257, %c34_258] : memref<1x4x8x258xbf16, #tpu.memory_space<vmem>>, vector<1x1x8x224xbf16>
    %145 = vector.shape_cast %144 : vector<1x1x8x224xbf16> to vector<8x224xbf16>
    %c184_259 = arith.constant 184 : index
    %c256_260 = arith.constant 256 : index
    %146 = vector.load %arg5[%c184_259, %c256_260] : memref<200x1024xbf16, #tpu.memory_space<vmem>>, vector<8x224xbf16>
    tpu.vector_store %arg5[%c184_259, %c256_260], %145 {strides = array<i32>} : memref<200x1024xbf16, #tpu.memory_space<vmem>>, vector<8x224xbf16>,
    %c0_261 = arith.constant 0 : index
    %c1_262 = arith.constant 1 : index
    %c0_263 = arith.constant 0 : index
    %c34_264 = arith.constant 34 : index
    %147 = vector.load %arg1[%c0_261, %c1_262, %c0_263, %c34_264] : memref<1x4x8x258xbf16, #tpu.memory_space<vmem>>, vector<1x1x8x224xbf16>
    %148 = vector.shape_cast %147 : vector<1x1x8x224xbf16> to vector<8x224xbf16>
    %c192_265 = arith.constant 192 : index
    %c256_266 = arith.constant 256 : index
    %149 = vector.load %arg5[%c192_265, %c256_266] : memref<200x1024xbf16, #tpu.memory_space<vmem>>, vector<8x224xbf16>
    tpu.vector_store %arg5[%c192_265, %c256_266], %148 {strides = array<i32>} : memref<200x1024xbf16, #tpu.memory_space<vmem>>, vector<8x224xbf16>,
    %c0_267 = arith.constant 0 : index
    %c2_268 = arith.constant 2 : index
    %c0_269 = arith.constant 0 : index
    %c0_270 = arith.constant 0 : index
    %150 = vector.load %arg1[%c0_267, %c2_268, %c0_269, %c0_270] : memref<1x4x8x258xbf16, #tpu.memory_space<vmem>>, vector<1x1x8x224xbf16>
    %151 = vector.shape_cast %150 : vector<1x1x8x224xbf16> to vector<8x224xbf16>
    %c0_271 = arith.constant 0 : index
    %c512 = arith.constant 512 : index
    %152 = vector.load %arg5[%c0_271, %c512] : memref<200x1024xbf16, #tpu.memory_space<vmem>>, vector<8x224xbf16>
    tpu.vector_store %arg5[%c0_271, %c512], %151 {strides = array<i32>} : memref<200x1024xbf16, #tpu.memory_space<vmem>>, vector<8x224xbf16>,
    %c0_272 = arith.constant 0 : index
    %c3_273 = arith.constant 3 : index
    %c0_274 = arith.constant 0 : index
    %c0_275 = arith.constant 0 : index
    %153 = vector.load %arg1[%c0_272, %c3_273, %c0_274, %c0_275] : memref<1x4x8x258xbf16, #tpu.memory_space<vmem>>, vector<1x1x8x224xbf16>
    %154 = vector.shape_cast %153 : vector<1x1x8x224xbf16> to vector<8x224xbf16>
    %c8_276 = arith.constant 8 : index
    %c512_277 = arith.constant 512 : index
    %155 = vector.load %arg5[%c8_276, %c512_277] : memref<200x1024xbf16, #tpu.memory_space<vmem>>, vector<8x224xbf16>
    tpu.vector_store %arg5[%c8_276, %c512_277], %154 {strides = array<i32>} : memref<200x1024xbf16, #tpu.memory_space<vmem>>, vector<8x224xbf16>,
    %c0_278 = arith.constant 0 : index
    %c2_279 = arith.constant 2 : index
    %c0_280 = arith.constant 0 : index
    %c1_281 = arith.constant 1 : index
    %156 = vector.load %arg1[%c0_278, %c2_279, %c0_280, %c1_281] : memref<1x4x8x258xbf16, #tpu.memory_space<vmem>>, vector<1x1x8x224xbf16>
    %157 = vector.shape_cast %156 : vector<1x1x8x224xbf16> to vector<8x224xbf16>
    %c16_282 = arith.constant 16 : index
    %c512_283 = arith.constant 512 : index
    %158 = vector.load %arg5[%c16_282, %c512_283] : memref<200x1024xbf16, #tpu.memory_space<vmem>>, vector<8x224xbf16>
    tpu.vector_store %arg5[%c16_282, %c512_283], %157 {strides = array<i32>} : memref<200x1024xbf16, #tpu.memory_space<vmem>>, vector<8x224xbf16>,
    %c0_284 = arith.constant 0 : index
    %c3_285 = arith.constant 3 : index
    %c0_286 = arith.constant 0 : index
    %c1_287 = arith.constant 1 : index
    %159 = vector.load %arg1[%c0_284, %c3_285, %c0_286, %c1_287] : memref<1x4x8x258xbf16, #tpu.memory_space<vmem>>, vector<1x1x8x224xbf16>
    %160 = vector.shape_cast %159 : vector<1x1x8x224xbf16> to vector<8x224xbf16>
    %c24_288 = arith.constant 24 : index
    %c512_289 = arith.constant 512 : index
    %161 = vector.load %arg5[%c24_288, %c512_289] : memref<200x1024xbf16, #tpu.memory_space<vmem>>, vector<8x224xbf16>
    tpu.vector_store %arg5[%c24_288, %c512_289], %160 {strides = array<i32>} : memref<200x1024xbf16, #tpu.memory_space<vmem>>, vector<8x224xbf16>,
    %c0_290 = arith.constant 0 : index
    %c2_291 = arith.constant 2 : index
    %c0_292 = arith.constant 0 : index
    %c2_293 = arith.constant 2 : index
    %162 = vector.load %arg1[%c0_290, %c2_291, %c0_292, %c2_293] : memref<1x4x8x258xbf16, #tpu.memory_space<vmem>>, vector<1x1x8x224xbf16>
    %163 = vector.shape_cast %162 : vector<1x1x8x224xbf16> to vector<8x224xbf16>
    %c32_294 = arith.constant 32 : index
    %c512_295 = arith.constant 512 : index
    %164 = vector.load %arg5[%c32_294, %c512_295] : memref<200x1024xbf16, #tpu.memory_space<vmem>>, vector<8x224xbf16>
    tpu.vector_store %arg5[%c32_294, %c512_295], %163 {strides = array<i32>} : memref<200x1024xbf16, #tpu.memory_space<vmem>>, vector<8x224xbf16>,
    %c0_296 = arith.constant 0 : index
    %c0_297 = arith.constant 0 : index
    %c0_298 = arith.constant 0 : index
    %c16_299 = arith.constant 16 : index
    %165 = vector.load %arg1[%c0_296, %c0_297, %c0_298, %c16_299] : memref<1x4x8x258xbf16, #tpu.memory_space<vmem>>, vector<1x1x8x224xbf16>
    %166 = vector.shape_cast %165 : vector<1x1x8x224xbf16> to vector<8x224xbf16>
    %c40_300 = arith.constant 40 : index
    %c512_301 = arith.constant 512 : index
    %167 = vector.load %arg5[%c40_300, %c512_301] : memref<200x1024xbf16, #tpu.memory_space<vmem>>, vector<8x224xbf16>
    tpu.vector_store %arg5[%c40_300, %c512_301], %166 {strides = array<i32>} : memref<200x1024xbf16, #tpu.memory_space<vmem>>, vector<8x224xbf16>,
    %c0_302 = arith.constant 0 : index
    %c1_303 = arith.constant 1 : index
    %c0_304 = arith.constant 0 : index
    %c16_305 = arith.constant 16 : index
    %168 = vector.load %arg1[%c0_302, %c1_303, %c0_304, %c16_305] : memref<1x4x8x258xbf16, #tpu.memory_space<vmem>>, vector<1x1x8x224xbf16>
    %169 = vector.shape_cast %168 : vector<1x1x8x224xbf16> to vector<8x224xbf16>
    %c48_306 = arith.constant 48 : index
    %c512_307 = arith.constant 512 : index
    %170 = vector.load %arg5[%c48_306, %c512_307] : memref<200x1024xbf16, #tpu.memory_space<vmem>>, vector<8x224xbf16>
    tpu.vector_store %arg5[%c48_306, %c512_307], %169 {strides = array<i32>} : memref<200x1024xbf16, #tpu.memory_space<vmem>>, vector<8x224xbf16>,
    %c0_308 = arith.constant 0 : index
    %c0_309 = arith.constant 0 : index
    %c0_310 = arith.constant 0 : index
    %c17_311 = arith.constant 17 : index
    %171 = vector.load %arg1[%c0_308, %c0_309, %c0_310, %c17_311] : memref<1x4x8x258xbf16, #tpu.memory_space<vmem>>, vector<1x1x8x224xbf16>
    %172 = vector.shape_cast %171 : vector<1x1x8x224xbf16> to vector<8x224xbf16>
    %c56_312 = arith.constant 56 : index
    %c512_313 = arith.constant 512 : index
    %173 = vector.load %arg5[%c56_312, %c512_313] : memref<200x1024xbf16, #tpu.memory_space<vmem>>, vector<8x224xbf16>
    tpu.vector_store %arg5[%c56_312, %c512_313], %172 {strides = array<i32>} : memref<200x1024xbf16, #tpu.memory_space<vmem>>, vector<8x224xbf16>,
    %c0_314 = arith.constant 0 : index
    %c1_315 = arith.constant 1 : index
    %c0_316 = arith.constant 0 : index
    %c17_317 = arith.constant 17 : index
    %174 = vector.load %arg1[%c0_314, %c1_315, %c0_316, %c17_317] : memref<1x4x8x258xbf16, #tpu.memory_space<vmem>>, vector<1x1x8x224xbf16>
    %175 = vector.shape_cast %174 : vector<1x1x8x224xbf16> to vector<8x224xbf16>
    %c64_318 = arith.constant 64 : index
    %c512_319 = arith.constant 512 : index
    %176 = vector.load %arg5[%c64_318, %c512_319] : memref<200x1024xbf16, #tpu.memory_space<vmem>>, vector<8x224xbf16>
    tpu.vector_store %arg5[%c64_318, %c512_319], %175 {strides = array<i32>} : memref<200x1024xbf16, #tpu.memory_space<vmem>>, vector<8x224xbf16>,
    %c0_320 = arith.constant 0 : index
    %c0_321 = arith.constant 0 : index
    %c0_322 = arith.constant 0 : index
    %c18_323 = arith.constant 18 : index
    %177 = vector.load %arg1[%c0_320, %c0_321, %c0_322, %c18_323] : memref<1x4x8x258xbf16, #tpu.memory_space<vmem>>, vector<1x1x8x224xbf16>
    %178 = vector.shape_cast %177 : vector<1x1x8x224xbf16> to vector<8x224xbf16>
    %c72_324 = arith.constant 72 : index
    %c512_325 = arith.constant 512 : index
    %179 = vector.load %arg5[%c72_324, %c512_325] : memref<200x1024xbf16, #tpu.memory_space<vmem>>, vector<8x224xbf16>
    tpu.vector_store %arg5[%c72_324, %c512_325], %178 {strides = array<i32>} : memref<200x1024xbf16, #tpu.memory_space<vmem>>, vector<8x224xbf16>,
    %c0_326 = arith.constant 0 : index
    %c2_327 = arith.constant 2 : index
    %c0_328 = arith.constant 0 : index
    %c16_329 = arith.constant 16 : index
    %180 = vector.load %arg1[%c0_326, %c2_327, %c0_328, %c16_329] : memref<1x4x8x258xbf16, #tpu.memory_space<vmem>>, vector<1x1x8x224xbf16>
    %181 = vector.shape_cast %180 : vector<1x1x8x224xbf16> to vector<8x224xbf16>
    %c80_330 = arith.constant 80 : index
    %c512_331 = arith.constant 512 : index
    %182 = vector.load %arg5[%c80_330, %c512_331] : memref<200x1024xbf16, #tpu.memory_space<vmem>>, vector<8x224xbf16>
    tpu.vector_store %arg5[%c80_330, %c512_331], %181 {strides = array<i32>} : memref<200x1024xbf16, #tpu.memory_space<vmem>>, vector<8x224xbf16>,
    %c0_332 = arith.constant 0 : index
    %c3_333 = arith.constant 3 : index
    %c0_334 = arith.constant 0 : index
    %c16_335 = arith.constant 16 : index
    %183 = vector.load %arg1[%c0_332, %c3_333, %c0_334, %c16_335] : memref<1x4x8x258xbf16, #tpu.memory_space<vmem>>, vector<1x1x8x224xbf16>
    %184 = vector.shape_cast %183 : vector<1x1x8x224xbf16> to vector<8x224xbf16>
    %c88_336 = arith.constant 88 : index
    %c512_337 = arith.constant 512 : index
    %185 = vector.load %arg5[%c88_336, %c512_337] : memref<200x1024xbf16, #tpu.memory_space<vmem>>, vector<8x224xbf16>
    tpu.vector_store %arg5[%c88_336, %c512_337], %184 {strides = array<i32>} : memref<200x1024xbf16, #tpu.memory_space<vmem>>, vector<8x224xbf16>,
    %c0_338 = arith.constant 0 : index
    %c2_339 = arith.constant 2 : index
    %c0_340 = arith.constant 0 : index
    %c17_341 = arith.constant 17 : index
    %186 = vector.load %arg1[%c0_338, %c2_339, %c0_340, %c17_341] : memref<1x4x8x258xbf16, #tpu.memory_space<vmem>>, vector<1x1x8x224xbf16>
    %187 = vector.shape_cast %186 : vector<1x1x8x224xbf16> to vector<8x224xbf16>
    %c96_342 = arith.constant 96 : index
    %c512_343 = arith.constant 512 : index
    %188 = vector.load %arg5[%c96_342, %c512_343] : memref<200x1024xbf16, #tpu.memory_space<vmem>>, vector<8x224xbf16>
    tpu.vector_store %arg5[%c96_342, %c512_343], %187 {strides = array<i32>} : memref<200x1024xbf16, #tpu.memory_space<vmem>>, vector<8x224xbf16>,
    %c0_344 = arith.constant 0 : index
    %c3_345 = arith.constant 3 : index
    %c0_346 = arith.constant 0 : index
    %c17_347 = arith.constant 17 : index
    %189 = vector.load %arg1[%c0_344, %c3_345, %c0_346, %c17_347] : memref<1x4x8x258xbf16, #tpu.memory_space<vmem>>, vector<1x1x8x224xbf16>
    %190 = vector.shape_cast %189 : vector<1x1x8x224xbf16> to vector<8x224xbf16>
    %c104_348 = arith.constant 104 : index
    %c512_349 = arith.constant 512 : index
    %191 = vector.load %arg5[%c104_348, %c512_349] : memref<200x1024xbf16, #tpu.memory_space<vmem>>, vector<8x224xbf16>
    tpu.vector_store %arg5[%c104_348, %c512_349], %190 {strides = array<i32>} : memref<200x1024xbf16, #tpu.memory_space<vmem>>, vector<8x224xbf16>,
    %c0_350 = arith.constant 0 : index
    %c2_351 = arith.constant 2 : index
    %c0_352 = arith.constant 0 : index
    %c18_353 = arith.constant 18 : index
    %192 = vector.load %arg1[%c0_350, %c2_351, %c0_352, %c18_353] : memref<1x4x8x258xbf16, #tpu.memory_space<vmem>>, vector<1x1x8x224xbf16>
    %193 = vector.shape_cast %192 : vector<1x1x8x224xbf16> to vector<8x224xbf16>
    %c112_354 = arith.constant 112 : index
    %c512_355 = arith.constant 512 : index
    %194 = vector.load %arg5[%c112_354, %c512_355] : memref<200x1024xbf16, #tpu.memory_space<vmem>>, vector<8x224xbf16>
    tpu.vector_store %arg5[%c112_354, %c512_355], %193 {strides = array<i32>} : memref<200x1024xbf16, #tpu.memory_space<vmem>>, vector<8x224xbf16>,
    %c0_356 = arith.constant 0 : index
    %c0_357 = arith.constant 0 : index
    %c0_358 = arith.constant 0 : index
    %c32_359 = arith.constant 32 : index
    %195 = vector.load %arg1[%c0_356, %c0_357, %c0_358, %c32_359] : memref<1x4x8x258xbf16, #tpu.memory_space<vmem>>, vector<1x1x8x224xbf16>
    %196 = vector.shape_cast %195 : vector<1x1x8x224xbf16> to vector<8x224xbf16>
    %c120_360 = arith.constant 120 : index
    %c512_361 = arith.constant 512 : index
    %197 = vector.load %arg5[%c120_360, %c512_361] : memref<200x1024xbf16, #tpu.memory_space<vmem>>, vector<8x224xbf16>
    tpu.vector_store %arg5[%c120_360, %c512_361], %196 {strides = array<i32>} : memref<200x1024xbf16, #tpu.memory_space<vmem>>, vector<8x224xbf16>,
    %c0_362 = arith.constant 0 : index
    %c1_363 = arith.constant 1 : index
    %c0_364 = arith.constant 0 : index
    %c32_365 = arith.constant 32 : index
    %198 = vector.load %arg1[%c0_362, %c1_363, %c0_364, %c32_365] : memref<1x4x8x258xbf16, #tpu.memory_space<vmem>>, vector<1x1x8x224xbf16>
    %199 = vector.shape_cast %198 : vector<1x1x8x224xbf16> to vector<8x224xbf16>
    %c128_366 = arith.constant 128 : index
    %c512_367 = arith.constant 512 : index
    %200 = vector.load %arg5[%c128_366, %c512_367] : memref<200x1024xbf16, #tpu.memory_space<vmem>>, vector<8x224xbf16>
    tpu.vector_store %arg5[%c128_366, %c512_367], %199 {strides = array<i32>} : memref<200x1024xbf16, #tpu.memory_space<vmem>>, vector<8x224xbf16>,
    %c0_368 = arith.constant 0 : index
    %c0_369 = arith.constant 0 : index
    %c0_370 = arith.constant 0 : index
    %c33_371 = arith.constant 33 : index
    %201 = vector.load %arg1[%c0_368, %c0_369, %c0_370, %c33_371] : memref<1x4x8x258xbf16, #tpu.memory_space<vmem>>, vector<1x1x8x224xbf16>
    %202 = vector.shape_cast %201 : vector<1x1x8x224xbf16> to vector<8x224xbf16>
    %c136_372 = arith.constant 136 : index
    %c512_373 = arith.constant 512 : index
    %203 = vector.load %arg5[%c136_372, %c512_373] : memref<200x1024xbf16, #tpu.memory_space<vmem>>, vector<8x224xbf16>
    tpu.vector_store %arg5[%c136_372, %c512_373], %202 {strides = array<i32>} : memref<200x1024xbf16, #tpu.memory_space<vmem>>, vector<8x224xbf16>,
    %c0_374 = arith.constant 0 : index
    %c1_375 = arith.constant 1 : index
    %c0_376 = arith.constant 0 : index
    %c33_377 = arith.constant 33 : index
    %204 = vector.load %arg1[%c0_374, %c1_375, %c0_376, %c33_377] : memref<1x4x8x258xbf16, #tpu.memory_space<vmem>>, vector<1x1x8x224xbf16>
    %205 = vector.shape_cast %204 : vector<1x1x8x224xbf16> to vector<8x224xbf16>
    %c144_378 = arith.constant 144 : index
    %c512_379 = arith.constant 512 : index
    %206 = vector.load %arg5[%c144_378, %c512_379] : memref<200x1024xbf16, #tpu.memory_space<vmem>>, vector<8x224xbf16>
    tpu.vector_store %arg5[%c144_378, %c512_379], %205 {strides = array<i32>} : memref<200x1024xbf16, #tpu.memory_space<vmem>>, vector<8x224xbf16>,
    %c0_380 = arith.constant 0 : index
    %c0_381 = arith.constant 0 : index
    %c0_382 = arith.constant 0 : index
    %c34_383 = arith.constant 34 : index
    %207 = vector.load %arg1[%c0_380, %c0_381, %c0_382, %c34_383] : memref<1x4x8x258xbf16, #tpu.memory_space<vmem>>, vector<1x1x8x224xbf16>
    %208 = vector.shape_cast %207 : vector<1x1x8x224xbf16> to vector<8x224xbf16>
    %c152_384 = arith.constant 152 : index
    %c512_385 = arith.constant 512 : index
    %209 = vector.load %arg5[%c152_384, %c512_385] : memref<200x1024xbf16, #tpu.memory_space<vmem>>, vector<8x224xbf16>
    tpu.vector_store %arg5[%c152_384, %c512_385], %208 {strides = array<i32>} : memref<200x1024xbf16, #tpu.memory_space<vmem>>, vector<8x224xbf16>,
    %c0_386 = arith.constant 0 : index
    %c2_387 = arith.constant 2 : index
    %c0_388 = arith.constant 0 : index
    %c32_389 = arith.constant 32 : index
    %210 = vector.load %arg1[%c0_386, %c2_387, %c0_388, %c32_389] : memref<1x4x8x258xbf16, #tpu.memory_space<vmem>>, vector<1x1x8x224xbf16>
    %211 = vector.shape_cast %210 : vector<1x1x8x224xbf16> to vector<8x224xbf16>
    %c160_390 = arith.constant 160 : index
    %c512_391 = arith.constant 512 : index
    %212 = vector.load %arg5[%c160_390, %c512_391] : memref<200x1024xbf16, #tpu.memory_space<vmem>>, vector<8x224xbf16>
    tpu.vector_store %arg5[%c160_390, %c512_391], %211 {strides = array<i32>} : memref<200x1024xbf16, #tpu.memory_space<vmem>>, vector<8x224xbf16>,
    %c0_392 = arith.constant 0 : index
    %c3_393 = arith.constant 3 : index
    %c0_394 = arith.constant 0 : index
    %c32_395 = arith.constant 32 : index
    %213 = vector.load %arg1[%c0_392, %c3_393, %c0_394, %c32_395] : memref<1x4x8x258xbf16, #tpu.memory_space<vmem>>, vector<1x1x8x224xbf16>
    %214 = vector.shape_cast %213 : vector<1x1x8x224xbf16> to vector<8x224xbf16>
    %c168_396 = arith.constant 168 : index
    %c512_397 = arith.constant 512 : index
    %215 = vector.load %arg5[%c168_396, %c512_397] : memref<200x1024xbf16, #tpu.memory_space<vmem>>, vector<8x224xbf16>
    tpu.vector_store %arg5[%c168_396, %c512_397], %214 {strides = array<i32>} : memref<200x1024xbf16, #tpu.memory_space<vmem>>, vector<8x224xbf16>,
    %c0_398 = arith.constant 0 : index
    %c2_399 = arith.constant 2 : index
    %c0_400 = arith.constant 0 : index
    %c33_401 = arith.constant 33 : index
    %216 = vector.load %arg1[%c0_398, %c2_399, %c0_400, %c33_401] : memref<1x4x8x258xbf16, #tpu.memory_space<vmem>>, vector<1x1x8x224xbf16>
    %217 = vector.shape_cast %216 : vector<1x1x8x224xbf16> to vector<8x224xbf16>
    %c176_402 = arith.constant 176 : index
    %c512_403 = arith.constant 512 : index
    %218 = vector.load %arg5[%c176_402, %c512_403] : memref<200x1024xbf16, #tpu.memory_space<vmem>>, vector<8x224xbf16>
    tpu.vector_store %arg5[%c176_402, %c512_403], %217 {strides = array<i32>} : memref<200x1024xbf16, #tpu.memory_space<vmem>>, vector<8x224xbf16>,
    %c0_404 = arith.constant 0 : index
    %c3_405 = arith.constant 3 : index
    %c0_406 = arith.constant 0 : index
    %c33_407 = arith.constant 33 : index
    %219 = vector.load %arg1[%c0_404, %c3_405, %c0_406, %c33_407] : memref<1x4x8x258xbf16, #tpu.memory_space<vmem>>, vector<1x1x8x224xbf16>
    %220 = vector.shape_cast %219 : vector<1x1x8x224xbf16> to vector<8x224xbf16>
    %c184_408 = arith.constant 184 : index
    %c512_409 = arith.constant 512 : index
    %221 = vector.load %arg5[%c184_408, %c512_409] : memref<200x1024xbf16, #tpu.memory_space<vmem>>, vector<8x224xbf16>
    tpu.vector_store %arg5[%c184_408, %c512_409], %220 {strides = array<i32>} : memref<200x1024xbf16, #tpu.memory_space<vmem>>, vector<8x224xbf16>,
    %c0_410 = arith.constant 0 : index
    %c2_411 = arith.constant 2 : index
    %c0_412 = arith.constant 0 : index
    %c34_413 = arith.constant 34 : index
    %222 = vector.load %arg1[%c0_410, %c2_411, %c0_412, %c34_413] : memref<1x4x8x258xbf16, #tpu.memory_space<vmem>>, vector<1x1x8x224xbf16>
    %223 = vector.shape_cast %222 : vector<1x1x8x224xbf16> to vector<8x224xbf16>
    %c192_414 = arith.constant 192 : index
    %c512_415 = arith.constant 512 : index
    %224 = vector.load %arg5[%c192_414, %c512_415] : memref<200x1024xbf16, #tpu.memory_space<vmem>>, vector<8x224xbf16>
    tpu.vector_store %arg5[%c192_414, %c512_415], %223 {strides = array<i32>} : memref<200x1024xbf16, #tpu.memory_space<vmem>>, vector<8x224xbf16>,
    %c0_416 = arith.constant 0 : index
    %c3_417 = arith.constant 3 : index
    %c0_418 = arith.constant 0 : index
    %c0_419 = arith.constant 0 : index
    %225 = vector.load %arg1[%c0_416, %c3_417, %c0_418, %c0_419] : memref<1x4x8x258xbf16, #tpu.memory_space<vmem>>, vector<1x1x8x224xbf16>
    %226 = vector.shape_cast %225 : vector<1x1x8x224xbf16> to vector<8x224xbf16>
    %c0_420 = arith.constant 0 : index
    %c768 = arith.constant 768 : index
    %227 = vector.load %arg5[%c0_420, %c768] : memref<200x1024xbf16, #tpu.memory_space<vmem>>, vector<8x224xbf16>
    tpu.vector_store %arg5[%c0_420, %c768], %226 {strides = array<i32>} : memref<200x1024xbf16, #tpu.memory_space<vmem>>, vector<8x224xbf16>,
    %c0_421 = arith.constant 0 : index
    %c2_422 = arith.constant 2 : index
    %c0_423 = arith.constant 0 : index
    %c1_424 = arith.constant 1 : index
    %228 = vector.load %arg1[%c0_421, %c2_422, %c0_423, %c1_424] : memref<1x4x8x258xbf16, #tpu.memory_space<vmem>>, vector<1x1x8x224xbf16>
    %229 = vector.shape_cast %228 : vector<1x1x8x224xbf16> to vector<8x224xbf16>
    %c8_425 = arith.constant 8 : index
    %c768_426 = arith.constant 768 : index
    %230 = vector.load %arg5[%c8_425, %c768_426] : memref<200x1024xbf16, #tpu.memory_space<vmem>>, vector<8x224xbf16>
    tpu.vector_store %arg5[%c8_425, %c768_426], %229 {strides = array<i32>} : memref<200x1024xbf16, #tpu.memory_space<vmem>>, vector<8x224xbf16>,
    %c0_427 = arith.constant 0 : index
    %c3_428 = arith.constant 3 : index
    %c0_429 = arith.constant 0 : index
    %c1_430 = arith.constant 1 : index
    %231 = vector.load %arg1[%c0_427, %c3_428, %c0_429, %c1_430] : memref<1x4x8x258xbf16, #tpu.memory_space<vmem>>, vector<1x1x8x224xbf16>
    %232 = vector.shape_cast %231 : vector<1x1x8x224xbf16> to vector<8x224xbf16>
    %c16_431 = arith.constant 16 : index
    %c768_432 = arith.constant 768 : index
    %233 = vector.load %arg5[%c16_431, %c768_432] : memref<200x1024xbf16, #tpu.memory_space<vmem>>, vector<8x224xbf16>
    tpu.vector_store %arg5[%c16_431, %c768_432], %232 {strides = array<i32>} : memref<200x1024xbf16, #tpu.memory_space<vmem>>, vector<8x224xbf16>,
    %c0_433 = arith.constant 0 : index
    %c2_434 = arith.constant 2 : index
    %c0_435 = arith.constant 0 : index
    %c2_436 = arith.constant 2 : index
    %234 = vector.load %arg1[%c0_433, %c2_434, %c0_435, %c2_436] : memref<1x4x8x258xbf16, #tpu.memory_space<vmem>>, vector<1x1x8x224xbf16>
    %235 = vector.shape_cast %234 : vector<1x1x8x224xbf16> to vector<8x224xbf16>
    %c24_437 = arith.constant 24 : index
    %c768_438 = arith.constant 768 : index
    %236 = vector.load %arg5[%c24_437, %c768_438] : memref<200x1024xbf16, #tpu.memory_space<vmem>>, vector<8x224xbf16>
    tpu.vector_store %arg5[%c24_437, %c768_438], %235 {strides = array<i32>} : memref<200x1024xbf16, #tpu.memory_space<vmem>>, vector<8x224xbf16>,
    %c0_439 = arith.constant 0 : index
    %c3_440 = arith.constant 3 : index
    %c0_441 = arith.constant 0 : index
    %c2_442 = arith.constant 2 : index
    %237 = vector.load %arg1[%c0_439, %c3_440, %c0_441, %c2_442] : memref<1x4x8x258xbf16, #tpu.memory_space<vmem>>, vector<1x1x8x224xbf16>
    %238 = vector.shape_cast %237 : vector<1x1x8x224xbf16> to vector<8x224xbf16>
    %c32_443 = arith.constant 32 : index
    %c768_444 = arith.constant 768 : index
    %239 = vector.load %arg5[%c32_443, %c768_444] : memref<200x1024xbf16, #tpu.memory_space<vmem>>, vector<8x224xbf16>
    tpu.vector_store %arg5[%c32_443, %c768_444], %238 {strides = array<i32>} : memref<200x1024xbf16, #tpu.memory_space<vmem>>, vector<8x224xbf16>,
    %c0_445 = arith.constant 0 : index
    %c1_446 = arith.constant 1 : index
    %c0_447 = arith.constant 0 : index
    %c16_448 = arith.constant 16 : index
    %240 = vector.load %arg1[%c0_445, %c1_446, %c0_447, %c16_448] : memref<1x4x8x258xbf16, #tpu.memory_space<vmem>>, vector<1x1x8x224xbf16>
    %241 = vector.shape_cast %240 : vector<1x1x8x224xbf16> to vector<8x224xbf16>
    %c40_449 = arith.constant 40 : index
    %c768_450 = arith.constant 768 : index
    %242 = vector.load %arg5[%c40_449, %c768_450] : memref<200x1024xbf16, #tpu.memory_space<vmem>>, vector<8x224xbf16>
    tpu.vector_store %arg5[%c40_449, %c768_450], %241 {strides = array<i32>} : memref<200x1024xbf16, #tpu.memory_space<vmem>>, vector<8x224xbf16>,
    %c0_451 = arith.constant 0 : index
    %c0_452 = arith.constant 0 : index
    %c0_453 = arith.constant 0 : index
    %c17_454 = arith.constant 17 : index
    %243 = vector.load %arg1[%c0_451, %c0_452, %c0_453, %c17_454] : memref<1x4x8x258xbf16, #tpu.memory_space<vmem>>, vector<1x1x8x224xbf16>
    %244 = vector.shape_cast %243 : vector<1x1x8x224xbf16> to vector<8x224xbf16>
    %c48_455 = arith.constant 48 : index
    %c768_456 = arith.constant 768 : index
    %245 = vector.load %arg5[%c48_455, %c768_456] : memref<200x1024xbf16, #tpu.memory_space<vmem>>, vector<8x224xbf16>
    tpu.vector_store %arg5[%c48_455, %c768_456], %244 {strides = array<i32>} : memref<200x1024xbf16, #tpu.memory_space<vmem>>, vector<8x224xbf16>,
    %c0_457 = arith.constant 0 : index
    %c1_458 = arith.constant 1 : index
    %c0_459 = arith.constant 0 : index
    %c17_460 = arith.constant 17 : index
    %246 = vector.load %arg1[%c0_457, %c1_458, %c0_459, %c17_460] : memref<1x4x8x258xbf16, #tpu.memory_space<vmem>>, vector<1x1x8x224xbf16>
    %247 = vector.shape_cast %246 : vector<1x1x8x224xbf16> to vector<8x224xbf16>
    %c56_461 = arith.constant 56 : index
    %c768_462 = arith.constant 768 : index
    %248 = vector.load %arg5[%c56_461, %c768_462] : memref<200x1024xbf16, #tpu.memory_space<vmem>>, vector<8x224xbf16>
    tpu.vector_store %arg5[%c56_461, %c768_462], %247 {strides = array<i32>} : memref<200x1024xbf16, #tpu.memory_space<vmem>>, vector<8x224xbf16>,
    %c0_463 = arith.constant 0 : index
    %c0_464 = arith.constant 0 : index
    %c0_465 = arith.constant 0 : index
    %c18_466 = arith.constant 18 : index
    %249 = vector.load %arg1[%c0_463, %c0_464, %c0_465, %c18_466] : memref<1x4x8x258xbf16, #tpu.memory_space<vmem>>, vector<1x1x8x224xbf16>
    %250 = vector.shape_cast %249 : vector<1x1x8x224xbf16> to vector<8x224xbf16>
    %c64_467 = arith.constant 64 : index
    %c768_468 = arith.constant 768 : index
    %251 = vector.load %arg5[%c64_467, %c768_468] : memref<200x1024xbf16, #tpu.memory_space<vmem>>, vector<8x224xbf16>
    tpu.vector_store %arg5[%c64_467, %c768_468], %250 {strides = array<i32>} : memref<200x1024xbf16, #tpu.memory_space<vmem>>, vector<8x224xbf16>,
    %c0_469 = arith.constant 0 : index
    %c1_470 = arith.constant 1 : index
    %c0_471 = arith.constant 0 : index
    %c18_472 = arith.constant 18 : index
    %252 = vector.load %arg1[%c0_469, %c1_470, %c0_471, %c18_472] : memref<1x4x8x258xbf16, #tpu.memory_space<vmem>>, vector<1x1x8x224xbf16>
    %253 = vector.shape_cast %252 : vector<1x1x8x224xbf16> to vector<8x224xbf16>
    %c72_473 = arith.constant 72 : index
    %c768_474 = arith.constant 768 : index
    %254 = vector.load %arg5[%c72_473, %c768_474] : memref<200x1024xbf16, #tpu.memory_space<vmem>>, vector<8x224xbf16>
    tpu.vector_store %arg5[%c72_473, %c768_474], %253 {strides = array<i32>} : memref<200x1024xbf16, #tpu.memory_space<vmem>>, vector<8x224xbf16>,
    %c0_475 = arith.constant 0 : index
    %c3_476 = arith.constant 3 : index
    %c0_477 = arith.constant 0 : index
    %c16_478 = arith.constant 16 : index
    %255 = vector.load %arg1[%c0_475, %c3_476, %c0_477, %c16_478] : memref<1x4x8x258xbf16, #tpu.memory_space<vmem>>, vector<1x1x8x224xbf16>
    %256 = vector.shape_cast %255 : vector<1x1x8x224xbf16> to vector<8x224xbf16>
    %c80_479 = arith.constant 80 : index
    %c768_480 = arith.constant 768 : index
    %257 = vector.load %arg5[%c80_479, %c768_480] : memref<200x1024xbf16, #tpu.memory_space<vmem>>, vector<8x224xbf16>
    tpu.vector_store %arg5[%c80_479, %c768_480], %256 {strides = array<i32>} : memref<200x1024xbf16, #tpu.memory_space<vmem>>, vector<8x224xbf16>,
    %c0_481 = arith.constant 0 : index
    %c2_482 = arith.constant 2 : index
    %c0_483 = arith.constant 0 : index
    %c17_484 = arith.constant 17 : index
    %258 = vector.load %arg1[%c0_481, %c2_482, %c0_483, %c17_484] : memref<1x4x8x258xbf16, #tpu.memory_space<vmem>>, vector<1x1x8x224xbf16>
    %259 = vector.shape_cast %258 : vector<1x1x8x224xbf16> to vector<8x224xbf16>
    %c88_485 = arith.constant 88 : index
    %c768_486 = arith.constant 768 : index
    %260 = vector.load %arg5[%c88_485, %c768_486] : memref<200x1024xbf16, #tpu.memory_space<vmem>>, vector<8x224xbf16>
    tpu.vector_store %arg5[%c88_485, %c768_486], %259 {strides = array<i32>} : memref<200x1024xbf16, #tpu.memory_space<vmem>>, vector<8x224xbf16>,
    %c0_487 = arith.constant 0 : index
    %c3_488 = arith.constant 3 : index
    %c0_489 = arith.constant 0 : index
    %c17_490 = arith.constant 17 : index
    %261 = vector.load %arg1[%c0_487, %c3_488, %c0_489, %c17_490] : memref<1x4x8x258xbf16, #tpu.memory_space<vmem>>, vector<1x1x8x224xbf16>
    %262 = vector.shape_cast %261 : vector<1x1x8x224xbf16> to vector<8x224xbf16>
    %c96_491 = arith.constant 96 : index
    %c768_492 = arith.constant 768 : index
    %263 = vector.load %arg5[%c96_491, %c768_492] : memref<200x1024xbf16, #tpu.memory_space<vmem>>, vector<8x224xbf16>
    tpu.vector_store %arg5[%c96_491, %c768_492], %262 {strides = array<i32>} : memref<200x1024xbf16, #tpu.memory_space<vmem>>, vector<8x224xbf16>,
    %c0_493 = arith.constant 0 : index
    %c2_494 = arith.constant 2 : index
    %c0_495 = arith.constant 0 : index
    %c18_496 = arith.constant 18 : index
    %264 = vector.load %arg1[%c0_493, %c2_494, %c0_495, %c18_496] : memref<1x4x8x258xbf16, #tpu.memory_space<vmem>>, vector<1x1x8x224xbf16>
    %265 = vector.shape_cast %264 : vector<1x1x8x224xbf16> to vector<8x224xbf16>
    %c104_497 = arith.constant 104 : index
    %c768_498 = arith.constant 768 : index
    %266 = vector.load %arg5[%c104_497, %c768_498] : memref<200x1024xbf16, #tpu.memory_space<vmem>>, vector<8x224xbf16>
    tpu.vector_store %arg5[%c104_497, %c768_498], %265 {strides = array<i32>} : memref<200x1024xbf16, #tpu.memory_space<vmem>>, vector<8x224xbf16>,
    %c0_499 = arith.constant 0 : index
    %c3_500 = arith.constant 3 : index
    %c0_501 = arith.constant 0 : index
    %c18_502 = arith.constant 18 : index
    %267 = vector.load %arg1[%c0_499, %c3_500, %c0_501, %c18_502] : memref<1x4x8x258xbf16, #tpu.memory_space<vmem>>, vector<1x1x8x224xbf16>
    %268 = vector.shape_cast %267 : vector<1x1x8x224xbf16> to vector<8x224xbf16>
    %c112_503 = arith.constant 112 : index
    %c768_504 = arith.constant 768 : index
    %269 = vector.load %arg5[%c112_503, %c768_504] : memref<200x1024xbf16, #tpu.memory_space<vmem>>, vector<8x224xbf16>
    tpu.vector_store %arg5[%c112_503, %c768_504], %268 {strides = array<i32>} : memref<200x1024xbf16, #tpu.memory_space<vmem>>, vector<8x224xbf16>,
    %c0_505 = arith.constant 0 : index
    %c1_506 = arith.constant 1 : index
    %c0_507 = arith.constant 0 : index
    %c32_508 = arith.constant 32 : index
    %270 = vector.load %arg1[%c0_505, %c1_506, %c0_507, %c32_508] : memref<1x4x8x258xbf16, #tpu.memory_space<vmem>>, vector<1x1x8x224xbf16>
    %271 = vector.shape_cast %270 : vector<1x1x8x224xbf16> to vector<8x224xbf16>
    %c120_509 = arith.constant 120 : index
    %c768_510 = arith.constant 768 : index
    %272 = vector.load %arg5[%c120_509, %c768_510] : memref<200x1024xbf16, #tpu.memory_space<vmem>>, vector<8x224xbf16>
    tpu.vector_store %arg5[%c120_509, %c768_510], %271 {strides = array<i32>} : memref<200x1024xbf16, #tpu.memory_space<vmem>>, vector<8x224xbf16>,
    %c0_511 = arith.constant 0 : index
    %c0_512 = arith.constant 0 : index
    %c0_513 = arith.constant 0 : index
    %c33_514 = arith.constant 33 : index
    %273 = vector.load %arg1[%c0_511, %c0_512, %c0_513, %c33_514] : memref<1x4x8x258xbf16, #tpu.memory_space<vmem>>, vector<1x1x8x224xbf16>
    %274 = vector.shape_cast %273 : vector<1x1x8x224xbf16> to vector<8x224xbf16>
    %c128_515 = arith.constant 128 : index
    %c768_516 = arith.constant 768 : index
    %275 = vector.load %arg5[%c128_515, %c768_516] : memref<200x1024xbf16, #tpu.memory_space<vmem>>, vector<8x224xbf16>
    tpu.vector_store %arg5[%c128_515, %c768_516], %274 {strides = array<i32>} : memref<200x1024xbf16, #tpu.memory_space<vmem>>, vector<8x224xbf16>,
    %c0_517 = arith.constant 0 : index
    %c1_518 = arith.constant 1 : index
    %c0_519 = arith.constant 0 : index
    %c33_520 = arith.constant 33 : index
    %276 = vector.load %arg1[%c0_517, %c1_518, %c0_519, %c33_520] : memref<1x4x8x258xbf16, #tpu.memory_space<vmem>>, vector<1x1x8x224xbf16>
    %277 = vector.shape_cast %276 : vector<1x1x8x224xbf16> to vector<8x224xbf16>
    %c136_521 = arith.constant 136 : index
    %c768_522 = arith.constant 768 : index
    %278 = vector.load %arg5[%c136_521, %c768_522] : memref<200x1024xbf16, #tpu.memory_space<vmem>>, vector<8x224xbf16>
    tpu.vector_store %arg5[%c136_521, %c768_522], %277 {strides = array<i32>} : memref<200x1024xbf16, #tpu.memory_space<vmem>>, vector<8x224xbf16>,
    %c0_523 = arith.constant 0 : index
    %c0_524 = arith.constant 0 : index
    %c0_525 = arith.constant 0 : index
    %c34_526 = arith.constant 34 : index
    %279 = vector.load %arg1[%c0_523, %c0_524, %c0_525, %c34_526] : memref<1x4x8x258xbf16, #tpu.memory_space<vmem>>, vector<1x1x8x224xbf16>
    %280 = vector.shape_cast %279 : vector<1x1x8x224xbf16> to vector<8x224xbf16>
    %c144_527 = arith.constant 144 : index
    %c768_528 = arith.constant 768 : index
    %281 = vector.load %arg5[%c144_527, %c768_528] : memref<200x1024xbf16, #tpu.memory_space<vmem>>, vector<8x224xbf16>
    tpu.vector_store %arg5[%c144_527, %c768_528], %280 {strides = array<i32>} : memref<200x1024xbf16, #tpu.memory_space<vmem>>, vector<8x224xbf16>,
    %c0_529 = arith.constant 0 : index
    %c1_530 = arith.constant 1 : index
    %c0_531 = arith.constant 0 : index
    %c34_532 = arith.constant 34 : index
    %282 = vector.load %arg1[%c0_529, %c1_530, %c0_531, %c34_532] : memref<1x4x8x258xbf16, #tpu.memory_space<vmem>>, vector<1x1x8x224xbf16>
    %283 = vector.shape_cast %282 : vector<1x1x8x224xbf16> to vector<8x224xbf16>
    %c152_533 = arith.constant 152 : index
    %c768_534 = arith.constant 768 : index
    %284 = vector.load %arg5[%c152_533, %c768_534] : memref<200x1024xbf16, #tpu.memory_space<vmem>>, vector<8x224xbf16>
    tpu.vector_store %arg5[%c152_533, %c768_534], %283 {strides = array<i32>} : memref<200x1024xbf16, #tpu.memory_space<vmem>>, vector<8x224xbf16>,
    %c0_535 = arith.constant 0 : index
    %c3_536 = arith.constant 3 : index
    %c0_537 = arith.constant 0 : index
    %c32_538 = arith.constant 32 : index
    %285 = vector.load %arg1[%c0_535, %c3_536, %c0_537, %c32_538] : memref<1x4x8x258xbf16, #tpu.memory_space<vmem>>, vector<1x1x8x224xbf16>
    %286 = vector.shape_cast %285 : vector<1x1x8x224xbf16> to vector<8x224xbf16>
    %c160_539 = arith.constant 160 : index
    %c768_540 = arith.constant 768 : index
    %287 = vector.load %arg5[%c160_539, %c768_540] : memref<200x1024xbf16, #tpu.memory_space<vmem>>, vector<8x224xbf16>
    tpu.vector_store %arg5[%c160_539, %c768_540], %286 {strides = array<i32>} : memref<200x1024xbf16, #tpu.memory_space<vmem>>, vector<8x224xbf16>,
    %c0_541 = arith.constant 0 : index
    %c2_542 = arith.constant 2 : index
    %c0_543 = arith.constant 0 : index
    %c33_544 = arith.constant 33 : index
    %288 = vector.load %arg1[%c0_541, %c2_542, %c0_543, %c33_544] : memref<1x4x8x258xbf16, #tpu.memory_space<vmem>>, vector<1x1x8x224xbf16>
    %289 = vector.shape_cast %288 : vector<1x1x8x224xbf16> to vector<8x224xbf16>
    %c168_545 = arith.constant 168 : index
    %c768_546 = arith.constant 768 : index
    %290 = vector.load %arg5[%c168_545, %c768_546] : memref<200x1024xbf16, #tpu.memory_space<vmem>>, vector<8x224xbf16>
    tpu.vector_store %arg5[%c168_545, %c768_546], %289 {strides = array<i32>} : memref<200x1024xbf16, #tpu.memory_space<vmem>>, vector<8x224xbf16>,
    %c0_547 = arith.constant 0 : index
    %c3_548 = arith.constant 3 : index
    %c0_549 = arith.constant 0 : index
    %c33_550 = arith.constant 33 : index
    %291 = vector.load %arg1[%c0_547, %c3_548, %c0_549, %c33_550] : memref<1x4x8x258xbf16, #tpu.memory_space<vmem>>, vector<1x1x8x224xbf16>
    %292 = vector.shape_cast %291 : vector<1x1x8x224xbf16> to vector<8x224xbf16>
    %c176_551 = arith.constant 176 : index
    %c768_552 = arith.constant 768 : index
    %293 = vector.load %arg5[%c176_551, %c768_552] : memref<200x1024xbf16, #tpu.memory_space<vmem>>, vector<8x224xbf16>
    tpu.vector_store %arg5[%c176_551, %c768_552], %292 {strides = array<i32>} : memref<200x1024xbf16, #tpu.memory_space<vmem>>, vector<8x224xbf16>,
    %c0_553 = arith.constant 0 : index
    %c2_554 = arith.constant 2 : index
    %c0_555 = arith.constant 0 : index
    %c34_556 = arith.constant 34 : index
    %294 = vector.load %arg1[%c0_553, %c2_554, %c0_555, %c34_556] : memref<1x4x8x258xbf16, #tpu.memory_space<vmem>>, vector<1x1x8x224xbf16>
    %295 = vector.shape_cast %294 : vector<1x1x8x224xbf16> to vector<8x224xbf16>
    %c184_557 = arith.constant 184 : index
    %c768_558 = arith.constant 768 : index
    %296 = vector.load %arg5[%c184_557, %c768_558] : memref<200x1024xbf16, #tpu.memory_space<vmem>>, vector<8x224xbf16>
    tpu.vector_store %arg5[%c184_557, %c768_558], %295 {strides = array<i32>} : memref<200x1024xbf16, #tpu.memory_space<vmem>>, vector<8x224xbf16>,
    %c0_559 = arith.constant 0 : index
    %c3_560 = arith.constant 3 : index
    %c0_561 = arith.constant 0 : index
    %c34_562 = arith.constant 34 : index
    %297 = vector.load %arg1[%c0_559, %c3_560, %c0_561, %c34_562] : memref<1x4x8x258xbf16, #tpu.memory_space<vmem>>, vector<1x1x8x224xbf16>
    %298 = vector.shape_cast %297 : vector<1x1x8x224xbf16> to vector<8x224xbf16>
    %c192_563 = arith.constant 192 : index
    %c768_564 = arith.constant 768 : index
    %299 = vector.load %arg5[%c192_563, %c768_564] : memref<200x1024xbf16, #tpu.memory_space<vmem>>, vector<8x224xbf16>
    tpu.vector_store %arg5[%c192_563, %c768_564], %298 {strides = array<i32>} : memref<200x1024xbf16, #tpu.memory_space<vmem>>, vector<8x224xbf16>,
    %c0_565 = arith.constant 0 : index
    %c0_566 = arith.constant 0 : index
    %300 = vector.load %arg2[%c0_565, %c0_566] : memref<16x200xbf16, #tpu.memory_space<vmem>>, vector<16x200xbf16>
    %c0_567 = arith.constant 0 : index
    %c0_568 = arith.constant 0 : index
    %301 = vector.load %arg5[%c0_567, %c0_568] : memref<200x1024xbf16, #tpu.memory_space<vmem>>, vector<200x1024xbf16>
    %cst = arith.constant dense<0.000000e+00> : vector<16x1024xf32>
    %302 = tpu.matmul %300, %301, %cst {dimension_numbers = #tpu.dot_dimension_numbers<[1], [0], [0], [1], [0, 0, 1, 1], [], []>} : vector<16x200xbf16>, vector<200x1024xbf16>, vector<16x1024xf32> -> vector<16x1024xf32>
    %303 = vector.extract_strided_slice %302 {offsets = [0, 0], sizes = [16, 224], strides = [1, 1]} : vector<16x1024xf32> to vector<16x224xf32>
    %304 = vector.extract_strided_slice %302 {offsets = [0, 256], sizes = [16, 224], strides = [1, 1]} : vector<16x1024xf32> to vector<16x224xf32>
    %305 = arith.maximumf %303, %304 : vector<16x224xf32>
    %306 = vector.extract_strided_slice %302 {offsets = [0, 512], sizes = [16, 224], strides = [1, 1]} : vector<16x1024xf32> to vector<16x224xf32>
    %307 = arith.maximumf %305, %306 : vector<16x224xf32>
    %308 = vector.extract_strided_slice %302 {offsets = [0, 768], sizes = [16, 224], strides = [1, 1]} : vector<16x1024xf32> to vector<16x224xf32>
    %309 = arith.maximumf %307, %308 : vector<16x224xf32>
    %c0_569 = arith.constant 0 : index
    %c0_570 = arith.constant 0 : index
    %310 = vector.load %arg3[%c0_569, %c0_570] : memref<16x1xf32, #tpu.memory_space<vmem>>, vector<16x1xf32>
    %311 = vector.broadcast %310 : vector<16x1xf32> to vector<16x224xf32>
    %312 = arith.addf %309, %311 : vector<16x224xf32>
    %cst_571 = arith.constant 0.000000e+00 : f32
    %313 = vector.broadcast %cst_571 : f32 to vector<16x224xf32>
    %314 = arith.maximumf %312, %313 : vector<16x224xf32>
    %315 = arith.truncf %314 : vector<16x224xf32> to vector<16x224xbf16>
    %c0_572 = arith.constant 0 : index
    %c0_573 = arith.constant 0 : index
    %c0_574 = arith.constant 0 : index
    %316 = vector.load %arg4[%c0_572, %c0_573, %c0_574] : memref<1x16x224xbf16, #tpu.memory_space<vmem>>, vector<1x16x224xbf16>
    %317 = vector.shape_cast %316 : vector<1x16x224xbf16> to vector<16x224xbf16>
    %318 = vector.shape_cast %315 : vector<16x224xbf16> to vector<1x16x224xbf16>
    tpu.vector_store %arg4[%c0_572, %c0_573, %c0_574], %318 {strides = array<i32>} : memref<1x16x224xbf16, #tpu.memory_space<vmem>>, vector<1x16x224xbf16>,
    return
  }
  func.func @transform_0(%arg0: i32) -> (i32, i32, i32, i32) {
    %c0_i32 = arith.constant 0 : i32
    %c0_i32_0 = arith.constant 0 : i32
    %c0_i32_1 = arith.constant 0 : i32
    %c0_i32_2 = arith.constant 0 : i32
    return %arg0, %c0_i32, %c0_i32_0, %c0_i32_1 : i32, i32, i32, i32
  }
  func.func @transform_1(%arg0: i32) -> (i32, i32) {
    %c0_i32 = arith.constant 0 : i32
    %c0_i32_0 = arith.constant 0 : i32
    %c0_i32_1 = arith.constant 0 : i32
    return %c0_i32, %c0_i32_0 : i32, i32
  }
  func.func @transform_2(%arg0: i32) -> (i32, i32) {
    %c0_i32 = arith.constant 0 : i32
    %c0_i32_0 = arith.constant 0 : i32
    %c0_i32_1 = arith.constant 0 : i32
    return %c0_i32, %c0_i32_0 : i32, i32
  }
  func.func @transform_3(%arg0: i32) -> (i32, i32, i32) {
    %c0_i32 = arith.constant 0 : i32
    %c0_i32_0 = arith.constant 0 : i32
    %c0_i32_1 = arith.constant 0 : i32
    return %arg0, %c0_i32, %c0_i32_0 : i32, i32, i32
  }
}

module attributes {stable_mosaic.version = 11 : i64} {
  func.func @_conv_relu_pool_kernel(%arg0: i32, %arg1: memref<1x4x16x83xbf16, #tpu.memory_space<vmem>>, %arg2: memref<32x400xbf16, #tpu.memory_space<vmem>>, %arg3: memref<32x1xf32, #tpu.memory_space<vmem>>, %arg4: memref<1x32x63xbf16, #tpu.memory_space<vmem>>, %arg5: memref<400x512xbf16, #tpu.memory_space<vmem>>) attributes {dimension_semantics = [#tpu.dimension_semantics<parallel>], iteration_bounds = array<i64: 2>, scalar_prefetch = 0 : i64, scratch_operands = 1 : i64, tpu.core_type = #tpu.core_type<tc>, window_params = [{transform_indices = @transform_0, window_bounds = array<i64: 1, 4, 16, 83>}, {pipeline_mode = #tpu.pipeline_mode<synchronous>, transform_indices = @transform_1, window_bounds = array<i64: 32, 400>}, {pipeline_mode = #tpu.pipeline_mode<synchronous>, transform_indices = @transform_2, window_bounds = array<i64: 32, 1>}, {transform_indices = @transform_3, window_bounds = array<i64: 1, 32, 63>}]} {
    %c0 = arith.constant 0 : index
    %c0_0 = arith.constant 0 : index
    %c0_1 = arith.constant 0 : index
    %c0_2 = arith.constant 0 : index
    %0 = vector.load %arg1[%c0, %c0_0, %c0_1, %c0_2] : memref<1x4x16x83xbf16, #tpu.memory_space<vmem>>, vector<1x1x16x63xbf16>
    %1 = vector.shape_cast %0 : vector<1x1x16x63xbf16> to vector<16x63xbf16>
    %c0_3 = arith.constant 0 : index
    %c0_4 = arith.constant 0 : index
    %2 = vector.load %arg5[%c0_3, %c0_4] : memref<400x512xbf16, #tpu.memory_space<vmem>>, vector<16x63xbf16>
    tpu.vector_store %arg5[%c0_3, %c0_4], %1 {strides = array<i32>} : memref<400x512xbf16, #tpu.memory_space<vmem>>, vector<16x63xbf16>,
    %c0_5 = arith.constant 0 : index
    %c1 = arith.constant 1 : index
    %c0_6 = arith.constant 0 : index
    %c0_7 = arith.constant 0 : index
    %3 = vector.load %arg1[%c0_5, %c1, %c0_6, %c0_7] : memref<1x4x16x83xbf16, #tpu.memory_space<vmem>>, vector<1x1x16x63xbf16>
    %4 = vector.shape_cast %3 : vector<1x1x16x63xbf16> to vector<16x63xbf16>
    %c16 = arith.constant 16 : index
    %c0_8 = arith.constant 0 : index
    %5 = vector.load %arg5[%c16, %c0_8] : memref<400x512xbf16, #tpu.memory_space<vmem>>, vector<16x63xbf16>
    tpu.vector_store %arg5[%c16, %c0_8], %4 {strides = array<i32>} : memref<400x512xbf16, #tpu.memory_space<vmem>>, vector<16x63xbf16>,
    %c0_9 = arith.constant 0 : index
    %c0_10 = arith.constant 0 : index
    %c0_11 = arith.constant 0 : index
    %c1_12 = arith.constant 1 : index
    %6 = vector.load %arg1[%c0_9, %c0_10, %c0_11, %c1_12] : memref<1x4x16x83xbf16, #tpu.memory_space<vmem>>, vector<1x1x16x63xbf16>
    %7 = vector.shape_cast %6 : vector<1x1x16x63xbf16> to vector<16x63xbf16>
    %c32 = arith.constant 32 : index
    %c0_13 = arith.constant 0 : index
    %8 = vector.load %arg5[%c32, %c0_13] : memref<400x512xbf16, #tpu.memory_space<vmem>>, vector<16x63xbf16>
    tpu.vector_store %arg5[%c32, %c0_13], %7 {strides = array<i32>} : memref<400x512xbf16, #tpu.memory_space<vmem>>, vector<16x63xbf16>,
    %c0_14 = arith.constant 0 : index
    %c1_15 = arith.constant 1 : index
    %c0_16 = arith.constant 0 : index
    %c1_17 = arith.constant 1 : index
    %9 = vector.load %arg1[%c0_14, %c1_15, %c0_16, %c1_17] : memref<1x4x16x83xbf16, #tpu.memory_space<vmem>>, vector<1x1x16x63xbf16>
    %10 = vector.shape_cast %9 : vector<1x1x16x63xbf16> to vector<16x63xbf16>
    %c48 = arith.constant 48 : index
    %c0_18 = arith.constant 0 : index
    %11 = vector.load %arg5[%c48, %c0_18] : memref<400x512xbf16, #tpu.memory_space<vmem>>, vector<16x63xbf16>
    tpu.vector_store %arg5[%c48, %c0_18], %10 {strides = array<i32>} : memref<400x512xbf16, #tpu.memory_space<vmem>>, vector<16x63xbf16>,
    %c0_19 = arith.constant 0 : index
    %c0_20 = arith.constant 0 : index
    %c0_21 = arith.constant 0 : index
    %c2 = arith.constant 2 : index
    %12 = vector.load %arg1[%c0_19, %c0_20, %c0_21, %c2] : memref<1x4x16x83xbf16, #tpu.memory_space<vmem>>, vector<1x1x16x63xbf16>
    %13 = vector.shape_cast %12 : vector<1x1x16x63xbf16> to vector<16x63xbf16>
    %c64 = arith.constant 64 : index
    %c0_22 = arith.constant 0 : index
    %14 = vector.load %arg5[%c64, %c0_22] : memref<400x512xbf16, #tpu.memory_space<vmem>>, vector<16x63xbf16>
    tpu.vector_store %arg5[%c64, %c0_22], %13 {strides = array<i32>} : memref<400x512xbf16, #tpu.memory_space<vmem>>, vector<16x63xbf16>,
    %c0_23 = arith.constant 0 : index
    %c2_24 = arith.constant 2 : index
    %c0_25 = arith.constant 0 : index
    %c0_26 = arith.constant 0 : index
    %15 = vector.load %arg1[%c0_23, %c2_24, %c0_25, %c0_26] : memref<1x4x16x83xbf16, #tpu.memory_space<vmem>>, vector<1x1x16x63xbf16>
    %16 = vector.shape_cast %15 : vector<1x1x16x63xbf16> to vector<16x63xbf16>
    %c80 = arith.constant 80 : index
    %c0_27 = arith.constant 0 : index
    %17 = vector.load %arg5[%c80, %c0_27] : memref<400x512xbf16, #tpu.memory_space<vmem>>, vector<16x63xbf16>
    tpu.vector_store %arg5[%c80, %c0_27], %16 {strides = array<i32>} : memref<400x512xbf16, #tpu.memory_space<vmem>>, vector<16x63xbf16>,
    %c0_28 = arith.constant 0 : index
    %c3 = arith.constant 3 : index
    %c0_29 = arith.constant 0 : index
    %c0_30 = arith.constant 0 : index
    %18 = vector.load %arg1[%c0_28, %c3, %c0_29, %c0_30] : memref<1x4x16x83xbf16, #tpu.memory_space<vmem>>, vector<1x1x16x63xbf16>
    %19 = vector.shape_cast %18 : vector<1x1x16x63xbf16> to vector<16x63xbf16>
    %c96 = arith.constant 96 : index
    %c0_31 = arith.constant 0 : index
    %20 = vector.load %arg5[%c96, %c0_31] : memref<400x512xbf16, #tpu.memory_space<vmem>>, vector<16x63xbf16>
    tpu.vector_store %arg5[%c96, %c0_31], %19 {strides = array<i32>} : memref<400x512xbf16, #tpu.memory_space<vmem>>, vector<16x63xbf16>,
    %c0_32 = arith.constant 0 : index
    %c2_33 = arith.constant 2 : index
    %c0_34 = arith.constant 0 : index
    %c1_35 = arith.constant 1 : index
    %21 = vector.load %arg1[%c0_32, %c2_33, %c0_34, %c1_35] : memref<1x4x16x83xbf16, #tpu.memory_space<vmem>>, vector<1x1x16x63xbf16>
    %22 = vector.shape_cast %21 : vector<1x1x16x63xbf16> to vector<16x63xbf16>
    %c112 = arith.constant 112 : index
    %c0_36 = arith.constant 0 : index
    %23 = vector.load %arg5[%c112, %c0_36] : memref<400x512xbf16, #tpu.memory_space<vmem>>, vector<16x63xbf16>
    tpu.vector_store %arg5[%c112, %c0_36], %22 {strides = array<i32>} : memref<400x512xbf16, #tpu.memory_space<vmem>>, vector<16x63xbf16>,
    %c0_37 = arith.constant 0 : index
    %c3_38 = arith.constant 3 : index
    %c0_39 = arith.constant 0 : index
    %c1_40 = arith.constant 1 : index
    %24 = vector.load %arg1[%c0_37, %c3_38, %c0_39, %c1_40] : memref<1x4x16x83xbf16, #tpu.memory_space<vmem>>, vector<1x1x16x63xbf16>
    %25 = vector.shape_cast %24 : vector<1x1x16x63xbf16> to vector<16x63xbf16>
    %c128 = arith.constant 128 : index
    %c0_41 = arith.constant 0 : index
    %26 = vector.load %arg5[%c128, %c0_41] : memref<400x512xbf16, #tpu.memory_space<vmem>>, vector<16x63xbf16>
    tpu.vector_store %arg5[%c128, %c0_41], %25 {strides = array<i32>} : memref<400x512xbf16, #tpu.memory_space<vmem>>, vector<16x63xbf16>,
    %c0_42 = arith.constant 0 : index
    %c2_43 = arith.constant 2 : index
    %c0_44 = arith.constant 0 : index
    %c2_45 = arith.constant 2 : index
    %27 = vector.load %arg1[%c0_42, %c2_43, %c0_44, %c2_45] : memref<1x4x16x83xbf16, #tpu.memory_space<vmem>>, vector<1x1x16x63xbf16>
    %28 = vector.shape_cast %27 : vector<1x1x16x63xbf16> to vector<16x63xbf16>
    %c144 = arith.constant 144 : index
    %c0_46 = arith.constant 0 : index
    %29 = vector.load %arg5[%c144, %c0_46] : memref<400x512xbf16, #tpu.memory_space<vmem>>, vector<16x63xbf16>
    tpu.vector_store %arg5[%c144, %c0_46], %28 {strides = array<i32>} : memref<400x512xbf16, #tpu.memory_space<vmem>>, vector<16x63xbf16>,
    %c0_47 = arith.constant 0 : index
    %c0_48 = arith.constant 0 : index
    %c0_49 = arith.constant 0 : index
    %c9 = arith.constant 9 : index
    %30 = vector.load %arg1[%c0_47, %c0_48, %c0_49, %c9] : memref<1x4x16x83xbf16, #tpu.memory_space<vmem>>, vector<1x1x16x63xbf16>
    %31 = vector.shape_cast %30 : vector<1x1x16x63xbf16> to vector<16x63xbf16>
    %c160 = arith.constant 160 : index
    %c0_50 = arith.constant 0 : index
    %32 = vector.load %arg5[%c160, %c0_50] : memref<400x512xbf16, #tpu.memory_space<vmem>>, vector<16x63xbf16>
    tpu.vector_store %arg5[%c160, %c0_50], %31 {strides = array<i32>} : memref<400x512xbf16, #tpu.memory_space<vmem>>, vector<16x63xbf16>,
    %c0_51 = arith.constant 0 : index
    %c1_52 = arith.constant 1 : index
    %c0_53 = arith.constant 0 : index
    %c9_54 = arith.constant 9 : index
    %33 = vector.load %arg1[%c0_51, %c1_52, %c0_53, %c9_54] : memref<1x4x16x83xbf16, #tpu.memory_space<vmem>>, vector<1x1x16x63xbf16>
    %34 = vector.shape_cast %33 : vector<1x1x16x63xbf16> to vector<16x63xbf16>
    %c176 = arith.constant 176 : index
    %c0_55 = arith.constant 0 : index
    %35 = vector.load %arg5[%c176, %c0_55] : memref<400x512xbf16, #tpu.memory_space<vmem>>, vector<16x63xbf16>
    tpu.vector_store %arg5[%c176, %c0_55], %34 {strides = array<i32>} : memref<400x512xbf16, #tpu.memory_space<vmem>>, vector<16x63xbf16>,
    %c0_56 = arith.constant 0 : index
    %c0_57 = arith.constant 0 : index
    %c0_58 = arith.constant 0 : index
    %c10 = arith.constant 10 : index
    %36 = vector.load %arg1[%c0_56, %c0_57, %c0_58, %c10] : memref<1x4x16x83xbf16, #tpu.memory_space<vmem>>, vector<1x1x16x63xbf16>
    %37 = vector.shape_cast %36 : vector<1x1x16x63xbf16> to vector<16x63xbf16>
    %c192 = arith.constant 192 : index
    %c0_59 = arith.constant 0 : index
    %38 = vector.load %arg5[%c192, %c0_59] : memref<400x512xbf16, #tpu.memory_space<vmem>>, vector<16x63xbf16>
    tpu.vector_store %arg5[%c192, %c0_59], %37 {strides = array<i32>} : memref<400x512xbf16, #tpu.memory_space<vmem>>, vector<16x63xbf16>,
    %c0_60 = arith.constant 0 : index
    %c1_61 = arith.constant 1 : index
    %c0_62 = arith.constant 0 : index
    %c10_63 = arith.constant 10 : index
    %39 = vector.load %arg1[%c0_60, %c1_61, %c0_62, %c10_63] : memref<1x4x16x83xbf16, #tpu.memory_space<vmem>>, vector<1x1x16x63xbf16>
    %40 = vector.shape_cast %39 : vector<1x1x16x63xbf16> to vector<16x63xbf16>
    %c208 = arith.constant 208 : index
    %c0_64 = arith.constant 0 : index
    %41 = vector.load %arg5[%c208, %c0_64] : memref<400x512xbf16, #tpu.memory_space<vmem>>, vector<16x63xbf16>
    tpu.vector_store %arg5[%c208, %c0_64], %40 {strides = array<i32>} : memref<400x512xbf16, #tpu.memory_space<vmem>>, vector<16x63xbf16>,
    %c0_65 = arith.constant 0 : index
    %c0_66 = arith.constant 0 : index
    %c0_67 = arith.constant 0 : index
    %c11 = arith.constant 11 : index
    %42 = vector.load %arg1[%c0_65, %c0_66, %c0_67, %c11] : memref<1x4x16x83xbf16, #tpu.memory_space<vmem>>, vector<1x1x16x63xbf16>
    %43 = vector.shape_cast %42 : vector<1x1x16x63xbf16> to vector<16x63xbf16>
    %c224 = arith.constant 224 : index
    %c0_68 = arith.constant 0 : index
    %44 = vector.load %arg5[%c224, %c0_68] : memref<400x512xbf16, #tpu.memory_space<vmem>>, vector<16x63xbf16>
    tpu.vector_store %arg5[%c224, %c0_68], %43 {strides = array<i32>} : memref<400x512xbf16, #tpu.memory_space<vmem>>, vector<16x63xbf16>,
    %c0_69 = arith.constant 0 : index
    %c2_70 = arith.constant 2 : index
    %c0_71 = arith.constant 0 : index
    %c9_72 = arith.constant 9 : index
    %45 = vector.load %arg1[%c0_69, %c2_70, %c0_71, %c9_72] : memref<1x4x16x83xbf16, #tpu.memory_space<vmem>>, vector<1x1x16x63xbf16>
    %46 = vector.shape_cast %45 : vector<1x1x16x63xbf16> to vector<16x63xbf16>
    %c240 = arith.constant 240 : index
    %c0_73 = arith.constant 0 : index
    %47 = vector.load %arg5[%c240, %c0_73] : memref<400x512xbf16, #tpu.memory_space<vmem>>, vector<16x63xbf16>
    tpu.vector_store %arg5[%c240, %c0_73], %46 {strides = array<i32>} : memref<400x512xbf16, #tpu.memory_space<vmem>>, vector<16x63xbf16>,
    %c0_74 = arith.constant 0 : index
    %c3_75 = arith.constant 3 : index
    %c0_76 = arith.constant 0 : index
    %c9_77 = arith.constant 9 : index
    %48 = vector.load %arg1[%c0_74, %c3_75, %c0_76, %c9_77] : memref<1x4x16x83xbf16, #tpu.memory_space<vmem>>, vector<1x1x16x63xbf16>
    %49 = vector.shape_cast %48 : vector<1x1x16x63xbf16> to vector<16x63xbf16>
    %c256 = arith.constant 256 : index
    %c0_78 = arith.constant 0 : index
    %50 = vector.load %arg5[%c256, %c0_78] : memref<400x512xbf16, #tpu.memory_space<vmem>>, vector<16x63xbf16>
    tpu.vector_store %arg5[%c256, %c0_78], %49 {strides = array<i32>} : memref<400x512xbf16, #tpu.memory_space<vmem>>, vector<16x63xbf16>,
    %c0_79 = arith.constant 0 : index
    %c2_80 = arith.constant 2 : index
    %c0_81 = arith.constant 0 : index
    %c10_82 = arith.constant 10 : index
    %51 = vector.load %arg1[%c0_79, %c2_80, %c0_81, %c10_82] : memref<1x4x16x83xbf16, #tpu.memory_space<vmem>>, vector<1x1x16x63xbf16>
    %52 = vector.shape_cast %51 : vector<1x1x16x63xbf16> to vector<16x63xbf16>
    %c272 = arith.constant 272 : index
    %c0_83 = arith.constant 0 : index
    %53 = vector.load %arg5[%c272, %c0_83] : memref<400x512xbf16, #tpu.memory_space<vmem>>, vector<16x63xbf16>
    tpu.vector_store %arg5[%c272, %c0_83], %52 {strides = array<i32>} : memref<400x512xbf16, #tpu.memory_space<vmem>>, vector<16x63xbf16>,
    %c0_84 = arith.constant 0 : index
    %c3_85 = arith.constant 3 : index
    %c0_86 = arith.constant 0 : index
    %c10_87 = arith.constant 10 : index
    %54 = vector.load %arg1[%c0_84, %c3_85, %c0_86, %c10_87] : memref<1x4x16x83xbf16, #tpu.memory_space<vmem>>, vector<1x1x16x63xbf16>
    %55 = vector.shape_cast %54 : vector<1x1x16x63xbf16> to vector<16x63xbf16>
    %c288 = arith.constant 288 : index
    %c0_88 = arith.constant 0 : index
    %56 = vector.load %arg5[%c288, %c0_88] : memref<400x512xbf16, #tpu.memory_space<vmem>>, vector<16x63xbf16>
    tpu.vector_store %arg5[%c288, %c0_88], %55 {strides = array<i32>} : memref<400x512xbf16, #tpu.memory_space<vmem>>, vector<16x63xbf16>,
    %c0_89 = arith.constant 0 : index
    %c2_90 = arith.constant 2 : index
    %c0_91 = arith.constant 0 : index
    %c11_92 = arith.constant 11 : index
    %57 = vector.load %arg1[%c0_89, %c2_90, %c0_91, %c11_92] : memref<1x4x16x83xbf16, #tpu.memory_space<vmem>>, vector<1x1x16x63xbf16>
    %58 = vector.shape_cast %57 : vector<1x1x16x63xbf16> to vector<16x63xbf16>
    %c304 = arith.constant 304 : index
    %c0_93 = arith.constant 0 : index
    %59 = vector.load %arg5[%c304, %c0_93] : memref<400x512xbf16, #tpu.memory_space<vmem>>, vector<16x63xbf16>
    tpu.vector_store %arg5[%c304, %c0_93], %58 {strides = array<i32>} : memref<400x512xbf16, #tpu.memory_space<vmem>>, vector<16x63xbf16>,
    %c0_94 = arith.constant 0 : index
    %c0_95 = arith.constant 0 : index
    %c0_96 = arith.constant 0 : index
    %c18 = arith.constant 18 : index
    %60 = vector.load %arg1[%c0_94, %c0_95, %c0_96, %c18] : memref<1x4x16x83xbf16, #tpu.memory_space<vmem>>, vector<1x1x16x63xbf16>
    %61 = vector.shape_cast %60 : vector<1x1x16x63xbf16> to vector<16x63xbf16>
    %c320 = arith.constant 320 : index
    %c0_97 = arith.constant 0 : index
    %62 = vector.load %arg5[%c320, %c0_97] : memref<400x512xbf16, #tpu.memory_space<vmem>>, vector<16x63xbf16>
    tpu.vector_store %arg5[%c320, %c0_97], %61 {strides = array<i32>} : memref<400x512xbf16, #tpu.memory_space<vmem>>, vector<16x63xbf16>,
    %c0_98 = arith.constant 0 : index
    %c1_99 = arith.constant 1 : index
    %c0_100 = arith.constant 0 : index
    %c18_101 = arith.constant 18 : index
    %63 = vector.load %arg1[%c0_98, %c1_99, %c0_100, %c18_101] : memref<1x4x16x83xbf16, #tpu.memory_space<vmem>>, vector<1x1x16x63xbf16>
    %64 = vector.shape_cast %63 : vector<1x1x16x63xbf16> to vector<16x63xbf16>
    %c336 = arith.constant 336 : index
    %c0_102 = arith.constant 0 : index
    %65 = vector.load %arg5[%c336, %c0_102] : memref<400x512xbf16, #tpu.memory_space<vmem>>, vector<16x63xbf16>
    tpu.vector_store %arg5[%c336, %c0_102], %64 {strides = array<i32>} : memref<400x512xbf16, #tpu.memory_space<vmem>>, vector<16x63xbf16>,
    %c0_103 = arith.constant 0 : index
    %c0_104 = arith.constant 0 : index
    %c0_105 = arith.constant 0 : index
    %c19 = arith.constant 19 : index
    %66 = vector.load %arg1[%c0_103, %c0_104, %c0_105, %c19] : memref<1x4x16x83xbf16, #tpu.memory_space<vmem>>, vector<1x1x16x63xbf16>
    %67 = vector.shape_cast %66 : vector<1x1x16x63xbf16> to vector<16x63xbf16>
    %c352 = arith.constant 352 : index
    %c0_106 = arith.constant 0 : index
    %68 = vector.load %arg5[%c352, %c0_106] : memref<400x512xbf16, #tpu.memory_space<vmem>>, vector<16x63xbf16>
    tpu.vector_store %arg5[%c352, %c0_106], %67 {strides = array<i32>} : memref<400x512xbf16, #tpu.memory_space<vmem>>, vector<16x63xbf16>,
    %c0_107 = arith.constant 0 : index
    %c1_108 = arith.constant 1 : index
    %c0_109 = arith.constant 0 : index
    %c19_110 = arith.constant 19 : index
    %69 = vector.load %arg1[%c0_107, %c1_108, %c0_109, %c19_110] : memref<1x4x16x83xbf16, #tpu.memory_space<vmem>>, vector<1x1x16x63xbf16>
    %70 = vector.shape_cast %69 : vector<1x1x16x63xbf16> to vector<16x63xbf16>
    %c368 = arith.constant 368 : index
    %c0_111 = arith.constant 0 : index
    %71 = vector.load %arg5[%c368, %c0_111] : memref<400x512xbf16, #tpu.memory_space<vmem>>, vector<16x63xbf16>
    tpu.vector_store %arg5[%c368, %c0_111], %70 {strides = array<i32>} : memref<400x512xbf16, #tpu.memory_space<vmem>>, vector<16x63xbf16>,
    %c0_112 = arith.constant 0 : index
    %c0_113 = arith.constant 0 : index
    %c0_114 = arith.constant 0 : index
    %c20 = arith.constant 20 : index
    %72 = vector.load %arg1[%c0_112, %c0_113, %c0_114, %c20] : memref<1x4x16x83xbf16, #tpu.memory_space<vmem>>, vector<1x1x16x63xbf16>
    %73 = vector.shape_cast %72 : vector<1x1x16x63xbf16> to vector<16x63xbf16>
    %c384 = arith.constant 384 : index
    %c0_115 = arith.constant 0 : index
    %74 = vector.load %arg5[%c384, %c0_115] : memref<400x512xbf16, #tpu.memory_space<vmem>>, vector<16x63xbf16>
    tpu.vector_store %arg5[%c384, %c0_115], %73 {strides = array<i32>} : memref<400x512xbf16, #tpu.memory_space<vmem>>, vector<16x63xbf16>,
    %c0_116 = arith.constant 0 : index
    %c1_117 = arith.constant 1 : index
    %c0_118 = arith.constant 0 : index
    %c0_119 = arith.constant 0 : index
    %75 = vector.load %arg1[%c0_116, %c1_117, %c0_118, %c0_119] : memref<1x4x16x83xbf16, #tpu.memory_space<vmem>>, vector<1x1x16x63xbf16>
    %76 = vector.shape_cast %75 : vector<1x1x16x63xbf16> to vector<16x63xbf16>
    %c0_120 = arith.constant 0 : index
    %c128_121 = arith.constant 128 : index
    %77 = vector.load %arg5[%c0_120, %c128_121] : memref<400x512xbf16, #tpu.memory_space<vmem>>, vector<16x63xbf16>
    tpu.vector_store %arg5[%c0_120, %c128_121], %76 {strides = array<i32>} : memref<400x512xbf16, #tpu.memory_space<vmem>>, vector<16x63xbf16>,
    %c0_122 = arith.constant 0 : index
    %c0_123 = arith.constant 0 : index
    %c0_124 = arith.constant 0 : index
    %c1_125 = arith.constant 1 : index
    %78 = vector.load %arg1[%c0_122, %c0_123, %c0_124, %c1_125] : memref<1x4x16x83xbf16, #tpu.memory_space<vmem>>, vector<1x1x16x63xbf16>
    %79 = vector.shape_cast %78 : vector<1x1x16x63xbf16> to vector<16x63xbf16>
    %c16_126 = arith.constant 16 : index
    %c128_127 = arith.constant 128 : index
    %80 = vector.load %arg5[%c16_126, %c128_127] : memref<400x512xbf16, #tpu.memory_space<vmem>>, vector<16x63xbf16>
    tpu.vector_store %arg5[%c16_126, %c128_127], %79 {strides = array<i32>} : memref<400x512xbf16, #tpu.memory_space<vmem>>, vector<16x63xbf16>,
    %c0_128 = arith.constant 0 : index
    %c1_129 = arith.constant 1 : index
    %c0_130 = arith.constant 0 : index
    %c1_131 = arith.constant 1 : index
    %81 = vector.load %arg1[%c0_128, %c1_129, %c0_130, %c1_131] : memref<1x4x16x83xbf16, #tpu.memory_space<vmem>>, vector<1x1x16x63xbf16>
    %82 = vector.shape_cast %81 : vector<1x1x16x63xbf16> to vector<16x63xbf16>
    %c32_132 = arith.constant 32 : index
    %c128_133 = arith.constant 128 : index
    %83 = vector.load %arg5[%c32_132, %c128_133] : memref<400x512xbf16, #tpu.memory_space<vmem>>, vector<16x63xbf16>
    tpu.vector_store %arg5[%c32_132, %c128_133], %82 {strides = array<i32>} : memref<400x512xbf16, #tpu.memory_space<vmem>>, vector<16x63xbf16>,
    %c0_134 = arith.constant 0 : index
    %c0_135 = arith.constant 0 : index
    %c0_136 = arith.constant 0 : index
    %c2_137 = arith.constant 2 : index
    %84 = vector.load %arg1[%c0_134, %c0_135, %c0_136, %c2_137] : memref<1x4x16x83xbf16, #tpu.memory_space<vmem>>, vector<1x1x16x63xbf16>
    %85 = vector.shape_cast %84 : vector<1x1x16x63xbf16> to vector<16x63xbf16>
    %c48_138 = arith.constant 48 : index
    %c128_139 = arith.constant 128 : index
    %86 = vector.load %arg5[%c48_138, %c128_139] : memref<400x512xbf16, #tpu.memory_space<vmem>>, vector<16x63xbf16>
    tpu.vector_store %arg5[%c48_138, %c128_139], %85 {strides = array<i32>} : memref<400x512xbf16, #tpu.memory_space<vmem>>, vector<16x63xbf16>,
    %c0_140 = arith.constant 0 : index
    %c1_141 = arith.constant 1 : index
    %c0_142 = arith.constant 0 : index
    %c2_143 = arith.constant 2 : index
    %87 = vector.load %arg1[%c0_140, %c1_141, %c0_142, %c2_143] : memref<1x4x16x83xbf16, #tpu.memory_space<vmem>>, vector<1x1x16x63xbf16>
    %88 = vector.shape_cast %87 : vector<1x1x16x63xbf16> to vector<16x63xbf16>
    %c64_144 = arith.constant 64 : index
    %c128_145 = arith.constant 128 : index
    %89 = vector.load %arg5[%c64_144, %c128_145] : memref<400x512xbf16, #tpu.memory_space<vmem>>, vector<16x63xbf16>
    tpu.vector_store %arg5[%c64_144, %c128_145], %88 {strides = array<i32>} : memref<400x512xbf16, #tpu.memory_space<vmem>>, vector<16x63xbf16>,
    %c0_146 = arith.constant 0 : index
    %c3_147 = arith.constant 3 : index
    %c0_148 = arith.constant 0 : index
    %c0_149 = arith.constant 0 : index
    %90 = vector.load %arg1[%c0_146, %c3_147, %c0_148, %c0_149] : memref<1x4x16x83xbf16, #tpu.memory_space<vmem>>, vector<1x1x16x63xbf16>
    %91 = vector.shape_cast %90 : vector<1x1x16x63xbf16> to vector<16x63xbf16>
    %c80_150 = arith.constant 80 : index
    %c128_151 = arith.constant 128 : index
    %92 = vector.load %arg5[%c80_150, %c128_151] : memref<400x512xbf16, #tpu.memory_space<vmem>>, vector<16x63xbf16>
    tpu.vector_store %arg5[%c80_150, %c128_151], %91 {strides = array<i32>} : memref<400x512xbf16, #tpu.memory_space<vmem>>, vector<16x63xbf16>,
    %c0_152 = arith.constant 0 : index
    %c2_153 = arith.constant 2 : index
    %c0_154 = arith.constant 0 : index
    %c1_155 = arith.constant 1 : index
    %93 = vector.load %arg1[%c0_152, %c2_153, %c0_154, %c1_155] : memref<1x4x16x83xbf16, #tpu.memory_space<vmem>>, vector<1x1x16x63xbf16>
    %94 = vector.shape_cast %93 : vector<1x1x16x63xbf16> to vector<16x63xbf16>
    %c96_156 = arith.constant 96 : index
    %c128_157 = arith.constant 128 : index
    %95 = vector.load %arg5[%c96_156, %c128_157] : memref<400x512xbf16, #tpu.memory_space<vmem>>, vector<16x63xbf16>
    tpu.vector_store %arg5[%c96_156, %c128_157], %94 {strides = array<i32>} : memref<400x512xbf16, #tpu.memory_space<vmem>>, vector<16x63xbf16>,
    %c0_158 = arith.constant 0 : index
    %c3_159 = arith.constant 3 : index
    %c0_160 = arith.constant 0 : index
    %c1_161 = arith.constant 1 : index
    %96 = vector.load %arg1[%c0_158, %c3_159, %c0_160, %c1_161] : memref<1x4x16x83xbf16, #tpu.memory_space<vmem>>, vector<1x1x16x63xbf16>
    %97 = vector.shape_cast %96 : vector<1x1x16x63xbf16> to vector<16x63xbf16>
    %c112_162 = arith.constant 112 : index
    %c128_163 = arith.constant 128 : index
    %98 = vector.load %arg5[%c112_162, %c128_163] : memref<400x512xbf16, #tpu.memory_space<vmem>>, vector<16x63xbf16>
    tpu.vector_store %arg5[%c112_162, %c128_163], %97 {strides = array<i32>} : memref<400x512xbf16, #tpu.memory_space<vmem>>, vector<16x63xbf16>,
    %c0_164 = arith.constant 0 : index
    %c2_165 = arith.constant 2 : index
    %c0_166 = arith.constant 0 : index
    %c2_167 = arith.constant 2 : index
    %99 = vector.load %arg1[%c0_164, %c2_165, %c0_166, %c2_167] : memref<1x4x16x83xbf16, #tpu.memory_space<vmem>>, vector<1x1x16x63xbf16>
    %100 = vector.shape_cast %99 : vector<1x1x16x63xbf16> to vector<16x63xbf16>
    %c128_168 = arith.constant 128 : index
    %c128_169 = arith.constant 128 : index
    %101 = vector.load %arg5[%c128_168, %c128_169] : memref<400x512xbf16, #tpu.memory_space<vmem>>, vector<16x63xbf16>
    tpu.vector_store %arg5[%c128_168, %c128_169], %100 {strides = array<i32>} : memref<400x512xbf16, #tpu.memory_space<vmem>>, vector<16x63xbf16>,
    %c0_170 = arith.constant 0 : index
    %c3_171 = arith.constant 3 : index
    %c0_172 = arith.constant 0 : index
    %c2_173 = arith.constant 2 : index
    %102 = vector.load %arg1[%c0_170, %c3_171, %c0_172, %c2_173] : memref<1x4x16x83xbf16, #tpu.memory_space<vmem>>, vector<1x1x16x63xbf16>
    %103 = vector.shape_cast %102 : vector<1x1x16x63xbf16> to vector<16x63xbf16>
    %c144_174 = arith.constant 144 : index
    %c128_175 = arith.constant 128 : index
    %104 = vector.load %arg5[%c144_174, %c128_175] : memref<400x512xbf16, #tpu.memory_space<vmem>>, vector<16x63xbf16>
    tpu.vector_store %arg5[%c144_174, %c128_175], %103 {strides = array<i32>} : memref<400x512xbf16, #tpu.memory_space<vmem>>, vector<16x63xbf16>,
    %c0_176 = arith.constant 0 : index
    %c1_177 = arith.constant 1 : index
    %c0_178 = arith.constant 0 : index
    %c9_179 = arith.constant 9 : index
    %105 = vector.load %arg1[%c0_176, %c1_177, %c0_178, %c9_179] : memref<1x4x16x83xbf16, #tpu.memory_space<vmem>>, vector<1x1x16x63xbf16>
    %106 = vector.shape_cast %105 : vector<1x1x16x63xbf16> to vector<16x63xbf16>
    %c160_180 = arith.constant 160 : index
    %c128_181 = arith.constant 128 : index
    %107 = vector.load %arg5[%c160_180, %c128_181] : memref<400x512xbf16, #tpu.memory_space<vmem>>, vector<16x63xbf16>
    tpu.vector_store %arg5[%c160_180, %c128_181], %106 {strides = array<i32>} : memref<400x512xbf16, #tpu.memory_space<vmem>>, vector<16x63xbf16>,
    %c0_182 = arith.constant 0 : index
    %c0_183 = arith.constant 0 : index
    %c0_184 = arith.constant 0 : index
    %c10_185 = arith.constant 10 : index
    %108 = vector.load %arg1[%c0_182, %c0_183, %c0_184, %c10_185] : memref<1x4x16x83xbf16, #tpu.memory_space<vmem>>, vector<1x1x16x63xbf16>
    %109 = vector.shape_cast %108 : vector<1x1x16x63xbf16> to vector<16x63xbf16>
    %c176_186 = arith.constant 176 : index
    %c128_187 = arith.constant 128 : index
    %110 = vector.load %arg5[%c176_186, %c128_187] : memref<400x512xbf16, #tpu.memory_space<vmem>>, vector<16x63xbf16>
    tpu.vector_store %arg5[%c176_186, %c128_187], %109 {strides = array<i32>} : memref<400x512xbf16, #tpu.memory_space<vmem>>, vector<16x63xbf16>,
    %c0_188 = arith.constant 0 : index
    %c1_189 = arith.constant 1 : index
    %c0_190 = arith.constant 0 : index
    %c10_191 = arith.constant 10 : index
    %111 = vector.load %arg1[%c0_188, %c1_189, %c0_190, %c10_191] : memref<1x4x16x83xbf16, #tpu.memory_space<vmem>>, vector<1x1x16x63xbf16>
    %112 = vector.shape_cast %111 : vector<1x1x16x63xbf16> to vector<16x63xbf16>
    %c192_192 = arith.constant 192 : index
    %c128_193 = arith.constant 128 : index
    %113 = vector.load %arg5[%c192_192, %c128_193] : memref<400x512xbf16, #tpu.memory_space<vmem>>, vector<16x63xbf16>
    tpu.vector_store %arg5[%c192_192, %c128_193], %112 {strides = array<i32>} : memref<400x512xbf16, #tpu.memory_space<vmem>>, vector<16x63xbf16>,
    %c0_194 = arith.constant 0 : index
    %c0_195 = arith.constant 0 : index
    %c0_196 = arith.constant 0 : index
    %c11_197 = arith.constant 11 : index
    %114 = vector.load %arg1[%c0_194, %c0_195, %c0_196, %c11_197] : memref<1x4x16x83xbf16, #tpu.memory_space<vmem>>, vector<1x1x16x63xbf16>
    %115 = vector.shape_cast %114 : vector<1x1x16x63xbf16> to vector<16x63xbf16>
    %c208_198 = arith.constant 208 : index
    %c128_199 = arith.constant 128 : index
    %116 = vector.load %arg5[%c208_198, %c128_199] : memref<400x512xbf16, #tpu.memory_space<vmem>>, vector<16x63xbf16>
    tpu.vector_store %arg5[%c208_198, %c128_199], %115 {strides = array<i32>} : memref<400x512xbf16, #tpu.memory_space<vmem>>, vector<16x63xbf16>,
    %c0_200 = arith.constant 0 : index
    %c1_201 = arith.constant 1 : index
    %c0_202 = arith.constant 0 : index
    %c11_203 = arith.constant 11 : index
    %117 = vector.load %arg1[%c0_200, %c1_201, %c0_202, %c11_203] : memref<1x4x16x83xbf16, #tpu.memory_space<vmem>>, vector<1x1x16x63xbf16>
    %118 = vector.shape_cast %117 : vector<1x1x16x63xbf16> to vector<16x63xbf16>
    %c224_204 = arith.constant 224 : index
    %c128_205 = arith.constant 128 : index
    %119 = vector.load %arg5[%c224_204, %c128_205] : memref<400x512xbf16, #tpu.memory_space<vmem>>, vector<16x63xbf16>
    tpu.vector_store %arg5[%c224_204, %c128_205], %118 {strides = array<i32>} : memref<400x512xbf16, #tpu.memory_space<vmem>>, vector<16x63xbf16>,
    %c0_206 = arith.constant 0 : index
    %c3_207 = arith.constant 3 : index
    %c0_208 = arith.constant 0 : index
    %c9_209 = arith.constant 9 : index
    %120 = vector.load %arg1[%c0_206, %c3_207, %c0_208, %c9_209] : memref<1x4x16x83xbf16, #tpu.memory_space<vmem>>, vector<1x1x16x63xbf16>
    %121 = vector.shape_cast %120 : vector<1x1x16x63xbf16> to vector<16x63xbf16>
    %c240_210 = arith.constant 240 : index
    %c128_211 = arith.constant 128 : index
    %122 = vector.load %arg5[%c240_210, %c128_211] : memref<400x512xbf16, #tpu.memory_space<vmem>>, vector<16x63xbf16>
    tpu.vector_store %arg5[%c240_210, %c128_211], %121 {strides = array<i32>} : memref<400x512xbf16, #tpu.memory_space<vmem>>, vector<16x63xbf16>,
    %c0_212 = arith.constant 0 : index
    %c2_213 = arith.constant 2 : index
    %c0_214 = arith.constant 0 : index
    %c10_215 = arith.constant 10 : index
    %123 = vector.load %arg1[%c0_212, %c2_213, %c0_214, %c10_215] : memref<1x4x16x83xbf16, #tpu.memory_space<vmem>>, vector<1x1x16x63xbf16>
    %124 = vector.shape_cast %123 : vector<1x1x16x63xbf16> to vector<16x63xbf16>
    %c256_216 = arith.constant 256 : index
    %c128_217 = arith.constant 128 : index
    %125 = vector.load %arg5[%c256_216, %c128_217] : memref<400x512xbf16, #tpu.memory_space<vmem>>, vector<16x63xbf16>
    tpu.vector_store %arg5[%c256_216, %c128_217], %124 {strides = array<i32>} : memref<400x512xbf16, #tpu.memory_space<vmem>>, vector<16x63xbf16>,
    %c0_218 = arith.constant 0 : index
    %c3_219 = arith.constant 3 : index
    %c0_220 = arith.constant 0 : index
    %c10_221 = arith.constant 10 : index
    %126 = vector.load %arg1[%c0_218, %c3_219, %c0_220, %c10_221] : memref<1x4x16x83xbf16, #tpu.memory_space<vmem>>, vector<1x1x16x63xbf16>
    %127 = vector.shape_cast %126 : vector<1x1x16x63xbf16> to vector<16x63xbf16>
    %c272_222 = arith.constant 272 : index
    %c128_223 = arith.constant 128 : index
    %128 = vector.load %arg5[%c272_222, %c128_223] : memref<400x512xbf16, #tpu.memory_space<vmem>>, vector<16x63xbf16>
    tpu.vector_store %arg5[%c272_222, %c128_223], %127 {strides = array<i32>} : memref<400x512xbf16, #tpu.memory_space<vmem>>, vector<16x63xbf16>,
    %c0_224 = arith.constant 0 : index
    %c2_225 = arith.constant 2 : index
    %c0_226 = arith.constant 0 : index
    %c11_227 = arith.constant 11 : index
    %129 = vector.load %arg1[%c0_224, %c2_225, %c0_226, %c11_227] : memref<1x4x16x83xbf16, #tpu.memory_space<vmem>>, vector<1x1x16x63xbf16>
    %130 = vector.shape_cast %129 : vector<1x1x16x63xbf16> to vector<16x63xbf16>
    %c288_228 = arith.constant 288 : index
    %c128_229 = arith.constant 128 : index
    %131 = vector.load %arg5[%c288_228, %c128_229] : memref<400x512xbf16, #tpu.memory_space<vmem>>, vector<16x63xbf16>
    tpu.vector_store %arg5[%c288_228, %c128_229], %130 {strides = array<i32>} : memref<400x512xbf16, #tpu.memory_space<vmem>>, vector<16x63xbf16>,
    %c0_230 = arith.constant 0 : index
    %c3_231 = arith.constant 3 : index
    %c0_232 = arith.constant 0 : index
    %c11_233 = arith.constant 11 : index
    %132 = vector.load %arg1[%c0_230, %c3_231, %c0_232, %c11_233] : memref<1x4x16x83xbf16, #tpu.memory_space<vmem>>, vector<1x1x16x63xbf16>
    %133 = vector.shape_cast %132 : vector<1x1x16x63xbf16> to vector<16x63xbf16>
    %c304_234 = arith.constant 304 : index
    %c128_235 = arith.constant 128 : index
    %134 = vector.load %arg5[%c304_234, %c128_235] : memref<400x512xbf16, #tpu.memory_space<vmem>>, vector<16x63xbf16>
    tpu.vector_store %arg5[%c304_234, %c128_235], %133 {strides = array<i32>} : memref<400x512xbf16, #tpu.memory_space<vmem>>, vector<16x63xbf16>,
    %c0_236 = arith.constant 0 : index
    %c1_237 = arith.constant 1 : index
    %c0_238 = arith.constant 0 : index
    %c18_239 = arith.constant 18 : index
    %135 = vector.load %arg1[%c0_236, %c1_237, %c0_238, %c18_239] : memref<1x4x16x83xbf16, #tpu.memory_space<vmem>>, vector<1x1x16x63xbf16>
    %136 = vector.shape_cast %135 : vector<1x1x16x63xbf16> to vector<16x63xbf16>
    %c320_240 = arith.constant 320 : index
    %c128_241 = arith.constant 128 : index
    %137 = vector.load %arg5[%c320_240, %c128_241] : memref<400x512xbf16, #tpu.memory_space<vmem>>, vector<16x63xbf16>
    tpu.vector_store %arg5[%c320_240, %c128_241], %136 {strides = array<i32>} : memref<400x512xbf16, #tpu.memory_space<vmem>>, vector<16x63xbf16>,
    %c0_242 = arith.constant 0 : index
    %c0_243 = arith.constant 0 : index
    %c0_244 = arith.constant 0 : index
    %c19_245 = arith.constant 19 : index
    %138 = vector.load %arg1[%c0_242, %c0_243, %c0_244, %c19_245] : memref<1x4x16x83xbf16, #tpu.memory_space<vmem>>, vector<1x1x16x63xbf16>
    %139 = vector.shape_cast %138 : vector<1x1x16x63xbf16> to vector<16x63xbf16>
    %c336_246 = arith.constant 336 : index
    %c128_247 = arith.constant 128 : index
    %140 = vector.load %arg5[%c336_246, %c128_247] : memref<400x512xbf16, #tpu.memory_space<vmem>>, vector<16x63xbf16>
    tpu.vector_store %arg5[%c336_246, %c128_247], %139 {strides = array<i32>} : memref<400x512xbf16, #tpu.memory_space<vmem>>, vector<16x63xbf16>,
    %c0_248 = arith.constant 0 : index
    %c1_249 = arith.constant 1 : index
    %c0_250 = arith.constant 0 : index
    %c19_251 = arith.constant 19 : index
    %141 = vector.load %arg1[%c0_248, %c1_249, %c0_250, %c19_251] : memref<1x4x16x83xbf16, #tpu.memory_space<vmem>>, vector<1x1x16x63xbf16>
    %142 = vector.shape_cast %141 : vector<1x1x16x63xbf16> to vector<16x63xbf16>
    %c352_252 = arith.constant 352 : index
    %c128_253 = arith.constant 128 : index
    %143 = vector.load %arg5[%c352_252, %c128_253] : memref<400x512xbf16, #tpu.memory_space<vmem>>, vector<16x63xbf16>
    tpu.vector_store %arg5[%c352_252, %c128_253], %142 {strides = array<i32>} : memref<400x512xbf16, #tpu.memory_space<vmem>>, vector<16x63xbf16>,
    %c0_254 = arith.constant 0 : index
    %c0_255 = arith.constant 0 : index
    %c0_256 = arith.constant 0 : index
    %c20_257 = arith.constant 20 : index
    %144 = vector.load %arg1[%c0_254, %c0_255, %c0_256, %c20_257] : memref<1x4x16x83xbf16, #tpu.memory_space<vmem>>, vector<1x1x16x63xbf16>
    %145 = vector.shape_cast %144 : vector<1x1x16x63xbf16> to vector<16x63xbf16>
    %c368_258 = arith.constant 368 : index
    %c128_259 = arith.constant 128 : index
    %146 = vector.load %arg5[%c368_258, %c128_259] : memref<400x512xbf16, #tpu.memory_space<vmem>>, vector<16x63xbf16>
    tpu.vector_store %arg5[%c368_258, %c128_259], %145 {strides = array<i32>} : memref<400x512xbf16, #tpu.memory_space<vmem>>, vector<16x63xbf16>,
    %c0_260 = arith.constant 0 : index
    %c1_261 = arith.constant 1 : index
    %c0_262 = arith.constant 0 : index
    %c20_263 = arith.constant 20 : index
    %147 = vector.load %arg1[%c0_260, %c1_261, %c0_262, %c20_263] : memref<1x4x16x83xbf16, #tpu.memory_space<vmem>>, vector<1x1x16x63xbf16>
    %148 = vector.shape_cast %147 : vector<1x1x16x63xbf16> to vector<16x63xbf16>
    %c384_264 = arith.constant 384 : index
    %c128_265 = arith.constant 128 : index
    %149 = vector.load %arg5[%c384_264, %c128_265] : memref<400x512xbf16, #tpu.memory_space<vmem>>, vector<16x63xbf16>
    tpu.vector_store %arg5[%c384_264, %c128_265], %148 {strides = array<i32>} : memref<400x512xbf16, #tpu.memory_space<vmem>>, vector<16x63xbf16>,
    %c0_266 = arith.constant 0 : index
    %c2_267 = arith.constant 2 : index
    %c0_268 = arith.constant 0 : index
    %c0_269 = arith.constant 0 : index
    %150 = vector.load %arg1[%c0_266, %c2_267, %c0_268, %c0_269] : memref<1x4x16x83xbf16, #tpu.memory_space<vmem>>, vector<1x1x16x63xbf16>
    %151 = vector.shape_cast %150 : vector<1x1x16x63xbf16> to vector<16x63xbf16>
    %c0_270 = arith.constant 0 : index
    %c256_271 = arith.constant 256 : index
    %152 = vector.load %arg5[%c0_270, %c256_271] : memref<400x512xbf16, #tpu.memory_space<vmem>>, vector<16x63xbf16>
    tpu.vector_store %arg5[%c0_270, %c256_271], %151 {strides = array<i32>} : memref<400x512xbf16, #tpu.memory_space<vmem>>, vector<16x63xbf16>,
    %c0_272 = arith.constant 0 : index
    %c3_273 = arith.constant 3 : index
    %c0_274 = arith.constant 0 : index
    %c0_275 = arith.constant 0 : index
    %153 = vector.load %arg1[%c0_272, %c3_273, %c0_274, %c0_275] : memref<1x4x16x83xbf16, #tpu.memory_space<vmem>>, vector<1x1x16x63xbf16>
    %154 = vector.shape_cast %153 : vector<1x1x16x63xbf16> to vector<16x63xbf16>
    %c16_276 = arith.constant 16 : index
    %c256_277 = arith.constant 256 : index
    %155 = vector.load %arg5[%c16_276, %c256_277] : memref<400x512xbf16, #tpu.memory_space<vmem>>, vector<16x63xbf16>
    tpu.vector_store %arg5[%c16_276, %c256_277], %154 {strides = array<i32>} : memref<400x512xbf16, #tpu.memory_space<vmem>>, vector<16x63xbf16>,
    %c0_278 = arith.constant 0 : index
    %c2_279 = arith.constant 2 : index
    %c0_280 = arith.constant 0 : index
    %c1_281 = arith.constant 1 : index
    %156 = vector.load %arg1[%c0_278, %c2_279, %c0_280, %c1_281] : memref<1x4x16x83xbf16, #tpu.memory_space<vmem>>, vector<1x1x16x63xbf16>
    %157 = vector.shape_cast %156 : vector<1x1x16x63xbf16> to vector<16x63xbf16>
    %c32_282 = arith.constant 32 : index
    %c256_283 = arith.constant 256 : index
    %158 = vector.load %arg5[%c32_282, %c256_283] : memref<400x512xbf16, #tpu.memory_space<vmem>>, vector<16x63xbf16>
    tpu.vector_store %arg5[%c32_282, %c256_283], %157 {strides = array<i32>} : memref<400x512xbf16, #tpu.memory_space<vmem>>, vector<16x63xbf16>,
    %c0_284 = arith.constant 0 : index
    %c3_285 = arith.constant 3 : index
    %c0_286 = arith.constant 0 : index
    %c1_287 = arith.constant 1 : index
    %159 = vector.load %arg1[%c0_284, %c3_285, %c0_286, %c1_287] : memref<1x4x16x83xbf16, #tpu.memory_space<vmem>>, vector<1x1x16x63xbf16>
    %160 = vector.shape_cast %159 : vector<1x1x16x63xbf16> to vector<16x63xbf16>
    %c48_288 = arith.constant 48 : index
    %c256_289 = arith.constant 256 : index
    %161 = vector.load %arg5[%c48_288, %c256_289] : memref<400x512xbf16, #tpu.memory_space<vmem>>, vector<16x63xbf16>
    tpu.vector_store %arg5[%c48_288, %c256_289], %160 {strides = array<i32>} : memref<400x512xbf16, #tpu.memory_space<vmem>>, vector<16x63xbf16>,
    %c0_290 = arith.constant 0 : index
    %c2_291 = arith.constant 2 : index
    %c0_292 = arith.constant 0 : index
    %c2_293 = arith.constant 2 : index
    %162 = vector.load %arg1[%c0_290, %c2_291, %c0_292, %c2_293] : memref<1x4x16x83xbf16, #tpu.memory_space<vmem>>, vector<1x1x16x63xbf16>
    %163 = vector.shape_cast %162 : vector<1x1x16x63xbf16> to vector<16x63xbf16>
    %c64_294 = arith.constant 64 : index
    %c256_295 = arith.constant 256 : index
    %164 = vector.load %arg5[%c64_294, %c256_295] : memref<400x512xbf16, #tpu.memory_space<vmem>>, vector<16x63xbf16>
    tpu.vector_store %arg5[%c64_294, %c256_295], %163 {strides = array<i32>} : memref<400x512xbf16, #tpu.memory_space<vmem>>, vector<16x63xbf16>,
    %c0_296 = arith.constant 0 : index
    %c0_297 = arith.constant 0 : index
    %c0_298 = arith.constant 0 : index
    %c9_299 = arith.constant 9 : index
    %165 = vector.load %arg1[%c0_296, %c0_297, %c0_298, %c9_299] : memref<1x4x16x83xbf16, #tpu.memory_space<vmem>>, vector<1x1x16x63xbf16>
    %166 = vector.shape_cast %165 : vector<1x1x16x63xbf16> to vector<16x63xbf16>
    %c80_300 = arith.constant 80 : index
    %c256_301 = arith.constant 256 : index
    %167 = vector.load %arg5[%c80_300, %c256_301] : memref<400x512xbf16, #tpu.memory_space<vmem>>, vector<16x63xbf16>
    tpu.vector_store %arg5[%c80_300, %c256_301], %166 {strides = array<i32>} : memref<400x512xbf16, #tpu.memory_space<vmem>>, vector<16x63xbf16>,
    %c0_302 = arith.constant 0 : index
    %c1_303 = arith.constant 1 : index
    %c0_304 = arith.constant 0 : index
    %c9_305 = arith.constant 9 : index
    %168 = vector.load %arg1[%c0_302, %c1_303, %c0_304, %c9_305] : memref<1x4x16x83xbf16, #tpu.memory_space<vmem>>, vector<1x1x16x63xbf16>
    %169 = vector.shape_cast %168 : vector<1x1x16x63xbf16> to vector<16x63xbf16>
    %c96_306 = arith.constant 96 : index
    %c256_307 = arith.constant 256 : index
    %170 = vector.load %arg5[%c96_306, %c256_307] : memref<400x512xbf16, #tpu.memory_space<vmem>>, vector<16x63xbf16>
    tpu.vector_store %arg5[%c96_306, %c256_307], %169 {strides = array<i32>} : memref<400x512xbf16, #tpu.memory_space<vmem>>, vector<16x63xbf16>,
    %c0_308 = arith.constant 0 : index
    %c0_309 = arith.constant 0 : index
    %c0_310 = arith.constant 0 : index
    %c10_311 = arith.constant 10 : index
    %171 = vector.load %arg1[%c0_308, %c0_309, %c0_310, %c10_311] : memref<1x4x16x83xbf16, #tpu.memory_space<vmem>>, vector<1x1x16x63xbf16>
    %172 = vector.shape_cast %171 : vector<1x1x16x63xbf16> to vector<16x63xbf16>
    %c112_312 = arith.constant 112 : index
    %c256_313 = arith.constant 256 : index
    %173 = vector.load %arg5[%c112_312, %c256_313] : memref<400x512xbf16, #tpu.memory_space<vmem>>, vector<16x63xbf16>
    tpu.vector_store %arg5[%c112_312, %c256_313], %172 {strides = array<i32>} : memref<400x512xbf16, #tpu.memory_space<vmem>>, vector<16x63xbf16>,
    %c0_314 = arith.constant 0 : index
    %c1_315 = arith.constant 1 : index
    %c0_316 = arith.constant 0 : index
    %c10_317 = arith.constant 10 : index
    %174 = vector.load %arg1[%c0_314, %c1_315, %c0_316, %c10_317] : memref<1x4x16x83xbf16, #tpu.memory_space<vmem>>, vector<1x1x16x63xbf16>
    %175 = vector.shape_cast %174 : vector<1x1x16x63xbf16> to vector<16x63xbf16>
    %c128_318 = arith.constant 128 : index
    %c256_319 = arith.constant 256 : index
    %176 = vector.load %arg5[%c128_318, %c256_319] : memref<400x512xbf16, #tpu.memory_space<vmem>>, vector<16x63xbf16>
    tpu.vector_store %arg5[%c128_318, %c256_319], %175 {strides = array<i32>} : memref<400x512xbf16, #tpu.memory_space<vmem>>, vector<16x63xbf16>,
    %c0_320 = arith.constant 0 : index
    %c0_321 = arith.constant 0 : index
    %c0_322 = arith.constant 0 : index
    %c11_323 = arith.constant 11 : index
    %177 = vector.load %arg1[%c0_320, %c0_321, %c0_322, %c11_323] : memref<1x4x16x83xbf16, #tpu.memory_space<vmem>>, vector<1x1x16x63xbf16>
    %178 = vector.shape_cast %177 : vector<1x1x16x63xbf16> to vector<16x63xbf16>
    %c144_324 = arith.constant 144 : index
    %c256_325 = arith.constant 256 : index
    %179 = vector.load %arg5[%c144_324, %c256_325] : memref<400x512xbf16, #tpu.memory_space<vmem>>, vector<16x63xbf16>
    tpu.vector_store %arg5[%c144_324, %c256_325], %178 {strides = array<i32>} : memref<400x512xbf16, #tpu.memory_space<vmem>>, vector<16x63xbf16>,
    %c0_326 = arith.constant 0 : index
    %c2_327 = arith.constant 2 : index
    %c0_328 = arith.constant 0 : index
    %c9_329 = arith.constant 9 : index
    %180 = vector.load %arg1[%c0_326, %c2_327, %c0_328, %c9_329] : memref<1x4x16x83xbf16, #tpu.memory_space<vmem>>, vector<1x1x16x63xbf16>
    %181 = vector.shape_cast %180 : vector<1x1x16x63xbf16> to vector<16x63xbf16>
    %c160_330 = arith.constant 160 : index
    %c256_331 = arith.constant 256 : index
    %182 = vector.load %arg5[%c160_330, %c256_331] : memref<400x512xbf16, #tpu.memory_space<vmem>>, vector<16x63xbf16>
    tpu.vector_store %arg5[%c160_330, %c256_331], %181 {strides = array<i32>} : memref<400x512xbf16, #tpu.memory_space<vmem>>, vector<16x63xbf16>,
    %c0_332 = arith.constant 0 : index
    %c3_333 = arith.constant 3 : index
    %c0_334 = arith.constant 0 : index
    %c9_335 = arith.constant 9 : index
    %183 = vector.load %arg1[%c0_332, %c3_333, %c0_334, %c9_335] : memref<1x4x16x83xbf16, #tpu.memory_space<vmem>>, vector<1x1x16x63xbf16>
    %184 = vector.shape_cast %183 : vector<1x1x16x63xbf16> to vector<16x63xbf16>
    %c176_336 = arith.constant 176 : index
    %c256_337 = arith.constant 256 : index
    %185 = vector.load %arg5[%c176_336, %c256_337] : memref<400x512xbf16, #tpu.memory_space<vmem>>, vector<16x63xbf16>
    tpu.vector_store %arg5[%c176_336, %c256_337], %184 {strides = array<i32>} : memref<400x512xbf16, #tpu.memory_space<vmem>>, vector<16x63xbf16>,
    %c0_338 = arith.constant 0 : index
    %c2_339 = arith.constant 2 : index
    %c0_340 = arith.constant 0 : index
    %c10_341 = arith.constant 10 : index
    %186 = vector.load %arg1[%c0_338, %c2_339, %c0_340, %c10_341] : memref<1x4x16x83xbf16, #tpu.memory_space<vmem>>, vector<1x1x16x63xbf16>
    %187 = vector.shape_cast %186 : vector<1x1x16x63xbf16> to vector<16x63xbf16>
    %c192_342 = arith.constant 192 : index
    %c256_343 = arith.constant 256 : index
    %188 = vector.load %arg5[%c192_342, %c256_343] : memref<400x512xbf16, #tpu.memory_space<vmem>>, vector<16x63xbf16>
    tpu.vector_store %arg5[%c192_342, %c256_343], %187 {strides = array<i32>} : memref<400x512xbf16, #tpu.memory_space<vmem>>, vector<16x63xbf16>,
    %c0_344 = arith.constant 0 : index
    %c3_345 = arith.constant 3 : index
    %c0_346 = arith.constant 0 : index
    %c10_347 = arith.constant 10 : index
    %189 = vector.load %arg1[%c0_344, %c3_345, %c0_346, %c10_347] : memref<1x4x16x83xbf16, #tpu.memory_space<vmem>>, vector<1x1x16x63xbf16>
    %190 = vector.shape_cast %189 : vector<1x1x16x63xbf16> to vector<16x63xbf16>
    %c208_348 = arith.constant 208 : index
    %c256_349 = arith.constant 256 : index
    %191 = vector.load %arg5[%c208_348, %c256_349] : memref<400x512xbf16, #tpu.memory_space<vmem>>, vector<16x63xbf16>
    tpu.vector_store %arg5[%c208_348, %c256_349], %190 {strides = array<i32>} : memref<400x512xbf16, #tpu.memory_space<vmem>>, vector<16x63xbf16>,
    %c0_350 = arith.constant 0 : index
    %c2_351 = arith.constant 2 : index
    %c0_352 = arith.constant 0 : index
    %c11_353 = arith.constant 11 : index
    %192 = vector.load %arg1[%c0_350, %c2_351, %c0_352, %c11_353] : memref<1x4x16x83xbf16, #tpu.memory_space<vmem>>, vector<1x1x16x63xbf16>
    %193 = vector.shape_cast %192 : vector<1x1x16x63xbf16> to vector<16x63xbf16>
    %c224_354 = arith.constant 224 : index
    %c256_355 = arith.constant 256 : index
    %194 = vector.load %arg5[%c224_354, %c256_355] : memref<400x512xbf16, #tpu.memory_space<vmem>>, vector<16x63xbf16>
    tpu.vector_store %arg5[%c224_354, %c256_355], %193 {strides = array<i32>} : memref<400x512xbf16, #tpu.memory_space<vmem>>, vector<16x63xbf16>,
    %c0_356 = arith.constant 0 : index
    %c0_357 = arith.constant 0 : index
    %c0_358 = arith.constant 0 : index
    %c18_359 = arith.constant 18 : index
    %195 = vector.load %arg1[%c0_356, %c0_357, %c0_358, %c18_359] : memref<1x4x16x83xbf16, #tpu.memory_space<vmem>>, vector<1x1x16x63xbf16>
    %196 = vector.shape_cast %195 : vector<1x1x16x63xbf16> to vector<16x63xbf16>
    %c240_360 = arith.constant 240 : index
    %c256_361 = arith.constant 256 : index
    %197 = vector.load %arg5[%c240_360, %c256_361] : memref<400x512xbf16, #tpu.memory_space<vmem>>, vector<16x63xbf16>
    tpu.vector_store %arg5[%c240_360, %c256_361], %196 {strides = array<i32>} : memref<400x512xbf16, #tpu.memory_space<vmem>>, vector<16x63xbf16>,
    %c0_362 = arith.constant 0 : index
    %c1_363 = arith.constant 1 : index
    %c0_364 = arith.constant 0 : index
    %c18_365 = arith.constant 18 : index
    %198 = vector.load %arg1[%c0_362, %c1_363, %c0_364, %c18_365] : memref<1x4x16x83xbf16, #tpu.memory_space<vmem>>, vector<1x1x16x63xbf16>
    %199 = vector.shape_cast %198 : vector<1x1x16x63xbf16> to vector<16x63xbf16>
    %c256_366 = arith.constant 256 : index
    %c256_367 = arith.constant 256 : index
    %200 = vector.load %arg5[%c256_366, %c256_367] : memref<400x512xbf16, #tpu.memory_space<vmem>>, vector<16x63xbf16>
    tpu.vector_store %arg5[%c256_366, %c256_367], %199 {strides = array<i32>} : memref<400x512xbf16, #tpu.memory_space<vmem>>, vector<16x63xbf16>,
    %c0_368 = arith.constant 0 : index
    %c0_369 = arith.constant 0 : index
    %c0_370 = arith.constant 0 : index
    %c19_371 = arith.constant 19 : index
    %201 = vector.load %arg1[%c0_368, %c0_369, %c0_370, %c19_371] : memref<1x4x16x83xbf16, #tpu.memory_space<vmem>>, vector<1x1x16x63xbf16>
    %202 = vector.shape_cast %201 : vector<1x1x16x63xbf16> to vector<16x63xbf16>
    %c272_372 = arith.constant 272 : index
    %c256_373 = arith.constant 256 : index
    %203 = vector.load %arg5[%c272_372, %c256_373] : memref<400x512xbf16, #tpu.memory_space<vmem>>, vector<16x63xbf16>
    tpu.vector_store %arg5[%c272_372, %c256_373], %202 {strides = array<i32>} : memref<400x512xbf16, #tpu.memory_space<vmem>>, vector<16x63xbf16>,
    %c0_374 = arith.constant 0 : index
    %c1_375 = arith.constant 1 : index
    %c0_376 = arith.constant 0 : index
    %c19_377 = arith.constant 19 : index
    %204 = vector.load %arg1[%c0_374, %c1_375, %c0_376, %c19_377] : memref<1x4x16x83xbf16, #tpu.memory_space<vmem>>, vector<1x1x16x63xbf16>
    %205 = vector.shape_cast %204 : vector<1x1x16x63xbf16> to vector<16x63xbf16>
    %c288_378 = arith.constant 288 : index
    %c256_379 = arith.constant 256 : index
    %206 = vector.load %arg5[%c288_378, %c256_379] : memref<400x512xbf16, #tpu.memory_space<vmem>>, vector<16x63xbf16>
    tpu.vector_store %arg5[%c288_378, %c256_379], %205 {strides = array<i32>} : memref<400x512xbf16, #tpu.memory_space<vmem>>, vector<16x63xbf16>,
    %c0_380 = arith.constant 0 : index
    %c0_381 = arith.constant 0 : index
    %c0_382 = arith.constant 0 : index
    %c20_383 = arith.constant 20 : index
    %207 = vector.load %arg1[%c0_380, %c0_381, %c0_382, %c20_383] : memref<1x4x16x83xbf16, #tpu.memory_space<vmem>>, vector<1x1x16x63xbf16>
    %208 = vector.shape_cast %207 : vector<1x1x16x63xbf16> to vector<16x63xbf16>
    %c304_384 = arith.constant 304 : index
    %c256_385 = arith.constant 256 : index
    %209 = vector.load %arg5[%c304_384, %c256_385] : memref<400x512xbf16, #tpu.memory_space<vmem>>, vector<16x63xbf16>
    tpu.vector_store %arg5[%c304_384, %c256_385], %208 {strides = array<i32>} : memref<400x512xbf16, #tpu.memory_space<vmem>>, vector<16x63xbf16>,
    %c0_386 = arith.constant 0 : index
    %c2_387 = arith.constant 2 : index
    %c0_388 = arith.constant 0 : index
    %c18_389 = arith.constant 18 : index
    %210 = vector.load %arg1[%c0_386, %c2_387, %c0_388, %c18_389] : memref<1x4x16x83xbf16, #tpu.memory_space<vmem>>, vector<1x1x16x63xbf16>
    %211 = vector.shape_cast %210 : vector<1x1x16x63xbf16> to vector<16x63xbf16>
    %c320_390 = arith.constant 320 : index
    %c256_391 = arith.constant 256 : index
    %212 = vector.load %arg5[%c320_390, %c256_391] : memref<400x512xbf16, #tpu.memory_space<vmem>>, vector<16x63xbf16>
    tpu.vector_store %arg5[%c320_390, %c256_391], %211 {strides = array<i32>} : memref<400x512xbf16, #tpu.memory_space<vmem>>, vector<16x63xbf16>,
    %c0_392 = arith.constant 0 : index
    %c3_393 = arith.constant 3 : index
    %c0_394 = arith.constant 0 : index
    %c18_395 = arith.constant 18 : index
    %213 = vector.load %arg1[%c0_392, %c3_393, %c0_394, %c18_395] : memref<1x4x16x83xbf16, #tpu.memory_space<vmem>>, vector<1x1x16x63xbf16>
    %214 = vector.shape_cast %213 : vector<1x1x16x63xbf16> to vector<16x63xbf16>
    %c336_396 = arith.constant 336 : index
    %c256_397 = arith.constant 256 : index
    %215 = vector.load %arg5[%c336_396, %c256_397] : memref<400x512xbf16, #tpu.memory_space<vmem>>, vector<16x63xbf16>
    tpu.vector_store %arg5[%c336_396, %c256_397], %214 {strides = array<i32>} : memref<400x512xbf16, #tpu.memory_space<vmem>>, vector<16x63xbf16>,
    %c0_398 = arith.constant 0 : index
    %c2_399 = arith.constant 2 : index
    %c0_400 = arith.constant 0 : index
    %c19_401 = arith.constant 19 : index
    %216 = vector.load %arg1[%c0_398, %c2_399, %c0_400, %c19_401] : memref<1x4x16x83xbf16, #tpu.memory_space<vmem>>, vector<1x1x16x63xbf16>
    %217 = vector.shape_cast %216 : vector<1x1x16x63xbf16> to vector<16x63xbf16>
    %c352_402 = arith.constant 352 : index
    %c256_403 = arith.constant 256 : index
    %218 = vector.load %arg5[%c352_402, %c256_403] : memref<400x512xbf16, #tpu.memory_space<vmem>>, vector<16x63xbf16>
    tpu.vector_store %arg5[%c352_402, %c256_403], %217 {strides = array<i32>} : memref<400x512xbf16, #tpu.memory_space<vmem>>, vector<16x63xbf16>,
    %c0_404 = arith.constant 0 : index
    %c3_405 = arith.constant 3 : index
    %c0_406 = arith.constant 0 : index
    %c19_407 = arith.constant 19 : index
    %219 = vector.load %arg1[%c0_404, %c3_405, %c0_406, %c19_407] : memref<1x4x16x83xbf16, #tpu.memory_space<vmem>>, vector<1x1x16x63xbf16>
    %220 = vector.shape_cast %219 : vector<1x1x16x63xbf16> to vector<16x63xbf16>
    %c368_408 = arith.constant 368 : index
    %c256_409 = arith.constant 256 : index
    %221 = vector.load %arg5[%c368_408, %c256_409] : memref<400x512xbf16, #tpu.memory_space<vmem>>, vector<16x63xbf16>
    tpu.vector_store %arg5[%c368_408, %c256_409], %220 {strides = array<i32>} : memref<400x512xbf16, #tpu.memory_space<vmem>>, vector<16x63xbf16>,
    %c0_410 = arith.constant 0 : index
    %c2_411 = arith.constant 2 : index
    %c0_412 = arith.constant 0 : index
    %c20_413 = arith.constant 20 : index
    %222 = vector.load %arg1[%c0_410, %c2_411, %c0_412, %c20_413] : memref<1x4x16x83xbf16, #tpu.memory_space<vmem>>, vector<1x1x16x63xbf16>
    %223 = vector.shape_cast %222 : vector<1x1x16x63xbf16> to vector<16x63xbf16>
    %c384_414 = arith.constant 384 : index
    %c256_415 = arith.constant 256 : index
    %224 = vector.load %arg5[%c384_414, %c256_415] : memref<400x512xbf16, #tpu.memory_space<vmem>>, vector<16x63xbf16>
    tpu.vector_store %arg5[%c384_414, %c256_415], %223 {strides = array<i32>} : memref<400x512xbf16, #tpu.memory_space<vmem>>, vector<16x63xbf16>,
    %c0_416 = arith.constant 0 : index
    %c3_417 = arith.constant 3 : index
    %c0_418 = arith.constant 0 : index
    %c0_419 = arith.constant 0 : index
    %225 = vector.load %arg1[%c0_416, %c3_417, %c0_418, %c0_419] : memref<1x4x16x83xbf16, #tpu.memory_space<vmem>>, vector<1x1x16x63xbf16>
    %226 = vector.shape_cast %225 : vector<1x1x16x63xbf16> to vector<16x63xbf16>
    %c0_420 = arith.constant 0 : index
    %c384_421 = arith.constant 384 : index
    %227 = vector.load %arg5[%c0_420, %c384_421] : memref<400x512xbf16, #tpu.memory_space<vmem>>, vector<16x63xbf16>
    tpu.vector_store %arg5[%c0_420, %c384_421], %226 {strides = array<i32>} : memref<400x512xbf16, #tpu.memory_space<vmem>>, vector<16x63xbf16>,
    %c0_422 = arith.constant 0 : index
    %c2_423 = arith.constant 2 : index
    %c0_424 = arith.constant 0 : index
    %c1_425 = arith.constant 1 : index
    %228 = vector.load %arg1[%c0_422, %c2_423, %c0_424, %c1_425] : memref<1x4x16x83xbf16, #tpu.memory_space<vmem>>, vector<1x1x16x63xbf16>
    %229 = vector.shape_cast %228 : vector<1x1x16x63xbf16> to vector<16x63xbf16>
    %c16_426 = arith.constant 16 : index
    %c384_427 = arith.constant 384 : index
    %230 = vector.load %arg5[%c16_426, %c384_427] : memref<400x512xbf16, #tpu.memory_space<vmem>>, vector<16x63xbf16>
    tpu.vector_store %arg5[%c16_426, %c384_427], %229 {strides = array<i32>} : memref<400x512xbf16, #tpu.memory_space<vmem>>, vector<16x63xbf16>,
    %c0_428 = arith.constant 0 : index
    %c3_429 = arith.constant 3 : index
    %c0_430 = arith.constant 0 : index
    %c1_431 = arith.constant 1 : index
    %231 = vector.load %arg1[%c0_428, %c3_429, %c0_430, %c1_431] : memref<1x4x16x83xbf16, #tpu.memory_space<vmem>>, vector<1x1x16x63xbf16>
    %232 = vector.shape_cast %231 : vector<1x1x16x63xbf16> to vector<16x63xbf16>
    %c32_432 = arith.constant 32 : index
    %c384_433 = arith.constant 384 : index
    %233 = vector.load %arg5[%c32_432, %c384_433] : memref<400x512xbf16, #tpu.memory_space<vmem>>, vector<16x63xbf16>
    tpu.vector_store %arg5[%c32_432, %c384_433], %232 {strides = array<i32>} : memref<400x512xbf16, #tpu.memory_space<vmem>>, vector<16x63xbf16>,
    %c0_434 = arith.constant 0 : index
    %c2_435 = arith.constant 2 : index
    %c0_436 = arith.constant 0 : index
    %c2_437 = arith.constant 2 : index
    %234 = vector.load %arg1[%c0_434, %c2_435, %c0_436, %c2_437] : memref<1x4x16x83xbf16, #tpu.memory_space<vmem>>, vector<1x1x16x63xbf16>
    %235 = vector.shape_cast %234 : vector<1x1x16x63xbf16> to vector<16x63xbf16>
    %c48_438 = arith.constant 48 : index
    %c384_439 = arith.constant 384 : index
    %236 = vector.load %arg5[%c48_438, %c384_439] : memref<400x512xbf16, #tpu.memory_space<vmem>>, vector<16x63xbf16>
    tpu.vector_store %arg5[%c48_438, %c384_439], %235 {strides = array<i32>} : memref<400x512xbf16, #tpu.memory_space<vmem>>, vector<16x63xbf16>,
    %c0_440 = arith.constant 0 : index
    %c3_441 = arith.constant 3 : index
    %c0_442 = arith.constant 0 : index
    %c2_443 = arith.constant 2 : index
    %237 = vector.load %arg1[%c0_440, %c3_441, %c0_442, %c2_443] : memref<1x4x16x83xbf16, #tpu.memory_space<vmem>>, vector<1x1x16x63xbf16>
    %238 = vector.shape_cast %237 : vector<1x1x16x63xbf16> to vector<16x63xbf16>
    %c64_444 = arith.constant 64 : index
    %c384_445 = arith.constant 384 : index
    %239 = vector.load %arg5[%c64_444, %c384_445] : memref<400x512xbf16, #tpu.memory_space<vmem>>, vector<16x63xbf16>
    tpu.vector_store %arg5[%c64_444, %c384_445], %238 {strides = array<i32>} : memref<400x512xbf16, #tpu.memory_space<vmem>>, vector<16x63xbf16>,
    %c0_446 = arith.constant 0 : index
    %c1_447 = arith.constant 1 : index
    %c0_448 = arith.constant 0 : index
    %c9_449 = arith.constant 9 : index
    %240 = vector.load %arg1[%c0_446, %c1_447, %c0_448, %c9_449] : memref<1x4x16x83xbf16, #tpu.memory_space<vmem>>, vector<1x1x16x63xbf16>
    %241 = vector.shape_cast %240 : vector<1x1x16x63xbf16> to vector<16x63xbf16>
    %c80_450 = arith.constant 80 : index
    %c384_451 = arith.constant 384 : index
    %242 = vector.load %arg5[%c80_450, %c384_451] : memref<400x512xbf16, #tpu.memory_space<vmem>>, vector<16x63xbf16>
    tpu.vector_store %arg5[%c80_450, %c384_451], %241 {strides = array<i32>} : memref<400x512xbf16, #tpu.memory_space<vmem>>, vector<16x63xbf16>,
    %c0_452 = arith.constant 0 : index
    %c0_453 = arith.constant 0 : index
    %c0_454 = arith.constant 0 : index
    %c10_455 = arith.constant 10 : index
    %243 = vector.load %arg1[%c0_452, %c0_453, %c0_454, %c10_455] : memref<1x4x16x83xbf16, #tpu.memory_space<vmem>>, vector<1x1x16x63xbf16>
    %244 = vector.shape_cast %243 : vector<1x1x16x63xbf16> to vector<16x63xbf16>
    %c96_456 = arith.constant 96 : index
    %c384_457 = arith.constant 384 : index
    %245 = vector.load %arg5[%c96_456, %c384_457] : memref<400x512xbf16, #tpu.memory_space<vmem>>, vector<16x63xbf16>
    tpu.vector_store %arg5[%c96_456, %c384_457], %244 {strides = array<i32>} : memref<400x512xbf16, #tpu.memory_space<vmem>>, vector<16x63xbf16>,
    %c0_458 = arith.constant 0 : index
    %c1_459 = arith.constant 1 : index
    %c0_460 = arith.constant 0 : index
    %c10_461 = arith.constant 10 : index
    %246 = vector.load %arg1[%c0_458, %c1_459, %c0_460, %c10_461] : memref<1x4x16x83xbf16, #tpu.memory_space<vmem>>, vector<1x1x16x63xbf16>
    %247 = vector.shape_cast %246 : vector<1x1x16x63xbf16> to vector<16x63xbf16>
    %c112_462 = arith.constant 112 : index
    %c384_463 = arith.constant 384 : index
    %248 = vector.load %arg5[%c112_462, %c384_463] : memref<400x512xbf16, #tpu.memory_space<vmem>>, vector<16x63xbf16>
    tpu.vector_store %arg5[%c112_462, %c384_463], %247 {strides = array<i32>} : memref<400x512xbf16, #tpu.memory_space<vmem>>, vector<16x63xbf16>,
    %c0_464 = arith.constant 0 : index
    %c0_465 = arith.constant 0 : index
    %c0_466 = arith.constant 0 : index
    %c11_467 = arith.constant 11 : index
    %249 = vector.load %arg1[%c0_464, %c0_465, %c0_466, %c11_467] : memref<1x4x16x83xbf16, #tpu.memory_space<vmem>>, vector<1x1x16x63xbf16>
    %250 = vector.shape_cast %249 : vector<1x1x16x63xbf16> to vector<16x63xbf16>
    %c128_468 = arith.constant 128 : index
    %c384_469 = arith.constant 384 : index
    %251 = vector.load %arg5[%c128_468, %c384_469] : memref<400x512xbf16, #tpu.memory_space<vmem>>, vector<16x63xbf16>
    tpu.vector_store %arg5[%c128_468, %c384_469], %250 {strides = array<i32>} : memref<400x512xbf16, #tpu.memory_space<vmem>>, vector<16x63xbf16>,
    %c0_470 = arith.constant 0 : index
    %c1_471 = arith.constant 1 : index
    %c0_472 = arith.constant 0 : index
    %c11_473 = arith.constant 11 : index
    %252 = vector.load %arg1[%c0_470, %c1_471, %c0_472, %c11_473] : memref<1x4x16x83xbf16, #tpu.memory_space<vmem>>, vector<1x1x16x63xbf16>
    %253 = vector.shape_cast %252 : vector<1x1x16x63xbf16> to vector<16x63xbf16>
    %c144_474 = arith.constant 144 : index
    %c384_475 = arith.constant 384 : index
    %254 = vector.load %arg5[%c144_474, %c384_475] : memref<400x512xbf16, #tpu.memory_space<vmem>>, vector<16x63xbf16>
    tpu.vector_store %arg5[%c144_474, %c384_475], %253 {strides = array<i32>} : memref<400x512xbf16, #tpu.memory_space<vmem>>, vector<16x63xbf16>,
    %c0_476 = arith.constant 0 : index
    %c3_477 = arith.constant 3 : index
    %c0_478 = arith.constant 0 : index
    %c9_479 = arith.constant 9 : index
    %255 = vector.load %arg1[%c0_476, %c3_477, %c0_478, %c9_479] : memref<1x4x16x83xbf16, #tpu.memory_space<vmem>>, vector<1x1x16x63xbf16>
    %256 = vector.shape_cast %255 : vector<1x1x16x63xbf16> to vector<16x63xbf16>
    %c160_480 = arith.constant 160 : index
    %c384_481 = arith.constant 384 : index
    %257 = vector.load %arg5[%c160_480, %c384_481] : memref<400x512xbf16, #tpu.memory_space<vmem>>, vector<16x63xbf16>
    tpu.vector_store %arg5[%c160_480, %c384_481], %256 {strides = array<i32>} : memref<400x512xbf16, #tpu.memory_space<vmem>>, vector<16x63xbf16>,
    %c0_482 = arith.constant 0 : index
    %c2_483 = arith.constant 2 : index
    %c0_484 = arith.constant 0 : index
    %c10_485 = arith.constant 10 : index
    %258 = vector.load %arg1[%c0_482, %c2_483, %c0_484, %c10_485] : memref<1x4x16x83xbf16, #tpu.memory_space<vmem>>, vector<1x1x16x63xbf16>
    %259 = vector.shape_cast %258 : vector<1x1x16x63xbf16> to vector<16x63xbf16>
    %c176_486 = arith.constant 176 : index
    %c384_487 = arith.constant 384 : index
    %260 = vector.load %arg5[%c176_486, %c384_487] : memref<400x512xbf16, #tpu.memory_space<vmem>>, vector<16x63xbf16>
    tpu.vector_store %arg5[%c176_486, %c384_487], %259 {strides = array<i32>} : memref<400x512xbf16, #tpu.memory_space<vmem>>, vector<16x63xbf16>,
    %c0_488 = arith.constant 0 : index
    %c3_489 = arith.constant 3 : index
    %c0_490 = arith.constant 0 : index
    %c10_491 = arith.constant 10 : index
    %261 = vector.load %arg1[%c0_488, %c3_489, %c0_490, %c10_491] : memref<1x4x16x83xbf16, #tpu.memory_space<vmem>>, vector<1x1x16x63xbf16>
    %262 = vector.shape_cast %261 : vector<1x1x16x63xbf16> to vector<16x63xbf16>
    %c192_492 = arith.constant 192 : index
    %c384_493 = arith.constant 384 : index
    %263 = vector.load %arg5[%c192_492, %c384_493] : memref<400x512xbf16, #tpu.memory_space<vmem>>, vector<16x63xbf16>
    tpu.vector_store %arg5[%c192_492, %c384_493], %262 {strides = array<i32>} : memref<400x512xbf16, #tpu.memory_space<vmem>>, vector<16x63xbf16>,
    %c0_494 = arith.constant 0 : index
    %c2_495 = arith.constant 2 : index
    %c0_496 = arith.constant 0 : index
    %c11_497 = arith.constant 11 : index
    %264 = vector.load %arg1[%c0_494, %c2_495, %c0_496, %c11_497] : memref<1x4x16x83xbf16, #tpu.memory_space<vmem>>, vector<1x1x16x63xbf16>
    %265 = vector.shape_cast %264 : vector<1x1x16x63xbf16> to vector<16x63xbf16>
    %c208_498 = arith.constant 208 : index
    %c384_499 = arith.constant 384 : index
    %266 = vector.load %arg5[%c208_498, %c384_499] : memref<400x512xbf16, #tpu.memory_space<vmem>>, vector<16x63xbf16>
    tpu.vector_store %arg5[%c208_498, %c384_499], %265 {strides = array<i32>} : memref<400x512xbf16, #tpu.memory_space<vmem>>, vector<16x63xbf16>,
    %c0_500 = arith.constant 0 : index
    %c3_501 = arith.constant 3 : index
    %c0_502 = arith.constant 0 : index
    %c11_503 = arith.constant 11 : index
    %267 = vector.load %arg1[%c0_500, %c3_501, %c0_502, %c11_503] : memref<1x4x16x83xbf16, #tpu.memory_space<vmem>>, vector<1x1x16x63xbf16>
    %268 = vector.shape_cast %267 : vector<1x1x16x63xbf16> to vector<16x63xbf16>
    %c224_504 = arith.constant 224 : index
    %c384_505 = arith.constant 384 : index
    %269 = vector.load %arg5[%c224_504, %c384_505] : memref<400x512xbf16, #tpu.memory_space<vmem>>, vector<16x63xbf16>
    tpu.vector_store %arg5[%c224_504, %c384_505], %268 {strides = array<i32>} : memref<400x512xbf16, #tpu.memory_space<vmem>>, vector<16x63xbf16>,
    %c0_506 = arith.constant 0 : index
    %c1_507 = arith.constant 1 : index
    %c0_508 = arith.constant 0 : index
    %c18_509 = arith.constant 18 : index
    %270 = vector.load %arg1[%c0_506, %c1_507, %c0_508, %c18_509] : memref<1x4x16x83xbf16, #tpu.memory_space<vmem>>, vector<1x1x16x63xbf16>
    %271 = vector.shape_cast %270 : vector<1x1x16x63xbf16> to vector<16x63xbf16>
    %c240_510 = arith.constant 240 : index
    %c384_511 = arith.constant 384 : index
    %272 = vector.load %arg5[%c240_510, %c384_511] : memref<400x512xbf16, #tpu.memory_space<vmem>>, vector<16x63xbf16>
    tpu.vector_store %arg5[%c240_510, %c384_511], %271 {strides = array<i32>} : memref<400x512xbf16, #tpu.memory_space<vmem>>, vector<16x63xbf16>,
    %c0_512 = arith.constant 0 : index
    %c0_513 = arith.constant 0 : index
    %c0_514 = arith.constant 0 : index
    %c19_515 = arith.constant 19 : index
    %273 = vector.load %arg1[%c0_512, %c0_513, %c0_514, %c19_515] : memref<1x4x16x83xbf16, #tpu.memory_space<vmem>>, vector<1x1x16x63xbf16>
    %274 = vector.shape_cast %273 : vector<1x1x16x63xbf16> to vector<16x63xbf16>
    %c256_516 = arith.constant 256 : index
    %c384_517 = arith.constant 384 : index
    %275 = vector.load %arg5[%c256_516, %c384_517] : memref<400x512xbf16, #tpu.memory_space<vmem>>, vector<16x63xbf16>
    tpu.vector_store %arg5[%c256_516, %c384_517], %274 {strides = array<i32>} : memref<400x512xbf16, #tpu.memory_space<vmem>>, vector<16x63xbf16>,
    %c0_518 = arith.constant 0 : index
    %c1_519 = arith.constant 1 : index
    %c0_520 = arith.constant 0 : index
    %c19_521 = arith.constant 19 : index
    %276 = vector.load %arg1[%c0_518, %c1_519, %c0_520, %c19_521] : memref<1x4x16x83xbf16, #tpu.memory_space<vmem>>, vector<1x1x16x63xbf16>
    %277 = vector.shape_cast %276 : vector<1x1x16x63xbf16> to vector<16x63xbf16>
    %c272_522 = arith.constant 272 : index
    %c384_523 = arith.constant 384 : index
    %278 = vector.load %arg5[%c272_522, %c384_523] : memref<400x512xbf16, #tpu.memory_space<vmem>>, vector<16x63xbf16>
    tpu.vector_store %arg5[%c272_522, %c384_523], %277 {strides = array<i32>} : memref<400x512xbf16, #tpu.memory_space<vmem>>, vector<16x63xbf16>,
    %c0_524 = arith.constant 0 : index
    %c0_525 = arith.constant 0 : index
    %c0_526 = arith.constant 0 : index
    %c20_527 = arith.constant 20 : index
    %279 = vector.load %arg1[%c0_524, %c0_525, %c0_526, %c20_527] : memref<1x4x16x83xbf16, #tpu.memory_space<vmem>>, vector<1x1x16x63xbf16>
    %280 = vector.shape_cast %279 : vector<1x1x16x63xbf16> to vector<16x63xbf16>
    %c288_528 = arith.constant 288 : index
    %c384_529 = arith.constant 384 : index
    %281 = vector.load %arg5[%c288_528, %c384_529] : memref<400x512xbf16, #tpu.memory_space<vmem>>, vector<16x63xbf16>
    tpu.vector_store %arg5[%c288_528, %c384_529], %280 {strides = array<i32>} : memref<400x512xbf16, #tpu.memory_space<vmem>>, vector<16x63xbf16>,
    %c0_530 = arith.constant 0 : index
    %c1_531 = arith.constant 1 : index
    %c0_532 = arith.constant 0 : index
    %c20_533 = arith.constant 20 : index
    %282 = vector.load %arg1[%c0_530, %c1_531, %c0_532, %c20_533] : memref<1x4x16x83xbf16, #tpu.memory_space<vmem>>, vector<1x1x16x63xbf16>
    %283 = vector.shape_cast %282 : vector<1x1x16x63xbf16> to vector<16x63xbf16>
    %c304_534 = arith.constant 304 : index
    %c384_535 = arith.constant 384 : index
    %284 = vector.load %arg5[%c304_534, %c384_535] : memref<400x512xbf16, #tpu.memory_space<vmem>>, vector<16x63xbf16>
    tpu.vector_store %arg5[%c304_534, %c384_535], %283 {strides = array<i32>} : memref<400x512xbf16, #tpu.memory_space<vmem>>, vector<16x63xbf16>,
    %c0_536 = arith.constant 0 : index
    %c3_537 = arith.constant 3 : index
    %c0_538 = arith.constant 0 : index
    %c18_539 = arith.constant 18 : index
    %285 = vector.load %arg1[%c0_536, %c3_537, %c0_538, %c18_539] : memref<1x4x16x83xbf16, #tpu.memory_space<vmem>>, vector<1x1x16x63xbf16>
    %286 = vector.shape_cast %285 : vector<1x1x16x63xbf16> to vector<16x63xbf16>
    %c320_540 = arith.constant 320 : index
    %c384_541 = arith.constant 384 : index
    %287 = vector.load %arg5[%c320_540, %c384_541] : memref<400x512xbf16, #tpu.memory_space<vmem>>, vector<16x63xbf16>
    tpu.vector_store %arg5[%c320_540, %c384_541], %286 {strides = array<i32>} : memref<400x512xbf16, #tpu.memory_space<vmem>>, vector<16x63xbf16>,
    %c0_542 = arith.constant 0 : index
    %c2_543 = arith.constant 2 : index
    %c0_544 = arith.constant 0 : index
    %c19_545 = arith.constant 19 : index
    %288 = vector.load %arg1[%c0_542, %c2_543, %c0_544, %c19_545] : memref<1x4x16x83xbf16, #tpu.memory_space<vmem>>, vector<1x1x16x63xbf16>
    %289 = vector.shape_cast %288 : vector<1x1x16x63xbf16> to vector<16x63xbf16>
    %c336_546 = arith.constant 336 : index
    %c384_547 = arith.constant 384 : index
    %290 = vector.load %arg5[%c336_546, %c384_547] : memref<400x512xbf16, #tpu.memory_space<vmem>>, vector<16x63xbf16>
    tpu.vector_store %arg5[%c336_546, %c384_547], %289 {strides = array<i32>} : memref<400x512xbf16, #tpu.memory_space<vmem>>, vector<16x63xbf16>,
    %c0_548 = arith.constant 0 : index
    %c3_549 = arith.constant 3 : index
    %c0_550 = arith.constant 0 : index
    %c19_551 = arith.constant 19 : index
    %291 = vector.load %arg1[%c0_548, %c3_549, %c0_550, %c19_551] : memref<1x4x16x83xbf16, #tpu.memory_space<vmem>>, vector<1x1x16x63xbf16>
    %292 = vector.shape_cast %291 : vector<1x1x16x63xbf16> to vector<16x63xbf16>
    %c352_552 = arith.constant 352 : index
    %c384_553 = arith.constant 384 : index
    %293 = vector.load %arg5[%c352_552, %c384_553] : memref<400x512xbf16, #tpu.memory_space<vmem>>, vector<16x63xbf16>
    tpu.vector_store %arg5[%c352_552, %c384_553], %292 {strides = array<i32>} : memref<400x512xbf16, #tpu.memory_space<vmem>>, vector<16x63xbf16>,
    %c0_554 = arith.constant 0 : index
    %c2_555 = arith.constant 2 : index
    %c0_556 = arith.constant 0 : index
    %c20_557 = arith.constant 20 : index
    %294 = vector.load %arg1[%c0_554, %c2_555, %c0_556, %c20_557] : memref<1x4x16x83xbf16, #tpu.memory_space<vmem>>, vector<1x1x16x63xbf16>
    %295 = vector.shape_cast %294 : vector<1x1x16x63xbf16> to vector<16x63xbf16>
    %c368_558 = arith.constant 368 : index
    %c384_559 = arith.constant 384 : index
    %296 = vector.load %arg5[%c368_558, %c384_559] : memref<400x512xbf16, #tpu.memory_space<vmem>>, vector<16x63xbf16>
    tpu.vector_store %arg5[%c368_558, %c384_559], %295 {strides = array<i32>} : memref<400x512xbf16, #tpu.memory_space<vmem>>, vector<16x63xbf16>,
    %c0_560 = arith.constant 0 : index
    %c3_561 = arith.constant 3 : index
    %c0_562 = arith.constant 0 : index
    %c20_563 = arith.constant 20 : index
    %297 = vector.load %arg1[%c0_560, %c3_561, %c0_562, %c20_563] : memref<1x4x16x83xbf16, #tpu.memory_space<vmem>>, vector<1x1x16x63xbf16>
    %298 = vector.shape_cast %297 : vector<1x1x16x63xbf16> to vector<16x63xbf16>
    %c384_564 = arith.constant 384 : index
    %c384_565 = arith.constant 384 : index
    %299 = vector.load %arg5[%c384_564, %c384_565] : memref<400x512xbf16, #tpu.memory_space<vmem>>, vector<16x63xbf16>
    tpu.vector_store %arg5[%c384_564, %c384_565], %298 {strides = array<i32>} : memref<400x512xbf16, #tpu.memory_space<vmem>>, vector<16x63xbf16>,
    %c0_566 = arith.constant 0 : index
    %c0_567 = arith.constant 0 : index
    %300 = vector.load %arg2[%c0_566, %c0_567] : memref<32x400xbf16, #tpu.memory_space<vmem>>, vector<32x400xbf16>
    %c0_568 = arith.constant 0 : index
    %c0_569 = arith.constant 0 : index
    %301 = vector.load %arg5[%c0_568, %c0_569] : memref<400x512xbf16, #tpu.memory_space<vmem>>, vector<400x512xbf16>
    %cst = arith.constant dense<0.000000e+00> : vector<32x512xf32>
    %302 = tpu.matmul %300, %301, %cst {dimension_numbers = #tpu.dot_dimension_numbers<[1], [0], [0], [1], [0, 0, 1, 1], [], []>} : vector<32x400xbf16>, vector<400x512xbf16>, vector<32x512xf32> -> vector<32x512xf32>
    %303 = vector.extract_strided_slice %302 {offsets = [0, 0], sizes = [32, 63], strides = [1, 1]} : vector<32x512xf32> to vector<32x63xf32>
    %304 = vector.extract_strided_slice %302 {offsets = [0, 128], sizes = [32, 63], strides = [1, 1]} : vector<32x512xf32> to vector<32x63xf32>
    %305 = arith.maximumf %303, %304 : vector<32x63xf32>
    %306 = vector.extract_strided_slice %302 {offsets = [0, 256], sizes = [32, 63], strides = [1, 1]} : vector<32x512xf32> to vector<32x63xf32>
    %307 = arith.maximumf %305, %306 : vector<32x63xf32>
    %308 = vector.extract_strided_slice %302 {offsets = [0, 384], sizes = [32, 63], strides = [1, 1]} : vector<32x512xf32> to vector<32x63xf32>
    %309 = arith.maximumf %307, %308 : vector<32x63xf32>
    %c0_570 = arith.constant 0 : index
    %c0_571 = arith.constant 0 : index
    %310 = vector.load %arg3[%c0_570, %c0_571] : memref<32x1xf32, #tpu.memory_space<vmem>>, vector<32x1xf32>
    %311 = vector.broadcast %310 : vector<32x1xf32> to vector<32x63xf32>
    %312 = arith.addf %309, %311 : vector<32x63xf32>
    %cst_572 = arith.constant 0.000000e+00 : f32
    %313 = vector.broadcast %cst_572 : f32 to vector<32x63xf32>
    %314 = arith.maximumf %312, %313 : vector<32x63xf32>
    %315 = arith.truncf %314 : vector<32x63xf32> to vector<32x63xbf16>
    %c0_573 = arith.constant 0 : index
    %c0_574 = arith.constant 0 : index
    %c0_575 = arith.constant 0 : index
    %316 = vector.load %arg4[%c0_573, %c0_574, %c0_575] : memref<1x32x63xbf16, #tpu.memory_space<vmem>>, vector<1x32x63xbf16>
    %317 = vector.shape_cast %316 : vector<1x32x63xbf16> to vector<32x63xbf16>
    %318 = vector.shape_cast %315 : vector<32x63xbf16> to vector<1x32x63xbf16>
    tpu.vector_store %arg4[%c0_573, %c0_574, %c0_575], %318 {strides = array<i32>} : memref<1x32x63xbf16, #tpu.memory_space<vmem>>, vector<1x32x63xbf16>,
    return
  }
  func.func @transform_0(%arg0: i32) -> (i32, i32, i32, i32) {
    %c0_i32 = arith.constant 0 : i32
    %c0_i32_0 = arith.constant 0 : i32
    %c0_i32_1 = arith.constant 0 : i32
    %c0_i32_2 = arith.constant 0 : i32
    return %arg0, %c0_i32, %c0_i32_0, %c0_i32_1 : i32, i32, i32, i32
  }
  func.func @transform_1(%arg0: i32) -> (i32, i32) {
    %c0_i32 = arith.constant 0 : i32
    %c0_i32_0 = arith.constant 0 : i32
    %c0_i32_1 = arith.constant 0 : i32
    return %c0_i32, %c0_i32_0 : i32, i32
  }
  func.func @transform_2(%arg0: i32) -> (i32, i32) {
    %c0_i32 = arith.constant 0 : i32
    %c0_i32_0 = arith.constant 0 : i32
    %c0_i32_1 = arith.constant 0 : i32
    return %c0_i32, %c0_i32_0 : i32, i32
  }
  func.func @transform_3(%arg0: i32) -> (i32, i32, i32) {
    %c0_i32 = arith.constant 0 : i32
    %c0_i32_0 = arith.constant 0 : i32
    %c0_i32_1 = arith.constant 0 : i32
    return %arg0, %c0_i32, %c0_i32_0 : i32, i32, i32
  }
}

module attributes {stable_mosaic.version = 11 : i64} {
  func.func @_fc_kernel(%arg0: i32, %arg1: memref<2x1568xbf16, #tpu.memory_space<vmem>>, %arg2: memref<1568x10xbf16, #tpu.memory_space<vmem>>, %arg3: memref<1x10xf32, #tpu.memory_space<vmem>>, %arg4: memref<2x10xf32, #tpu.memory_space<vmem>>) attributes {dimension_semantics = [#tpu.dimension_semantics<arbitrary>], iteration_bounds = array<i64: 1>, scalar_prefetch = 0 : i64, scratch_operands = 0 : i64, tpu.core_type = #tpu.core_type<tc>, window_params = [{pipeline_mode = #tpu.pipeline_mode<synchronous>, transform_indices = @transform_0, window_bounds = array<i64: 2, 1568>}, {pipeline_mode = #tpu.pipeline_mode<synchronous>, transform_indices = @transform_1, window_bounds = array<i64: 1568, 10>}, {pipeline_mode = #tpu.pipeline_mode<synchronous>, transform_indices = @transform_2, window_bounds = array<i64: 1, 10>}, {pipeline_mode = #tpu.pipeline_mode<synchronous>, transform_indices = @transform_3, window_bounds = array<i64: 2, 10>}]} {
    %c0 = arith.constant 0 : index
    %c0_0 = arith.constant 0 : index
    %0 = vector.load %arg1[%c0, %c0_0] : memref<2x1568xbf16, #tpu.memory_space<vmem>>, vector<2x1568xbf16>
    %c0_1 = arith.constant 0 : index
    %c0_2 = arith.constant 0 : index
    %1 = vector.load %arg2[%c0_1, %c0_2] : memref<1568x10xbf16, #tpu.memory_space<vmem>>, vector<1568x10xbf16>
    %cst = arith.constant dense<0.000000e+00> : vector<2x10xf32>
    %2 = tpu.matmul %0, %1, %cst {dimension_numbers = #tpu.dot_dimension_numbers<[1], [0], [0], [1], [0, 0, 1, 1], [], []>} : vector<2x1568xbf16>, vector<1568x10xbf16>, vector<2x10xf32> -> vector<2x10xf32>
    %c0_3 = arith.constant 0 : index
    %c0_4 = arith.constant 0 : index
    %3 = vector.load %arg3[%c0_3, %c0_4] : memref<1x10xf32, #tpu.memory_space<vmem>>, vector<1x10xf32>
    %4 = vector.broadcast %3 : vector<1x10xf32> to vector<2x10xf32>
    %5 = arith.addf %2, %4 : vector<2x10xf32>
    %c0_5 = arith.constant 0 : index
    %c0_6 = arith.constant 0 : index
    %6 = vector.load %arg4[%c0_5, %c0_6] : memref<2x10xf32, #tpu.memory_space<vmem>>, vector<2x10xf32>
    tpu.vector_store %arg4[%c0_5, %c0_6], %5 {strides = array<i32>} : memref<2x10xf32, #tpu.memory_space<vmem>>, vector<2x10xf32>,
    return
  }
  func.func @transform_0(%arg0: i32) -> (i32, i32) {
    %c0_i32 = arith.constant 0 : i32
    %c0_i32_0 = arith.constant 0 : i32
    %c0_i32_1 = arith.constant 0 : i32
    return %c0_i32, %c0_i32_0 : i32, i32
  }
  func.func @transform_1(%arg0: i32) -> (i32, i32) {
    %c0_i32 = arith.constant 0 : i32
    %c0_i32_0 = arith.constant 0 : i32
    %c0_i32_1 = arith.constant 0 : i32
    return %c0_i32, %c0_i32_0 : i32, i32
  }
  func.func @transform_2(%arg0: i32) -> (i32, i32) {
    %c0_i32 = arith.constant 0 : i32
    %c0_i32_0 = arith.constant 0 : i32
    %c0_i32_1 = arith.constant 0 : i32
    return %c0_i32, %c0_i32_0 : i32, i32
  }
  func.func @transform_3(%arg0: i32) -> (i32, i32) {
    %c0_i32 = arith.constant 0 : i32
    %c0_i32_0 = arith.constant 0 : i32
    %c0_i32_1 = arith.constant 0 : i32
    return %c0_i32, %c0_i32_0 : i32, i32
  }
}

</mosaic_0001>

<bundles_post_ra>
// kernel: cnn_forward.3
= control target key start
LH: loop header
LB: loop body
LE: loop exit
PB: predicated region body
PF: predicated region fallthrough
CT: control target
= control target key end

     0   :  { %s2253_s12 = smov 0   ;;  %s2887_s0 = inlined_call_operand.vmem [shape: bf16[2,4,8,258], index: 0, kind: input, shape index: {}]   ;;  %s2888_s1 = inlined_call_operand.vmem [shape: bf16[16,200], index: 1, kind: input, shape index: {}]   ;;  %s2889_s2 = inlined_call_operand.vmem [shape: f32[16,1], index: 2, kind: input, shape index: {}]   ;;  %s2890_s3 = inlined_call_operand.vmem [shape: bf16[2,16,224], index: 3, kind: output, shape index: {}]  }
   0x1 LB: > { %s1971_s13 = sadd.s32 4294967295, %s2222_s12   ;;  %p1975_p0 = scmp.ge.s32.totalorder %s2222_s12, 1  ;;  %s2222_s12 = sphi %s2253_s12, %s13_s12  }
   0x2   : > { %p137_p1 = scmp.lt.s32.totalorder %s2222_s12, 3 }
   0x4   : > { %p138_p2 = pnand %p1975_p0, %p137_p1 }
   0x5   : > { %p161_p3 = scmp.lt.s32.totalorder (!%p138_p2), %s1971_s13, 1  ;;  %vm173_vm0 = vcmask (!%p138_p2), 1043456   ;;  %vm174_vm1 = vcmask (!%p138_p2), 785412   ;;  %s2224_s18 = smov (!%p138_p2), 127   ;;  %v2426_v18 = vld [vmem:[%s2888_s1 + $0x4] ss:$8 sps:$4 sm:$0xff] (!%p138_p2)  }
   0x6   : > { %141 = sbr.rel (%p138_p2) target bundleno = 596 (0x254), region = 32  ;;  %vm2265_vm2 = vmor (!%p138_p2), %vm174_vm1, %vm173_vm0  ;;  %s2225_s19 = smov (!%p138_p2), 126   ;;  %vm1670_vm3 = vcmask (!%p138_p2), 588800   ;;  %vm185_vm4 = vcmask (!%p138_p2), 1039360   ;;  %vm202_vm5 = vcmask (!%p138_p2), 1031168   ;;  %vm241_vm6 = vcmask (!%p138_p2), 916480  }
   0x7   : > { %s2226_s20 = smov (!%p138_p2), 112   ;;  %s2227_s21 = smov (!%p138_p2), 111   ;;  %2174 = vmatprep.mubr.msk.bf16.mxu0 (!%p138_p2), %vm1670_vm3, %v2426_v18  ;;  %2176 = vmatprep.mubr.msk.bf16.mxu1 (!%p138_p2), %vm1670_vm3, %v2426_v18  ;;  %vm258_vm7 = vcmask (!%p138_p2), 908288   ;;  %vm275_vm8 = vcmask (!%p138_p2), 900096   ;;  %vm324_vm9 = vcmask (!%p138_p2), 785408   ;;  %vm348_vm10 = vcmask (!%p138_p2), 777216  }
   0x8   : > { %s2228_s22 = smov (!%p138_p2), 110   ;;  %s2229_s23 = smov (!%p138_p2), 96   ;;  %vm377_vm11 = vcmask (!%p138_p2), 769024  }
   0x9   : > { %s2230_s24 = smov (!%p138_p2), 95   ;;  %s2231_s25 = smov (!%p138_p2), 94  }
   0xd   : > { %s2894_s13 = smov (!%p161_p3, %s1971_s13), 1 }
   0xe   : > { %s2188_s14 = smul.u32 48, %s2894_s13  ;;  %s2185_s9 = sshll.u32 %s2894_s13, 4 }
  0x10   : > { %s2272_s17 = scalar_lea.vmem %s2887_s0, %s2188_s14  ;;  %s170_s14 = scalar_lea.vmem %s2890_s3, %s2185_s9 }
  0x11   : > { %v2275_v1 = vld [vmem:[%s2272_s17] sm:$0xff]  ;;  %v2278_v2 = vld [vmem:[%s2272_s17 + $0xc] sm:$0xff]  ;;  %v2281_v3 = vld [vmem:[%s2272_s17 + $0x18] sm:$0xff] }
  0x12   : > { %385 = vrot.lane.b32.xlu0 %v2275_v1, %s2224_s18  ;;  %191 = vrot.lane.b32.xlu1 %v2278_v2, %s2224_s18  ;;  %v2288_v4 = vld [vmem:[%s2272_s17 + $0x24] sm:$0xff]  ;;  %382 = vst.msk [vmem:[#allocation2 + $0x8] sm:$0xff] %vm2265_vm2, %v2278_v2  ;;  %176 = vst.msk [vmem:[#allocation2] sm:$0xff] %vm2265_vm2, %v2275_v1  ;;  %v2381_v10 = vld [vmem:[%s2272_s17 + $0x18] sm:$0xff] }
  0x13   : > { %179 = vst.msk [vmem:[#allocation2 + $0x20] sm:$0xff] %vm2265_vm2, %v2278_v2  ;;  %208 = vst.msk [vmem:[#allocation2 + $0xa0] sm:$0xff] %vm2265_vm2, %v2281_v3  ;;  %v538_v9 = vld [vmem:[%s2272_s17 + $0x8] sm:$0xf]  ;;  %v1995_v13 = vld [vmem:[%s2272_s17 + $0x14] sm:$0xf] }
  0x14   : > { %211 = vst.msk [vmem:[#allocation2 + $0xc0] sm:$0xff] %vm2265_vm2, %v2288_v4  ;;  %416 = vst.msk [vmem:[#allocation2 + $0xa8] sm:$0xff] %vm2265_vm2, %v2288_v4  ;;  %v2391_v11 = vld [vmem:[%s2272_s17 + $0x24] sm:$0xff]  ;;  %v2014_v14 = vld [vmem:[%s2272_s17 + $0x14] sm:$0xf] }
  0x15   : > { %594 = vst.msk [vmem:[#allocation2 + $0x10] sm:$0xff] %vm2265_vm2, %v2381_v10  ;;  %v337_v12 = vld [vmem:[%s2272_s17 + $0x8] sm:$0xf]  ;;  %596 = vst.msk [vmem:[#allocation2 + $0x30] sm:$0xff] %vm2265_vm2, %v2391_v11  ;;  %v2016_v17 = vld [vmem:[%s2272_s17 + $0x14] sm:$0xf] }
  0x16   : > { %393 = vrot.lane.b32.xlu1 %v2278_v2, %s2224_s18  ;;  %182 = vrot.lane.b32.xlu0 %v2275_v1, %s2224_s18  ;;  %818 = vst.msk [vmem:[#allocation2 + $0x18] sm:$0xff] %vm2265_vm2, %v2391_v11  ;;  %v566_v15 = vld [vmem:[%s2272_s17 + $0x8] sm:$0xf] }
  0x17   : > { %v367_v16 = vld [vmem:[%s2272_s17 + $0x8] sm:$0xf] }
  0x19   : > { %v1061_v5 = vld [vmem:[#allocation2] sm:$0xff]  ;;  %v1062_v35 = vld [vmem:[#allocation2 + $0x8] sm:$0xff] }
  0x1a   : > { %v1065_v6 = vld [vmem:[#allocation2 + $0x20] sm:$0xff]  ;;  %199 = vrot.lane.b32.xlu1 %v2275_v1, %s2225_s19  ;;  %401 = vrot.lane.b32.xlu0 %v2275_v1, %s2225_s19 }
  0x1b   : > { %v2070_v7 = vcombine.high %v1061_v5, %v1065_v6  ;;  %v2069_v8 = vcombine.low %v1061_v5, %v1065_v6  ;;  %v1081_v55 = vld [vmem:[#allocation2 + $0xa0] sm:$0xff] }
  0x1d   : > { %1698 = vmatprep.subr.bf16.mxu0 %v2070_v7 }
  0x1e   : > { %1699 = vmatpush1.bf16.msra.mxu0 %v2069_v8  ;;  %214 = vrot.lane.b32.xlu1 %v2281_v3, %s2224_s18 }
  0x1f   : > { %409 = vrot.lane.b32.xlu0 %v2278_v2, %s2225_s19 }
  0x22   : > { %427 = vrot.lane.b32.xlu1 %v2288_v4, %s2224_s18 }
  0x23   : > { %419 = vrot.lane.b32.xlu0 %v2281_v3, %s2224_s18 }
  0x26   : > { %230 = vrot.lane.b32.xlu1 %v2281_v3, %s2225_s19 }
  0x27   : > { %222 = vrot.lane.b32.xlu0 %v2288_v4, %s2224_s18 }
  0x2a   : > { %443 = vrot.lane.b32.xlu1 %v2288_v4, %s2225_s19 }
  0x2b   : > { %435 = vrot.lane.b32.xlu0 %v2281_v3, %s2225_s19 }
  0x2e   : > { %247 = vrot.lane.b32.xlu1 %v2278_v2, %s2226_s20 }
  0x2f   : > { %238 = vrot.lane.b32.xlu0 %v2275_v1, %s2226_s20 }
  0x32   : > { %459 = vrot.lane.b32.xlu1 %v2275_v1, %s2227_s21 }
  0x33   : > { %451 = vrot.lane.b32.xlu0 %v2278_v2, %s2226_s20 }
  0x36   : > { %264 = vrot.lane.b32.xlu1 %v2278_v2, %s2227_s21 }
  0x37   : > { %255 = vrot.lane.b32.xlu0 %v2275_v1, %s2227_s21 }
  0x3a   : > { %475 = vrot.lane.b32.xlu1 %v2275_v1, %s2228_s22 }
  0x3b   : > { %467 = vrot.lane.b32.xlu0 %v2278_v2, %s2227_s21 }
  0x3e   : > { %281 = vrot.lane.b32.xlu1 %v2281_v3, %s2226_s20 }
  0x3f   : > { %272 = vrot.lane.b32.xlu0 %v2275_v1, %s2228_s22 }
  0x42   : > { %491 = vrot.lane.b32.xlu1 %v2288_v4, %s2226_s20 }
  0x43   : > { %483 = vrot.lane.b32.xlu0 %v2278_v2, %s2228_s22 }
  0x46   : > { %297 = vrot.lane.b32.xlu1 %v2281_v3, %s2227_s21 }
  0x47   : > { %289 = vrot.lane.b32.xlu0 %v2288_v4, %s2226_s20 }
  0x4a   : > { %507 = vrot.lane.b32.xlu1 %v2288_v4, %s2227_s21 }
  0x4b   : > { %499 = vrot.lane.b32.xlu0 %v2281_v3, %s2227_s21 }
  0x4e   : > { %313 = vrot.lane.b32.xlu1 %v2281_v3, %s2228_s22 }
  0x4f   : > { %305 = vrot.lane.b32.xlu0 %v2288_v4, %s2227_s21 }
  0x52   : > { %523 = vrot.lane.b32.xlu1 %v2288_v4, %s2228_s22 }
  0x53   : > { %515 = vrot.lane.b32.xlu0 %v2281_v3, %s2228_s22 }
  0x56   : > { %330 = vrot.lane.b32.xlu1 %v2278_v2, %s2229_s23 }
  0x57   : > { %321 = vrot.lane.b32.xlu0 %v2275_v1, %s2229_s23 }
  0x5a   : > { %543 = vrot.lane.b32.xlu1 %v538_v9, %s2230_s24 }
  0x5b   : > { %541 = vrot.lane.b32.xlu0 %v2275_v1, %s2230_s24 }
  0x5e   : > { %340 = vrot.lane.b32.xlu1 %v2275_v1, %s2230_s24 }
  0x5f   : > { %531 = vrot.lane.b32.xlu0 %v2278_v2, %s2229_s23 }
  0x62   : > { %356 = vrot.lane.b32.xlu1 %v2278_v2, %s2230_s24 }
  0x63   : > { %342 = vrot.lane.b32.xlu0 %v337_v12, %s2230_s24  ;;  %v1085_v12 = vld [vmem:[#allocation2 + $0xc0] sm:$0xff] }
  0x66   : > { %555 = vrot.lane.b32.xlu1 %v2278_v2, %s2230_s24 }
  0x67   : > { %358 = vrot.lane.b32.xlu0 %v1995_v13, %s2230_s24  ;;  %v1082_v13 = vld [vmem:[#allocation2 + $0xa8] sm:$0xff] }
  0x6a   : > { %569 = vrot.lane.b32.xlu1 %v2275_v1, %s2231_s25 }
  0x6b   : > { %557 = vrot.lane.b32.xlu0 %v2014_v14, %s2230_s24 }
  0x6e   : > { %370 = vrot.lane.b32.xlu1 %v2275_v1, %s2231_s25 }
  0x6f   : > { %571 = vrot.lane.b32.xlu0 %v566_v15, %s2231_s25 }
  0x72   : > { %583 = vrot.lane.b32.xlu1 %v2278_v2, %s2231_s25 }
  0x73   : > { %372 = vrot.lane.b32.xlu0 %v367_v16, %s2231_s25 }
  0x76   : > { %821 = vrot.lane.b32.xlu1 %v2281_v3, %s2224_s18 }
  0x77   : > { %585 = vrot.lane.b32.xlu0 %v2016_v17, %s2231_s25 }
  0x7a   : > { %607 = vrot.lane.b32.xlu1 %v2288_v4, %s2224_s18 }
  0x7b   : > { %599 = vrot.lane.b32.xlu0 %v2281_v3, %s2224_s18 }
  0x7e   : > { %837 = vrot.lane.b32.xlu1 %v2281_v3, %s2225_s19 }
  0x7f   : > { %829 = vrot.lane.b32.xlu0 %v2288_v4, %s2224_s18 }
  0x82   : > { %623 = vrot.lane.b32.xlu1 %v2275_v1, %s2226_s20 }
  0x83   : > { %615 = vrot.lane.b32.xlu0 %v2281_v3, %s2225_s19 }
  0x84   : > { %v386_v19 = vpop.permute.xlu0 %385  ;;  %v192_v20 = vpop.permute.xlu1 %191 }
  0x85   : > { %v387_v21 = vrot.slane %v386_v19, 4  ;;  %v193_v22 = vrot.slane %v192_v20, 4 }
  0x86   : > { %853 = vrot.lane.b32.xlu1 %v2278_v2, %s2226_s20 }
  0x87   : > { %845 = vrot.lane.b32.xlu0 %v2288_v4, %s2225_s19  ;;  %v388_v23 = vsel %vm185_vm4, %v386_v19, %v387_v21  ;;  %v194_v24 = vsel %vm185_vm4, %v192_v20, %v193_v22 }
  0x88   : > { %390 = vst.msk [vmem:[#allocation2 + $0x28] sm:$0xff] %vm2265_vm2, %v388_v23  ;;  %196 = vst.msk [vmem:[#allocation2 + $0x60] sm:$0xff] %vm2265_vm2, %v194_v24  ;;  %v394_v25 = vpop.permute.xlu1 %393  ;;  %v183_v26 = vpop.permute.xlu0 %182 }
  0x89   : > { %v395_v27 = vrot.slane %v394_v25, 4  ;;  %v184_v28 = vrot.slane %v183_v26, 4 }
  0x8a   : > { %639 = vrot.lane.b32.xlu1 %v2275_v1, %s2227_s21 }
  0x8b   : > { %631 = vrot.lane.b32.xlu0 %v2278_v2, %s2226_s20  ;;  %v396_v29 = vsel %vm185_vm4, %v394_v25, %v395_v27  ;;  %v186_v30 = vsel %vm185_vm4, %v183_v26, %v184_v28 }
  0x8c   : > { %398 = vst.msk [vmem:[#allocation2 + $0x48] sm:$0xff] %vm2265_vm2, %v396_v29  ;;  %188 = vst.msk [vmem:[#allocation2 + $0x40] sm:$0xff] %vm2265_vm2, %v186_v30  ;;  %v200_v31 = vpop.permute.xlu1 %199  ;;  %v402_v32 = vpop.permute.xlu0 %401 }
  0x8d   : > { %v201_v33 = vrot.slane %v200_v31, 4  ;;  %v403_v34 = vrot.slane %v402_v32, 4 }
  0x8e   : > { %869 = vrot.lane.b32.xlu1 %v2278_v2, %s2227_s21 }
  0x8f   : > { %861 = vrot.lane.b32.xlu0 %v2275_v1, %s2227_s21  ;;  %v203_v36 = vsel %vm202_vm5, %v200_v31, %v201_v33  ;;  %v404_v37 = vsel %vm202_vm5, %v402_v32, %v403_v34  ;;  %v1066_v38 = vld [vmem:[#allocation2 + $0x28] sm:$0xff]  ;;  %v1073_v48 = vld [vmem:[#allocation2 + $0x60] sm:$0xff] }
  0x90   : > { %205 = vst.msk [vmem:[#allocation2 + $0x80] sm:$0xff] %vm2265_vm2, %v203_v36  ;;  %406 = vst.msk [vmem:[#allocation2 + $0x68] sm:$0xff] %vm2265_vm2, %v404_v37  ;;  %v215_v39 = vpop.permute.xlu1 %214  ;;  %v2072_v41 = vcombine.high %v1062_v35, %v1066_v38  ;;  %v2071_v42 = vcombine.low %v1062_v35, %v1066_v38 }
  0x91   : > { %v410_v40 = vpop.permute.xlu0 %409  ;;  %v216_v43 = vrot.slane %v215_v39, 4 }
  0x92   : > { %v411_v44 = vrot.slane %v410_v40, 4  ;;  %1741 = vmatprep.subr.bf16.mxu1 %v2072_v41  ;;  %655 = vrot.lane.b32.xlu1 %v2275_v1, %s2228_s22 }
  0x93   : > { %v217_v45 = vsel %vm185_vm4, %v215_v39, %v216_v43  ;;  %647 = vrot.lane.b32.xlu0 %v2278_v2, %s2227_s21  ;;  %1742 = vmatpush1.bf16.msra.mxu1 %v2071_v42  ;;  %v1069_v47 = vld [vmem:[#allocation2 + $0x40] sm:$0xff]  ;;  %v1070_v59 = vld [vmem:[#allocation2 + $0x48] sm:$0xff] }
  0x94   : > { %v412_v46 = vsel %vm202_vm5, %v410_v40, %v411_v44  ;;  %219 = vst.msk [vmem:[#allocation2 + $0xe0] sm:$0xff] %vm2265_vm2, %v217_v45  ;;  %v428_v49 = vpop.permute.xlu1 %427  ;;  %v2078_v51 = vcombine.high %v1069_v47, %v1073_v48  ;;  %v2077_v52 = vcombine.low %v1069_v47, %v1073_v48 }
  0x95   : > { %414 = vst.msk [vmem:[#allocation2 + $0x88] sm:$0xff] %vm2265_vm2, %v412_v46  ;;  %v420_v50 = vpop.permute.xlu0 %419  ;;  %v429_v53 = vrot.slane %v428_v49, 4 }
  0x96   : > { %v421_v54 = vrot.slane %v420_v50, 4  ;;  %885 = vrot.lane.b32.xlu1 %v2278_v2, %s2228_s22  ;;  %1700 = vmatprep.subr.bf16.mxu0 %v2078_v51 }
  0x97   : > { %v430_v56 = vsel %vm185_vm4, %v428_v49, %v429_v53  ;;  %877 = vrot.lane.b32.xlu0 %v2275_v1, %s2228_s22  ;;  %1701 = vmatpush1.bf16.msra.mxu0 %v2077_v52  ;;  %v1077_v58 = vld [vmem:[#allocation2 + $0x80] sm:$0xff]  ;;  %v1074_v60 = vld [vmem:[#allocation2 + $0x68] sm:$0xff] }
  0x98   : > { %v422_v57 = vsel %vm185_vm4, %v420_v50, %v421_v54  ;;  %432 = vst.msk [vmem:[#allocation2 + $0xe8] sm:$0xff] %vm2265_vm2, %v430_v56  ;;  %v231_v61 = vpop.permute.xlu1 %230  ;;  %v2086_v63 = vcombine.high %v1077_v58, %v1081_v55  ;;  %v2080_v5 = vcombine.high %v1070_v59, %v1074_v60  ;;  %v2085_v6 = vcombine.low %v1077_v58, %v1081_v55 }
  0x99   : > { %424 = vst.msk [vmem:[#allocation2 + $0xc8] sm:$0xff] %vm2265_vm2, %v422_v57  ;;  %v223_v62 = vpop.permute.xlu0 %222  ;;  %v2079_v7 = vcombine.low %v1070_v59, %v1074_v60  ;;  %v232_v8 = vrot.slane %v231_v61, 4 }
  0x9a   : > { %v224_v9 = vrot.slane %v223_v62, 4  ;;  %671 = vrot.lane.b32.xlu1 %v2288_v4, %s2226_s20  ;;  %1702 = vmatprep.subr.bf16.mxu0 %v2086_v63 }
  0x9b   : > { %v233_v14 = vsel %vm202_vm5, %v231_v61, %v232_v8  ;;  %663 = vrot.lane.b32.xlu0 %v2281_v3, %s2226_s20  ;;  %1743 = vmatprep.subr.bf16.mxu1 %v2080_v5  ;;  %v1089_v16 = vld [vmem:[#allocation2 + $0xe0] sm:$0xff] }
  0x9c   : > { %v225_v15 = vsel %vm185_vm4, %v223_v62, %v224_v9  ;;  %v1078_v17 = vld [vmem:[#allocation2 + $0x88] sm:$0xff]  ;;  %235 = vst.msk [vmem:[#allocation2 + $0x120] sm:$0xff] %vm2265_vm2, %v233_v14  ;;  %1703 = vmatpush1.bf16.msra.mxu0 %v2085_v6  ;;  %1744 = vmatpush1.bf16.msra.mxu1 %v2079_v7  ;;  %v444_v19 = vpop.permute.xlu1 %443  ;;  %v2094_v21 = vcombine.high %v1085_v12, %v1089_v16 }
  0x9d   : > { %227 = vst.msk [vmem:[#allocation2 + $0x100] sm:$0xff] %vm2265_vm2, %v225_v15  ;;  %v436_v20 = vpop.permute.xlu0 %435  ;;  %v2088_v22 = vcombine.high %v1078_v17, %v1082_v13  ;;  %v2093_v23 = vcombine.low %v1085_v12, %v1089_v16  ;;  %v445_v24 = vrot.slane %v444_v19, 4  ;;  %v2087_v26 = vcombine.low %v1078_v17, %v1082_v13  ;;  %v718_v12 = vld [vmem:[%s2272_s17 + $0x8] sm:$0xf] }
  0x9e   : > { %v437_v25 = vrot.slane %v436_v20, 4  ;;  %901 = vrot.lane.b32.xlu1 %v2281_v3, %s2227_s21  ;;  %1704 = vmatprep.subr.bf16.mxu0 %v2094_v21 }
  0x9f   : > { %v446_v27 = vsel %vm202_vm5, %v444_v19, %v445_v24  ;;  %893 = vrot.lane.b32.xlu0 %v2288_v4, %s2226_s20  ;;  %1745 = vmatprep.subr.bf16.mxu1 %v2088_v22  ;;  %v1090_v30 = vld [vmem:[#allocation2 + $0xe8] sm:$0xff] }
  0xa0   : > { %v438_v28 = vsel %vm202_vm5, %v436_v20, %v437_v25  ;;  %v1086_v29 = vld [vmem:[#allocation2 + $0xc8] sm:$0xff]  ;;  %448 = vst.msk [vmem:[#allocation2 + $0x128] sm:$0xff] %vm2265_vm2, %v446_v27  ;;  %1705 = vmatpush1.bf16.msra.mxu0 %v2093_v23  ;;  %1746 = vmatpush1.bf16.msra.mxu1 %v2087_v26  ;;  %v248_v31 = vpop.permute.xlu1 %247 }
  0xa1   : > { %440 = vst.msk [vmem:[#allocation2 + $0x108] sm:$0xff] %vm2265_vm2, %v438_v28  ;;  %v239_v32 = vpop.permute.xlu0 %238  ;;  %v2096_v33 = vcombine.high %v1086_v29, %v1090_v30  ;;  %v2095_v34 = vcombine.low %v1086_v29, %v1090_v30  ;;  %v249_v35 = vrot.slane %v248_v31, 4 }
  0xa2   : > { %v240_v36 = vrot.slane %v239_v32, 4  ;;  %687 = vrot.lane.b32.xlu1 %v2288_v4, %s2227_s21 }
  0xa3   : > { %1747 = vmatprep.subr.bf16.mxu1 %v2096_v33  ;;  %v250_v37 = vsel %vm241_vm6, %v248_v31, %v249_v35  ;;  %679 = vrot.lane.b32.xlu0 %v2281_v3, %s2227_s21  ;;  %v1097_v40 = vld [vmem:[#allocation2 + $0x120] sm:$0xff] }
  0xa4   : > { %v242_v38 = vsel %vm241_vm6, %v239_v32, %v240_v36  ;;  %v1093_v39 = vld [vmem:[#allocation2 + $0x100] sm:$0xff]  ;;  %252 = vst.msk [vmem:[#allocation2 + $0x160] sm:$0xff] %vm2265_vm2, %v250_v37  ;;  %1748 = vmatpush1.bf16.msra.mxu1 %v2095_v34  ;;  %v460_v41 = vpop.permute.xlu1 %459 }
  0xa5   : > { %244 = vst.msk [vmem:[#allocation2 + $0x140] sm:$0xff] %vm2265_vm2, %v242_v38  ;;  %v452_v42 = vpop.permute.xlu0 %451  ;;  %v2102_v43 = vcombine.high %v1093_v39, %v1097_v40  ;;  %v2101_v44 = vcombine.low %v1093_v39, %v1097_v40  ;;  %v461_v45 = vrot.slane %v460_v41, 4  ;;  %v940_v38 = vld [vmem:[%s2272_s17 + $0x8] sm:$0xf] }
  0xa6   : > { %v453_v46 = vrot.slane %v452_v42, 4  ;;  %917 = vrot.lane.b32.xlu1 %v2281_v3, %s2228_s22 }
  0xa7   : > { %1706 = vmatprep.subr.bf16.mxu0 %v2102_v43  ;;  %v462_v47 = vsel %vm258_vm7, %v460_v41, %v461_v45  ;;  %909 = vrot.lane.b32.xlu0 %v2288_v4, %s2227_s21  ;;  %v1098_v50 = vld [vmem:[#allocation2 + $0x128] sm:$0xff] }
  0xa8   : > { %v454_v48 = vsel %vm241_vm6, %v452_v42, %v453_v46  ;;  %1707 = vmatpush1.bf16.msra.mxu0 %v2101_v44  ;;  %v1094_v49 = vld [vmem:[#allocation2 + $0x108] sm:$0xff]  ;;  %464 = vst.msk [vmem:[#allocation2 + $0x168] sm:$0xff] %vm2265_vm2, %v462_v47  ;;  %v265_v51 = vpop.permute.xlu1 %264 }
  0xa9   : > { %456 = vst.msk [vmem:[#allocation2 + $0x148] sm:$0xff] %vm2265_vm2, %v454_v48  ;;  %v256_v52 = vpop.permute.xlu0 %255  ;;  %v2104_v53 = vcombine.high %v1094_v49, %v1098_v50  ;;  %v2103_v54 = vcombine.low %v1094_v49, %v1098_v50  ;;  %v266_v55 = vrot.slane %v265_v51, 4  ;;  %v2055_v49 = vld [vmem:[%s2272_s17 + $0x14] sm:$0xf] }
  0xaa   : > { %v257_v56 = vrot.slane %v256_v52, 4  ;;  %703 = vrot.lane.b32.xlu1 %v2275_v1, %s2229_s23 }
  0xab   : > { %1749 = vmatprep.subr.bf16.mxu1 %v2104_v53  ;;  %v267_v57 = vsel %vm258_vm7, %v265_v51, %v266_v55  ;;  %695 = vrot.lane.b32.xlu0 %v2281_v3, %s2228_s22  ;;  %v1105_v60 = vld [vmem:[#allocation2 + $0x160] sm:$0xff] }
  0xac   : > { %v259_v58 = vsel %vm258_vm7, %v256_v52, %v257_v56  ;;  %1750 = vmatpush1.bf16.msra.mxu1 %v2103_v54  ;;  %v1101_v59 = vld [vmem:[#allocation2 + $0x140] sm:$0xff]  ;;  %269 = vst.msk [vmem:[#allocation2 + $0x1a0] sm:$0xff] %vm2265_vm2, %v267_v57  ;;  %v476_v61 = vpop.permute.xlu1 %475 }
  0xad   : > { %261 = vst.msk [vmem:[#allocation2 + $0x180] sm:$0xff] %vm2265_vm2, %v259_v58  ;;  %v468_v62 = vpop.permute.xlu0 %467  ;;  %v2110_v63 = vcombine.high %v1101_v59, %v1105_v60  ;;  %v2109_v5 = vcombine.low %v1101_v59, %v1105_v60  ;;  %v477_v6 = vrot.slane %v476_v61, 4  ;;  %v2031_v60 = vld [vmem:[%s2272_s17 + $0x14] sm:$0xf] }
  0xae   : > { %v469_v7 = vrot.slane %v468_v62, 4  ;;  %933 = vrot.lane.b32.xlu1 %v2278_v2, %s2229_s23 }
  0xaf   : > { %1708 = vmatprep.subr.bf16.mxu0 %v2110_v63  ;;  %v478_v8 = vsel %vm275_vm8, %v476_v61, %v477_v6  ;;  %925 = vrot.lane.b32.xlu0 %v2288_v4, %s2228_s22  ;;  %v1106_v14 = vld [vmem:[#allocation2 + $0x168] sm:$0xff] }
  0xb0   : > { %v470_v9 = vsel %vm258_vm7, %v468_v62, %v469_v7  ;;  %1709 = vmatpush1.bf16.msra.mxu0 %v2109_v5  ;;  %v1102_v13 = vld [vmem:[#allocation2 + $0x148] sm:$0xff]  ;;  %480 = vst.msk [vmem:[#allocation2 + $0x1a8] sm:$0xff] %vm2265_vm2, %v478_v8  ;;  %v282_v15 = vpop.permute.xlu1 %281 }
  0xb1   : > { %472 = vst.msk [vmem:[#allocation2 + $0x188] sm:$0xff] %vm2265_vm2, %v470_v9  ;;  %v273_v16 = vpop.permute.xlu0 %272  ;;  %v2112_v17 = vcombine.high %v1102_v13, %v1106_v14  ;;  %v2111_v19 = vcombine.low %v1102_v13, %v1106_v14  ;;  %v283_v20 = vrot.slane %v282_v15, 4  ;;  %v746_v14 = vld [vmem:[%s2272_s17 + $0x8] sm:$0xf] }
  0xb2   : > { %v274_v21 = vrot.slane %v273_v16, 4  ;;  %723 = vrot.lane.b32.xlu1 %v718_v12, %s2230_s24 }
  0xb3   : > { %1751 = vmatprep.subr.bf16.mxu1 %v2112_v17  ;;  %v284_v22 = vsel %vm241_vm6, %v282_v15, %v283_v20  ;;  %721 = vrot.lane.b32.xlu0 %v2275_v1, %s2230_s24  ;;  %v1113_v25 = vld [vmem:[#allocation2 + $0x1a0] sm:$0xff] }
  0xb4   : > { %v276_v23 = vsel %vm275_vm8, %v273_v16, %v274_v21  ;;  %1752 = vmatpush1.bf16.msra.mxu1 %v2111_v19  ;;  %v1109_v24 = vld [vmem:[#allocation2 + $0x180] sm:$0xff]  ;;  %286 = vst.msk [vmem:[#allocation2 + $0x1e0] sm:$0xff] %vm2265_vm2, %v284_v22  ;;  %v492_v26 = vpop.permute.xlu1 %491 }
  0xb5   : > { %278 = vst.msk [vmem:[#allocation2 + $0x1c0] sm:$0xff] %vm2265_vm2, %v276_v23  ;;  %v484_v27 = vpop.permute.xlu0 %483  ;;  %v2118_v28 = vcombine.high %v1109_v24, %v1113_v25  ;;  %v2117_v29 = vcombine.low %v1109_v24, %v1113_v25  ;;  %v493_v30 = vrot.slane %v492_v26, 4 }
  0xb6   : > { %v485_v31 = vrot.slane %v484_v27, 4  ;;  %943 = vrot.lane.b32.xlu1 %v2275_v1, %s2230_s24 }
  0xb7   : > { %1710 = vmatprep.subr.bf16.mxu0 %v2118_v28  ;;  %v494_v32 = vsel %vm241_vm6, %v492_v26, %v493_v30  ;;  %711 = vrot.lane.b32.xlu0 %v2278_v2, %s2229_s23  ;;  %v1114_v35 = vld [vmem:[#allocation2 + $0x1a8] sm:$0xff] }
  0xb8   : > { %v486_v33 = vsel %vm275_vm8, %v484_v27, %v485_v31  ;;  %1711 = vmatpush1.bf16.msra.mxu0 %v2117_v29  ;;  %v1110_v34 = vld [vmem:[#allocation2 + $0x188] sm:$0xff]  ;;  %496 = vst.msk [vmem:[#allocation2 + $0x1e8] sm:$0xff] %vm2265_vm2, %v494_v32  ;;  %v298_v36 = vpop.permute.xlu1 %297 }
  0xb9   : > { %488 = vst.msk [vmem:[#allocation2 + $0x1c8] sm:$0xff] %vm2265_vm2, %v486_v33  ;;  %v290_v37 = vpop.permute.xlu0 %289  ;;  %v2120_v39 = vcombine.high %v1110_v34, %v1114_v35  ;;  %v2119_v40 = vcombine.low %v1110_v34, %v1114_v35  ;;  %v299_v41 = vrot.slane %v298_v36, 4 }
  0xba   : > { %v291_v42 = vrot.slane %v290_v37, 4  ;;  %957 = vrot.lane.b32.xlu1 %v2278_v2, %s2230_s24 }
  0xbb   : > { %1753 = vmatprep.subr.bf16.mxu1 %v2120_v39  ;;  %v300_v43 = vsel %vm258_vm7, %v298_v36, %v299_v41  ;;  %945 = vrot.lane.b32.xlu0 %v940_v38, %s2230_s24  ;;  %v1121_v46 = vld [vmem:[#allocation2 + $0x1e0] sm:$0xff]  ;;  %v2057_v36 = vld [vmem:[%s2272_s17 + $0x14] sm:$0xf] }
  0xbc   : > { %v292_v44 = vsel %vm241_vm6, %v290_v37, %v291_v42  ;;  %1754 = vmatpush1.bf16.msra.mxu1 %v2119_v40  ;;  %v1117_v45 = vld [vmem:[#allocation2 + $0x1c0] sm:$0xff]  ;;  %302 = vst.msk [vmem:[#allocation2 + $0x220] sm:$0xff] %vm2265_vm2, %v300_v43  ;;  %v508_v47 = vpop.permute.xlu1 %507 }
  0xbd   : > { %294 = vst.msk [vmem:[#allocation2 + $0x200] sm:$0xff] %vm2265_vm2, %v292_v44  ;;  %v500_v48 = vpop.permute.xlu0 %499  ;;  %v2126_v50 = vcombine.high %v1117_v45, %v1121_v46  ;;  %v2125_v51 = vcombine.low %v1117_v45, %v1121_v46  ;;  %v509_v52 = vrot.slane %v508_v47, 4 }
  0xbe   : > { %v501_v53 = vrot.slane %v500_v48, 4  ;;  %735 = vrot.lane.b32.xlu1 %v2278_v2, %s2230_s24 }
  0xbf   : > { %1712 = vmatprep.subr.bf16.mxu0 %v2126_v50  ;;  %v510_v54 = vsel %vm258_vm7, %v508_v47, %v509_v52  ;;  %959 = vrot.lane.b32.xlu0 %v2055_v49, %s2230_s24  ;;  %v1122_v57 = vld [vmem:[#allocation2 + $0x1e8] sm:$0xff] }
  0xc0   : > { %v502_v55 = vsel %vm258_vm7, %v500_v48, %v501_v53  ;;  %1713 = vmatpush1.bf16.msra.mxu0 %v2125_v51  ;;  %v1118_v56 = vld [vmem:[#allocation2 + $0x1c8] sm:$0xff]  ;;  %512 = vst.msk [vmem:[#allocation2 + $0x228] sm:$0xff] %vm2265_vm2, %v510_v54  ;;  %v314_v58 = vpop.permute.xlu1 %313  ;;  %v2060_v54 = vld [vmem:[%s2272_s17 + $0x20] sm:$0xf] }
  0xc1   : > { %504 = vst.msk [vmem:[#allocation2 + $0x208] sm:$0xff] %vm2265_vm2, %v502_v55  ;;  %v306_v59 = vpop.permute.xlu0 %305  ;;  %v2128_v61 = vcombine.high %v1118_v56, %v1122_v57  ;;  %v2127_v62 = vcombine.low %v1118_v56, %v1122_v57  ;;  %v315_v63 = vrot.slane %v314_v58, 4 }
  0xc2   : > { %v307_v5 = vrot.slane %v306_v59, 4  ;;  %749 = vrot.lane.b32.xlu1 %v2275_v1, %s2231_s25 }
  0xc3   : > { %1755 = vmatprep.subr.bf16.mxu1 %v2128_v61  ;;  %v316_v6 = vsel %vm275_vm8, %v314_v58, %v315_v63  ;;  %737 = vrot.lane.b32.xlu0 %v2031_v60, %s2230_s24  ;;  %v1129_v9 = vld [vmem:[#allocation2 + $0x220] sm:$0xff] }
  0xc4   : > { %v308_v7 = vsel %vm258_vm7, %v306_v59, %v307_v5  ;;  %1756 = vmatpush1.bf16.msra.mxu1 %v2127_v62  ;;  %v1125_v8 = vld [vmem:[#allocation2 + $0x200] sm:$0xff]  ;;  %318 = vst.msk [vmem:[#allocation2 + $0x260] sm:$0xff] %vm2265_vm2, %v316_v6  ;;  %v524_v12 = vpop.permute.xlu1 %523  ;;  %v2037_v6 = vld [vmem:[%s2272_s17 + $0x2c] sm:$0xf] }
  0xc5   : > { %310 = vst.msk [vmem:[#allocation2 + $0x240] sm:$0xff] %vm2265_vm2, %v308_v7  ;;  %v516_v13 = vpop.permute.xlu0 %515  ;;  %v2134_v15 = vcombine.high %v1125_v8, %v1129_v9  ;;  %v2133_v16 = vcombine.low %v1125_v8, %v1129_v9  ;;  %v525_v17 = vrot.slane %v524_v12, 4  ;;  %v2035_v59 = vld [vmem:[%s2272_s17 + $0x20] sm:$0xf] }
  0xc6   : > { %v517_v19 = vrot.slane %v516_v13, 4  ;;  %971 = vrot.lane.b32.xlu1 %v2275_v1, %s2231_s25  ;;  %v968_v1 = vld [vmem:[%s2272_s17 + $0x8] sm:$0xf] }
  0xc7   : > { %1714 = vmatprep.subr.bf16.mxu0 %v2134_v15  ;;  %v526_v20 = vsel %vm275_vm8, %v524_v12, %v525_v17  ;;  %751 = vrot.lane.b32.xlu0 %v746_v14, %s2231_s25  ;;  %v1130_v23 = vld [vmem:[#allocation2 + $0x228] sm:$0xff] }
  0xc8   : > { %v518_v21 = vsel %vm275_vm8, %v516_v13, %v517_v19  ;;  %1715 = vmatpush1.bf16.msra.mxu0 %v2133_v16  ;;  %v1126_v22 = vld [vmem:[#allocation2 + $0x208] sm:$0xff]  ;;  %528 = vst.msk [vmem:[#allocation2 + $0x268] sm:$0xff] %vm2265_vm2, %v526_v20  ;;  %v331_v24 = vpop.permute.xlu1 %330 }
  0xc9   : > { %520 = vst.msk [vmem:[#allocation2 + $0x248] sm:$0xff] %vm2265_vm2, %v518_v21  ;;  %v322_v25 = vpop.permute.xlu0 %321  ;;  %v2136_v26 = vcombine.high %v1126_v22, %v1130_v23  ;;  %v2135_v27 = vcombine.low %v1126_v22, %v1130_v23  ;;  %v332_v28 = vrot.slane %v331_v24, 4  ;;  %v2062_v20 = vld [vmem:[%s2272_s17 + $0x2c] sm:$0xf] }
  0xca   : > { %v323_v29 = vrot.slane %v322_v25, 4  ;;  %985 = vrot.lane.b32.xlu1 %v2278_v2, %s2231_s25 }
  0xcb   : > { %1757 = vmatprep.subr.bf16.mxu1 %v2136_v26  ;;  %v333_v30 = vsel %vm324_vm9, %v331_v24, %v332_v28  ;;  %973 = vrot.lane.b32.xlu0 %v968_v1, %s2231_s25  ;;  %v1137_v33 = vld [vmem:[#allocation2 + $0x260] sm:$0xff] }
  0xcc   : > { %v325_v31 = vsel %vm324_vm9, %v322_v25, %v323_v29  ;;  %1758 = vmatpush1.bf16.msra.mxu1 %v2135_v27  ;;  %v1133_v32 = vld [vmem:[#allocation2 + $0x240] sm:$0xff]  ;;  %335 = vst.msk [vmem:[#allocation2 + $0x2a0] sm:$0xff] %vm2265_vm2, %v333_v30  ;;  %v544_v34 = vpop.permute.xlu1 %543 }
  0xcd   : > { %327 = vst.msk [vmem:[#allocation2 + $0x280] sm:$0xff] %vm2265_vm2, %v325_v31  ;;  %v542_v35 = vpop.permute.xlu0 %541  ;;  %v2142_v2 = vcombine.high %v1133_v32, %v1137_v33  ;;  %v2141_v37 = vcombine.low %v1133_v32, %v1137_v33  ;;  %v546_v38 = vrot.slane %v544_v34, 4  ;;  %v2064_v26 = vld [vmem:[%s2272_s17 + $0x20] sm:$0xf] }
  0xce   : > { %v545_v39 = vrot.slane %v542_v35, 4  ;;  %761 = vrot.lane.b32.xlu1 %v2281_v3, %s2229_s23 }
  0xcf   : > { %1716 = vmatprep.subr.bf16.mxu0 %v2142_v2  ;;  %987 = vrot.lane.b32.xlu0 %v2057_v36, %s2231_s25  ;;  %v1138_v42 = vld [vmem:[#allocation2 + $0x268] sm:$0xff]  ;;  %v2039_v2 = vld [vmem:[%s2272_s17 + $0x20] sm:$0xf] }
  0xd0   : > { %v547_v40 = vsel %vm173_vm0, %v545_v39, %v546_v38  ;;  %1717 = vmatpush1.bf16.msra.mxu0 %v2141_v37  ;;  %v1134_v41 = vld [vmem:[#allocation2 + $0x248] sm:$0xff]  ;;  %v341_v44 = vpop.permute.xlu1 %340 }
  0xd1   : > { %v548_v43 = vsel %vm348_vm10, %v542_v35, %v547_v40  ;;  %v532_v45 = vpop.permute.xlu0 %531  ;;  %v2144_v46 = vcombine.high %v1134_v41, %v1138_v42  ;;  %v2143_v47 = vcombine.low %v1134_v41, %v1138_v42  ;;  %v344_v57 = vrot.slane %v341_v44, 4 }
  0xd2   : > { %550 = vst.msk [vmem:[#allocation2 + $0x2a8] sm:$0xff] %vm2265_vm2, %v548_v43  ;;  %v533_v48 = vrot.slane %v532_v45, 4  ;;  %1007 = vrot.lane.b32.xlu1 %v2281_v3, %s2230_s24 }
  0xd3   : > { %1759 = vmatprep.subr.bf16.mxu1 %v2144_v46  ;;  %769 = vrot.lane.b32.xlu0 %v2288_v4, %s2229_s23  ;;  %v1145_v51 = vld [vmem:[#allocation2 + $0x2a0] sm:$0xff] }
  0xd4   : > { %v534_v49 = vsel %vm324_vm9, %v532_v45, %v533_v48  ;;  %1760 = vmatpush1.bf16.msra.mxu1 %v2143_v47  ;;  %v1141_v50 = vld [vmem:[#allocation2 + $0x280] sm:$0xff]  ;;  %v357_v52 = vpop.permute.xlu1 %356  ;;  %v2066_v45 = vld [vmem:[%s2272_s17 + $0x2c] sm:$0xf] }
  0xd5   : > { %536 = vst.msk [vmem:[#allocation2 + $0x288] sm:$0xff] %vm2265_vm2, %v534_v49  ;;  %v343_v53 = vpop.permute.xlu0 %342  ;;  %v2150_v55 = vcombine.high %v1141_v50, %v1145_v51  ;;  %v2149_v56 = vcombine.low %v1141_v50, %v1145_v51  ;;  %v360_v63 = vrot.slane %v357_v52, 4 }
  0xd6   : > { %v345_v3 = vrot.slane %v343_v53, 4  ;;  %997 = vrot.lane.b32.xlu1 %v2288_v4, %s2229_s23 }
  0xd7   : > { %1718 = vmatprep.subr.bf16.mxu0 %v2150_v55  ;;  %1009 = vrot.lane.b32.xlu0 %v2060_v54, %s2230_s24  ;;  %v1063_v55 = vld [vmem:[#allocation2 + $0x10] sm:$0xff] }
  0xd8   : > { %v347_v58 = vsel %vm173_vm0, %v344_v57, %v345_v3  ;;  %1719 = vmatpush1.bf16.msra.mxu0 %v2149_v56  ;;  %v556_v61 = vpop.permute.xlu1 %555  ;;  %v1067_v56 = vld [vmem:[#allocation2 + $0x30] sm:$0xff] }
  0xd9   : > { %v349_v60 = vsel %vm348_vm10, %v341_v44, %v347_v58  ;;  %v359_v62 = vpop.permute.xlu0 %358  ;;  %v1146_v8 = vld [vmem:[#allocation2 + $0x2a8] sm:$0xff]  ;;  %v559_v16 = vrot.slane %v556_v61, 4 }
  0xda   : > { %351 = vst.msk [vmem:[#allocation2 + $0x2c0] sm:$0xff] %vm2265_vm2, %v349_v60  ;;  %v361_v5 = vrot.slane %v359_v62, 4  ;;  %781 = vrot.lane.b32.xlu1 %v2035_v59, %s2230_s24  ;;  %v1059_v60 = vld [vmem:[%s2888_s1] sm:$0xff] }
  0xdb   : > { %779 = vrot.lane.b32.xlu0 %v2381_v10, %s2230_s24 }
  0xdc   : > { %v362_v4 = vsel %vm173_vm0, %v360_v63, %v361_v5  ;;  %v1142_v7 = vld [vmem:[#allocation2 + $0x288] sm:$0xff]  ;;  %v570_v12 = vpop.permute.xlu1 %569 }
  0xdd   : > { %v363_v9 = vsel %vm348_vm10, %v357_v52, %v362_v4  ;;  %v558_v13 = vpop.permute.xlu0 %557  ;;  %v2152_v14 = vcombine.high %v1142_v7, %v1146_v8  ;;  %v2151_v15 = vcombine.low %v1142_v7, %v1146_v8  ;;  %v573_v24 = vrot.slane %v570_v12, 4 }
  0xde   : > { %365 = vst.msk [vmem:[#allocation2 + $0x2e0] sm:$0xff] %vm2265_vm2, %v363_v9  ;;  %v560_v17 = vrot.slane %v558_v13, 4  ;;  %795 = vrot.lane.b32.xlu1 %v2037_v6, %s2230_s24 }
  0xdf   : > { %1761 = vmatprep.subr.bf16.mxu1 %v2152_v14  ;;  %793 = vrot.lane.b32.xlu0 %v2391_v11, %s2230_s24 }
  0xe0   : > { %v561_v19 = vsel %vm173_vm0, %v559_v16, %v560_v17  ;;  %1762 = vmatpush1.bf16.msra.mxu1 %v2151_v15  ;;  %v371_v22 = vpop.permute.xlu1 %370  ;;  %v2073_v16 = vcombine.low %v1063_v55, %v1067_v56 }
  0xe1   : > { %v562_v21 = vsel %vm348_vm10, %v556_v61, %v561_v19  ;;  %v572_v23 = vpop.permute.xlu0 %571  ;;  %v1149_v30 = vld [vmem:[#allocation2 + $0x2c0] sm:$0xff]  ;;  %v374_v32 = vrot.slane %v371_v22, 4  ;;  %v1060_v61 = vld [vmem:[%s2888_s1 + $0x8] sm:$0xff] }
  0xe2   : > { %564 = vst.msk [vmem:[#allocation2 + $0x2c8] sm:$0xff] %vm2265_vm2, %v562_v21  ;;  %v574_v25 = vrot.slane %v572_v23, 4  ;;  %1023 = vrot.lane.b32.xlu1 %v2062_v20, %s2230_s24  ;;  %v2710_v9 = vcombine.low %v1059_v60, %v1060_v61  ;;  %v1882_v19 = vld [vmem:[%s2889_s2] sm:$0xff] }
  0xe3   : > { %1021 = vrot.lane.b32.xlu0 %v2391_v11, %s2230_s24 }
  0xe4   : > { %v575_v1 = vsel %vm173_vm0, %v573_v24, %v574_v25  ;;  %v584_v28 = vpop.permute.xlu1 %583  ;;  %v2232_v24 = vmov 0  }
  0xe5   : > { %v576_v27 = vsel %vm377_vm11, %v570_v12, %v575_v1  ;;  %v373_v29 = vpop.permute.xlu0 %372  ;;  %v1153_v31 = vld [vmem:[#allocation2 + $0x2e0] sm:$0xff]  ;;  %v587_v40 = vrot.slane %v584_v28, 4  ;;  %v1064_v12 = vld [vmem:[#allocation2 + $0x18] sm:$0xff]  ;;  %2206 = vset.pattern.permute.xlu0 %v2232_v24  ;;  %2207 = vset.pattern.permute.xlu1 %v2232_v24 }
  0xe6   : > { %578 = vst.msk [vmem:[#allocation2 + $0x2e8] sm:$0xff] %vm2265_vm2, %v576_v27  ;;  %v375_v33 = vrot.slane %v373_v29, 4  ;;  %v2158_v34 = vcombine.high %v1149_v30, %v1153_v31  ;;  %v2157_v35 = vcombine.low %v1149_v30, %v1153_v31  ;;  %1037 = vrot.lane.b32.xlu1 %v2064_v26, %s2231_s25  ;;  %v1883_v30 = vld [vmem:[%s2889_s2 + $0x8] sm:$0xff] }
  0xe7   : > { %1035 = vrot.lane.b32.xlu0 %v2381_v10, %s2231_s25 }
  0xe8   : > { %v376_v36 = vsel %vm173_vm0, %v374_v32, %v375_v33  ;;  %1720 = vmatprep.subr.bf16.mxu0 %v2158_v34  ;;  %v822_v38 = vpop.permute.xlu1 %821 }
  0xe9   : > { %v378_v37 = vsel %vm377_vm11, %v371_v22, %v376_v36  ;;  %v586_v39 = vpop.permute.xlu0 %585  ;;  %1721 = vmatpush1.bf16.msra.mxu0 %v2157_v35  ;;  %v823_v41 = vrot.slane %v822_v38, 4  ;;  %v1150_v49 = vld [vmem:[#allocation2 + $0x2c8] sm:$0xff] }
  0xea   : > { %380 = vst.msk [vmem:[#allocation2 + $0x300] sm:$0xff] %vm2265_vm2, %v378_v37  ;;  %v588_v42 = vrot.slane %v586_v39, 4  ;;  %809 = vrot.lane.b32.xlu1 %v2039_v2, %s2231_s25 }
  0xeb   : > { %v824_v43 = vsel %vm185_vm4, %v822_v38, %v823_v41  ;;  %807 = vrot.lane.b32.xlu0 %v2381_v10, %s2231_s25 }
  0xec   : > { %v589_v44 = vsel %vm173_vm0, %v587_v40, %v588_v42  ;;  %826 = vst.msk [vmem:[#allocation2 + $0x38] sm:$0xff] %vm2265_vm2, %v824_v43  ;;  %v608_v47 = vpop.permute.xlu1 %607 }
  0xed   : > { %v590_v46 = vsel %vm377_vm11, %v584_v28, %v589_v44  ;;  %v600_v48 = vpop.permute.xlu0 %599  ;;  %v1154_v50 = vld [vmem:[#allocation2 + $0x2e8] sm:$0xff]  ;;  %v609_v51 = vrot.slane %v608_v47, 4 }
  0xee   : > { %592 = vst.msk [vmem:[#allocation2 + $0x308] sm:$0xff] %vm2265_vm2, %v590_v46  ;;  %v601_v52 = vrot.slane %v600_v48, 4  ;;  %v2160_v53 = vcombine.high %v1150_v49, %v1154_v50  ;;  %v2159_v54 = vcombine.low %v1150_v49, %v1154_v50  ;;  %1051 = vrot.lane.b32.xlu1 %v2066_v45, %s2231_s25 }
  0xef   : > { %v610_v10 = vsel %vm185_vm4, %v608_v47, %v609_v51  ;;  %1049 = vrot.lane.b32.xlu0 %v2391_v11, %s2231_s25  ;;  %v2074_v11 = vcombine.high %v1063_v55, %v1067_v56 }
  0xf0   : > { %v602_v57 = vsel %vm185_vm4, %v600_v48, %v601_v52  ;;  %1763 = vmatprep.subr.bf16.mxu1 %v2160_v53  ;;  %612 = vst.msk [vmem:[#allocation2 + $0x70] sm:$0xff] %vm2265_vm2, %v610_v10  ;;  %v838_v3 = vpop.permute.xlu1 %837 }
  0xf1   : > { %604 = vst.msk [vmem:[#allocation2 + $0x50] sm:$0xff] %vm2265_vm2, %v602_v57  ;;  %1764 = vmatpush1.bf16.msra.mxu1 %v2159_v54  ;;  %v830_v58 = vpop.permute.xlu0 %829  ;;  %v1157_v59 = vld [vmem:[#allocation2 + $0x300] sm:$0xff]  ;;  %v839_v62 = vrot.slane %v838_v3, 4 }
  0xf2   : > { %v831_v63 = vrot.slane %v830_v58, 4  ;;  %v2166_v5 = vcombine.high %v1157_v59, %v1157_v59  ;;  %v2165_v4 = vcombine.low %v1157_v59, %v1157_v59  ;;  %1891 = vperm.xlu1 %2207, %v1883_v30  }
  0xf3   : > { %v840_v6 = vsel %vm202_vm5, %v838_v3, %v839_v62  ;;  %v1068_v17 = vld [vmem:[#allocation2 + $0x38] sm:$0xff]  ;;  %1886 = vperm.xlu0 %2206, %v1882_v19  }
  0xf4   : > { %v832_v7 = vsel %vm185_vm4, %v830_v58, %v831_v63  ;;  %2173 = vmatprep.subr.msk.bf16.mxu0 %vm173_vm0, %v2166_v5  ;;  %v1675_v8 = vsel %vm173_vm0, %v2165_v4, 0  ;;  %842 = vst.msk [vmem:[#allocation2 + $0x78] sm:$0xff] %vm2265_vm2, %v840_v6  ;;  %v624_v13 = vpop.permute.xlu1 %623  ;;  %v2076_v27 = vcombine.high %v1064_v12, %v1068_v17  ;;  %v2075_v36 = vcombine.low %v1064_v12, %v1068_v17 }
  0xf5   : > { %834 = vst.msk [vmem:[#allocation2 + $0x58] sm:$0xff] %vm2265_vm2, %v832_v7  ;;  %v616_v14 = vpop.permute.xlu0 %615  ;;  %1723 = vmatpush1.bf16.msra.mxu0 %v1675_v8  ;;  %v1158_v15 = vld [vmem:[#allocation2 + $0x308] sm:$0xff]  ;;  %v625_v20 = vrot.slane %v624_v13, 4 }
  0xf6   : > { %v617_v21 = vrot.slane %v616_v14, 4  ;;  %v2168_v22 = vcombine.high %v1158_v15, %v1158_v15  ;;  %1784 = vmatprep.subr.bf16.mxu0 %v2074_v11  ;;  %v2167_v23 = vcombine.low %v1158_v15, %v1158_v15 }
  0xf7   : > { %v626_v25 = vsel %vm241_vm6, %v624_v13, %v625_v20  ;;  %v1075_v29 = vld [vmem:[#allocation2 + $0x70] sm:$0xff] }
  0xf8   : > { %v618_v1 = vsel %vm202_vm5, %v616_v14, %v617_v21  ;;  %2175 = vmatprep.subr.msk.bf16.mxu1 %vm173_vm0, %v2168_v22  ;;  %v1681_v26 = vsel %vm173_vm0, %v2167_v23, 0  ;;  %1731 = vmatmul.mubr.bf16.vlgmr.msra.gmra.mrb[0].mxu0 %v2710_v9  ;;  %v1071_v28 = vld [vmem:[#allocation2 + $0x50] sm:$0xff]  ;;  %628 = vst.msk [vmem:[#allocation2 + $0xb0] sm:$0xff] %vm2265_vm2, %v626_v25  ;;  %v854_v31 = vpop.permute.xlu1 %853 }
  0xf9   : > { %620 = vst.msk [vmem:[#allocation2 + $0x90] sm:$0xff] %vm2265_vm2, %v618_v1  ;;  %1766 = vmatpush1.bf16.msra.mxu1 %v1681_v26  ;;  %v846_v32 = vpop.permute.xlu0 %845  ;;  %1785 = vmatpush1.bf16.msra.mxu0 %v2073_v16  ;;  %v2082_v33 = vcombine.high %v1071_v28, %v1075_v29  ;;  %v855_v34 = vrot.slane %v854_v31, 4  ;;  %v2081_v2 = vcombine.low %v1071_v28, %v1075_v29 }
  0xfa   : > { %v847_v35 = vrot.slane %v846_v32, 4  ;;  %1827 = vmatprep.subr.bf16.mxu1 %v2076_v27  ;;  %2178 = vmatprep.mubr.msk.bf16.mxu0 %vm1670_vm3, %v2426_v18 }
  0xfb   : > { %1786 = vmatprep.subr.bf16.mxu0 %v2082_v33  ;;  %v856_v37 = vsel %vm241_vm6, %v854_v31, %v855_v34  ;;  %v1076_v40 = vld [vmem:[#allocation2 + $0x78] sm:$0xff] }
  0xfc   : > { %v848_v38 = vsel %vm202_vm5, %v846_v32, %v847_v35  ;;  %1774 = vmatmul.mubr.bf16.vlgmr.msra.gmra.mrb[0].mxu1 %v2710_v9  ;;  %v1072_v39 = vld [vmem:[#allocation2 + $0x58] sm:$0xff]  ;;  %858 = vst.msk [vmem:[#allocation2 + $0xb8] sm:$0xff] %vm2265_vm2, %v856_v37  ;;  %v640_v41 = vpop.permute.xlu1 %639 }
  0xfd   : > { %850 = vst.msk [vmem:[#allocation2 + $0x98] sm:$0xff] %vm2265_vm2, %v848_v38  ;;  %1828 = vmatpush1.bf16.msra.mxu1 %v2075_v36  ;;  %v632_v42 = vpop.permute.xlu0 %631  ;;  %1787 = vmatpush1.bf16.msra.mxu0 %v2081_v2  ;;  %v2084_v43 = vcombine.high %v1072_v39, %v1076_v40  ;;  %v641_v44 = vrot.slane %v640_v41, 4  ;;  %v2083_v46 = vcombine.low %v1072_v39, %v1076_v40 }
  0xfe   : > { %v633_v45 = vrot.slane %v632_v42, 4  ;;  %2180 = vmatprep.mubr.msk.bf16.mxu1 %vm1670_vm3, %v2426_v18 }
  0xff   : > { %1829 = vmatprep.subr.bf16.mxu1 %v2084_v43  ;;  %v642_v47 = vsel %vm258_vm7, %v640_v41, %v641_v44  ;;  %v1083_v50 = vld [vmem:[#allocation2 + $0xb0] sm:$0xff] }
 0x100   : > { %v634_v48 = vsel %vm241_vm6, %v632_v42, %v633_v45  ;;  %v1079_v49 = vld [vmem:[#allocation2 + $0x90] sm:$0xff]  ;;  %644 = vst.msk [vmem:[#allocation2 + $0xf0] sm:$0xff] %vm2265_vm2, %v642_v47  ;;  %v870_v51 = vpop.permute.xlu1 %869 }
 0x101   : > { %636 = vst.msk [vmem:[#allocation2 + $0xd0] sm:$0xff] %vm2265_vm2, %v634_v48  ;;  %1830 = vmatpush1.bf16.msra.mxu1 %v2083_v46  ;;  %v862_v52 = vpop.permute.xlu0 %861  ;;  %v2089_v53 = vcombine.low %v1079_v49, %v1083_v50  ;;  %v2090_v54 = vcombine.high %v1079_v49, %v1083_v50  ;;  %v871_v18 = vrot.slane %v870_v51, 4 }
 0x102   : > { %v863_v55 = vrot.slane %v862_v52, 4 }
 0x103   : > { %1788 = vmatprep.subr.bf16.mxu0 %v2090_v54  ;;  %v872_v56 = vsel %vm258_vm7, %v870_v51, %v871_v18  ;;  %v1084_v3 = vld [vmem:[#allocation2 + $0xb8] sm:$0xff] }
 0x104   : > { %v864_v10 = vsel %vm258_vm7, %v862_v52, %v863_v55  ;;  %1789 = vmatpush1.bf16.msra.mxu0 %v2089_v53  ;;  %v1080_v57 = vld [vmem:[#allocation2 + $0x98] sm:$0xff]  ;;  %874 = vst.msk [vmem:[#allocation2 + $0xf8] sm:$0xff] %vm2265_vm2, %v872_v56  ;;  %v656_v58 = vpop.permute.xlu1 %655 }
 0x105   : > { %866 = vst.msk [vmem:[#allocation2 + $0xd8] sm:$0xff] %vm2265_vm2, %v864_v10  ;;  %v2091_v59 = vcombine.low %v1080_v57, %v1084_v3  ;;  %v2092_v60 = vcombine.high %v1080_v57, %v1084_v3  ;;  %v657_v61 = vrot.slane %v656_v58, 4  ;;  %v648_v11 = vpop.permute.xlu0 %647 }
 0x106   : > { %v649_v62 = vrot.slane %v648_v11, 4 }
 0x107   : > { %1831 = vmatprep.subr.bf16.mxu1 %v2092_v60  ;;  %v658_v63 = vsel %vm275_vm8, %v656_v58, %v657_v61  ;;  %v1091_v4 = vld [vmem:[#allocation2 + $0xf0] sm:$0xff] }
 0x108   : > { %1832 = vmatpush1.bf16.msra.mxu1 %v2091_v59  ;;  %v1087_v5 = vld [vmem:[#allocation2 + $0xd0] sm:$0xff]  ;;  %660 = vst.msk [vmem:[#allocation2 + $0x130] sm:$0xff] %vm2265_vm2, %v658_v63  ;;  %v650_v6 = vsel %vm258_vm7, %v648_v11, %v649_v62  ;;  %v886_v7 = vpop.permute.xlu1 %885 }
 0x109   : > { %v2097_v8 = vcombine.low %v1087_v5, %v1091_v4  ;;  %v2098_v12 = vcombine.high %v1087_v5, %v1091_v4  ;;  %652 = vst.msk [vmem:[#allocation2 + $0x110] sm:$0xff] %vm2265_vm2, %v650_v6  ;;  %v887_v13 = vrot.slane %v886_v7, 4  ;;  %v878_v14 = vpop.permute.xlu0 %877 }
 0x10a   : > { %v879_v15 = vrot.slane %v878_v14, 4 }
 0x10b   : > { %1790 = vmatprep.subr.bf16.mxu0 %v2098_v12  ;;  %v888_v16 = vsel %vm275_vm8, %v886_v7, %v887_v13  ;;  %v1092_v19 = vld [vmem:[#allocation2 + $0xf8] sm:$0xff] }
 0x10c   : > { %1791 = vmatpush1.bf16.msra.mxu0 %v2097_v8  ;;  %v1088_v17 = vld [vmem:[#allocation2 + $0xd8] sm:$0xff]  ;;  %890 = vst.msk [vmem:[#allocation2 + $0x138] sm:$0xff] %vm2265_vm2, %v888_v16  ;;  %v880_v20 = vsel %vm275_vm8, %v878_v14, %v879_v15  ;;  %v672_v21 = vpop.permute.xlu1 %671 }
 0x10d   : > { %v2099_v22 = vcombine.low %v1088_v17, %v1092_v19  ;;  %v2100_v23 = vcombine.high %v1088_v17, %v1092_v19  ;;  %882 = vst.msk [vmem:[#allocation2 + $0x118] sm:$0xff] %vm2265_vm2, %v880_v20  ;;  %v673_v24 = vrot.slane %v672_v21, 4  ;;  %v664_v25 = vpop.permute.xlu0 %663 }
 0x10e   : > { %v665_v1 = vrot.slane %v664_v25, 4 }
 0x10f   : > { %1833 = vmatprep.subr.bf16.mxu1 %v2100_v23  ;;  %v674_v26 = vsel %vm241_vm6, %v672_v21, %v673_v24  ;;  %v1099_v27 = vld [vmem:[#allocation2 + $0x130] sm:$0xff] }
 0x110   : > { %1834 = vmatpush1.bf16.msra.mxu1 %v2099_v22  ;;  %676 = vst.msk [vmem:[#allocation2 + $0x170] sm:$0xff] %vm2265_vm2, %v674_v26  ;;  %v666_v28 = vsel %vm241_vm6, %v664_v25, %v665_v1  ;;  %v902_v29 = vpop.permute.xlu1 %901  ;;  %v1095_v30 = vld [vmem:[#allocation2 + $0x110] sm:$0xff] }
 0x111   : > { %668 = vst.msk [vmem:[#allocation2 + $0x150] sm:$0xff] %vm2265_vm2, %v666_v28  ;;  %v903_v31 = vrot.slane %v902_v29, 4  ;;  %v894_v32 = vpop.permute.xlu0 %893  ;;  %v2105_v33 = vcombine.low %v1095_v30, %v1099_v27  ;;  %v2106_v34 = vcombine.high %v1095_v30, %v1099_v27 }
 0x112   : > { %v895_v35 = vrot.slane %v894_v32, 4 }
 0x113   : > { %v904_v36 = vsel %vm258_vm7, %v902_v29, %v903_v31  ;;  %1792 = vmatprep.subr.bf16.mxu0 %v2106_v34  ;;  %v1100_v2 = vld [vmem:[#allocation2 + $0x138] sm:$0xff] }
 0x114   : > { %906 = vst.msk [vmem:[#allocation2 + $0x178] sm:$0xff] %vm2265_vm2, %v904_v36  ;;  %v896_v37 = vsel %vm241_vm6, %v894_v32, %v895_v35  ;;  %1793 = vmatpush1.bf16.msra.mxu0 %v2105_v33  ;;  %v688_v38 = vpop.permute.xlu1 %687  ;;  %v1096_v39 = vld [vmem:[#allocation2 + $0x118] sm:$0xff] }
 0x115   : > { %898 = vst.msk [vmem:[#allocation2 + $0x158] sm:$0xff] %vm2265_vm2, %v896_v37  ;;  %v689_v40 = vrot.slane %v688_v38, 4  ;;  %v680_v41 = vpop.permute.xlu0 %679  ;;  %v2107_v42 = vcombine.low %v1096_v39, %v1100_v2  ;;  %v2108_v43 = vcombine.high %v1096_v39, %v1100_v2 }
 0x116   : > { %v681_v44 = vrot.slane %v680_v41, 4 }
 0x117   : > { %v690_v45 = vsel %vm258_vm7, %v688_v38, %v689_v40  ;;  %1835 = vmatprep.subr.bf16.mxu1 %v2108_v43  ;;  %v1107_v46 = vld [vmem:[#allocation2 + $0x170] sm:$0xff] }
 0x118   : > { %692 = vst.msk [vmem:[#allocation2 + $0x1b0] sm:$0xff] %vm2265_vm2, %v690_v45  ;;  %v682_v47 = vsel %vm258_vm7, %v680_v41, %v681_v44  ;;  %1836 = vmatpush1.bf16.msra.mxu1 %v2107_v42  ;;  %v918_v48 = vpop.permute.xlu1 %917  ;;  %v1103_v49 = vld [vmem:[#allocation2 + $0x150] sm:$0xff] }
 0x119   : > { %684 = vst.msk [vmem:[#allocation2 + $0x190] sm:$0xff] %vm2265_vm2, %v682_v47  ;;  %v919_v50 = vrot.slane %v918_v48, 4  ;;  %v910_v51 = vpop.permute.xlu0 %909  ;;  %v2113_v52 = vcombine.low %v1103_v49, %v1107_v46  ;;  %v2114_v53 = vcombine.high %v1103_v49, %v1107_v46 }
 0x11a   : > { %v911_v54 = vrot.slane %v910_v51, 4 }
 0x11b   : > { %v920_v18 = vsel %vm275_vm8, %v918_v48, %v919_v50  ;;  %1794 = vmatprep.subr.bf16.mxu0 %v2114_v53  ;;  %v1108_v55 = vld [vmem:[#allocation2 + $0x178] sm:$0xff] }
 0x11c   : > { %922 = vst.msk [vmem:[#allocation2 + $0x1b8] sm:$0xff] %vm2265_vm2, %v920_v18  ;;  %v912_v56 = vsel %vm258_vm7, %v910_v51, %v911_v54  ;;  %1795 = vmatpush1.bf16.msra.mxu0 %v2113_v52  ;;  %v704_v10 = vpop.permute.xlu1 %703  ;;  %v1104_v57 = vld [vmem:[#allocation2 + $0x158] sm:$0xff] }
 0x11d   : > { %914 = vst.msk [vmem:[#allocation2 + $0x198] sm:$0xff] %vm2265_vm2, %v912_v56  ;;  %v705_v3 = vrot.slane %v704_v10, 4  ;;  %v696_v58 = vpop.permute.xlu0 %695  ;;  %v2115_v59 = vcombine.low %v1104_v57, %v1108_v55  ;;  %v2116_v60 = vcombine.high %v1104_v57, %v1108_v55 }
 0x11e   : > { %v697_v61 = vrot.slane %v696_v58, 4 }
 0x11f   : > { %v706_v11 = vsel %vm324_vm9, %v704_v10, %v705_v3  ;;  %1837 = vmatprep.subr.bf16.mxu1 %v2116_v60  ;;  %v1115_v62 = vld [vmem:[#allocation2 + $0x1b0] sm:$0xff] }
 0x120   : > { %708 = vst.msk [vmem:[#allocation2 + $0x1f0] sm:$0xff] %vm2265_vm2, %v706_v11  ;;  %v698_v63 = vsel %vm275_vm8, %v696_v58, %v697_v61  ;;  %1838 = vmatpush1.bf16.msra.mxu1 %v2115_v59  ;;  %v934_v5 = vpop.permute.xlu1 %933  ;;  %v1111_v4 = vld [vmem:[#allocation2 + $0x190] sm:$0xff] }
 0x121   : > { %700 = vst.msk [vmem:[#allocation2 + $0x1d0] sm:$0xff] %vm2265_vm2, %v698_v63  ;;  %v935_v6 = vrot.slane %v934_v5, 4  ;;  %v926_v7 = vpop.permute.xlu0 %925  ;;  %v2121_v8 = vcombine.low %v1111_v4, %v1115_v62  ;;  %v2122_v12 = vcombine.high %v1111_v4, %v1115_v62 }
 0x122   : > { %v927_v13 = vrot.slane %v926_v7, 4 }
 0x123   : > { %v936_v14 = vsel %vm324_vm9, %v934_v5, %v935_v6  ;;  %1796 = vmatprep.subr.bf16.mxu0 %v2122_v12  ;;  %v1116_v15 = vld [vmem:[#allocation2 + $0x1b8] sm:$0xff] }
 0x124   : > { %938 = vst.msk [vmem:[#allocation2 + $0x1f8] sm:$0xff] %vm2265_vm2, %v936_v14  ;;  %v928_v16 = vsel %vm275_vm8, %v926_v7, %v927_v13  ;;  %1797 = vmatpush1.bf16.msra.mxu0 %v2121_v8  ;;  %v724_v17 = vpop.permute.xlu1 %723  ;;  %v1112_v19 = vld [vmem:[#allocation2 + $0x198] sm:$0xff] }
 0x125   : > { %930 = vst.msk [vmem:[#allocation2 + $0x1d8] sm:$0xff] %vm2265_vm2, %v928_v16  ;;  %v726_v20 = vrot.slane %v724_v17, 4  ;;  %v722_v21 = vpop.permute.xlu0 %721  ;;  %v2123_v22 = vcombine.low %v1112_v19, %v1116_v15  ;;  %v2124_v23 = vcombine.high %v1112_v19, %v1116_v15 }
 0x126   : > { %v725_v24 = vrot.slane %v722_v21, 4 }
 0x127   : > { %1839 = vmatprep.subr.bf16.mxu1 %v2124_v23  ;;  %v1123_v25 = vld [vmem:[#allocation2 + $0x1f0] sm:$0xff] }
 0x128   : > { %v727_v1 = vsel %vm173_vm0, %v725_v24, %v726_v20  ;;  %1840 = vmatpush1.bf16.msra.mxu1 %v2123_v22  ;;  %v944_v26 = vpop.permute.xlu1 %943  ;;  %v1119_v27 = vld [vmem:[#allocation2 + $0x1d0] sm:$0xff] }
 0x129   : > { %v728_v28 = vsel %vm348_vm10, %v722_v21, %v727_v1  ;;  %v712_v29 = vpop.permute.xlu0 %711  ;;  %v2129_v30 = vcombine.low %v1119_v27, %v1123_v25  ;;  %v2130_v31 = vcombine.high %v1119_v27, %v1123_v25  ;;  %v947_v39 = vrot.slane %v944_v26, 4 }
 0x12a   : > { %730 = vst.msk [vmem:[#allocation2 + $0x230] sm:$0xff] %vm2265_vm2, %v728_v28  ;;  %v713_v32 = vrot.slane %v712_v29, 4 }
 0x12b   : > { %1798 = vmatprep.subr.bf16.mxu0 %v2130_v31  ;;  %v1124_v33 = vld [vmem:[#allocation2 + $0x1f8] sm:$0xff] }
 0x12c   : > { %v714_v34 = vsel %vm324_vm9, %v712_v29, %v713_v32  ;;  %1799 = vmatpush1.bf16.msra.mxu0 %v2129_v30  ;;  %v958_v35 = vpop.permute.xlu1 %957  ;;  %v1120_v36 = vld [vmem:[#allocation2 + $0x1d8] sm:$0xff] }
 0x12d   : > { %716 = vst.msk [vmem:[#allocation2 + $0x210] sm:$0xff] %vm2265_vm2, %v714_v34  ;;  %v946_v2 = vpop.permute.xlu0 %945  ;;  %v2131_v37 = vcombine.low %v1120_v36, %v1124_v33  ;;  %v2132_v38 = vcombine.high %v1120_v36, %v1124_v33  ;;  %v961_v45 = vrot.slane %v958_v35, 4 }
 0x12e   : > { %v948_v40 = vrot.slane %v946_v2, 4 }
 0x12f   : > { %1841 = vmatprep.subr.bf16.mxu1 %v2132_v38 }
 0x130   : > { %v949_v41 = vsel %vm173_vm0, %v947_v39, %v948_v40  ;;  %1842 = vmatpush1.bf16.msra.mxu1 %v2131_v37  ;;  %v736_v42 = vpop.permute.xlu1 %735 }
 0x131   : > { %v950_v43 = vsel %vm348_vm10, %v944_v26, %v949_v41  ;;  %v960_v44 = vpop.permute.xlu0 %959  ;;  %v1131_v50 = vld [vmem:[#allocation2 + $0x230] sm:$0xff]  ;;  %v739_v18 = vrot.slane %v736_v42, 4 }
 0x132   : > { %952 = vst.msk [vmem:[#allocation2 + $0x218] sm:$0xff] %vm2265_vm2, %v950_v43  ;;  %v962_v46 = vrot.slane %v960_v44, 4 }
 0x134   : > { %v963_v47 = vsel %vm173_vm0, %v961_v45, %v962_v46  ;;  %v750_v48 = vpop.permute.xlu1 %749  ;;  %v1127_v49 = vld [vmem:[#allocation2 + $0x210] sm:$0xff] }
 0x135   : > { %v964_v51 = vsel %vm348_vm10, %v958_v35, %v963_v47  ;;  %v738_v52 = vpop.permute.xlu0 %737  ;;  %v2137_v53 = vcombine.low %v1127_v49, %v1131_v50  ;;  %v2138_v54 = vcombine.high %v1127_v49, %v1131_v50  ;;  %v753_v58 = vrot.slane %v750_v48, 4 }
 0x136   : > { %966 = vst.msk [vmem:[#allocation2 + $0x238] sm:$0xff] %vm2265_vm2, %v964_v51  ;;  %v740_v55 = vrot.slane %v738_v52, 4 }
 0x137   : > { %1800 = vmatprep.subr.bf16.mxu0 %v2138_v54 }
 0x138   : > { %v741_v56 = vsel %vm173_vm0, %v739_v18, %v740_v55  ;;  %1801 = vmatpush1.bf16.msra.mxu0 %v2137_v53  ;;  %v972_v10 = vpop.permute.xlu1 %971 }
 0x139   : > { %v742_v57 = vsel %vm348_vm10, %v736_v42, %v741_v56  ;;  %v752_v3 = vpop.permute.xlu0 %751  ;;  %v1128_v63 = vld [vmem:[#allocation2 + $0x218] sm:$0xff]  ;;  %v975_v4 = vrot.slane %v972_v10, 4 }
 0x13a   : > { %744 = vst.msk [vmem:[#allocation2 + $0x250] sm:$0xff] %vm2265_vm2, %v742_v57  ;;  %v754_v59 = vrot.slane %v752_v3, 4 }
 0x13c   : > { %v755_v60 = vsel %vm173_vm0, %v753_v58, %v754_v59  ;;  %v986_v61 = vpop.permute.xlu1 %985 }
 0x13d   : > { %v756_v11 = vsel %vm377_vm11, %v750_v48, %v755_v60  ;;  %v974_v62 = vpop.permute.xlu0 %973  ;;  %v1132_v5 = vld [vmem:[#allocation2 + $0x238] sm:$0xff]  ;;  %v989_v17 = vrot.slane %v986_v61, 4 }
 0x13e   : > { %758 = vst.msk [vmem:[#allocation2 + $0x270] sm:$0xff] %vm2265_vm2, %v756_v11  ;;  %v976_v6 = vrot.slane %v974_v62, 4  ;;  %v2139_v7 = vcombine.low %v1128_v63, %v1132_v5  ;;  %v2140_v8 = vcombine.high %v1128_v63, %v1132_v5 }
 0x140   : > { %v977_v12 = vsel %vm173_vm0, %v975_v4, %v976_v6  ;;  %1843 = vmatprep.subr.bf16.mxu1 %v2140_v8  ;;  %v762_v13 = vpop.permute.xlu1 %761 }
 0x141   : > { %v978_v14 = vsel %vm377_vm11, %v972_v10, %v977_v12  ;;  %v763_v15 = vrot.slane %v762_v13, 4  ;;  %1844 = vmatpush1.bf16.msra.mxu1 %v2139_v7  ;;  %v988_v16 = vpop.permute.xlu0 %987  ;;  %v1135_v25 = vld [vmem:[#allocation2 + $0x250] sm:$0xff] }
 0x142   : > { %980 = vst.msk [vmem:[#allocation2 + $0x258] sm:$0xff] %vm2265_vm2, %v978_v14  ;;  %v990_v19 = vrot.slane %v988_v16, 4 }
 0x143   : > { %v764_v20 = vsel %vm324_vm9, %v762_v13, %v763_v15 }
 0x144   : > { %766 = vst.msk [vmem:[#allocation2 + $0x290] sm:$0xff] %vm2265_vm2, %v764_v20  ;;  %v991_v21 = vsel %vm173_vm0, %v989_v17, %v990_v19  ;;  %v1008_v22 = vpop.permute.xlu1 %1007 }
 0x145   : > { %v992_v23 = vsel %vm377_vm11, %v986_v61, %v991_v21  ;;  %v770_v24 = vpop.permute.xlu0 %769  ;;  %v1139_v1 = vld [vmem:[#allocation2 + $0x270] sm:$0xff]  ;;  %v1011_v33 = vrot.slane %v1008_v22, 4 }
 0x146   : > { %994 = vst.msk [vmem:[#allocation2 + $0x278] sm:$0xff] %vm2265_vm2, %v992_v23  ;;  %v771_v26 = vrot.slane %v770_v24, 4  ;;  %v2145_v27 = vcombine.low %v1135_v25, %v1139_v1  ;;  %v2146_v28 = vcombine.high %v1135_v25, %v1139_v1 }
 0x148   : > { %v772_v29 = vsel %vm324_vm9, %v770_v24, %v771_v26  ;;  %1802 = vmatprep.subr.bf16.mxu0 %v2146_v28  ;;  %v998_v30 = vpop.permute.xlu1 %997 }
 0x149   : > { %774 = vst.msk [vmem:[#allocation2 + $0x2b0] sm:$0xff] %vm2265_vm2, %v772_v29  ;;  %v999_v31 = vrot.slane %v998_v30, 4  ;;  %v1010_v32 = vpop.permute.xlu0 %1009  ;;  %1803 = vmatpush1.bf16.msra.mxu0 %v2145_v27  ;;  %v1136_v40 = vld [vmem:[#allocation2 + $0x258] sm:$0xff] }
 0x14a   : > { %v1012_v34 = vrot.slane %v1010_v32, 4 }
 0x14b   : > { %v1000_v35 = vsel %vm324_vm9, %v998_v30, %v999_v31  ;;  %v1143_v47 = vld [vmem:[#allocation2 + $0x290] sm:$0xff] }
 0x14c   : > { %1002 = vst.msk [vmem:[#allocation2 + $0x298] sm:$0xff] %vm2265_vm2, %v1000_v35  ;;  %v1013_v36 = vsel %vm173_vm0, %v1011_v33, %v1012_v34  ;;  %v782_v2 = vpop.permute.xlu1 %781 }
 0x14d   : > { %v1014_v37 = vsel %vm348_vm10, %v1008_v22, %v1013_v36  ;;  %v784_v38 = vrot.slane %v782_v2, 4  ;;  %v780_v39 = vpop.permute.xlu0 %779  ;;  %v1140_v41 = vld [vmem:[#allocation2 + $0x278] sm:$0xff] }
 0x14e   : > { %1016 = vst.msk [vmem:[#allocation2 + $0x2b8] sm:$0xff] %vm2265_vm2, %v1014_v37  ;;  %v783_v42 = vrot.slane %v780_v39, 4  ;;  %v2147_v43 = vcombine.low %v1136_v40, %v1140_v41  ;;  %v2148_v44 = vcombine.high %v1136_v40, %v1140_v41 }
 0x150   : > { %v785_v45 = vsel %vm173_vm0, %v783_v42, %v784_v38  ;;  %1845 = vmatprep.subr.bf16.mxu1 %v2148_v44  ;;  %v796_v46 = vpop.permute.xlu1 %795  ;;  %v1147_v48 = vld [vmem:[#allocation2 + $0x2b0] sm:$0xff] }
 0x151   : > { %v786_v49 = vsel %vm348_vm10, %v780_v39, %v785_v45  ;;  %v798_v50 = vrot.slane %v796_v46, 4  ;;  %1846 = vmatpush1.bf16.msra.mxu1 %v2147_v43  ;;  %v794_v51 = vpop.permute.xlu0 %793  ;;  %v2153_v52 = vcombine.low %v1143_v47, %v1147_v48  ;;  %v2154_v53 = vcombine.high %v1143_v47, %v1147_v48 }
 0x152   : > { %788 = vst.msk [vmem:[#allocation2 + $0x2d0] sm:$0xff] %vm2265_vm2, %v786_v49  ;;  %v797_v54 = vrot.slane %v794_v51, 4 }
 0x153   : > { %1804 = vmatprep.subr.bf16.mxu0 %v2154_v53  ;;  %v1144_v18 = vld [vmem:[#allocation2 + $0x298] sm:$0xff] }
 0x154   : > { %v799_v55 = vsel %vm173_vm0, %v797_v54, %v798_v50  ;;  %1805 = vmatpush1.bf16.msra.mxu0 %v2153_v52  ;;  %v1024_v56 = vpop.permute.xlu1 %1023 }
 0x155   : > { %v800_v10 = vsel %vm348_vm10, %v794_v51, %v799_v55  ;;  %v1026_v57 = vrot.slane %v1024_v56, 4  ;;  %v1022_v3 = vpop.permute.xlu0 %1021  ;;  %v1148_v58 = vld [vmem:[#allocation2 + $0x2b8] sm:$0xff] }
 0x156   : > { %802 = vst.msk [vmem:[#allocation2 + $0x2f0] sm:$0xff] %vm2265_vm2, %v800_v10  ;;  %v1025_v59 = vrot.slane %v1022_v3, 4  ;;  %v2155_v60 = vcombine.low %v1144_v18, %v1148_v58  ;;  %v2156_v61 = vcombine.high %v1144_v18, %v1148_v58 }
 0x158   : > { %v1027_v11 = vsel %vm173_vm0, %v1025_v59, %v1026_v57  ;;  %1847 = vmatprep.subr.bf16.mxu1 %v2156_v61  ;;  %v1038_v62 = vpop.permute.xlu1 %1037 }
 0x159   : > { %v1028_v63 = vsel %vm348_vm10, %v1022_v3, %v1027_v11  ;;  %v1040_v5 = vrot.slane %v1038_v62, 4  ;;  %1848 = vmatpush1.bf16.msra.mxu1 %v2155_v60  ;;  %v1036_v4 = vpop.permute.xlu0 %1035  ;;  %v1151_v15 = vld [vmem:[#allocation2 + $0x2d0] sm:$0xff] }
 0x15a   : > { %1030 = vst.msk [vmem:[#allocation2 + $0x2d8] sm:$0xff] %vm2265_vm2, %v1028_v63  ;;  %v1039_v6 = vrot.slane %v1036_v4, 4 }
 0x15c   : > { %v1041_v7 = vsel %vm173_vm0, %v1039_v6, %v1040_v5  ;;  %v810_v8 = vpop.permute.xlu1 %809 }
 0x15d   : > { %v1042_v12 = vsel %vm377_vm11, %v1036_v4, %v1041_v7  ;;  %v812_v13 = vrot.slane %v810_v8, 4  ;;  %v808_v14 = vpop.permute.xlu0 %807  ;;  %v1155_v16 = vld [vmem:[#allocation2 + $0x2f0] sm:$0xff] }
 0x15e   : > { %1044 = vst.msk [vmem:[#allocation2 + $0x2f8] sm:$0xff] %vm2265_vm2, %v1042_v12  ;;  %v811_v17 = vrot.slane %v808_v14, 4  ;;  %v2161_v19 = vcombine.low %v1151_v15, %v1155_v16  ;;  %v2162_v20 = vcombine.high %v1151_v15, %v1155_v16 }
 0x160   : > { %v813_v21 = vsel %vm173_vm0, %v811_v17, %v812_v13  ;;  %1806 = vmatprep.subr.bf16.mxu0 %v2162_v20  ;;  %v1052_v22 = vpop.permute.xlu1 %1051 }
 0x161   : > { %v814_v23 = vsel %vm377_vm11, %v808_v14, %v813_v21  ;;  %v1054_v24 = vrot.slane %v1052_v22, 4  ;;  %v1050_v25 = vpop.permute.xlu0 %1049  ;;  %1807 = vmatpush1.bf16.msra.mxu0 %v2161_v19  ;;  %v1152_v28 = vld [vmem:[#allocation2 + $0x2d8] sm:$0xff] }
 0x162   : > { %816 = vst.msk [vmem:[#allocation2 + $0x310] sm:$0xff] %vm2265_vm2, %v814_v23  ;;  %v1053_v1 = vrot.slane %v1050_v25, 4 }
 0x164   : > { %v1055_v26 = vsel %vm173_vm0, %v1053_v1, %v1054_v24 }
 0x165   : > { %v1056_v27 = vsel %vm377_vm11, %v1050_v25, %v1055_v26  ;;  %v1156_v29 = vld [vmem:[#allocation2 + $0x2f8] sm:$0xff] }
 0x166   : > { %1058 = vst.msk [vmem:[#allocation2 + $0x318] sm:$0xff] %vm2265_vm2, %v1056_v27  ;;  %v2163_v30 = vcombine.low %v1152_v28, %v1156_v29  ;;  %v2164_v31 = vcombine.high %v1152_v28, %v1156_v29 }
 0x168   : > { %1849 = vmatprep.subr.bf16.mxu1 %v2164_v31 }
 0x169   : > { %1850 = vmatpush1.bf16.msra.mxu1 %v2163_v30  ;;  %v1159_v32 = vld [vmem:[#allocation2 + $0x310] sm:$0xff] }
 0x16a   : > { %v2170_v33 = vcombine.high %v1159_v32, %v1159_v32  ;;  %v2169_v34 = vcombine.low %v1159_v32, %v1159_v32 }
 0x16c   : > { %2177 = vmatprep.subr.msk.bf16.mxu0 %vm173_vm0, %v2170_v33  ;;  %v1687_v35 = vsel %vm173_vm0, %v2169_v34, 0 }
 0x16d   : > { %1809 = vmatpush1.bf16.msra.mxu0 %v1687_v35  ;;  %v1160_v36 = vld [vmem:[#allocation2 + $0x318] sm:$0xff] }
 0x16e   : > { %v2172_v2 = vcombine.high %v1160_v36, %v1160_v36  ;;  %v2171_v37 = vcombine.low %v1160_v36, %v1160_v36 }
 0x170   : > { %1817 = vmatmul.mubr.bf16.vlgmr.msra.gmra.mrb[4].mxu0 %v2710_v9  ;;  %2179 = vmatprep.subr.msk.bf16.mxu1 %vm173_vm0, %v2172_v2  ;;  %v1693_v38 = vsel %vm173_vm0, %v2171_v37, 0 }
 0x171   : > { %1852 = vmatpush1.bf16.msra.mxu1 %v1693_v38  ;;  %v1892_v61 = vpop.permute.xlu1 %1891 }
 0x172   : > { %v1887_v57 = vpop.permute.xlu0 %1886 }
 0x174   : > { %1860 = vmatmul.mubr.bf16.vlgmr.msra.gmra.mrb[4].mxu1 %v2710_v9 }
 0x1cb   : > { %v1732_v39 = vpop.f32.mrb[0].mxu0 }
 0x1cc   : > { %v1734_v40 = vpop.f32.mrb[1].mxu0 }
 0x1cd   : > { %v1736_v41 = vpop.f32.mrb[2].mxu0 }
 0x1ce   : > { %v1738_v42 = vpop.f32.mrb[3].mxu0 }
 0x1cf   : > { %v1775_v43 = vpop.f32.mrb[0].mxu1 }
 0x1d0   : > { %v1870_v44 = vmax.f32 %v1732_v39, %v1775_v43  ;;  %v1777_v45 = vpop.f32.mrb[1].mxu1 }
 0x1d1   : > { %v1871_v46 = vmax.f32 %v1734_v40, %v1777_v45  ;;  %v1779_v47 = vpop.f32.mrb[2].mxu1 }
 0x1d2   : > { %v1872_v48 = vmax.f32 %v1736_v41, %v1779_v47  ;;  %v1781_v49 = vpop.f32.mrb[3].mxu1 }
 0x1d3   : > { %v1873_v50 = vmax.f32 %v1738_v42, %v1781_v49 }
 0x243   : > { %v1818_v51 = vpop.f32.mrb[4].mxu0 }
 0x244   : > { %v1874_v52 = vmax.f32 %v1870_v44, %v1818_v51  ;;  %v1820_v53 = vpop.f32.mrb[5].mxu0 }
 0x245   : > { %v1875_v54 = vmax.f32 %v1871_v46, %v1820_v53  ;;  %v1822_v18 = vpop.f32.mrb[6].mxu0 }
 0x246   : > { %v1876_v55 = vmax.f32 %v1872_v48, %v1822_v18  ;;  %v1824_v9 = vpop.f32.mrb[7].mxu0 }
 0x247   : > { %v1877_v56 = vmax.f32 %v1873_v50, %v1824_v9  ;;  %v1861_v10 = vpop.f32.mrb[4].mxu1 }
 0x248   : > { %v1878_v3 = vmax.f32 %v1874_v52, %v1861_v10  ;;  %v1863_v58 = vpop.f32.mrb[5].mxu1 }
 0x249   : > { %v1879_v59 = vmax.f32 %v1875_v54, %v1863_v58  ;;  %v1865_v60 = vpop.f32.mrb[6].mxu1 }
 0x24a   : > { %v1880_v11 = vmax.f32 %v1876_v55, %v1865_v60  ;;  %v1894_v62 = vadd.f32 %v1887_v57, %v1878_v3  ;;  %v1867_v63 = vpop.f32.mrb[7].mxu1 }
 0x24b   : > { %v1895_v5 = vadd.f32 %v1887_v57, %v1879_v59  ;;  %v1881_v4 = vmax.f32 %v1877_v56, %v1867_v63 }
 0x24c   : > { %v1898_v6 = vmax.f32 %v1894_v62, 0.0  ;;  %v1896_v7 = vadd.f32 %v1892_v61, %v1880_v11 }
 0x24d   : > { %v1899_v8 = vmax.f32 %v1895_v5, 0.0  ;;  %v1897_v12 = vadd.f32 %v1892_v61, %v1881_v4 }
 0x24e   : > { %v1900_v13 = vmax.f32 %v1896_v7, 0.0 }
 0x24f   : > { %v2186_v14 = vpack.c.bf16 %v1899_v8, %v1898_v6  ;;  %v1901_v15 = vmax.f32 %v1897_v12, 0.0 }
 0x251   : > { %1914 = vst.msk [vmem:[%s170_s14] sm:$0xff] %vm2265_vm2, %v2186_v14  ;;  %v2187_v16 = vpack.c.bf16 %v1901_v15, %v1900_v13 }
 0x253   : > { %1915 = vst.msk [vmem:[%s170_s14 + $0x8] sm:$0xff] %vm2265_vm2, %v2187_v16 }
 0x254 PF: > { %s13_s12 = sadd.s32 1, %s2222_s12  }
 0x255   : > { %p10_p4 = scmp.ge.s32.totalorder %s13_s12, 4  }
 0x257   :  { %12 = sbr.rel (!%p10_p4) target bundleno = 1 (0x1), region = 65 }

// kernel: cnn_forward.5
= control target key start
LH: loop header
LB: loop body
LE: loop exit
PB: predicated region body
PF: predicated region fallthrough
CT: control target
= control target key end

     0   :  { %v227_v29 = vlaneseq  ;;  %v1582_v35 = vmov 1966171168   ;;  %s1939_s0 = inlined_call_operand.vmem [shape: bf16[2,1568], index: 0, kind: input, shape index: {}]   ;;  %s1940_s1 = inlined_call_operand.vmem [shape: bf16[1568,10], index: 1, kind: input, shape index: {}]   ;;  %s1941_s2 = inlined_call_operand.vmem [shape: f32[1,10], index: 2, kind: input, shape index: {}]   ;;  %s1942_s3 = inlined_call_operand.hbm [shape: f32[2,10], index: 3, kind: output, shape index: {}]  }
   0x1   :  { %v1458_v0 = vld [vmem:[%s1940_s1 + $0x40] sm:$0xff]   ;;  %v1462_v4 = vld [vmem:[%s1940_s1 + $0x48] sm:$0xff]   ;;  %v1466_v8 = vld [vmem:[%s1940_s1 + $0x50] sm:$0xff]   ;;  %v225_v36 = vunpack.c.l.s4 %v1582_v35 }
   0x2   :  { %v1459_v1 = vld [vmem:[%s1940_s1] sm:$0xff]   ;;  %1311 = vmatprep.subr.bf16.mxu0 %v1458_v0  ;;  %v1463_v5 = vld [vmem:[%s1940_s1 + $0x8] sm:$0xff]   ;;  %v1467_v9 = vld [vmem:[%s1940_s1 + $0x10] sm:$0xff]   ;;  %v228_v33 = vshrl.u32 %v227_v29, 7 }
   0x3   :  { %v1460_v2 = vld [vmem:[%s1940_s1 + $0xc0] sm:$0xff]   ;;  %1312 = vmatpush3.bf16.msra.mxu0 %v1459_v1  ;;  %v1464_v6 = vld [vmem:[%s1940_s1 + $0xc8] sm:$0xff]   ;;  %v1468_v10 = vld [vmem:[%s1940_s1 + $0xd0] sm:$0xff]   ;;  %v226_v39 = vunpack.c.0.s8 %v225_v36 }
   0x4   :  { %v1461_v3 = vld [vmem:[%s1940_s1 + $0x80] sm:$0xff]   ;;  %1333 = vmatprep.subr.bf16.mxu1 %v1460_v2  ;;  %1313 = vmatprep.subr.bf16.mxu0 %v1462_v4  ;;  %v1465_v7 = vld [vmem:[%s1940_s1 + $0x88] sm:$0xff]   ;;  %v1469_v11 = vld [vmem:[%s1940_s1 + $0x90] sm:$0xff]  }
   0x5   :  { %1334 = vmatpush3.bf16.msra.mxu1 %v1461_v3  ;;  %v1470_v12 = vld [vmem:[%s1940_s1 + $0x58] sm:$0xff]   ;;  %v1474_v16 = vld [vmem:[%s1940_s1 + $0x60] sm:$0xff]   ;;  %v1478_v20 = vld [vmem:[%s1940_s1 + $0x68] sm:$0xff]   ;;  %v1711_v41 = vsub.s32 %v226_v39, %v228_v33 }
   0x6   :  { %1335 = vmatprep.subr.bf16.mxu1 %v1464_v6  ;;  %v1471_v13 = vld [vmem:[%s1940_s1 + $0x18] sm:$0xff]   ;;  %v1475_v17 = vld [vmem:[%s1940_s1 + $0x20] sm:$0xff]   ;;  %v1479_v21 = vld [vmem:[%s1940_s1 + $0x28] sm:$0xff]  }
   0x7   :  { %1314 = vmatpush3.bf16.msra.mxu0 %v1463_v5  ;;  %v1472_v14 = vld [vmem:[%s1940_s1 + $0xd8] sm:$0xff]   ;;  %v1476_v18 = vld [vmem:[%s1940_s1 + $0xe0] sm:$0xff]   ;;  %v1480_v22 = vld [vmem:[%s1940_s1 + $0xe8] sm:$0xff]  }
   0x8   :  { %1315 = vmatprep.subr.bf16.mxu0 %v1466_v8  ;;  %v1473_v15 = vld [vmem:[%s1940_s1 + $0x98] sm:$0xff]   ;;  %v1477_v19 = vld [vmem:[%s1940_s1 + $0xa0] sm:$0xff]   ;;  %v1481_v23 = vld [vmem:[%s1940_s1 + $0xa8] sm:$0xff]  }
   0x9   :  { %1336 = vmatpush3.bf16.msra.mxu1 %v1465_v7  ;;  %v1482_v24 = vld [vmem:[%s1940_s1 + $0x70] sm:$0xff]   ;;  %v1486_v28 = vld [vmem:[%s1940_s1 + $0x78] sm:$0xff]   ;;  %v1491_v34 = vld [vmem:[%s1940_s1 + $0x140] sm:$0xff]  }
   0xa   :  { %1337 = vmatprep.subr.bf16.mxu1 %v1468_v10  ;;  %v1483_v25 = vld [vmem:[%s1940_s1 + $0x30] sm:$0xff]   ;;  %v1487_v30 = vld [vmem:[%s1940_s1 + $0x38] sm:$0xff]   ;;  %v16_v37 = vld [vmem:[%s1939_s0] sm:$0xff] }
   0xb   :  { %1316 = vmatpush3.bf16.msra.mxu0 %v1467_v9  ;;  %v1484_v26 = vld [vmem:[%s1940_s1 + $0xf0] sm:$0xff]   ;;  %v1488_v31 = vld [vmem:[%s1940_s1 + $0xf8] sm:$0xff]   ;;  %v223_v38 = vcombine.high %v16_v37, %v16_v37  ;;  %v1493_v40 = vld [vmem:[%s1940_s1 + $0x1c0] sm:$0xff]   ;;  %v230_v42 = vrot.slane %v16_v37, %v1711_v41 }
   0xc   :  { %1317 = vmatprep.subr.bf16.mxu0 %v1470_v12  ;;  %v1485_v27 = vld [vmem:[%s1940_s1 + $0xb0] sm:$0xff]   ;;  %v1489_v32 = vld [vmem:[%s1940_s1 + $0xb8] sm:$0xff]   ;;  %v1492_v48 = vld [vmem:[%s1940_s1 + $0x100] sm:$0xff]  }
   0xd   :  { %1338 = vmatpush3.bf16.msra.mxu1 %v1469_v11  ;;  %v1715_v43 = vrot.slane %v223_v38, %v1711_v41  ;;  %v238_v44 = vcombine.high %v230_v42, %v230_v42  ;;  %v246_v45 = vrot.slane %v230_v42, %v1711_v41  ;;  %v1495_v51 = vld [vmem:[%s1940_s1 + $0x148] sm:$0xff]   ;;  %v1494_v53 = vld [vmem:[%s1940_s1 + $0x180] sm:$0xff]   ;;  %v1499_v57 = vld [vmem:[%s1940_s1 + $0x150] sm:$0xff]  }
   0xe   :  { %1339 = vmatprep.subr.bf16.mxu1 %v1472_v14  ;;  %v1497_v54 = vld [vmem:[%s1940_s1 + $0x1c8] sm:$0xff]   ;;  %v1501_v59 = vld [vmem:[%s1940_s1 + $0x1d0] sm:$0xff]   ;;  %v1503_v61 = vld [vmem:[%s1940_s1 + $0x158] sm:$0xff]  }
   0xf   :  { %1318 = vmatpush3.bf16.msra.mxu0 %v1471_v13  ;;  %v239_v46 = vcombine.high %v1715_v43, %v1715_v43  ;;  %v260_v47 = vrot.slane %v238_v44, %v1711_v41  ;;  %v268_v50 = vcombine.high %v246_v45, %v246_v45  ;;  %v1496_v56 = vld [vmem:[%s1940_s1 + $0x108] sm:$0xff]   ;;  %v1500_v60 = vld [vmem:[%s1940_s1 + $0x110] sm:$0xff]   ;;  %v1505_v63 = vld [vmem:[%s1940_s1 + $0x1d8] sm:$0xff]  }
  0x10   :  { %1319 = vmatprep.subr.bf16.mxu0 %v1474_v16  ;;  %v1498_v58 = vld [vmem:[%s1940_s1 + $0x188] sm:$0xff]   ;;  %v1502_v62 = vld [vmem:[%s1940_s1 + $0x190] sm:$0xff]   ;;  %v1504_v0 = vld [vmem:[%s1940_s1 + $0x118] sm:$0xff]  }
  0x11   :  { %1340 = vmatpush3.bf16.msra.mxu1 %v1473_v15  ;;  %v267_v49 = vrot.slane %v239_v46, %v1711_v41  ;;  %947 = vmatprep.mubr.bf16.mxu0 %v260_v47  ;;  %v270_v52 = vcombine.high %v260_v47, %v260_v47  ;;  %v1507_v1 = vld [vmem:[%s1940_s1 + $0x160] sm:$0xff]   ;;  %v1506_v2 = vld [vmem:[%s1940_s1 + $0x198] sm:$0xff]   ;;  %v1511_v5 = vld [vmem:[%s1940_s1 + $0x168] sm:$0xff]  }
  0x12   :  { %1341 = vmatprep.subr.bf16.mxu1 %v1476_v18  ;;  %v1509_v3 = vld [vmem:[%s1940_s1 + $0x1e0] sm:$0xff]   ;;  %v1513_v7 = vld [vmem:[%s1940_s1 + $0x1e8] sm:$0xff]   ;;  %v1515_v9 = vld [vmem:[%s1940_s1 + $0x170] sm:$0xff]  }
  0x13   :  { %1320 = vmatpush3.bf16.msra.mxu0 %v1475_v17  ;;  %v271_v55 = vcombine.high %v267_v49, %v267_v49  ;;  %987 = vmatprep.mubr.bf16.mxu1 %v270_v52  ;;  %v1508_v4 = vld [vmem:[%s1940_s1 + $0x120] sm:$0xff]   ;;  %v1512_v8 = vld [vmem:[%s1940_s1 + $0x128] sm:$0xff]   ;;  %v1517_v11 = vld [vmem:[%s1940_s1 + $0x1f0] sm:$0xff]   ;;  %v253_v17 = vrot.slane %v1715_v43, %v1711_v41 }
  0x14   :  { %1321 = vmatprep.subr.bf16.mxu0 %v1478_v20  ;;  %v1510_v6 = vld [vmem:[%s1940_s1 + $0x1a0] sm:$0xff]   ;;  %v1514_v10 = vld [vmem:[%s1940_s1 + $0x1a8] sm:$0xff]   ;;  %v1516_v12 = vld [vmem:[%s1940_s1 + $0x130] sm:$0xff]  }
  0x15   :  { %1342 = vmatpush3.bf16.msra.mxu1 %v1477_v19  ;;  %v1519_v13 = vld [vmem:[%s1940_s1 + $0x178] sm:$0xff]   ;;  %v1518_v14 = vld [vmem:[%s1940_s1 + $0x1b0] sm:$0xff]   ;;  %v1523_v18 = vld [vmem:[%s1940_s1 + $0x240] sm:$0xff]  }
  0x16   :  { %1343 = vmatprep.subr.bf16.mxu1 %v1480_v22  ;;  %v1521_v15 = vld [vmem:[%s1940_s1 + $0x1f8] sm:$0xff]   ;;  %v1525_v20 = vld [vmem:[%s1940_s1 + $0x2c0] sm:$0xff]   ;;  %v269_v22 = vcombine.high %v253_v17, %v253_v17  ;;  %v1533_v29 = vld [vmem:[%s1940_s1 + $0x2d0] sm:$0xff]  }
  0x17   :  { %1322 = vmatpush3.bf16.msra.mxu0 %v1479_v21  ;;  %v1520_v16 = vld [vmem:[%s1940_s1 + $0x138] sm:$0xff]   ;;  %v1524_v21 = vld [vmem:[%s1940_s1 + $0x200] sm:$0xff]   ;;  %v1543_v39 = vld [vmem:[%s1940_s1 + $0x268] sm:$0xff]  }
  0x18   :  { %1323 = vmatprep.subr.bf16.mxu0 %v1482_v24  ;;  %v1522_v19 = vld [vmem:[%s1940_s1 + $0x1b8] sm:$0xff]   ;;  %v1526_v24 = vld [vmem:[%s1940_s1 + $0x280] sm:$0xff]   ;;  %v1545_v42 = vld [vmem:[%s1940_s1 + $0x2e8] sm:$0xff]  }
  0x19   :  { %1344 = vmatpush3.bf16.msra.mxu1 %v1481_v23  ;;  %v1527_v23 = vld [vmem:[%s1940_s1 + $0x248] sm:$0xff]   ;;  %v1537_v33 = vld [vmem:[%s1940_s1 + $0x2d8] sm:$0xff]   ;;  %v1539_v35 = vld [vmem:[%s1940_s1 + $0x260] sm:$0xff]  }
  0x1a   :  { %1345 = vmatprep.subr.bf16.mxu1 %v1484_v26  ;;  %v1528_v26 = vld [vmem:[%s1940_s1 + $0x208] sm:$0xff]   ;;  %v1538_v36 = vld [vmem:[%s1940_s1 + $0x298] sm:$0xff]   ;;  %v1541_v37 = vld [vmem:[%s1940_s1 + $0x2e0] sm:$0xff]  }
  0x1b   :  { %1324 = vmatpush3.bf16.msra.mxu0 %v1483_v25  ;;  %v1529_v25 = vld [vmem:[%s1940_s1 + $0x2c8] sm:$0xff]   ;;  %v1540_v38 = vld [vmem:[%s1940_s1 + $0x220] sm:$0xff]   ;;  %v1547_v44 = vld [vmem:[%s1940_s1 + $0x270] sm:$0xff]  }
  0x1c   :  { %1325 = vmatprep.subr.bf16.mxu0 %v1486_v28  ;;  %v1530_v28 = vld [vmem:[%s1940_s1 + $0x288] sm:$0xff]  }
  0x1d   :  { %1346 = vmatpush3.bf16.msra.mxu1 %v1485_v27  ;;  %v1531_v27 = vld [vmem:[%s1940_s1 + $0x250] sm:$0xff]   ;;  %v1544_v43 = vld [vmem:[%s1940_s1 + $0x228] sm:$0xff]  }
  0x1e   :  { %1347 = vmatprep.subr.bf16.mxu1 %v1488_v31  ;;  %v1535_v31 = vld [vmem:[%s1940_s1 + $0x258] sm:$0xff]   ;;  %v1546_v46 = vld [vmem:[%s1940_s1 + $0x2a8] sm:$0xff]  }
  0x1f   :  { %1326 = vmatpush3.bf16.msra.mxu0 %v1487_v30  ;;  %v1532_v30 = vld [vmem:[%s1940_s1 + $0x210] sm:$0xff]  }
  0x20   :  { %1355 = vmatprep.subr.bf16.mxu0 %v1491_v34  ;;  %v1536_v34 = vld [vmem:[%s1940_s1 + $0x218] sm:$0xff]  }
  0x21   :  { %1348 = vmatpush3.bf16.msra.mxu1 %v1489_v32  ;;  %v1534_v32 = vld [vmem:[%s1940_s1 + $0x290] sm:$0xff]  }
  0x22   :  { %1377 = vmatprep.subr.bf16.mxu1 %v1493_v40  ;;  %948 = vmatmul.mubr.bf16.vlgmr.msra.gmra.mrb[0].mxu0 %v246_v45  ;;  %v1542_v40 = vld [vmem:[%s1940_s1 + $0x2a0] sm:$0xff]   ;;  %v17_v45 = vld [vmem:[%s1939_s0 + $0x8] sm:$0x1f] }
  0x23   :  { %1356 = vmatpush3.bf16.msra.mxu0 %v1492_v48  ;;  %1027 = vmatprep.mubr.bf16.mxu0 %v267_v49  ;;  %v279_v47 = vrot.slane %v17_v45, %v1711_v41  ;;  %v1549_v48 = vld [vmem:[%s1940_s1 + $0x2f0] sm:$0xff]  }
  0x24   :  { %988 = vmatmul.mubr.bf16.vlgmr.msra.gmra.mrb[0].mxu1 %v268_v50  ;;  %1357 = vmatprep.subr.bf16.mxu0 %v1495_v51 }
  0x25   :  { %1378 = vmatpush3.bf16.msra.mxu1 %v1494_v53  ;;  %1067 = vmatprep.mubr.bf16.mxu1 %v271_v55 }
  0x26   :  { %1379 = vmatprep.subr.bf16.mxu1 %v1497_v54 }
  0x27   :  { %1358 = vmatpush3.bf16.msra.mxu0 %v1496_v56 }
  0x28   :  { %1359 = vmatprep.subr.bf16.mxu0 %v1499_v57 }
  0x29   :  { %1380 = vmatpush3.bf16.msra.mxu1 %v1498_v58 }
  0x2a   :  { %1381 = vmatprep.subr.bf16.mxu1 %v1501_v59 }
  0x2b   :  { %1360 = vmatpush3.bf16.msra.mxu0 %v1500_v60 }
  0x2c   :  { %1361 = vmatprep.subr.bf16.mxu0 %v1503_v61 }
  0x2d   :  { %1382 = vmatpush3.bf16.msra.mxu1 %v1502_v62 }
  0x2e   :  { %1383 = vmatprep.subr.bf16.mxu1 %v1505_v63 }
  0x2f   :  { %1362 = vmatpush3.bf16.msra.mxu0 %v1504_v0 }
  0x30   :  { %1363 = vmatprep.subr.bf16.mxu0 %v1507_v1 }
  0x31   :  { %1384 = vmatpush3.bf16.msra.mxu1 %v1506_v2 }
  0x32   :  { %1385 = vmatprep.subr.bf16.mxu1 %v1509_v3 }
  0x33   :  { %1364 = vmatpush3.bf16.msra.mxu0 %v1508_v4 }
  0x34   :  { %1365 = vmatprep.subr.bf16.mxu0 %v1511_v5 }
  0x35   :  { %1386 = vmatpush3.bf16.msra.mxu1 %v1510_v6 }
  0x36   :  { %1387 = vmatprep.subr.bf16.mxu1 %v1513_v7 }
  0x37   :  { %1366 = vmatpush3.bf16.msra.mxu0 %v1512_v8 }
  0x38   :  { %1367 = vmatprep.subr.bf16.mxu0 %v1515_v9 }
  0x39   :  { %1388 = vmatpush3.bf16.msra.mxu1 %v1514_v10 }
  0x3a   :  { %1389 = vmatprep.subr.bf16.mxu1 %v1517_v11 }
  0x3b   :  { %1368 = vmatpush3.bf16.msra.mxu0 %v1516_v12 }
  0x3c   :  { %1369 = vmatprep.subr.bf16.mxu0 %v1519_v13 }
  0x3d   :  { %1390 = vmatpush3.bf16.msra.mxu1 %v1518_v14 }
  0x3e   :  { %1391 = vmatprep.subr.bf16.mxu1 %v1521_v15 }
  0x3f   :  { %1370 = vmatpush3.bf16.msra.mxu0 %v1520_v16 }
  0x40   :  { %1399 = vmatprep.subr.bf16.mxu0 %v1523_v18 }
  0x41   :  { %1392 = vmatpush3.bf16.msra.mxu1 %v1522_v19 }
  0x42   :  { %1028 = vmatmul.mubr.bf16.vlgmr.msra.gmra.mrb[4].mxu0 %v253_v17  ;;  %1421 = vmatprep.subr.bf16.mxu1 %v1525_v20 }
  0x43   :  { %1400 = vmatpush3.bf16.msra.mxu0 %v1524_v21 }
  0x44   :  { %1068 = vmatmul.mubr.bf16.vlgmr.msra.gmra.mrb[4].mxu1 %v269_v22  ;;  %1401 = vmatprep.subr.bf16.mxu0 %v1527_v23 }
  0x45   :  { %1422 = vmatpush3.bf16.msra.mxu1 %v1526_v24 }
  0x46   :  { %1423 = vmatprep.subr.bf16.mxu1 %v1529_v25 }
  0x47   :  { %1402 = vmatpush3.bf16.msra.mxu0 %v1528_v26 }
  0x48   :  { %1403 = vmatprep.subr.bf16.mxu0 %v1531_v27 }
  0x49   :  { %1424 = vmatpush3.bf16.msra.mxu1 %v1530_v28 }
  0x4a   :  { %1425 = vmatprep.subr.bf16.mxu1 %v1533_v29 }
  0x4b   :  { %1404 = vmatpush3.bf16.msra.mxu0 %v1532_v30 }
  0x4c   :  { %1405 = vmatprep.subr.bf16.mxu0 %v1535_v31 }
  0x4d   :  { %1426 = vmatpush3.bf16.msra.mxu1 %v1534_v32 }
  0x4e   :  { %1427 = vmatprep.subr.bf16.mxu1 %v1537_v33 }
  0x4f   :  { %1406 = vmatpush3.bf16.msra.mxu0 %v1536_v34 }
  0x50   :  { %1407 = vmatprep.subr.bf16.mxu0 %v1539_v35 }
  0x51   :  { %1428 = vmatpush3.bf16.msra.mxu1 %v1538_v36 }
  0x52   :  { %1429 = vmatprep.subr.bf16.mxu1 %v1541_v37 }
  0x53   :  { %1408 = vmatpush3.bf16.msra.mxu0 %v1540_v38 }
  0x54   :  { %1409 = vmatprep.subr.bf16.mxu0 %v1543_v39 }
  0x55   :  { %1430 = vmatpush3.bf16.msra.mxu1 %v1542_v40 }
  0x56   :  { %1431 = vmatprep.subr.bf16.mxu1 %v1545_v42 }
  0x57   :  { %8 = vsyncpa [#allocation3], 0  ;;  %1410 = vmatpush3.bf16.msra.mxu0 %v1544_v43  ;;  %v1548_v49 = vld [vmem:[%s1940_s1 + $0x230] sm:$0xff]   ;;  %v287_v50 = vcombine.high %v279_v47, %v279_v47  ;;  %v1551_v51 = vld [vmem:[%s1940_s1 + $0x278] sm:$0xff]   ;;  %v294_v57 = vrot.slane %v279_v47, %v1711_v41  ;;  %v272_v59 = vcombine.high %v17_v45, %v17_v45  ;;  %v1583_v61 = vmov 0.0  }
  0x58   :  { %1411 = vmatprep.subr.bf16.mxu0 %v1547_v44  ;;  %v1550_v52 = vld [vmem:[%s1940_s1 + $0x2b0] sm:$0xff]   ;;  %v1553_v54 = vld [vmem:[%s1940_s1 + $0x2f8] sm:$0xff]   ;;  %v1556_v60 = vld [vmem:[%s1940_s1 + $0x300] sm:$0xff]   ;;  %vm1584_vm0 = vmmov 0   ;;  %vm911_vm1 = vcmask 261120   ;;  %vm1195_vm2 = vcmask 74752  }
  0x59   :  { %1432 = vmatpush3.bf16.msra.mxu1 %v1546_v46  ;;  %v308_v53 = vrot.slane %v287_v50, %v1711_v41  ;;  %v1552_v55 = vld [vmem:[%s1940_s1 + $0x238] sm:$0xff]   ;;  %v309_v62 = vcombine.high %v294_v57, %v294_v57  ;;  %v286_v63 = vrot.slane %v272_v59, %v1711_v41  ;;  %v1557_v0 = vld [vmem:[%s1940_s1 + $0x308] sm:$0xff]   ;;  %v1211_v3 = vld [vmem:[%s1941_s2] ss:$0 sm:$0xff] }
  0x5a   :  { %1433 = vmatprep.subr.bf16.mxu1 %v1549_v48  ;;  %v1554_v58 = vld [vmem:[%s1940_s1 + $0x2b8] sm:$0xff]   ;;  %s1585_s1 = smov [#allocation2]  }
  0x5b   :  { %1412 = vmatpush3.bf16.msra.mxu0 %v1548_v49  ;;  %1107 = vmatprep.mubr.bf16.mxu0 %v308_v53  ;;  %v310_v56 = vcombine.high %v308_v53, %v308_v53  ;;  %v301_v1 = vrot.slane %v286_v63, %v1711_v41  ;;  %s1203_s2 = sshll.u32 %s1585_s1, 4  ;;  %s1204_s2 = int_to_ptr.vmem [resolvable:$true] %s1203_s2 }
  0x5c   :  { %1413 = vmatprep.subr.bf16.mxu0 %v1551_v51  ;;  %s1558_s24 = scalar_lea.vmem %s1204_s2, 32  ;;  %p1563_p1 = scmp.lt.s32.totalorder %s1204_s2, %s1204_s2 }
  0x5d   :  { %1434 = vmatpush3.bf16.msra.mxu1 %v1550_v52  ;;  %1147 = vmatprep.mubr.bf16.mxu1 %v310_v56  ;;  %p1559_p0 = scmp.ne.s32.totalorder %s1204_s2, %s1558_s24  ;;  %p1564_p2 = scmp.lt.s32.totalorder %s1558_s24, %s1558_s24 }
  0x5e   :  { %1435 = vmatprep.subr.bf16.mxu1 %v1553_v54 }
  0x5f   :  { %1414 = vmatpush3.bf16.msra.mxu0 %v1552_v55  ;;  %p1565_p3 = por %p1564_p2, %p1563_p1 }
  0x60   :  { %1446 = vmatprep.subr.bf16.mxu0 %v1583_v61 }
  0x61   :  { %1436 = vmatpush3.bf16.msra.mxu1 %v1554_v58  ;;  %p1566_p4 = pnand %p1565_p3, %p1559_p0 }
  0x62   :  { %1108 = vmatmul.mubr.bf16.vlgmr.msra.gmra.mrb[8].mxu0 %v294_v57 }
  0x63   :  { %1447 = vmatpush3.bf16.msra.mxu0 %v1556_v60  ;;  %1450 = vmatprep.mubr.msk.bf16.mxu0 %vm1584_vm0, %v1583_v61 }
  0x64   :  { %1148 = vmatmul.mubr.bf16.vlgmr.msra.gmra.mrb[8].mxu1 %v309_v62  ;;  %1448 = vmatprep.subr.bf16.mxu0 %v1583_v61 }
  0x67   :  { %1449 = vmatpush3.bf16.msra.mxu0 %v1557_v0 }
  0x6a   :  { %1451 = vmatmul.mubr.msk.bf16.vlgmr.msra.gmra.mrb[12].mxu0 %vm911_vm1, %v301_v1 }
  0xf5   :  { %v1327_v2 = vpop.f32.mrb[0].mxu0 }
  0xf6   :  { %v1328_v4 = vpop.f32.mrb[1].mxu0 }
  0xf7   :  { %v1329_v5 = vadd.f32 %v1328_v4, %v1327_v2  ;;  %v1330_v6 = vpop.f32.mrb[2].mxu0  ;;  %v1349_v7 = vpop.f32.mrb[0].mxu1 }
  0xf8   :  { %v1331_v8 = vpop.f32.mrb[3].mxu0  ;;  %v1350_v9 = vpop.f32.mrb[1].mxu1 }
  0xf9   :  { %v950_v10 = vadd.f32 %v1329_v5, %v1211_v3  ;;  %v1351_v11 = vadd.f32 %v1350_v9, %v1349_v7  ;;  %v1352_v12 = vpop.f32.mrb[2].mxu1 }
  0xfa   :  { %v1353_v13 = vpop.f32.mrb[3].mxu1 }
  0xfb   :  { %v990_v14 = vadd.f32 %v1351_v11, %v950_v10 }
 0x115   :  { %v1371_v41 = vpop.f32.mrb[4].mxu0 }
 0x116   :  { %v1372_v15 = vpop.f32.mrb[5].mxu0 }
 0x117   :  { %v1373_v16 = vadd.f32 %v1372_v15, %v1371_v41  ;;  %v1374_v17 = vpop.f32.mrb[6].mxu0  ;;  %v1393_v18 = vpop.f32.mrb[4].mxu1 }
 0x118   :  { %v1375_v19 = vpop.f32.mrb[7].mxu0  ;;  %v1394_v20 = vpop.f32.mrb[5].mxu1 }
 0x119   :  { %v1030_v21 = vadd.f32 %v1373_v16, %v990_v14  ;;  %v1395_v22 = vadd.f32 %v1394_v20, %v1393_v18  ;;  %v1396_v23 = vpop.f32.mrb[6].mxu1 }
 0x11a   :  { %v1397_v24 = vpop.f32.mrb[7].mxu1 }
 0x11b   :  { %v1070_v25 = vadd.f32 %v1395_v22, %v1030_v21 }
 0x135   :  { %v1415_v26 = vpop.f32.mrb[8].mxu0 }
 0x136   :  { %v1416_v27 = vpop.f32.mrb[9].mxu0 }
 0x137   :  { %v1417_v28 = vadd.f32 %v1416_v27, %v1415_v26  ;;  %v1437_v29 = vpop.f32.mrb[8].mxu1  ;;  %v1418_v30 = vpop.f32.mrb[10].mxu0 }
 0x138   :  { %v1438_v31 = vpop.f32.mrb[9].mxu1  ;;  %v1419_v32 = vpop.f32.mrb[11].mxu0 }
 0x139   :  { %v1110_v33 = vadd.f32 %v1417_v28, %v1070_v25  ;;  %v1439_v34 = vadd.f32 %v1438_v31, %v1437_v29  ;;  %v1440_v35 = vpop.f32.mrb[10].mxu1 }
 0x13a   :  { %v1441_v36 = vpop.f32.mrb[11].mxu1 }
 0x13b   :  { %v1150_v37 = vadd.f32 %v1439_v34, %v1110_v33 }
 0x13d   :  { %v1189_v38 = vpop.f32.mrb[12].mxu0 }
 0x13e   :  { %v1190_v39 = vadd.f32 %v1189_v38, %v1150_v37  ;;  %v1452_v40 = vpop.f32.mrb[13].mxu0 }
 0x13f   :  { %v1192_v42 = vpop.f32.mrb[14].mxu0 }
 0x140   :  { %v1453_v43 = vpop.f32.mrb[15].mxu0  ;;  %1196 = vst.msk [vmem:[#allocation2] sm:$0x3] %vm1195_vm2, %v1190_v39 }
 0x141   :  { %1569 = shalt.err (!%p1566_p4)
}
 0x142   :  { %s1570_s27 = scalar_lea.hbm %s1942_s3, 32 }
 0x143   :  { %p1571_p5 = scmp.ne.s32.totalorder %s1942_s3, %s1570_s27  ;;  %p1574_p6 = scmp.lt.u32.totalorder %s1570_s27, %s1942_s3 }
 0x145   :  { %p1576_p7 = pnand %p1574_p6, %p1571_p5 }
 0x147   :  { %1579 = shalt.err (!%p1576_p7)
}
 0x148   :  { %1206 = dma.vmem_to_hbm [thread:$0]  %s1204_s2, 32, %s1942_s3, [#allocation3]  }
 0x149   :  { %1580 = dma.done.wait [#allocation3], 32  }
 0x14a   :  { %1581 = vsyncadd [#allocation3], 4294967264 }
 0x14b   :  { %1210 = vsyncpa [#allocation3], 1 }

// kernel: cnn_forward.4
= control target key start
LH: loop header
LB: loop body
LE: loop exit
PB: predicated region body
PF: predicated region fallthrough
CT: control target
= control target key end

     0   :  { %s2209_s12 = smov 0   ;;  %s2570_s0 = inlined_call_operand.vmem [shape: bf16[2,4,16,83], index: 0, kind: input, shape index: {}]   ;;  %s2571_s1 = inlined_call_operand.vmem [shape: bf16[32,400], index: 1, kind: input, shape index: {}]   ;;  %s2572_s2 = inlined_call_operand.vmem [shape: f32[32,1], index: 2, kind: input, shape index: {}]   ;;  %s2573_s3 = inlined_call_operand.vmem [shape: bf16[2,32,63], index: 3, kind: output, shape index: {}]  }
   0x1 LB: > { %s1743_s13 = sadd.s32 4294967295, %s2178_s12   ;;  %p1747_p0 = scmp.ge.s32.totalorder %s2178_s12, 1  ;;  %s2178_s12 = sphi %s2209_s12, %s13_s12  }
   0x2   : > { %p137_p1 = scmp.lt.s32.totalorder %s2178_s12, 3 }
   0x4   : > { %p138_p2 = pnand %p1747_p0, %p137_p1 }
   0x5   : > { %p161_p3 = scmp.lt.s32.totalorder (!%p138_p2), %s1743_s13, 1  ;;  %s2180_s18 = smov (!%p138_p2), 127   ;;  %vm180_vm0 = vcmask (!%p138_p2), 515072   ;;  %vm1404_vm1 = vcmask (!%p138_p2), 130048   ;;  %vm1683_vm2 = vcmask (!%p138_p2), 510976  }
   0x6   : > { %141 = sbr.rel (%p138_p2) target bundleno = 556 (0x22c), region = 32  ;;  %s2181_s19 = smov (!%p138_p2), 126  }
   0x7   : > { %s2182_s20 = smov (!%p138_p2), 119   ;;  %s2183_s21 = smov (!%p138_p2), 118  }
   0x8   : > { %s2184_s22 = smov (!%p138_p2), 117   ;;  %s2185_s25 = smov (!%p138_p2), 110  }
   0x9   : > { %s2186_s26 = smov (!%p138_p2), 109   ;;  %s2187_s27 = smov (!%p138_p2), 108  }
   0xd   : > { %s2575_s13 = smov (!%p161_p3, %s1743_s13), 1 }
   0xe   : > { %s2020_s14 = sshll.u32 %s2575_s13, 5 }
   0xf   : > { %s2223_s17 = scalar_lea.vmem %s2570_s0, %s2020_s14 }
  0x10   : > { %v2061_v0 = vld [vmem:[%s2223_s17] sm:$0xff]   ;;  %v2062_v1 = vld [vmem:[%s2223_s17 + $0x8] sm:$0xff]   ;;  %v2063_v2 = vld [vmem:[%s2223_s17 + $0x10] sm:$0xff]  }
  0x11   : > { %459 = vrot.lane.b32.xlu0 %v2061_v0, %s2180_s18  ;;  %470 = vrot.lane.b32.xlu1 %v2062_v1, %s2180_s18  ;;  %v2064_v3 = vld [vmem:[%s2223_s17] sm:$0xff]   ;;  %v2065_v4 = vld [vmem:[%s2223_s17 + $0x18] sm:$0xff]  }
  0x12   : > { %v2066_v5 = vld [vmem:[%s2223_s17] sm:$0xff]   ;;  %v2067_v6 = vld [vmem:[%s2223_s17 + $0x10] sm:$0xff]   ;;  %v2068_v7 = vld [vmem:[%s2223_s17 + $0x8] sm:$0xff]  }
  0x13   : > { %v2069_v8 = vld [vmem:[%s2223_s17 + $0x10] sm:$0xff]   ;;  %v2070_v9 = vld [vmem:[%s2223_s17 + $0x8] sm:$0xff]   ;;  %v2071_v10 = vld [vmem:[%s2223_s17 + $0x18] sm:$0xff]  }
  0x14   : > { %v2072_v11 = vld [vmem:[%s2223_s17] sm:$0xff]   ;;  %v2073_v12 = vld [vmem:[%s2223_s17 + $0x18] sm:$0xff]   ;;  %v2074_v13 = vld [vmem:[%s2223_s17 + $0x10] sm:$0xff]  }
  0x15   : > { %1001 = vrot.lane.b32.xlu0 %v2063_v2, %s2180_s18  ;;  %199 = vrot.lane.b32.xlu1 %v2064_v3, %s2180_s18  ;;  %v2075_v14 = vld [vmem:[%s2223_s17 + $0x8] sm:$0xff]   ;;  %v2076_v15 = vld [vmem:[%s2223_s17 + $0x10] sm:$0xff]  }
  0x16   : > { %v2077_v16 = vld [vmem:[%s2223_s17] sm:$0xff]   ;;  %v2079_v18 = vld [vmem:[%s2223_s17 + $0x18] sm:$0xff]   ;;  %v2080_v19 = vld [vmem:[%s2223_s17 + $0x8] sm:$0xff]  }
  0x17   : > { %v2078_v17 = vld [vmem:[%s2223_s17] sm:$0xff]   ;;  %v2081_v20 = vld [vmem:[%s2223_s17 + $0x10] sm:$0xff]   ;;  %v2082_v21 = vld [vmem:[%s2223_s17 + $0x8] sm:$0xff]  }
  0x18   : > { %v2083_v22 = vld [vmem:[%s2223_s17 + $0x10] sm:$0xff]   ;;  %v2084_v23 = vld [vmem:[%s2223_s17] sm:$0xff]   ;;  %v2085_v24 = vld [vmem:[%s2223_s17 + $0x18] sm:$0xff]  }
  0x19   : > { %1012 = vrot.lane.b32.xlu0 %v2065_v4, %s2180_s18  ;;  %481 = vrot.lane.b32.xlu1 %v2066_v5, %s2181_s19  ;;  %v2086_v25 = vld [vmem:[%s2223_s17] sm:$0xff]   ;;  %v2087_v26 = vld [vmem:[%s2223_s17 + $0x18] sm:$0xff]  }
  0x1a   : > { %v2088_v27 = vld [vmem:[%s2223_s17 + $0x8] sm:$0xff]   ;;  %v2089_v28 = vld [vmem:[%s2223_s17 + $0x10] sm:$0xff]   ;;  %v2092_v31 = vld [vmem:[%s2223_s17] sm:$0xff]  }
  0x1b   : > { %v2090_v29 = vld [vmem:[%s2223_s17 + $0x8] sm:$0xff]   ;;  %v2093_v33 = vld [vmem:[%s2223_s17] sm:$0xff]   ;;  %v2094_v35 = vld [vmem:[%s2223_s17 + $0x18] sm:$0xff]  }
  0x1c   : > { %v2091_v30 = vld [vmem:[%s2223_s17 + $0x8] sm:$0xff]   ;;  %v2123_v34 = vld [vmem:[%s2223_s17] sm:$0xff]   ;;  %v2096_v37 = vld [vmem:[%s2223_s17 + $0x10] sm:$0xff]  }
  0x1d   : > { %739 = vrot.lane.b32.xlu0 %v2067_v6, %s2180_s18  ;;  %210 = vrot.lane.b32.xlu1 %v2068_v7, %s2180_s18  ;;  %v2121_v32 = vld [vmem:[%s2223_s17 + $0x8] sm:$0xff]   ;;  %v2095_v36 = vld [vmem:[%s2223_s17] sm:$0xff]   ;;  %181 = vst.msk [vmem:[#allocation2] sm:$0xff] %vm180_vm0, %v2123_v34 }
  0x1e   : > { %451 = vst.msk [vmem:[#allocation2 + $0x8] sm:$0xff] %vm180_vm0, %v2121_v32  ;;  %v2126_v38 = vld [vmem:[%s2223_s17 + $0x18] sm:$0xff]   ;;  %v2127_v39 = vld [vmem:[%s2223_s17 + $0x8] sm:$0xff]   ;;  %v2128_v40 = vld [vmem:[%s2223_s17 + $0x10] sm:$0xff]  }
  0x1f   : > { %993 = vst.msk [vmem:[#allocation2 + $0x18] sm:$0xff] %vm180_vm0, %v2126_v38  ;;  %v2097_v41 = vld [vmem:[%s2223_s17 + $0x8] sm:$0xff]   ;;  %191 = vst.msk [vmem:[#allocation2 + $0x20] sm:$0xff] %vm180_vm0, %v2127_v39  ;;  %v2098_v43 = vld [vmem:[%s2223_s17 + $0x10] sm:$0xff]  }
  0x20   : > { %722 = vst.msk [vmem:[#allocation2 + $0x10] sm:$0xff] %vm180_vm0, %v2128_v40  ;;  %v2131_v45 = vld [vmem:[%s2223_s17 + $0x18] sm:$0xff]   ;;  %v2099_v46 = vld [vmem:[%s2223_s17 + $0x8] sm:$0xff]   ;;  %v2101_v50 = vld [vmem:[%s2223_s17] sm:$0xff]  }
  0x21   : > { %1023 = vrot.lane.b32.xlu0 %v2069_v8, %s2181_s19  ;;  %492 = vrot.lane.b32.xlu1 %v2070_v9, %s2181_s19  ;;  %731 = vst.msk [vmem:[#allocation2 + $0x30] sm:$0xff] %vm180_vm0, %v2131_v45  ;;  %v2100_v48 = vld [vmem:[%s2223_s17 + $0x18] sm:$0xff]   ;;  %v2103_v52 = vld [vmem:[%s2223_s17] sm:$0xff]  }
  0x22   : > { %v2102_v51 = vld [vmem:[%s2223_s17 + $0x18] sm:$0xff]   ;;  %v2104_v53 = vld [vmem:[%s2223_s17 + $0x10] sm:$0xff]   ;;  %v2105_v54 = vld [vmem:[%s2223_s17 + $0x8] sm:$0xff]  }
  0x23   : > { %v2144_v55 = vld [vmem:[%s2223_s17 + $0x18] sm:$0xff]   ;;  %v2145_v56 = vld [vmem:[%s2223_s17 + $0x10] sm:$0xff]   ;;  %v2107_v59 = vld [vmem:[%s2223_s17 + $0x8] sm:$0xff]  }
  0x24   : > { %v1266_v44 = vld [vmem:[#allocation2] sm:$0xff]  ;;  %v2106_v57 = vld [vmem:[%s2223_s17 + $0x10] sm:$0xff]   ;;  %504 = vst.msk [vmem:[#allocation2 + $0xa8] sm:$0xff] %vm180_vm0, %v2144_v55  ;;  %234 = vst.msk [vmem:[#allocation2 + $0xa0] sm:$0xff] %vm180_vm0, %v2145_v56 }
  0x25   : > { %750 = vrot.lane.b32.xlu0 %v2071_v10, %s2180_s18  ;;  %221 = vrot.lane.b32.xlu1 %v2072_v11, %s2181_s19  ;;  %v1267_v42 = vld [vmem:[#allocation2 + $0x8] sm:$0xff]  ;;  %v2148_v58 = vld [vmem:[%s2223_s17 + $0x18] sm:$0xff]   ;;  %v2109_v61 = vld [vmem:[%s2223_s17] sm:$0xff]  }
  0x26   : > { %1411 = vmatprep.subr.bf16.mxu0 %v1267_v42  ;;  %v1269_v47 = vld [vmem:[#allocation2 + $0x18] sm:$0xff]  ;;  %244 = vst.msk [vmem:[#allocation2 + $0xc0] sm:$0xff] %vm180_vm0, %v2148_v58  ;;  %v2112_v0 = vld [vmem:[%s2223_s17 + $0x10] sm:$0xff]   ;;  %v2114_v2 = vld [vmem:[%s2223_s17 + $0x8] sm:$0xff]  }
  0x27   : > { %1412 = vmatpush1.bf16.msra.mxu0 %v1266_v44  ;;  %1517 = vmatprep.subr.bf16.mxu1 %v1269_v47  ;;  %v1268_v49 = vld [vmem:[#allocation2 + $0x10] sm:$0xff]  ;;  %v2108_v60 = vld [vmem:[%s2223_s17 + $0x18] sm:$0xff]   ;;  %v2116_v5 = vld [vmem:[%s2223_s17] sm:$0xff]  }
  0x28   : > { %1518 = vmatpush1.bf16.msra.mxu1 %v1268_v49  ;;  %v2110_v62 = vld [vmem:[%s2223_s17 + $0x18] sm:$0xff]   ;;  %v2113_v1 = vld [vmem:[%s2223_s17 + $0x10] sm:$0xff]   ;;  %v2118_v7 = vld [vmem:[%s2223_s17] sm:$0xff]  }
  0x29   : > { %1034 = vrot.lane.b32.xlu0 %v2073_v12, %s2181_s19  ;;  %761 = vrot.lane.b32.xlu1 %v2074_v13, %s2181_s19  ;;  %v2111_v63 = vld [vmem:[%s2223_s17 + $0x18] sm:$0xff]   ;;  %v2115_v3 = vld [vmem:[%s2223_s17 + $0x10] sm:$0xff]  }
  0x2a   : > { %v2163_v4 = vld [vmem:[%s2571_s1 + $0x4] ss:$16 sps:$4 sm:$0xff]   ;;  %v2117_v6 = vld [vmem:[%s2223_s17 + $0x18] sm:$0xff]   ;;  %v2120_v9 = vld [vmem:[%s2223_s17 + $0x8] sm:$0xff]  }
  0x2b   : > { %1443 = vmatprep.mubr.bf16.mxu0 %v2163_v4  ;;  %1549 = vmatprep.mubr.bf16.mxu1 %v2163_v4  ;;  %v2119_v8 = vld [vmem:[%s2223_s17 + $0x18] sm:$0xff]   ;;  %v2122_v12 = vld [vmem:[%s2223_s17 + $0x10] sm:$0xff]   ;;  %v2124_v13 = vld [vmem:[%s2223_s17 + $0x8] sm:$0xff]  }
  0x2c   : > { %v2137_v42 = vld [vmem:[%s2223_s17 + $0x8] sm:$0xff]   ;;  %v2140_v49 = vld [vmem:[%s2223_s17 + $0x18] sm:$0xff]   ;;  %v2141_v55 = vld [vmem:[%s2223_s17] sm:$0xff]  }
  0x2d   : > { %1045 = vrot.lane.b32.xlu0 %v2075_v14, %s2182_s20  ;;  %512 = vrot.lane.b32.xlu1 %v2076_v15, %s2180_s18  ;;  %v2142_v56 = vld [vmem:[%s2223_s17 + $0x10] sm:$0xff]  }
  0x31   : > { %772 = vrot.lane.b32.xlu0 %v2077_v16, %s2182_s20  ;;  %1056 = vrot.lane.b32.xlu1 %v2078_v17, %s2183_s21  ;;  %v2125_v16 = vld [vmem:[%s2223_s17 + $0x10] sm:$0xff]   ;;  %v1270_v17 = vld [vmem:[#allocation2 + $0x20] sm:$0xff] }
  0x35   : > { %523 = vrot.lane.b32.xlu0 %v2079_v18, %s2180_s18  ;;  %783 = vrot.lane.b32.xlu1 %v2080_v19, %s2182_s20  ;;  %v2129_v18 = vld [vmem:[%s2223_s17] sm:$0xff]  }
  0x39   : > { %252 = vrot.lane.b32.xlu0 %v2081_v20, %s2180_s18  ;;  %1067 = vrot.lane.b32.xlu1 %v2082_v21, %s2183_s21 }
  0x3d   : > { %534 = vrot.lane.b32.xlu0 %v2083_v22, %s2181_s19  ;;  %794 = vrot.lane.b32.xlu1 %v2084_v23, %s2183_s21  ;;  %v2130_v23 = vld [vmem:[%s2223_s17 + $0x18] sm:$0xff]  }
  0x41   : > { %263 = vrot.lane.b32.xlu0 %v2085_v24, %s2180_s18  ;;  %1078 = vrot.lane.b32.xlu1 %v2086_v25, %s2184_s22  ;;  %v1272_v24 = vld [vmem:[#allocation2 + $0x30] sm:$0xff]  ;;  %v2132_v25 = vld [vmem:[%s2223_s17] sm:$0xff]  }
  0x45   : > { %545 = vrot.lane.b32.xlu0 %v2087_v26, %s2181_s19  ;;  %805 = vrot.lane.b32.xlu1 %v2088_v27, %s2183_s21 }
  0x49   : > { %274 = vrot.lane.b32.xlu0 %v2089_v28, %s2181_s19  ;;  %1089 = vrot.lane.b32.xlu1 %v2090_v29, %s2184_s22 }
  0x4d   : > { %556 = vrot.lane.b32.xlu0 %v2091_v30, %s2182_s20  ;;  %816 = vrot.lane.b32.xlu1 %v2092_v31, %s2184_s22  ;;  %v2133_v30 = vld [vmem:[%s2223_s17 + $0x18] sm:$0xff]   ;;  %v2134_v31 = vld [vmem:[%s2223_s17 + $0x8] sm:$0xff]  }
  0x51   : > { %285 = vrot.lane.b32.xlu0 %v2093_v33, %s2182_s20  ;;  %1100 = vrot.lane.b32.xlu1 %v2094_v35, %s2182_s20 }
  0x55   : > { %567 = vrot.lane.b32.xlu0 %v2095_v36, %s2183_s21  ;;  %827 = vrot.lane.b32.xlu1 %v2096_v37, %s2182_s20  ;;  %v2135_v36 = vld [vmem:[%s2223_s17 + $0x10] sm:$0xff]   ;;  %v2136_v37 = vld [vmem:[%s2223_s17 + $0x8] sm:$0xff]  }
  0x59   : > { %296 = vrot.lane.b32.xlu0 %v2097_v41, %s2182_s20  ;;  %1111 = vrot.lane.b32.xlu1 %v2098_v43, %s2183_s21  ;;  %v2138_v43 = vld [vmem:[%s2223_s17] sm:$0xff]  }
  0x5d   : > { %578 = vrot.lane.b32.xlu0 %v2099_v46, %s2183_s21  ;;  %838 = vrot.lane.b32.xlu1 %v2100_v48, %s2182_s20  ;;  %v2139_v48 = vld [vmem:[%s2223_s17] sm:$0xff]  }
  0x61   : > { %307 = vrot.lane.b32.xlu0 %v2101_v50, %s2183_s21  ;;  %1122 = vrot.lane.b32.xlu1 %v2102_v51, %s2183_s21 }
  0x65   : > { %589 = vrot.lane.b32.xlu0 %v2103_v52, %s2184_s22  ;;  %849 = vrot.lane.b32.xlu1 %v2104_v53, %s2183_s21  ;;  %v1287_v52 = vld [vmem:[#allocation2 + $0xa8] sm:$0xff] }
  0x69   : > { %318 = vrot.lane.b32.xlu0 %v2105_v54, %s2183_s21  ;;  %1133 = vrot.lane.b32.xlu1 %v2106_v57, %s2184_s22 }
  0x6d   : > { %600 = vrot.lane.b32.xlu0 %v2107_v59, %s2184_s22  ;;  %860 = vrot.lane.b32.xlu1 %v2108_v60, %s2183_s21  ;;  %v1286_v59 = vld [vmem:[#allocation2 + $0xa0] sm:$0xff] }
  0x71   : > { %329 = vrot.lane.b32.xlu0 %v2109_v61, %s2184_s22  ;;  %1144 = vrot.lane.b32.xlu1 %v2110_v62, %s2184_s22  ;;  %v2143_v62 = vld [vmem:[%s2223_s17 + $0x8] sm:$0xff]  }
  0x75   : > { %611 = vrot.lane.b32.xlu0 %v2111_v63, %s2182_s20  ;;  %871 = vrot.lane.b32.xlu1 %v2112_v0, %s2184_s22  ;;  %v2146_v63 = vld [vmem:[%s2223_s17 + $0x10] sm:$0xff]  }
  0x79   : > { %340 = vrot.lane.b32.xlu0 %v2113_v1, %s2182_s20  ;;  %1155 = vrot.lane.b32.xlu1 %v2114_v2, %s2185_s25  ;;  %v1290_v2 = vld [vmem:[#allocation2 + $0xc0] sm:$0xff] }
  0x7d   : > { %622 = vrot.lane.b32.xlu0 %v2115_v3, %s2183_s21  ;;  %882 = vrot.lane.b32.xlu1 %v2116_v5, %s2185_s25  ;;  %v2147_v5 = vld [vmem:[%s2223_s17 + $0x8] sm:$0xff]  }
  0x81   : > { %351 = vrot.lane.b32.xlu0 %v2117_v6, %s2182_s20  ;;  %1166 = vrot.lane.b32.xlu1 %v2118_v7, %s2186_s26  ;;  %v2149_v6 = vld [vmem:[%s2223_s17 + $0x18] sm:$0xff]  }
  0x83   : > { %v460_v10 = vpop.permute.xlu0 %459  ;;  %v471_v11 = vpop.permute.xlu1 %470 }
  0x84   : > { %462 = vst.msk [vmem:[#allocation2 + $0x28] sm:$0xff] %vm180_vm0, %v460_v10  ;;  %473 = vst.msk [vmem:[#allocation2 + $0x48] sm:$0xff] %vm180_vm0, %v471_v11  ;;  %v2150_v11 = vld [vmem:[%s2223_s17] sm:$0xff]  }
  0x85   : > { %633 = vrot.lane.b32.xlu0 %v2119_v8, %s2183_s21  ;;  %893 = vrot.lane.b32.xlu1 %v2120_v9, %s2185_s25 }
  0x87   : > { %v1002_v14 = vpop.permute.xlu0 %1001  ;;  %v200_v15 = vpop.permute.xlu1 %199 }
  0x88   : > { %1004 = vst.msk [vmem:[#allocation2 + $0x38] sm:$0xff] %vm180_vm0, %v1002_v14  ;;  %202 = vst.msk [vmem:[#allocation2 + $0x40] sm:$0xff] %vm180_vm0, %v200_v15 }
  0x89   : > { %362 = vrot.lane.b32.xlu0 %v2122_v12, %s2183_s21  ;;  %1177 = vrot.lane.b32.xlu1 %v2124_v13, %s2186_s26  ;;  %v2151_v12 = vld [vmem:[%s2223_s17 + $0x18] sm:$0xff]  }
  0x8b   : > { %v1013_v19 = vpop.permute.xlu0 %1012  ;;  %v1271_v20 = vld [vmem:[#allocation2 + $0x28] sm:$0xff]  ;;  %v482_v21 = vpop.permute.xlu1 %481 }
  0x8c   : > { %1015 = vst.msk [vmem:[#allocation2 + $0x58] sm:$0xff] %vm180_vm0, %v1013_v19  ;;  %1413 = vmatprep.subr.bf16.mxu0 %v1271_v20  ;;  %v1275_v22 = vld [vmem:[#allocation2 + $0x48] sm:$0xff]  ;;  %484 = vst.msk [vmem:[#allocation2 + $0x68] sm:$0xff] %vm180_vm0, %v482_v21 }
  0x8d   : > { %644 = vrot.lane.b32.xlu0 %v2125_v16, %s2184_s22  ;;  %1414 = vmatpush1.bf16.msra.mxu0 %v1270_v17  ;;  %v2152_v17 = vld [vmem:[%s2223_s17] sm:$0xff]  }
  0x8e   : > { %1415 = vmatprep.subr.bf16.mxu0 %v1275_v22  ;;  %904 = vrot.lane.b32.xlu1 %v2129_v18, %s2186_s26  ;;  %v2153_v18 = vld [vmem:[%s2223_s17 + $0x10] sm:$0xff]  }
  0x8f   : > { %v740_v26 = vpop.permute.xlu0 %739  ;;  %v1273_v27 = vld [vmem:[#allocation2 + $0x38] sm:$0xff]  ;;  %v211_v28 = vpop.permute.xlu1 %210  ;;  %v1274_v29 = vld [vmem:[#allocation2 + $0x40] sm:$0xff] }
  0x90   : > { %742 = vst.msk [vmem:[#allocation2 + $0x50] sm:$0xff] %vm180_vm0, %v740_v26  ;;  %1519 = vmatprep.subr.bf16.mxu1 %v1273_v27  ;;  %213 = vst.msk [vmem:[#allocation2 + $0x60] sm:$0xff] %vm180_vm0, %v211_v28 }
  0x91   : > { %373 = vrot.lane.b32.xlu0 %v2130_v23, %s2183_s21  ;;  %1520 = vmatpush1.bf16.msra.mxu1 %v1272_v24  ;;  %v2154_v23 = vld [vmem:[%s2223_s17 + $0x8] sm:$0xff]   ;;  %v2155_v24 = vld [vmem:[%s2223_s17 + $0x10] sm:$0xff]  }
  0x92   : > { %1416 = vmatpush1.bf16.msra.mxu0 %v1274_v29  ;;  %1188 = vrot.lane.b32.xlu1 %v2132_v25, %s2187_s27  ;;  %v2156_v29 = vld [vmem:[%s2223_s17 + $0x8] sm:$0xff]  }
  0x93   : > { %v1024_v32 = vpop.permute.xlu0 %1023  ;;  %v1277_v33 = vld [vmem:[#allocation2 + $0x58] sm:$0xff]  ;;  %v493_v34 = vpop.permute.xlu1 %492  ;;  %v1279_v35 = vld [vmem:[#allocation2 + $0x68] sm:$0xff] }
  0x94   : > { %1026 = vst.msk [vmem:[#allocation2 + $0x78] sm:$0xff] %vm180_vm0, %v1024_v32  ;;  %1521 = vmatprep.subr.bf16.mxu1 %v1277_v33  ;;  %495 = vst.msk [vmem:[#allocation2 + $0x88] sm:$0xff] %vm180_vm0, %v493_v34  ;;  %1417 = vmatprep.subr.bf16.mxu0 %v1279_v35  ;;  %v2158_v35 = vld [vmem:[%s2223_s17] sm:$0xff]  }
  0x95   : > { %655 = vrot.lane.b32.xlu0 %v2133_v30, %s2184_s22  ;;  %v2157_v30 = vld [vmem:[%s2223_s17 + $0x18] sm:$0xff]  }
  0x96   : > { %915 = vrot.lane.b32.xlu1 %v2134_v31, %s2186_s26 }
  0x97   : > { %v751_v38 = vpop.permute.xlu0 %750  ;;  %v1276_v39 = vld [vmem:[#allocation2 + $0x50] sm:$0xff]  ;;  %v222_v40 = vpop.permute.xlu1 %221  ;;  %v1278_v41 = vld [vmem:[#allocation2 + $0x60] sm:$0xff] }
  0x98   : > { %753 = vst.msk [vmem:[#allocation2 + $0x70] sm:$0xff] %vm180_vm0, %v751_v38  ;;  %1522 = vmatpush1.bf16.msra.mxu1 %v1276_v39  ;;  %224 = vst.msk [vmem:[#allocation2 + $0x80] sm:$0xff] %vm180_vm0, %v222_v40  ;;  %1418 = vmatpush1.bf16.msra.mxu0 %v1278_v41  ;;  %v2160_v41 = vld [vmem:[%s2223_s17 + $0x10] sm:$0xff]  }
  0x99   : > { %384 = vrot.lane.b32.xlu0 %v2135_v36, %s2184_s22  ;;  %v2159_v36 = vld [vmem:[%s2223_s17 + $0x18] sm:$0xff]  }
  0x9a   : > { %1199 = vrot.lane.b32.xlu1 %v2136_v37, %s2187_s27 }
  0x9b   : > { %v1035_v44 = vpop.permute.xlu0 %1034  ;;  %v1281_v45 = vld [vmem:[#allocation2 + $0x78] sm:$0xff]  ;;  %v762_v46 = vpop.permute.xlu1 %761  ;;  %v1283_v47 = vld [vmem:[#allocation2 + $0x88] sm:$0xff] }
  0x9c   : > { %1037 = vst.msk [vmem:[#allocation2 + $0x98] sm:$0xff] %vm180_vm0, %v1035_v44  ;;  %1523 = vmatprep.subr.bf16.mxu1 %v1281_v45  ;;  %764 = vst.msk [vmem:[#allocation2 + $0x90] sm:$0xff] %vm180_vm0, %v762_v46  ;;  %1419 = vmatprep.subr.bf16.mxu0 %v1283_v47 }
  0x9d   : > { %666 = vrot.lane.b32.xlu0 %v2137_v42, %s2185_s25 }
  0x9e   : > { %926 = vrot.lane.b32.xlu1 %v2138_v43, %s2187_s27 }
  0x9f   : > { %v1046_v50 = vpop.permute.xlu0 %1045  ;;  %v1280_v51 = vld [vmem:[#allocation2 + $0x70] sm:$0xff]  ;;  %v513_v53 = vpop.permute.xlu1 %512  ;;  %v1282_v54 = vld [vmem:[#allocation2 + $0x80] sm:$0xff] }
  0xa0   : > { %1048 = vst.msk [vmem:[#allocation2 + $0xb8] sm:$0xff] %vm180_vm0, %v1046_v50  ;;  %1524 = vmatpush1.bf16.msra.mxu1 %v1280_v51  ;;  %515 = vst.msk [vmem:[#allocation2 + $0xc8] sm:$0xff] %vm180_vm0, %v513_v53  ;;  %1420 = vmatpush1.bf16.msra.mxu0 %v1282_v54 }
  0xa1   : > { %395 = vrot.lane.b32.xlu0 %v2139_v48, %s2185_s25  ;;  %1421 = vmatprep.subr.bf16.mxu0 %v1287_v52  ;;  %v1635_v52 = vld [vmem:[%s2572_s2] sm:$0xff] }
  0xa2   : > { %1210 = vrot.lane.b32.xlu1 %v2140_v49, %s2185_s25 }
  0xa3   : > { %v773_v57 = vpop.permute.xlu0 %772  ;;  %v1285_v58 = vld [vmem:[#allocation2 + $0x98] sm:$0xff]  ;;  %v1057_v60 = vpop.permute.xlu1 %1056  ;;  %v1284_v61 = vld [vmem:[#allocation2 + $0x90] sm:$0xff] }
  0xa4   : > { %775 = vst.msk [vmem:[#allocation2 + $0xb0] sm:$0xff] %vm180_vm0, %v773_v57  ;;  %1525 = vmatprep.subr.bf16.mxu1 %v1285_v58  ;;  %1059 = vst.msk [vmem:[#allocation2 + $0xd8] sm:$0xff] %vm180_vm0, %v1057_v60  ;;  %1422 = vmatpush1.bf16.msra.mxu0 %v1286_v59  ;;  %v1637_v57 = vld [vmem:[%s2572_s2 + $0x10] sm:$0xff] }
  0xa5   : > { %677 = vrot.lane.b32.xlu0 %v2141_v55, %s2186_s26  ;;  %1526 = vmatpush1.bf16.msra.mxu1 %v1284_v61  ;;  %v2188_v55 = vmov 0  }
  0xa6   : > { %937 = vrot.lane.b32.xlu1 %v2142_v56, %s2185_s25  ;;  %v1636_v56 = vld [vmem:[%s2572_s2 + $0x8] sm:$0xff]  ;;  %2060 = vset.pattern.permute.xlu0 %v2188_v55 }
  0xa7   : > { %v524_v0 = vpop.permute.xlu0 %523  ;;  %v1289_v1 = vld [vmem:[#allocation2 + $0xb8] sm:$0xff]  ;;  %v784_v3 = vpop.permute.xlu1 %783  ;;  %v1291_v4 = vld [vmem:[#allocation2 + $0xc8] sm:$0xff]  ;;  %2059 = vset.pattern.permute.xlu1 %v2188_v55 }
  0xa8   : > { %526 = vst.msk [vmem:[#allocation2 + $0xe8] sm:$0xff] %vm180_vm0, %v524_v0  ;;  %1527 = vmatprep.subr.bf16.mxu1 %v1289_v1  ;;  %786 = vst.msk [vmem:[#allocation2 + $0xd0] sm:$0xff] %vm180_vm0, %v784_v3  ;;  %1423 = vmatprep.subr.bf16.mxu0 %v1291_v4 }
  0xa9   : > { %406 = vrot.lane.b32.xlu0 %v2143_v62, %s2185_s25  ;;  %1424 = vmatpush1.bf16.msra.mxu0 %v1290_v2  ;;  %v1638_v62 = vld [vmem:[%s2572_s2 + $0x18] sm:$0xff] }
  0xaa   : > { %1221 = vrot.lane.b32.xlu1 %v2146_v63, %s2186_s26 }
  0xab   : > { %v253_v7 = vpop.permute.xlu0 %252  ;;  %v1288_v8 = vld [vmem:[#allocation2 + $0xb0] sm:$0xff]  ;;  %v1068_v9 = vpop.permute.xlu1 %1067  ;;  %v1293_v10 = vld [vmem:[#allocation2 + $0xd8] sm:$0xff] }
  0xac   : > { %255 = vst.msk [vmem:[#allocation2 + $0xe0] sm:$0xff] %vm180_vm0, %v253_v7  ;;  %1528 = vmatpush1.bf16.msra.mxu1 %v1288_v8  ;;  %1070 = vst.msk [vmem:[#allocation2 + $0xf8] sm:$0xff] %vm180_vm0, %v1068_v9 }
  0xad   : > { %688 = vrot.lane.b32.xlu0 %v2147_v5, %s2186_s26  ;;  %1529 = vmatprep.subr.bf16.mxu1 %v1293_v10 }
  0xae   : > { %948 = vrot.lane.b32.xlu1 %v2149_v6, %s2185_s25 }
  0xaf   : > { %v535_v13 = vpop.permute.xlu0 %534  ;;  %v1295_v14 = vld [vmem:[#allocation2 + $0xe8] sm:$0xff]  ;;  %v795_v15 = vpop.permute.xlu1 %794  ;;  %v1292_v16 = vld [vmem:[#allocation2 + $0xd0] sm:$0xff] }
  0xb0   : > { %537 = vst.msk [vmem:[#allocation2 + $0x108] sm:$0xff] %vm180_vm0, %v535_v13  ;;  %1425 = vmatprep.subr.bf16.mxu0 %v1295_v14  ;;  %797 = vst.msk [vmem:[#allocation2 + $0xf0] sm:$0xff] %vm180_vm0, %v795_v15  ;;  %1530 = vmatpush1.bf16.msra.mxu1 %v1292_v16 }
  0xb1   : > { %417 = vrot.lane.b32.xlu0 %v2150_v11, %s2186_s26 }
  0xb2   : > { %1232 = vrot.lane.b32.xlu1 %v2151_v12, %s2186_s26 }
  0xb3   : > { %v264_v19 = vpop.permute.xlu0 %263  ;;  %v1294_v20 = vld [vmem:[#allocation2 + $0xe0] sm:$0xff]  ;;  %v1079_v21 = vpop.permute.xlu1 %1078  ;;  %v1297_v22 = vld [vmem:[#allocation2 + $0xf8] sm:$0xff] }
  0xb4   : > { %266 = vst.msk [vmem:[#allocation2 + $0x100] sm:$0xff] %vm180_vm0, %v264_v19  ;;  %1426 = vmatpush1.bf16.msra.mxu0 %v1294_v20  ;;  %1081 = vst.msk [vmem:[#allocation2 + $0x118] sm:$0xff] %vm180_vm0, %v1079_v21  ;;  %1531 = vmatprep.subr.bf16.mxu1 %v1297_v22 }
  0xb5   : > { %699 = vrot.lane.b32.xlu0 %v2152_v17, %s2187_s27 }
  0xb6   : > { %959 = vrot.lane.b32.xlu1 %v2153_v18, %s2186_s26 }
  0xb7   : > { %v546_v25 = vpop.permute.xlu0 %545  ;;  %v1299_v26 = vld [vmem:[#allocation2 + $0x108] sm:$0xff]  ;;  %v806_v27 = vpop.permute.xlu1 %805  ;;  %v1296_v28 = vld [vmem:[#allocation2 + $0xf0] sm:$0xff] }
  0xb8   : > { %548 = vst.msk [vmem:[#allocation2 + $0x128] sm:$0xff] %vm180_vm0, %v546_v25  ;;  %1427 = vmatprep.subr.bf16.mxu0 %v1299_v26  ;;  %808 = vst.msk [vmem:[#allocation2 + $0x110] sm:$0xff] %vm180_vm0, %v806_v27  ;;  %1532 = vmatpush1.bf16.msra.mxu1 %v1296_v28 }
  0xb9   : > { %428 = vrot.lane.b32.xlu0 %v2154_v23, %s2186_s26 }
  0xba   : > { %1243 = vrot.lane.b32.xlu1 %v2155_v24, %s2187_s27 }
  0xbb   : > { %v275_v31 = vpop.permute.xlu0 %274  ;;  %v1298_v32 = vld [vmem:[#allocation2 + $0x100] sm:$0xff]  ;;  %v1090_v33 = vpop.permute.xlu1 %1089  ;;  %v1301_v34 = vld [vmem:[#allocation2 + $0x118] sm:$0xff] }
  0xbc   : > { %277 = vst.msk [vmem:[#allocation2 + $0x120] sm:$0xff] %vm180_vm0, %v275_v31  ;;  %1428 = vmatpush1.bf16.msra.mxu0 %v1298_v32  ;;  %1092 = vst.msk [vmem:[#allocation2 + $0x138] sm:$0xff] %vm180_vm0, %v1090_v33  ;;  %1533 = vmatprep.subr.bf16.mxu1 %v1301_v34  ;;  %v2161_v33 = vld [vmem:[%s2571_s1] ss:$16 sps:$4 sm:$0xff]  }
  0xbd   : > { %710 = vrot.lane.b32.xlu0 %v2156_v29, %s2187_s27 }
  0xbe   : > { %970 = vrot.lane.b32.xlu1 %v2157_v30, %s2186_s26 }
  0xbf   : > { %v557_v37 = vpop.permute.xlu0 %556  ;;  %v1303_v38 = vld [vmem:[#allocation2 + $0x128] sm:$0xff]  ;;  %v817_v39 = vpop.permute.xlu1 %816  ;;  %v1300_v40 = vld [vmem:[#allocation2 + $0x110] sm:$0xff] }
  0xc0   : > { %559 = vst.msk [vmem:[#allocation2 + $0x148] sm:$0xff] %vm180_vm0, %v557_v37  ;;  %1429 = vmatprep.subr.bf16.mxu0 %v1303_v38  ;;  %819 = vst.msk [vmem:[#allocation2 + $0x130] sm:$0xff] %vm180_vm0, %v817_v39  ;;  %1534 = vmatpush1.bf16.msra.mxu1 %v1300_v40 }
  0xc1   : > { %439 = vrot.lane.b32.xlu0 %v2158_v35, %s2187_s27 }
  0xc2   : > { %1254 = vrot.lane.b32.xlu1 %v2159_v36, %s2187_s27  ;;  %v2164_v36 = vld [vmem:[%s2571_s1 + $0x24] ss:$16 sps:$4 sm:$0xff]  }
  0xc3   : > { %v286_v42 = vpop.permute.xlu0 %285  ;;  %v1302_v43 = vld [vmem:[#allocation2 + $0x120] sm:$0xff]  ;;  %v1101_v44 = vpop.permute.xlu1 %1100  ;;  %v1305_v45 = vld [vmem:[#allocation2 + $0x138] sm:$0xff] }
  0xc4   : > { %288 = vst.msk [vmem:[#allocation2 + $0x140] sm:$0xff] %vm180_vm0, %v286_v42  ;;  %1430 = vmatpush1.bf16.msra.mxu0 %v1302_v43  ;;  %1103 = vst.msk [vmem:[#allocation2 + $0x158] sm:$0xff] %vm180_vm0, %v1101_v44  ;;  %1535 = vmatprep.subr.bf16.mxu1 %v1305_v45  ;;  %v1264_v42 = vld [vmem:[%s2571_s1 + $0x30] sm:$0xff] }
  0xc5   : > { %981 = vrot.lane.b32.xlu0 %v2160_v41, %s2187_s27  ;;  %v1262_v41 = vld [vmem:[%s2571_s1 + $0x20] sm:$0xff]  ;;  %s2021_s27 = sshll.u32 %s2575_s13, 4 }
  0xc6   : > { %1641 = vperm.xlu1 %2059, %v1635_v52   ;;  %v2006_v45 = vcombine.low %v1262_v41, %v1264_v42  ;;  %s170_s30 = scalar_lea.vmem %s2573_s3, %s2021_s27 }
  0xc7   : > { %v568_v46 = vpop.permute.xlu0 %567  ;;  %v1307_v47 = vld [vmem:[#allocation2 + $0x148] sm:$0xff]  ;;  %v828_v48 = vpop.permute.xlu1 %827  ;;  %v1304_v49 = vld [vmem:[#allocation2 + $0x130] sm:$0xff] }
  0xc8   : > { %570 = vst.msk [vmem:[#allocation2 + $0x168] sm:$0xff] %vm180_vm0, %v568_v46  ;;  %1431 = vmatprep.subr.bf16.mxu0 %v1307_v47  ;;  %830 = vst.msk [vmem:[#allocation2 + $0x150] sm:$0xff] %vm180_vm0, %v828_v48  ;;  %1536 = vmatpush1.bf16.msra.mxu1 %v1304_v49  ;;  %v2168_v48 = vld [vmem:[%s2571_s1 + $0xc] ss:$16 sps:$4 sm:$0xff]  }
  0xc9   : > { %1646 = vperm.xlu0 %2060, %v1636_v56  }
  0xca   : > { %1651 = vperm.xlu1 %2059, %v1637_v57  }
  0xcb   : > { %v297_v50 = vpop.permute.xlu0 %296  ;;  %v1306_v51 = vld [vmem:[#allocation2 + $0x140] sm:$0xff]  ;;  %v1112_v53 = vpop.permute.xlu1 %1111  ;;  %v1309_v54 = vld [vmem:[#allocation2 + $0x158] sm:$0xff] }
  0xcc   : > { %299 = vst.msk [vmem:[#allocation2 + $0x160] sm:$0xff] %vm180_vm0, %v297_v50  ;;  %1432 = vmatpush1.bf16.msra.mxu0 %v1306_v51  ;;  %1114 = vst.msk [vmem:[#allocation2 + $0x178] sm:$0xff] %vm180_vm0, %v1112_v53  ;;  %1537 = vmatprep.subr.bf16.mxu1 %v1309_v54 }
  0xce   : > { %1656 = vperm.xlu1 %2059, %v1638_v62  }
  0xcf   : > { %v579_v58 = vpop.permute.xlu0 %578  ;;  %v1311_v59 = vld [vmem:[#allocation2 + $0x168] sm:$0xff]  ;;  %v839_v60 = vpop.permute.xlu1 %838  ;;  %v1308_v61 = vld [vmem:[#allocation2 + $0x150] sm:$0xff] }
  0xd0   : > { %581 = vst.msk [vmem:[#allocation2 + $0x188] sm:$0xff] %vm180_vm0, %v579_v58  ;;  %1433 = vmatprep.subr.bf16.mxu0 %v1311_v59  ;;  %841 = vst.msk [vmem:[#allocation2 + $0x170] sm:$0xff] %vm180_vm0, %v839_v60  ;;  %1538 = vmatpush1.bf16.msra.mxu1 %v1308_v61 }
  0xd3   : > { %v308_v63 = vpop.permute.xlu0 %307  ;;  %v1310_v0 = vld [vmem:[#allocation2 + $0x160] sm:$0xff]  ;;  %v1123_v1 = vpop.permute.xlu1 %1122  ;;  %v1313_v2 = vld [vmem:[#allocation2 + $0x178] sm:$0xff] }
  0xd4   : > { %310 = vst.msk [vmem:[#allocation2 + $0x180] sm:$0xff] %vm180_vm0, %v308_v63  ;;  %1434 = vmatpush1.bf16.msra.mxu0 %v1310_v0  ;;  %1125 = vst.msk [vmem:[#allocation2 + $0x198] sm:$0xff] %vm180_vm0, %v1123_v1  ;;  %1539 = vmatprep.subr.bf16.mxu1 %v1313_v2 }
  0xd7   : > { %v590_v3 = vpop.permute.xlu0 %589  ;;  %v1315_v4 = vld [vmem:[#allocation2 + $0x188] sm:$0xff]  ;;  %v850_v5 = vpop.permute.xlu1 %849  ;;  %v1312_v6 = vld [vmem:[#allocation2 + $0x170] sm:$0xff] }
  0xd8   : > { %592 = vst.msk [vmem:[#allocation2 + $0x1a8] sm:$0xff] %vm180_vm0, %v590_v3  ;;  %1435 = vmatprep.subr.bf16.mxu0 %v1315_v4  ;;  %852 = vst.msk [vmem:[#allocation2 + $0x190] sm:$0xff] %vm180_vm0, %v850_v5  ;;  %1540 = vmatpush1.bf16.msra.mxu1 %v1312_v6 }
  0xdb   : > { %v319_v7 = vpop.permute.xlu0 %318  ;;  %v1314_v8 = vld [vmem:[#allocation2 + $0x180] sm:$0xff]  ;;  %v1134_v9 = vpop.permute.xlu1 %1133  ;;  %v1317_v10 = vld [vmem:[#allocation2 + $0x198] sm:$0xff] }
  0xdc   : > { %321 = vst.msk [vmem:[#allocation2 + $0x1a0] sm:$0xff] %vm180_vm0, %v319_v7  ;;  %1436 = vmatpush1.bf16.msra.mxu0 %v1314_v8  ;;  %1136 = vst.msk [vmem:[#allocation2 + $0x1b8] sm:$0xff] %vm180_vm0, %v1134_v9  ;;  %1541 = vmatprep.subr.bf16.mxu1 %v1317_v10 }
  0xdf   : > { %v601_v11 = vpop.permute.xlu0 %600  ;;  %v1319_v12 = vld [vmem:[#allocation2 + $0x1a8] sm:$0xff]  ;;  %v861_v13 = vpop.permute.xlu1 %860  ;;  %v1316_v14 = vld [vmem:[#allocation2 + $0x190] sm:$0xff] }
  0xe0   : > { %603 = vst.msk [vmem:[#allocation2 + $0x1c8] sm:$0xff] %vm180_vm0, %v601_v11  ;;  %1437 = vmatprep.subr.bf16.mxu0 %v1319_v12  ;;  %863 = vst.msk [vmem:[#allocation2 + $0x1b0] sm:$0xff] %vm180_vm0, %v861_v13  ;;  %1542 = vmatpush1.bf16.msra.mxu1 %v1316_v14 }
  0xe3   : > { %v330_v15 = vpop.permute.xlu0 %329  ;;  %v1318_v16 = vld [vmem:[#allocation2 + $0x1a0] sm:$0xff]  ;;  %v1145_v17 = vpop.permute.xlu1 %1144  ;;  %v1321_v18 = vld [vmem:[#allocation2 + $0x1b8] sm:$0xff] }
  0xe4   : > { %332 = vst.msk [vmem:[#allocation2 + $0x1c0] sm:$0xff] %vm180_vm0, %v330_v15  ;;  %1438 = vmatpush1.bf16.msra.mxu0 %v1318_v16  ;;  %1147 = vst.msk [vmem:[#allocation2 + $0x1d8] sm:$0xff] %vm180_vm0, %v1145_v17  ;;  %1543 = vmatprep.subr.bf16.mxu1 %v1321_v18 }
  0xe7   : > { %v612_v19 = vpop.permute.xlu0 %611  ;;  %v1323_v20 = vld [vmem:[#allocation2 + $0x1c8] sm:$0xff]  ;;  %v872_v21 = vpop.permute.xlu1 %871  ;;  %v1320_v22 = vld [vmem:[#allocation2 + $0x1b0] sm:$0xff] }
  0xe8   : > { %614 = vst.msk [vmem:[#allocation2 + $0x1e8] sm:$0xff] %vm180_vm0, %v612_v19  ;;  %1439 = vmatprep.subr.bf16.mxu0 %v1323_v20  ;;  %874 = vst.msk [vmem:[#allocation2 + $0x1d0] sm:$0xff] %vm180_vm0, %v872_v21  ;;  %1544 = vmatpush1.bf16.msra.mxu1 %v1320_v22 }
  0xeb   : > { %v341_v23 = vpop.permute.xlu0 %340  ;;  %v1322_v24 = vld [vmem:[#allocation2 + $0x1c0] sm:$0xff]  ;;  %v1156_v25 = vpop.permute.xlu1 %1155  ;;  %v1325_v26 = vld [vmem:[#allocation2 + $0x1d8] sm:$0xff] }
  0xec   : > { %343 = vst.msk [vmem:[#allocation2 + $0x1e0] sm:$0xff] %vm180_vm0, %v341_v23  ;;  %1440 = vmatpush1.bf16.msra.mxu0 %v1322_v24  ;;  %1158 = vst.msk [vmem:[#allocation2 + $0x1f8] sm:$0xff] %vm180_vm0, %v1156_v25  ;;  %1545 = vmatprep.subr.bf16.mxu1 %v1325_v26 }
  0xef   : > { %v623_v27 = vpop.permute.xlu0 %622  ;;  %v1327_v28 = vld [vmem:[#allocation2 + $0x1e8] sm:$0xff]  ;;  %v883_v29 = vpop.permute.xlu1 %882  ;;  %v1324_v30 = vld [vmem:[#allocation2 + $0x1d0] sm:$0xff] }
  0xf0   : > { %625 = vst.msk [vmem:[#allocation2 + $0x208] sm:$0xff] %vm180_vm0, %v623_v27  ;;  %1441 = vmatprep.subr.bf16.mxu0 %v1327_v28  ;;  %885 = vst.msk [vmem:[#allocation2 + $0x1f0] sm:$0xff] %vm180_vm0, %v883_v29  ;;  %1546 = vmatpush1.bf16.msra.mxu1 %v1324_v30 }
  0xf3   : > { %v352_v31 = vpop.permute.xlu0 %351  ;;  %v1326_v32 = vld [vmem:[#allocation2 + $0x1e0] sm:$0xff]  ;;  %v1167_v34 = vpop.permute.xlu1 %1166  ;;  %v1329_v35 = vld [vmem:[#allocation2 + $0x1f8] sm:$0xff] }
  0xf4   : > { %354 = vst.msk [vmem:[#allocation2 + $0x200] sm:$0xff] %vm180_vm0, %v352_v31  ;;  %1442 = vmatpush1.bf16.msra.mxu0 %v1326_v32  ;;  %1169 = vst.msk [vmem:[#allocation2 + $0x218] sm:$0xff] %vm180_vm0, %v1167_v34  ;;  %1547 = vmatprep.subr.bf16.mxu1 %v1329_v35 }
  0xf7   : > { %v634_v37 = vpop.permute.xlu0 %633  ;;  %v1331_v38 = vld [vmem:[#allocation2 + $0x208] sm:$0xff]  ;;  %1444 = vmatmul.mubr.bf16.vlgmr.msra.gmra.mrb[0].mxu0 %v2161_v33  ;;  %v894_v39 = vpop.permute.xlu1 %893  ;;  %v1328_v40 = vld [vmem:[#allocation2 + $0x1f0] sm:$0xff] }
  0xf8   : > { %636 = vst.msk [vmem:[#allocation2 + $0x228] sm:$0xff] %vm180_vm0, %v634_v37  ;;  %1464 = vmatprep.subr.bf16.mxu0 %v1331_v38  ;;  %1453 = vmatprep.mubr.bf16.mxu0 %v2164_v36  ;;  %896 = vst.msk [vmem:[#allocation2 + $0x210] sm:$0xff] %vm180_vm0, %v894_v39 }
  0xf9   : > { %1548 = vmatpush1.bf16.msra.mxu1 %v1328_v40 }
  0xfb   : > { %v363_v43 = vpop.permute.xlu0 %362  ;;  %v1330_v44 = vld [vmem:[#allocation2 + $0x200] sm:$0xff]  ;;  %v1178_v46 = vpop.permute.xlu1 %1177  ;;  %v1333_v47 = vld [vmem:[#allocation2 + $0x218] sm:$0xff] }
  0xfc   : > { %365 = vst.msk [vmem:[#allocation2 + $0x220] sm:$0xff] %vm180_vm0, %v363_v43  ;;  %1465 = vmatpush1.bf16.msra.mxu0 %v1330_v44  ;;  %1550 = vmatmul.mubr.bf16.vlgmr.msra.gmra.mrb[0].mxu1 %v2161_v33  ;;  %1180 = vst.msk [vmem:[#allocation2 + $0x238] sm:$0xff] %vm180_vm0, %v1178_v46 }
  0xfd   : > { %1570 = vmatprep.subr.bf16.mxu1 %v1333_v47  ;;  %1559 = vmatprep.mubr.bf16.mxu1 %v2164_v36  ;;  %v2169_v47 = vld [vmem:[%s2571_s1 + $0x2c] ss:$16 sps:$4 sm:$0xff]  }
  0xff   : > { %v645_v49 = vpop.permute.xlu0 %644  ;;  %v1335_v50 = vld [vmem:[#allocation2 + $0x228] sm:$0xff]  ;;  %1454 = vmatmul.mubr.bf16.gmra.mrb[4].mxu0 %v2006_v45  ;;  %v1332_v52 = vld [vmem:[#allocation2 + $0x210] sm:$0xff] }
 0x100   : > { %647 = vst.msk [vmem:[#allocation2 + $0x248] sm:$0xff] %vm180_vm0, %v645_v49  ;;  %1466 = vmatprep.subr.bf16.mxu0 %v1335_v50  ;;  %v905_v51 = vpop.permute.xlu1 %904  ;;  %2010 = vmatprep.mubr.msk.bf16.mxu0 %vm1404_vm1, %v2168_v48  ;;  %v2171_v49 = vld [vmem:[%s2571_s1 + $0x28] ss:$16 sps:$4 sm:$0xff]  }
 0x101   : > { %907 = vst.msk [vmem:[#allocation2 + $0x230] sm:$0xff] %vm180_vm0, %v905_v51  ;;  %1571 = vmatpush1.bf16.msra.mxu1 %v1332_v52 }
 0x103   : > { %v374_v53 = vpop.permute.xlu0 %373  ;;  %v1334_v54 = vld [vmem:[#allocation2 + $0x220] sm:$0xff]  ;;  %v1337_v56 = vld [vmem:[#allocation2 + $0x238] sm:$0xff] }
 0x104   : > { %376 = vst.msk [vmem:[#allocation2 + $0x240] sm:$0xff] %vm180_vm0, %v374_v53  ;;  %1467 = vmatpush1.bf16.msra.mxu0 %v1334_v54  ;;  %v1189_v55 = vpop.permute.xlu1 %1188  ;;  %1560 = vmatmul.mubr.bf16.gmra.mrb[4].mxu1 %v2006_v45  ;;  %v2166_v45 = vld [vmem:[%s2571_s1 + $0x8] ss:$16 sps:$4 sm:$0xff]  }
 0x105   : > { %1191 = vst.msk [vmem:[#allocation2 + $0x258] sm:$0xff] %vm180_vm0, %v1189_v55  ;;  %1572 = vmatprep.subr.bf16.mxu1 %v1337_v56  ;;  %2012 = vmatprep.mubr.msk.bf16.mxu1 %vm1404_vm1, %v2168_v48 }
 0x107   : > { %v656_v57 = vpop.permute.xlu0 %655  ;;  %v1339_v58 = vld [vmem:[#allocation2 + $0x248] sm:$0xff] }
 0x108   : > { %658 = vst.msk [vmem:[#allocation2 + $0x268] sm:$0xff] %vm180_vm0, %v656_v57  ;;  %1468 = vmatprep.subr.bf16.mxu0 %v1339_v58  ;;  %v916_v59 = vpop.permute.xlu1 %915  ;;  %v1336_v60 = vld [vmem:[#allocation2 + $0x230] sm:$0xff] }
 0x109   : > { %918 = vst.msk [vmem:[#allocation2 + $0x250] sm:$0xff] %vm180_vm0, %v916_v59  ;;  %1573 = vmatpush1.bf16.msra.mxu1 %v1336_v60 }
 0x10b   : > { %v385_v61 = vpop.permute.xlu0 %384  ;;  %v1338_v62 = vld [vmem:[#allocation2 + $0x240] sm:$0xff] }
 0x10c   : > { %387 = vst.msk [vmem:[#allocation2 + $0x260] sm:$0xff] %vm180_vm0, %v385_v61  ;;  %1469 = vmatpush1.bf16.msra.mxu0 %v1338_v62  ;;  %v1200_v63 = vpop.permute.xlu1 %1199  ;;  %v1341_v0 = vld [vmem:[#allocation2 + $0x258] sm:$0xff] }
 0x10d   : > { %1202 = vst.msk [vmem:[#allocation2 + $0x278] sm:$0xff] %vm180_vm0, %v1200_v63  ;;  %1574 = vmatprep.subr.bf16.mxu1 %v1341_v0 }
 0x10f   : > { %v667_v1 = vpop.permute.xlu0 %666  ;;  %v1343_v2 = vld [vmem:[#allocation2 + $0x268] sm:$0xff] }
 0x110   : > { %669 = vst.msk [vmem:[#allocation2 + $0x288] sm:$0xff] %vm180_vm0, %v667_v1  ;;  %1470 = vmatprep.subr.bf16.mxu0 %v1343_v2  ;;  %v927_v3 = vpop.permute.xlu1 %926  ;;  %v1340_v4 = vld [vmem:[#allocation2 + $0x250] sm:$0xff] }
 0x111   : > { %929 = vst.msk [vmem:[#allocation2 + $0x270] sm:$0xff] %vm180_vm0, %v927_v3  ;;  %1575 = vmatpush1.bf16.msra.mxu1 %v1340_v4 }
 0x113   : > { %v396_v5 = vpop.permute.xlu0 %395  ;;  %v1342_v6 = vld [vmem:[#allocation2 + $0x260] sm:$0xff] }
 0x114   : > { %398 = vst.msk [vmem:[#allocation2 + $0x280] sm:$0xff] %vm180_vm0, %v396_v5  ;;  %1471 = vmatpush1.bf16.msra.mxu0 %v1342_v6  ;;  %v1211_v7 = vpop.permute.xlu1 %1210  ;;  %v1345_v8 = vld [vmem:[#allocation2 + $0x278] sm:$0xff] }
 0x115   : > { %1213 = vst.msk [vmem:[#allocation2 + $0x298] sm:$0xff] %vm180_vm0, %v1211_v7  ;;  %1576 = vmatprep.subr.bf16.mxu1 %v1345_v8 }
 0x117   : > { %v678_v9 = vpop.permute.xlu0 %677  ;;  %v1347_v10 = vld [vmem:[#allocation2 + $0x288] sm:$0xff] }
 0x118   : > { %680 = vst.msk [vmem:[#allocation2 + $0x2a8] sm:$0xff] %vm180_vm0, %v678_v9  ;;  %1472 = vmatprep.subr.bf16.mxu0 %v1347_v10  ;;  %v938_v11 = vpop.permute.xlu1 %937  ;;  %v1344_v12 = vld [vmem:[#allocation2 + $0x270] sm:$0xff] }
 0x119   : > { %940 = vst.msk [vmem:[#allocation2 + $0x290] sm:$0xff] %vm180_vm0, %v938_v11  ;;  %1577 = vmatpush1.bf16.msra.mxu1 %v1344_v12 }
 0x11b   : > { %v407_v13 = vpop.permute.xlu0 %406  ;;  %v1346_v14 = vld [vmem:[#allocation2 + $0x280] sm:$0xff] }
 0x11c   : > { %409 = vst.msk [vmem:[#allocation2 + $0x2a0] sm:$0xff] %vm180_vm0, %v407_v13  ;;  %1473 = vmatpush1.bf16.msra.mxu0 %v1346_v14  ;;  %v1222_v15 = vpop.permute.xlu1 %1221  ;;  %v1349_v16 = vld [vmem:[#allocation2 + $0x298] sm:$0xff] }
 0x11d   : > { %1224 = vst.msk [vmem:[#allocation2 + $0x2b8] sm:$0xff] %vm180_vm0, %v1222_v15  ;;  %1578 = vmatprep.subr.bf16.mxu1 %v1349_v16 }
 0x11f   : > { %v689_v17 = vpop.permute.xlu0 %688  ;;  %v1351_v18 = vld [vmem:[#allocation2 + $0x2a8] sm:$0xff] }
 0x120   : > { %691 = vst.msk [vmem:[#allocation2 + $0x2c8] sm:$0xff] %vm180_vm0, %v689_v17  ;;  %1474 = vmatprep.subr.bf16.mxu0 %v1351_v18  ;;  %v949_v19 = vpop.permute.xlu1 %948  ;;  %v1348_v20 = vld [vmem:[#allocation2 + $0x290] sm:$0xff] }
 0x121   : > { %951 = vst.msk [vmem:[#allocation2 + $0x2b0] sm:$0xff] %vm180_vm0, %v949_v19  ;;  %1579 = vmatpush1.bf16.msra.mxu1 %v1348_v20 }
 0x123   : > { %v418_v21 = vpop.permute.xlu0 %417  ;;  %v1350_v22 = vld [vmem:[#allocation2 + $0x2a0] sm:$0xff] }
 0x124   : > { %420 = vst.msk [vmem:[#allocation2 + $0x2c0] sm:$0xff] %vm180_vm0, %v418_v21  ;;  %1475 = vmatpush1.bf16.msra.mxu0 %v1350_v22  ;;  %v1233_v23 = vpop.permute.xlu1 %1232  ;;  %v1353_v24 = vld [vmem:[#allocation2 + $0x2b8] sm:$0xff] }
 0x125   : > { %1235 = vst.msk [vmem:[#allocation2 + $0x2d8] sm:$0xff] %vm180_vm0, %v1233_v23  ;;  %1580 = vmatprep.subr.bf16.mxu1 %v1353_v24 }
 0x127   : > { %v700_v25 = vpop.permute.xlu0 %699  ;;  %v1355_v26 = vld [vmem:[#allocation2 + $0x2c8] sm:$0xff] }
 0x128   : > { %702 = vst.msk [vmem:[#allocation2 + $0x2e8] sm:$0xff] %vm180_vm0, %v700_v25  ;;  %1476 = vmatprep.subr.bf16.mxu0 %v1355_v26  ;;  %v960_v27 = vpop.permute.xlu1 %959  ;;  %v1352_v28 = vld [vmem:[#allocation2 + $0x2b0] sm:$0xff] }
 0x129   : > { %962 = vst.msk [vmem:[#allocation2 + $0x2d0] sm:$0xff] %vm180_vm0, %v960_v27  ;;  %1581 = vmatpush1.bf16.msra.mxu1 %v1352_v28 }
 0x12b   : > { %v429_v29 = vpop.permute.xlu0 %428  ;;  %v1354_v30 = vld [vmem:[#allocation2 + $0x2c0] sm:$0xff] }
 0x12c   : > { %431 = vst.msk [vmem:[#allocation2 + $0x2e0] sm:$0xff] %vm180_vm0, %v429_v29  ;;  %1477 = vmatpush1.bf16.msra.mxu0 %v1354_v30  ;;  %v1244_v31 = vpop.permute.xlu1 %1243  ;;  %v1357_v32 = vld [vmem:[#allocation2 + $0x2d8] sm:$0xff] }
 0x12d   : > { %1246 = vst.msk [vmem:[#allocation2 + $0x2f8] sm:$0xff] %vm180_vm0, %v1244_v31  ;;  %1582 = vmatprep.subr.bf16.mxu1 %v1357_v32 }
 0x12f   : > { %v711_v33 = vpop.permute.xlu0 %710  ;;  %v1359_v34 = vld [vmem:[#allocation2 + $0x2e8] sm:$0xff] }
 0x130   : > { %713 = vst.msk [vmem:[#allocation2 + $0x308] sm:$0xff] %vm180_vm0, %v711_v33  ;;  %1478 = vmatprep.subr.bf16.mxu0 %v1359_v34  ;;  %v971_v35 = vpop.permute.xlu1 %970  ;;  %v1356_v36 = vld [vmem:[#allocation2 + $0x2d0] sm:$0xff] }
 0x131   : > { %973 = vst.msk [vmem:[#allocation2 + $0x2f0] sm:$0xff] %vm180_vm0, %v971_v35  ;;  %1583 = vmatpush1.bf16.msra.mxu1 %v1356_v36 }
 0x133   : > { %v440_v37 = vpop.permute.xlu0 %439  ;;  %v1358_v38 = vld [vmem:[#allocation2 + $0x2e0] sm:$0xff] }
 0x134   : > { %442 = vst.msk [vmem:[#allocation2 + $0x300] sm:$0xff] %vm180_vm0, %v440_v37  ;;  %1479 = vmatpush1.bf16.msra.mxu0 %v1358_v38  ;;  %v1255_v39 = vpop.permute.xlu1 %1254  ;;  %v1361_v40 = vld [vmem:[#allocation2 + $0x2f8] sm:$0xff] }
 0x135   : > { %1257 = vst.msk [vmem:[#allocation2 + $0x318] sm:$0xff] %vm180_vm0, %v1255_v39  ;;  %1584 = vmatprep.subr.bf16.mxu1 %v1361_v40 }
 0x137   : > { %v982_v41 = vpop.permute.xlu0 %981  ;;  %v1363_v42 = vld [vmem:[#allocation2 + $0x308] sm:$0xff] }
 0x138   : > { %984 = vst.msk [vmem:[#allocation2 + $0x310] sm:$0xff] %vm180_vm0, %v982_v41  ;;  %1480 = vmatprep.subr.bf16.mxu0 %v1363_v42  ;;  %v1360_v43 = vld [vmem:[#allocation2 + $0x2f0] sm:$0xff] }
 0x139   : > { %1585 = vmatpush1.bf16.msra.mxu1 %v1360_v43 }
 0x13b   : > { %v1362_v44 = vld [vmem:[#allocation2 + $0x300] sm:$0xff] }
 0x13c   : > { %1481 = vmatpush1.bf16.msra.mxu0 %v1362_v44  ;;  %v1365_v46 = vld [vmem:[#allocation2 + $0x318] sm:$0xff] }
 0x13d   : > { %1586 = vmatprep.subr.bf16.mxu1 %v1365_v46 }
 0x13f   : > { %1497 = vmatmul.mubr.bf16.vlgmr.msra.gmra.mrb[0].mxu0 %v2166_v45  ;;  %v1364_v48 = vld [vmem:[#allocation2 + $0x310] sm:$0xff] }
 0x140   : > { %1587 = vmatpush1.bf16.msra.mxu1 %v1364_v48  ;;  %2011 = vmatprep.mubr.msk.bf16.mxu0 %vm1404_vm1, %v2169_v47 }
 0x143   : > { %1603 = vmatmul.mubr.bf16.vlgmr.msra.gmra.mrb[0].mxu1 %v2166_v45 }
 0x144   : > { %2013 = vmatprep.mubr.msk.bf16.mxu1 %vm1404_vm1, %v2169_v47 }
 0x145   : > { %v1642_v59 = vpop.permute.xlu1 %1641 }
 0x147   : > { %1507 = vmatmul.mubr.bf16.gmra.mrb[4].mxu0 %v2171_v49 }
 0x148   : > { %v1647_v1 = vpop.permute.xlu0 %1646 }
 0x149   : > { %v1652_v10 = vpop.permute.xlu1 %1651 }
 0x14b   : > { %1613 = vmatmul.mubr.bf16.gmra.mrb[4].mxu1 %v2171_v49 }
 0x14d   : > { %v1657_v24 = vpop.permute.xlu1 %1656 }
 0x212   : > { %v1498_v50 = vpop.f32.mrb[0].mxu0 }
 0x213   : > { %v1500_v51 = vpop.f32.mrb[1].mxu0 }
 0x214   : > { %v1623_v52 = vmax.f32 %v1498_v50, %v1500_v51  ;;  %v1502_v53 = vpop.f32.mrb[2].mxu0 }
 0x215   : > { %v1504_v54 = vpop.f32.mrb[3].mxu0 }
 0x216   : > { %v1624_v55 = vmax.f32 %v1502_v53, %v1504_v54  ;;  %v1604_v56 = vpop.f32.mrb[0].mxu1 }
 0x217   : > { %v1627_v57 = vmax.f32 %v1623_v52, %v1604_v56  ;;  %v1606_v58 = vpop.f32.mrb[1].mxu1 }
 0x218   : > { %v1608_v60 = vpop.f32.mrb[2].mxu1 }
 0x219   : > { %v1631_v61 = vmax.f32 %v1627_v57, %v1606_v58  ;;  %v1628_v62 = vmax.f32 %v1624_v55, %v1608_v60  ;;  %v1610_v63 = vpop.f32.mrb[3].mxu1 }
 0x21a   : > { %v1508_v0 = vpop.f32.mrb[4].mxu0 }
 0x21b   : > { %v1659_v2 = vadd.f32 %v1642_v59, %v1631_v61  ;;  %v1632_v3 = vmax.f32 %v1628_v62, %v1610_v63  ;;  %v1510_v4 = vpop.f32.mrb[5].mxu0 }
 0x21c   : > { %v1625_v5 = vmax.f32 %v1508_v0, %v1510_v4  ;;  %v1512_v6 = vpop.f32.mrb[6].mxu0 }
 0x21d   : > { %v1663_v7 = vmax.f32 %v1659_v2, 0.0  ;;  %v1660_v8 = vadd.f32 %v1647_v1, %v1632_v3  ;;  %v1514_v9 = vpop.f32.mrb[7].mxu0 }
 0x21e   : > { %v1626_v11 = vmax.f32 %v1512_v6, %v1514_v9  ;;  %v1614_v12 = vpop.f32.mrb[4].mxu1 }
 0x21f   : > { %v2022_v13 = vpack.c.bf16 %v1663_v7, %v1663_v7  ;;  %v1664_v14 = vmax.f32 %v1660_v8, 0.0  ;;  %v1629_v15 = vmax.f32 %v1625_v5, %v1614_v12  ;;  %v1616_v16 = vpop.f32.mrb[5].mxu1 }
 0x220   : > { %v1618_v17 = vpop.f32.mrb[6].mxu1 }
 0x221   : > { %1684 = vst.msk [vmem:[%s170_s30] sm:$0xf] %vm1683_vm2, %v2022_v13  ;;  %v2023_v18 = vpack.c.bf16 %v1664_v14, %v1664_v14  ;;  %v1633_v19 = vmax.f32 %v1629_v15, %v1616_v16  ;;  %v1630_v20 = vmax.f32 %v1626_v11, %v1618_v17  ;;  %v1620_v21 = vpop.f32.mrb[7].mxu1 }
 0x223   : > { %1685 = vst.msk [vmem:[%s170_s30 + $0x4] sm:$0xf] %vm1683_vm2, %v2023_v18  ;;  %v1661_v22 = vadd.f32 %v1652_v10, %v1633_v19  ;;  %v1634_v23 = vmax.f32 %v1630_v20, %v1620_v21 }
 0x225   : > { %v1665_v25 = vmax.f32 %v1661_v22, 0.0  ;;  %v1662_v26 = vadd.f32 %v1657_v24, %v1634_v23 }
 0x227   : > { %v2024_v27 = vpack.c.bf16 %v1665_v25, %v1665_v25  ;;  %v1666_v28 = vmax.f32 %v1662_v26, 0.0 }
 0x229   : > { %1686 = vst.msk [vmem:[%s170_s30 + $0x8] sm:$0xf] %vm1683_vm2, %v2024_v27  ;;  %v2025_v29 = vpack.c.bf16 %v1666_v28, %v1666_v28 }
 0x22b   : > { %1687 = vst.msk [vmem:[%s170_s30 + $0xc] sm:$0xf] %vm1683_vm2, %v2025_v29 }
 0x22c PF: > { %s13_s12 = sadd.s32 1, %s2178_s12  }
 0x22d   : > { %p10_p4 = scmp.ge.s32.totalorder %s13_s12, 4  }
 0x22f   :  { %12 = sbr.rel (!%p10_p4) target bundleno = 1 (0x1), region = 65 }

</bundles_post_ra>
